<compile_context>
chip_gen: v7x
topology: tpu7x:2x2x1
jax: 0.10.0
libtpu: 0.0.40
codegen_flags: <defaults>
</compile_context>

<pallas_src>
import math
import jax
import jax.numpy as jnp
from jax.experimental import pallas as pl
from jax.experimental.pallas import tpu as pltpu

# ----------------------------- config ---------------------------------------
SRC_PAD_IDX = 1
TRG_PAD_IDX = 1
TRG_SOS_IDX = 2          # unused in forward()
ENC_VOC = 50
DEC_VOC = 60
D_MODEL = 32
N_HEAD = 4
MAX_LEN = 16
FFN_HIDDEN = 64
N_LAYERS = 2
EPS = 1e-12
VOCAB_PAD = 128          # lane-dense padded vocab for the output projection

_WROWS = max(D_MODEL, FFN_HIDDEN)        # 64  (padded weight-slab rows)
_WCOLS = max(3 * D_MODEL, FFN_HIDDEN)    # 96  (padded weight-slab cols)
_SCALE_HEAD = 1.0 / math.sqrt(D_MODEL // N_HEAD)


# ----------------------------- in-kernel math helpers ------------------------

def _layer_norm(x2, g, b):
    # x2: (M, D), g/b: (1, D);  unbiased=False variance, eps=1e-12
    mean = jnp.mean(x2, axis=-1, keepdims=True)
    var = jnp.mean(jnp.square(x2 - mean), axis=-1, keepdims=True)
    return (x2 - mean) * jax.lax.rsqrt(var + EPS) * g + b


def _ffn(x2, w1, b1, w2, b2):
    # x2: (M, D) -> (M, D)
    h = jnp.dot(x2, w1, preferred_element_type=jnp.float32) + b1
    h = jnp.maximum(h, 0.0)                                          # ReLU
    return jnp.dot(h, w2, preferred_element_type=jnp.float32) + b2


def _attend(q, k, v, mask_bool):
    # q: (B, Sq, D), k/v: (B, Sk, D), mask_bool: (B, Sq, Sk) bool (True = keep)
    B, Sq, D = q.shape
    dh = D // N_HEAD
    outs = []
    for h in range(N_HEAD):                       # static per-head loop
        lo = h * dh
        qh = q[:, :, lo:lo + dh]
        kh = k[:, :, lo:lo + dh]
        vh = v[:, :, lo:lo + dh]
        s = jnp.einsum("bqd,bkd->bqk", qh, kh,
                       preferred_element_type=jnp.float32) * _SCALE_HEAD
        s = jnp.where(mask_bool, s, jnp.float32(-10000.0))           # masked_fill
        s = s - jnp.max(s, axis=-1, keepdims=True)
        p = jnp.exp(s)
        p = p / jnp.sum(p, axis=-1, keepdims=True)                   # softmax
        outs.append(jnp.einsum("bqk,bkd->bqd", p, vh,
                               preferred_element_type=jnp.float32))
    return jnp.concatenate(outs, axis=-1)         # (B, Sq, D)


def _self_attention(x, mask_bool, wqkv, bqkv, wo, bo):
    # x: (B, S, D); fused QKV projection (D, 3D)
    B, S, D = x.shape
    x2 = x.reshape(B * S, D)
    qkv = jnp.dot(x2, wqkv, preferred_element_type=jnp.float32) + bqkv  # (B*S, 3D)
    q = qkv[:, 0 * D:1 * D].reshape(B, S, D)
    k = qkv[:, 1 * D:2 * D].reshape(B, S, D)
    v = qkv[:, 2 * D:3 * D].reshape(B, S, D)
    o = _attend(q, k, v, mask_bool)
    o2 = jnp.dot(o.reshape(B * S, D), wo,
                 preferred_element_type=jnp.float32) + bo
    return o2.reshape(B, S, D)


def _cross_attention(x_q, x_kv, mask_bool, wq, bq, wkv, bkv, wo, bo):
    # x_q: (B, Sq, D), x_kv: (B, Sk, D); fused KV projection (D, 2D)
    B, Sq, D = x_q.shape
    Sk = x_kv.shape[1]
    q = (jnp.dot(x_q.reshape(B * Sq, D), wq,
                 preferred_element_type=jnp.float32) + bq).reshape(B, Sq, D)
    kv = jnp.dot(x_kv.reshape(B * Sk, D), wkv,
                 preferred_element_type=jnp.float32) + bkv               # (B*Sk, 2D)
    k = kv[:, 0 * D:1 * D].reshape(B, Sk, D)
    v = kv[:, 1 * D:2 * D].reshape(B, Sk, D)
    o = _attend(q, k, v, mask_bool)
    o2 = jnp.dot(o.reshape(B * Sq, D), wo,
                 preferred_element_type=jnp.float32) + bo
    return o2.reshape(B, Sq, D)


# ----------------------------- the single fused kernel -----------------------
# Packed parameter layout:
#   enc_w : (L, 4, 64, 96)  slots: 0 qkv_w(D,3D) 1 wo(D,D) 2 w1(D,F) 3 w2(F,D)
#   enc_v : (L, 8, 96)      rows : 0 qkv_b 1 bo 2 ln1_g 3 ln1_b 4 b1 5 b2 6 ln2_g 7 ln2_b
#   dec_w : (L, 7, 64, 96)  slots: 0 qkv_w 1 wo1 2 cq_w 3 ckv_w(D,2D) 4 wo2 5 w1 6 w2
#   dec_v : (L, 16, 96)     rows : 0 qkv_b 1 bo1 2 ln1_g 3 ln1_b 4 cq_b 5 ckv_b
#                                  6 bo2 7 ln2_g 8 ln2_b 9 b1 10 b2 11 ln3_g 12 ln3_b

def _transformer_kernel(src_x_ref, trg_x_ref, enc_m_ref, dec_m_ref, cross_m_ref,
                        enc_w_ref, enc_v_ref, dec_w_ref, dec_v_ref,
                        out_w_ref, out_b_ref, out_ref):
    D, F = D_MODEL, FFN_HIDDEN

    # masks converted to boolean ONCE (shared across heads and layers)
    enc_mb = enc_m_ref[...] > 0.0
    dec_mb = dec_m_ref[...] > 0.0
    cross_mb = cross_m_ref[...] > 0.0

    # ---------------- encoder ----------------
    x = src_x_ref[...]                                   # (B, Ss, D)
    B, Ss, _ = x.shape
    for l in range(N_LAYERS):
        qkv_w = enc_w_ref[l, 0][:D, :3 * D]
        wo    = enc_w_ref[l, 1][:D, :D]
        w1    = enc_w_ref[l, 2][:D, :F]
        w2    = enc_w_ref[l, 3][:F, :D]
        vsl   = enc_v_ref[l]                             # (8, 96)
        qkv_b = vsl[0:1, :3 * D]
        bo    = vsl[1:2, :D]
        ln1_g = vsl[2:3, :D]
        ln1_b = vsl[3:4, :D]
        b1    = vsl[4:5, :F]
        b2    = vsl[5:6, :D]
        ln2_g = vsl[6:7, :D]
        ln2_b = vsl[7:8, :D]

        a = _self_attention(x, enc_mb, qkv_w, qkv_b, wo, bo)
        x = _layer_norm((a + x).reshape(B * Ss, D), ln1_g, ln1_b).reshape(B, Ss, D)
        f = _ffn(x.reshape(B * Ss, D), w1, b1, w2, b2).reshape(B, Ss, D)
        x = _layer_norm((f + x).reshape(B * Ss, D), ln2_g, ln2_b).reshape(B, Ss, D)
    enc_out = x                                          # (B, Ss, D)

    # ---------------- decoder ----------------
    y = trg_x_ref[...]                                   # (B, St, D)
    St = y.shape[1]
    for l in range(N_LAYERS):
        qkv_w = dec_w_ref[l, 0][:D, :3 * D]
        wo1   = dec_w_ref[l, 1][:D, :D]
        cq_w  = dec_w_ref[l, 2][:D, :D]
        ckv_w = dec_w_ref[l, 3][:D, :2 * D]
        wo2   = dec_w_ref[l, 4][:D, :D]
        w1    = dec_w_ref[l, 5][:D, :F]
        w2    = dec_w_ref[l, 6][:F, :D]
        vsl   = dec_v_ref[l]                             # (16, 96)
        qkv_b = vsl[0:1, :3 * D]
        bo1   = vsl[1:2, :D]
        ln1_g = vsl[2:3, :D]
        ln1_b = vsl[3:4, :D]
        cq_b  = vsl[4:5, :D]
        ckv_b = vsl[5:6, :2 * D]
        bo2   = vsl[6:7, :D]
        ln2_g = vsl[7:8, :D]
        ln2_b = vsl[8:9, :D]
        b1    = vsl[9:10, :F]
        b2    = vsl[10:11, :D]
        ln3_g = vsl[11:12, :D]
        ln3_b = vsl[12:13, :D]

        a = _self_attention(y, dec_mb, qkv_w, qkv_b, wo1, bo1)
        y = _layer_norm((a + y).reshape(B * St, D), ln1_g, ln1_b).reshape(B, St, D)
        c = _cross_attention(y, enc_out, cross_mb, cq_w, cq_b, ckv_w, ckv_b, wo2, bo2)
        y = _layer_norm((c + y).reshape(B * St, D), ln2_g, ln2_b).reshape(B, St, D)
        f = _ffn(y.reshape(B * St, D), w1, b1, w2, b2).reshape(B, St, D)
        y = _layer_norm((f + y).reshape(B * St, D), ln3_g, ln3_b).reshape(B, St, D)

    # ---------------- output projection (lane-dense padded vocab) ----------
    logits = jnp.dot(y.reshape(B * St, D), out_w_ref[...],
                     preferred_element_type=jnp.float32) + out_b_ref[...]
    out_ref[...] = logits.reshape(B, St, VOCAB_PAD)


# ----------------------------- wrapper ---------------------------------------

def _full_spec(shape):
    nd = len(shape)
    return pl.BlockSpec(tuple(shape), lambda i, _nd=nd: (0,) * _nd)


def sinusoid_encoding(max_len, d_model):
    pos = jnp.arange(max_len, dtype=jnp.float32)[:, None]
    two_i = jnp.arange(0, d_model, 2, dtype=jnp.float32)
    angle = pos / jnp.power(10000.0, two_i / d_model)
    pe = jnp.zeros((max_len, d_model), jnp.float32)
    pe = pe.at[:, 0::2].set(jnp.sin(angle))
    pe = pe.at[:, 1::2].set(jnp.cos(angle))
    return pe


@jax.jit
def transformer_forward(params, src, trg):
    B, Ss = src.shape
    St = trg.shape[1]

    # embeddings (gather stays in XLA; dropout = identity in eval mode)
    src_x = params["enc_emb"][src] + params["pos_enc"][:Ss][None, :, :]
    trg_x = params["dec_emb"][trg] + params["pos_enc"][:St][None, :, :]

    # masks as (B, Sq, Sk) float32 {0,1}, shared across heads inside the kernel
    src_key = (src != SRC_PAD_IDX).astype(jnp.float32)                    # (B, Ss)
    enc_mask = jnp.broadcast_to(src_key[:, None, :], (B, Ss, Ss))         # keys masked
    cross_mask = jnp.broadcast_to(src_key[:, None, :], (B, St, Ss))
    tril = jnp.tril(jnp.ones((St, St), jnp.float32))
    trg_q = (trg != TRG_PAD_IDX).astype(jnp.float32)[:, :, None]          # queries masked
    dec_mask = trg_q * tril[None, :, :]                                   # (B, St, St)

    inputs = [src_x, trg_x, enc_mask, dec_mask, cross_mask,
              params["enc_w"], params["enc_v"],
              params["dec_w"], params["dec_v"],
              params["out_w"], params["out_b"]]

    logits_pad = pl.pallas_call(
        _transformer_kernel,
        out_shape=jax.ShapeDtypeStruct((B, St, VOCAB_PAD), jnp.float32),
        grid=(1,),
        in_specs=[_full_spec(a.shape) for a in inputs],
        out_specs=_full_spec((B, St, VOCAB_PAD)),
        compiler_params=pltpu.CompilerParams(
            dimension_semantics=("arbitrary",)),
    )(*inputs)

    return logits_pad[:, :, :DEC_VOC]


# ----------------------------- deterministic init ----------------------------

def _dense(key, shape, scale=0.02):
    return (scale * jax.random.normal(key, shape)).astype(jnp.float32)


def init_params(key):
    D, F, L = D_MODEL, FFN_HIDDEN, N_LAYERS
    keys = iter(jax.random.split(key, 64))
    nxt = lambda: next(keys)

    enc_emb = jax.random.normal(nxt(), (ENC_VOC, D)).astype(jnp.float32)
    enc_emb = enc_emb.at[SRC_PAD_IDX].set(0.0)          # padding_idx=1
    dec_emb = jax.random.normal(nxt(), (DEC_VOC, D)).astype(jnp.float32)
    dec_emb = dec_emb.at[TRG_PAD_IDX].set(0.0)

    # packed encoder slabs
    enc_w = jnp.zeros((L, 4, _WROWS, _WCOLS), jnp.float32)
    enc_v = jnp.zeros((L, 8, _WCOLS), jnp.float32)
    for l in range(L):
        enc_w = enc_w.at[l, 0, :D, :3 * D].set(_dense(nxt(), (D, 3 * D)))   # qkv_w
        enc_w = enc_w.at[l, 1, :D, :D].set(_dense(nxt(), (D, D)))           # wo
        enc_w = enc_w.at[l, 2, :D, :F].set(_dense(nxt(), (D, F)))           # w1
        enc_w = enc_w.at[l, 3, :F, :D].set(_dense(nxt(), (F, D)))           # w2
        enc_v = enc_v.at[l, 2, :D].set(1.0)                                 # ln1_g
        enc_v = enc_v.at[l, 6, :D].set(1.0)                                 # ln2_g
        # all biases / ln betas stay 0

    # packed decoder slabs
    dec_w = jnp.zeros((L, 7, _WROWS, _WCOLS), jnp.float32)
    dec_v = jnp.zeros((L, 16, _WCOLS), jnp.float32)
    for l in range(L):
        dec_w = dec_w.at[l, 0, :D, :3 * D].set(_dense(nxt(), (D, 3 * D)))   # qkv_w
        dec_w = dec_w.at[l, 1, :D, :D].set(_dense(nxt(), (D, D)))           # wo1
        dec_w = dec_w.at[l, 2, :D, :D].set(_dense(nxt(), (D, D)))           # cq_w
        dec_w = dec_w.at[l, 3, :D, :2 * D].set(_dense(nxt(), (D, 2 * D)))   # ckv_w
        dec_w = dec_w.at[l, 4, :D, :D].set(_dense(nxt(), (D, D)))           # wo2
        dec_w = dec_w.at[l, 5, :D, :F].set(_dense(nxt(), (D, F)))           # w1
        dec_w = dec_w.at[l, 6, :F, :D].set(_dense(nxt(), (F, D)))           # w2
        dec_v = dec_v.at[l, 2, :D].set(1.0)                                 # ln1_g
        dec_v = dec_v.at[l, 7, :D].set(1.0)                                 # ln2_g
        dec_v = dec_v.at[l, 11, :D].set(1.0)                                # ln3_g

    # output projection padded to a lane-dense 128-wide tile (extra cols = 0)
    out_w = jnp.zeros((D, VOCAB_PAD), jnp.float32)
    out_w = out_w.at[:, :DEC_VOC].set(_dense(nxt(), (D, DEC_VOC)))
    out_b = jnp.zeros((1, VOCAB_PAD), jnp.float32)

    return dict(enc_emb=enc_emb, dec_emb=dec_emb,
                pos_enc=sinusoid_encoding(MAX_LEN, D),
                enc_w=enc_w, enc_v=enc_v, dec_w=dec_w, dec_v=dec_v,
                out_w=out_w, out_b=out_b)


# ----------------------------- main ------------------------------------------

if __name__ == "__main__":
    key = jax.random.PRNGKey(0)
    kp, ks, kt = jax.random.split(key, 3)
    params = init_params(kp)

    B, S_SRC, S_TRG = 2, 8, 8
    src = jax.random.randint(ks, (B, S_SRC), 0, ENC_VOC, dtype=jnp.int32)
    trg = jax.random.randint(kt, (B, S_TRG), 0, DEC_VOC, dtype=jnp.int32)
    # make sure some padding positions exist (exercises the masks)
    src = src.at[0, -2:].set(SRC_PAD_IDX)
    trg = trg.at[1, -3:].set(TRG_PAD_IDX)

    out = transformer_forward(params, src, trg)
    out = jax.block_until_ready(out)
    assert out.shape == (B, S_TRG, DEC_VOC), out.shape
    assert out.dtype == jnp.float32
    assert bool(jnp.all(jnp.isfinite(out)))
    print("KERNEL_OK")
</pallas_src>

<mosaic_0001>
module attributes {stable_mosaic.version = 11 : i64} {
  func.func @_transformer_kernel(%arg0: i32, %arg1: memref<2x8x32xf32, #tpu.memory_space<vmem>>, %arg2: memref<2x8x32xf32, #tpu.memory_space<vmem>>, %arg3: memref<2x8x8xf32, #tpu.memory_space<vmem>>, %arg4: memref<2x8x8xf32, #tpu.memory_space<vmem>>, %arg5: memref<2x8x8xf32, #tpu.memory_space<vmem>>, %arg6: memref<2x4x64x96xf32, #tpu.memory_space<vmem>>, %arg7: memref<2x8x96xf32, #tpu.memory_space<vmem>>, %arg8: memref<2x7x64x96xf32, #tpu.memory_space<vmem>>, %arg9: memref<2x16x96xf32, #tpu.memory_space<vmem>>, %arg10: memref<32x128xf32, #tpu.memory_space<vmem>>, %arg11: memref<1x128xf32, #tpu.memory_space<vmem>>, %arg12: memref<2x8x128xf32, #tpu.memory_space<vmem>>) attributes {dimension_semantics = [#tpu.dimension_semantics<arbitrary>], iteration_bounds = array<i64: 1>, scalar_prefetch = 0 : i64, scratch_operands = 0 : i64, tpu.core_type = #tpu.core_type<tc>, window_params = [{pipeline_mode = #tpu.pipeline_mode<synchronous>, transform_indices = @transform_0, window_bounds = array<i64: 2, 8, 32>}, {pipeline_mode = #tpu.pipeline_mode<synchronous>, transform_indices = @transform_1, window_bounds = array<i64: 2, 8, 32>}, {pipeline_mode = #tpu.pipeline_mode<synchronous>, transform_indices = @transform_2, window_bounds = array<i64: 2, 8, 8>}, {pipeline_mode = #tpu.pipeline_mode<synchronous>, transform_indices = @transform_3, window_bounds = array<i64: 2, 8, 8>}, {pipeline_mode = #tpu.pipeline_mode<synchronous>, transform_indices = @transform_4, window_bounds = array<i64: 2, 8, 8>}, {pipeline_mode = #tpu.pipeline_mode<synchronous>, transform_indices = @transform_5, window_bounds = array<i64: 2, 4, 64, 96>}, {pipeline_mode = #tpu.pipeline_mode<synchronous>, transform_indices = @transform_6, window_bounds = array<i64: 2, 8, 96>}, {pipeline_mode = #tpu.pipeline_mode<synchronous>, transform_indices = @transform_7, window_bounds = array<i64: 2, 7, 64, 96>}, {pipeline_mode = #tpu.pipeline_mode<synchronous>, transform_indices = @transform_8, window_bounds = array<i64: 2, 16, 96>}, {pipeline_mode = #tpu.pipeline_mode<synchronous>, transform_indices = @transform_9, window_bounds = array<i64: 32, 128>}, {pipeline_mode = #tpu.pipeline_mode<synchronous>, transform_indices = @transform_10, window_bounds = array<i64: 1, 128>}, {pipeline_mode = #tpu.pipeline_mode<synchronous>, transform_indices = @transform_11, window_bounds = array<i64: 2, 8, 128>}]} {
    %c0 = arith.constant 0 : index
    %c0_0 = arith.constant 0 : index
    %c0_1 = arith.constant 0 : index
    %0 = vector.load %arg3[%c0, %c0_0, %c0_1] : memref<2x8x8xf32, #tpu.memory_space<vmem>>, vector<2x8x8xf32>
    %cst = arith.constant 0.000000e+00 : f32
    %1 = vector.broadcast %cst : f32 to vector<2x8x8xf32>
    %2 = arith.cmpf ogt, %0, %1 : vector<2x8x8xf32>
    %c0_2 = arith.constant 0 : index
    %c0_3 = arith.constant 0 : index
    %c0_4 = arith.constant 0 : index
    %3 = vector.load %arg4[%c0_2, %c0_3, %c0_4] : memref<2x8x8xf32, #tpu.memory_space<vmem>>, vector<2x8x8xf32>
    %cst_5 = arith.constant 0.000000e+00 : f32
    %4 = vector.broadcast %cst_5 : f32 to vector<2x8x8xf32>
    %5 = arith.cmpf ogt, %3, %4 : vector<2x8x8xf32>
    %c0_6 = arith.constant 0 : index
    %c0_7 = arith.constant 0 : index
    %c0_8 = arith.constant 0 : index
    %6 = vector.load %arg5[%c0_6, %c0_7, %c0_8] : memref<2x8x8xf32, #tpu.memory_space<vmem>>, vector<2x8x8xf32>
    %cst_9 = arith.constant 0.000000e+00 : f32
    %7 = vector.broadcast %cst_9 : f32 to vector<2x8x8xf32>
    %8 = arith.cmpf ogt, %6, %7 : vector<2x8x8xf32>
    %c0_10 = arith.constant 0 : index
    %c0_11 = arith.constant 0 : index
    %c0_12 = arith.constant 0 : index
    %9 = vector.load %arg1[%c0_10, %c0_11, %c0_12] : memref<2x8x32xf32, #tpu.memory_space<vmem>>, vector<2x8x32xf32>
    %c0_13 = arith.constant 0 : index
    %c0_14 = arith.constant 0 : index
    %c0_15 = arith.constant 0 : index
    %c0_16 = arith.constant 0 : index
    %10 = vector.load %arg6[%c0_13, %c0_14, %c0_15, %c0_16] : memref<2x4x64x96xf32, #tpu.memory_space<vmem>>, vector<1x1x64x96xf32>
    %11 = vector.shape_cast %10 : vector<1x1x64x96xf32> to vector<64x96xf32>
    %12 = vector.extract_strided_slice %11 {offsets = [0, 0], sizes = [32, 96], strides = [1, 1]} : vector<64x96xf32> to vector<32x96xf32>
    %c0_17 = arith.constant 0 : index
    %c1 = arith.constant 1 : index
    %c0_18 = arith.constant 0 : index
    %c0_19 = arith.constant 0 : index
    %13 = vector.load %arg6[%c0_17, %c1, %c0_18, %c0_19] : memref<2x4x64x96xf32, #tpu.memory_space<vmem>>, vector<1x1x64x96xf32>
    %14 = vector.shape_cast %13 : vector<1x1x64x96xf32> to vector<64x96xf32>
    %15 = vector.extract_strided_slice %14 {offsets = [0, 0], sizes = [32, 32], strides = [1, 1]} : vector<64x96xf32> to vector<32x32xf32>
    %c0_20 = arith.constant 0 : index
    %c2 = arith.constant 2 : index
    %c0_21 = arith.constant 0 : index
    %c0_22 = arith.constant 0 : index
    %16 = vector.load %arg6[%c0_20, %c2, %c0_21, %c0_22] : memref<2x4x64x96xf32, #tpu.memory_space<vmem>>, vector<1x1x64x96xf32>
    %17 = vector.shape_cast %16 : vector<1x1x64x96xf32> to vector<64x96xf32>
    %18 = vector.extract_strided_slice %17 {offsets = [0, 0], sizes = [32, 64], strides = [1, 1]} : vector<64x96xf32> to vector<32x64xf32>
    %c0_23 = arith.constant 0 : index
    %c3 = arith.constant 3 : index
    %c0_24 = arith.constant 0 : index
    %c0_25 = arith.constant 0 : index
    %19 = vector.load %arg6[%c0_23, %c3, %c0_24, %c0_25] : memref<2x4x64x96xf32, #tpu.memory_space<vmem>>, vector<1x1x64x96xf32>
    %20 = vector.shape_cast %19 : vector<1x1x64x96xf32> to vector<64x96xf32>
    %21 = vector.extract_strided_slice %20 {offsets = [0, 0], sizes = [64, 32], strides = [1, 1]} : vector<64x96xf32> to vector<64x32xf32>
    %c0_26 = arith.constant 0 : index
    %c0_27 = arith.constant 0 : index
    %c0_28 = arith.constant 0 : index
    %22 = vector.load %arg7[%c0_26, %c0_27, %c0_28] : memref<2x8x96xf32, #tpu.memory_space<vmem>>, vector<1x8x96xf32>
    %23 = vector.shape_cast %22 : vector<1x8x96xf32> to vector<8x96xf32>
    %24 = vector.extract_strided_slice %23 {offsets = [0, 0], sizes = [1, 96], strides = [1, 1]} : vector<8x96xf32> to vector<1x96xf32>
    %25 = vector.extract_strided_slice %23 {offsets = [1, 0], sizes = [1, 32], strides = [1, 1]} : vector<8x96xf32> to vector<1x32xf32>
    %26 = vector.extract_strided_slice %23 {offsets = [2, 0], sizes = [1, 32], strides = [1, 1]} : vector<8x96xf32> to vector<1x32xf32>
    %27 = vector.extract_strided_slice %23 {offsets = [3, 0], sizes = [1, 32], strides = [1, 1]} : vector<8x96xf32> to vector<1x32xf32>
    %28 = vector.extract_strided_slice %23 {offsets = [4, 0], sizes = [1, 64], strides = [1, 1]} : vector<8x96xf32> to vector<1x64xf32>
    %29 = vector.extract_strided_slice %23 {offsets = [5, 0], sizes = [1, 32], strides = [1, 1]} : vector<8x96xf32> to vector<1x32xf32>
    %30 = vector.extract_strided_slice %23 {offsets = [6, 0], sizes = [1, 32], strides = [1, 1]} : vector<8x96xf32> to vector<1x32xf32>
    %31 = vector.extract_strided_slice %23 {offsets = [7, 0], sizes = [1, 32], strides = [1, 1]} : vector<8x96xf32> to vector<1x32xf32>
    %32 = vector.shape_cast %9 : vector<2x8x32xf32> to vector<16x32xf32>
    %cst_29 = arith.constant dense<0.000000e+00> : vector<16x96xf32>
    %33 = tpu.matmul %32, %12, %cst_29 {dimension_numbers = #tpu.dot_dimension_numbers<[1], [0], [0], [1], [0, 0, 1, 1], [], []>} : vector<16x32xf32>, vector<32x96xf32>, vector<16x96xf32> -> vector<16x96xf32>
    %34 = vector.broadcast %24 : vector<1x96xf32> to vector<16x96xf32>
    %35 = arith.addf %33, %34 : vector<16x96xf32>
    %36 = vector.extract_strided_slice %35 {offsets = [0, 0], sizes = [16, 32], strides = [1, 1]} : vector<16x96xf32> to vector<16x32xf32>
    %37 = vector.shape_cast %36 : vector<16x32xf32> to vector<2x8x32xf32>
    %38 = vector.extract_strided_slice %35 {offsets = [0, 32], sizes = [16, 32], strides = [1, 1]} : vector<16x96xf32> to vector<16x32xf32>
    %39 = vector.shape_cast %38 : vector<16x32xf32> to vector<2x8x32xf32>
    %40 = vector.extract_strided_slice %35 {offsets = [0, 64], sizes = [16, 32], strides = [1, 1]} : vector<16x96xf32> to vector<16x32xf32>
    %41 = vector.shape_cast %40 : vector<16x32xf32> to vector<2x8x32xf32>
    %42 = vector.extract_strided_slice %37 {offsets = [0, 0, 0], sizes = [2, 8, 8], strides = [1, 1, 1]} : vector<2x8x32xf32> to vector<2x8x8xf32>
    %43 = vector.extract_strided_slice %39 {offsets = [0, 0, 0], sizes = [2, 8, 8], strides = [1, 1, 1]} : vector<2x8x32xf32> to vector<2x8x8xf32>
    %44 = vector.extract_strided_slice %41 {offsets = [0, 0, 0], sizes = [2, 8, 8], strides = [1, 1, 1]} : vector<2x8x32xf32> to vector<2x8x8xf32>
    "tpu.trace_start"() <{level = 10 : i32, message = "bqd,bkd->bqk"}> : () -> ()
    %cst_30 = arith.constant dense<0.000000e+00> : vector<2x8x8xf32>
    %45 = tpu.matmul %42, %43, %cst_30 {dimension_numbers = #tpu.dot_dimension_numbers<[2], [2], [1], [1], [0, 0, 0, 1, 1, 1], [0], [0]>} : vector<2x8x8xf32>, vector<2x8x8xf32>, vector<2x8x8xf32> -> vector<2x8x8xf32>
    "tpu.trace_stop"() : () -> ()
    %cst_31 = arith.constant 0.353553385 : f32
    %46 = vector.broadcast %cst_31 : f32 to vector<2x8x8xf32>
    %47 = arith.mulf %45, %46 : vector<2x8x8xf32>
    %cst_32 = arith.constant -1.000000e+04 : f32
    %48 = vector.broadcast %cst_32 : f32 to vector<2x8x8xf32>
    %49 = arith.select %2, %47, %48 : vector<2x8x8xi1>, vector<2x8x8xf32>
    %cst_33 = arith.constant dense<0xFF800000> : vector<2x8xf32>
    %50 = vector.multi_reduction <maximumf>, %49, %cst_33 [2] : vector<2x8x8xf32> to vector<2x8xf32>
    %51 = vector.shape_cast %50 : vector<2x8xf32> to vector<2x8x1xf32>
    %52 = vector.broadcast %51 : vector<2x8x1xf32> to vector<2x8x8xf32>
    %53 = arith.subf %49, %52 : vector<2x8x8xf32>
    %54 = math.exp %53 : vector<2x8x8xf32>
    %cst_34 = arith.constant dense<0.000000e+00> : vector<2x8xf32>
    %55 = vector.multi_reduction <add>, %54, %cst_34 [2] : vector<2x8x8xf32> to vector<2x8xf32>
    %56 = vector.shape_cast %55 : vector<2x8xf32> to vector<2x8x1xf32>
    %57 = vector.broadcast %56 : vector<2x8x1xf32> to vector<2x8x8xf32>
    %58 = arith.divf %54, %57 : vector<2x8x8xf32>
    "tpu.trace_start"() <{level = 10 : i32, message = "bqk,bkd->bqd"}> : () -> ()
    %cst_35 = arith.constant dense<0.000000e+00> : vector<2x8x8xf32>
    %59 = tpu.matmul %58, %44, %cst_35 {dimension_numbers = #tpu.dot_dimension_numbers<[2], [1], [1], [2], [0, 0, 0, 1, 1, 2], [0], [0]>} : vector<2x8x8xf32>, vector<2x8x8xf32>, vector<2x8x8xf32> -> vector<2x8x8xf32>
    "tpu.trace_stop"() : () -> ()
    %60 = vector.extract_strided_slice %37 {offsets = [0, 0, 8], sizes = [2, 8, 8], strides = [1, 1, 1]} : vector<2x8x32xf32> to vector<2x8x8xf32>
    %61 = vector.extract_strided_slice %39 {offsets = [0, 0, 8], sizes = [2, 8, 8], strides = [1, 1, 1]} : vector<2x8x32xf32> to vector<2x8x8xf32>
    %62 = vector.extract_strided_slice %41 {offsets = [0, 0, 8], sizes = [2, 8, 8], strides = [1, 1, 1]} : vector<2x8x32xf32> to vector<2x8x8xf32>
    "tpu.trace_start"() <{level = 10 : i32, message = "bqd,bkd->bqk"}> : () -> ()
    %cst_36 = arith.constant dense<0.000000e+00> : vector<2x8x8xf32>
    %63 = tpu.matmul %60, %61, %cst_36 {dimension_numbers = #tpu.dot_dimension_numbers<[2], [2], [1], [1], [0, 0, 0, 1, 1, 1], [0], [0]>} : vector<2x8x8xf32>, vector<2x8x8xf32>, vector<2x8x8xf32> -> vector<2x8x8xf32>
    "tpu.trace_stop"() : () -> ()
    %cst_37 = arith.constant 0.353553385 : f32
    %64 = vector.broadcast %cst_37 : f32 to vector<2x8x8xf32>
    %65 = arith.mulf %63, %64 : vector<2x8x8xf32>
    %cst_38 = arith.constant -1.000000e+04 : f32
    %66 = vector.broadcast %cst_38 : f32 to vector<2x8x8xf32>
    %67 = arith.select %2, %65, %66 : vector<2x8x8xi1>, vector<2x8x8xf32>
    %cst_39 = arith.constant dense<0xFF800000> : vector<2x8xf32>
    %68 = vector.multi_reduction <maximumf>, %67, %cst_39 [2] : vector<2x8x8xf32> to vector<2x8xf32>
    %69 = vector.shape_cast %68 : vector<2x8xf32> to vector<2x8x1xf32>
    %70 = vector.broadcast %69 : vector<2x8x1xf32> to vector<2x8x8xf32>
    %71 = arith.subf %67, %70 : vector<2x8x8xf32>
    %72 = math.exp %71 : vector<2x8x8xf32>
    %cst_40 = arith.constant dense<0.000000e+00> : vector<2x8xf32>
    %73 = vector.multi_reduction <add>, %72, %cst_40 [2] : vector<2x8x8xf32> to vector<2x8xf32>
    %74 = vector.shape_cast %73 : vector<2x8xf32> to vector<2x8x1xf32>
    %75 = vector.broadcast %74 : vector<2x8x1xf32> to vector<2x8x8xf32>
    %76 = arith.divf %72, %75 : vector<2x8x8xf32>
    "tpu.trace_start"() <{level = 10 : i32, message = "bqk,bkd->bqd"}> : () -> ()
    %cst_41 = arith.constant dense<0.000000e+00> : vector<2x8x8xf32>
    %77 = tpu.matmul %76, %62, %cst_41 {dimension_numbers = #tpu.dot_dimension_numbers<[2], [1], [1], [2], [0, 0, 0, 1, 1, 2], [0], [0]>} : vector<2x8x8xf32>, vector<2x8x8xf32>, vector<2x8x8xf32> -> vector<2x8x8xf32>
    "tpu.trace_stop"() : () -> ()
    %78 = vector.extract_strided_slice %37 {offsets = [0, 0, 16], sizes = [2, 8, 8], strides = [1, 1, 1]} : vector<2x8x32xf32> to vector<2x8x8xf32>
    %79 = vector.extract_strided_slice %39 {offsets = [0, 0, 16], sizes = [2, 8, 8], strides = [1, 1, 1]} : vector<2x8x32xf32> to vector<2x8x8xf32>
    %80 = vector.extract_strided_slice %41 {offsets = [0, 0, 16], sizes = [2, 8, 8], strides = [1, 1, 1]} : vector<2x8x32xf32> to vector<2x8x8xf32>
    "tpu.trace_start"() <{level = 10 : i32, message = "bqd,bkd->bqk"}> : () -> ()
    %cst_42 = arith.constant dense<0.000000e+00> : vector<2x8x8xf32>
    %81 = tpu.matmul %78, %79, %cst_42 {dimension_numbers = #tpu.dot_dimension_numbers<[2], [2], [1], [1], [0, 0, 0, 1, 1, 1], [0], [0]>} : vector<2x8x8xf32>, vector<2x8x8xf32>, vector<2x8x8xf32> -> vector<2x8x8xf32>
    "tpu.trace_stop"() : () -> ()
    %cst_43 = arith.constant 0.353553385 : f32
    %82 = vector.broadcast %cst_43 : f32 to vector<2x8x8xf32>
    %83 = arith.mulf %81, %82 : vector<2x8x8xf32>
    %cst_44 = arith.constant -1.000000e+04 : f32
    %84 = vector.broadcast %cst_44 : f32 to vector<2x8x8xf32>
    %85 = arith.select %2, %83, %84 : vector<2x8x8xi1>, vector<2x8x8xf32>
    %cst_45 = arith.constant dense<0xFF800000> : vector<2x8xf32>
    %86 = vector.multi_reduction <maximumf>, %85, %cst_45 [2] : vector<2x8x8xf32> to vector<2x8xf32>
    %87 = vector.shape_cast %86 : vector<2x8xf32> to vector<2x8x1xf32>
    %88 = vector.broadcast %87 : vector<2x8x1xf32> to vector<2x8x8xf32>
    %89 = arith.subf %85, %88 : vector<2x8x8xf32>
    %90 = math.exp %89 : vector<2x8x8xf32>
    %cst_46 = arith.constant dense<0.000000e+00> : vector<2x8xf32>
    %91 = vector.multi_reduction <add>, %90, %cst_46 [2] : vector<2x8x8xf32> to vector<2x8xf32>
    %92 = vector.shape_cast %91 : vector<2x8xf32> to vector<2x8x1xf32>
    %93 = vector.broadcast %92 : vector<2x8x1xf32> to vector<2x8x8xf32>
    %94 = arith.divf %90, %93 : vector<2x8x8xf32>
    "tpu.trace_start"() <{level = 10 : i32, message = "bqk,bkd->bqd"}> : () -> ()
    %cst_47 = arith.constant dense<0.000000e+00> : vector<2x8x8xf32>
    %95 = tpu.matmul %94, %80, %cst_47 {dimension_numbers = #tpu.dot_dimension_numbers<[2], [1], [1], [2], [0, 0, 0, 1, 1, 2], [0], [0]>} : vector<2x8x8xf32>, vector<2x8x8xf32>, vector<2x8x8xf32> -> vector<2x8x8xf32>
    "tpu.trace_stop"() : () -> ()
    %96 = vector.extract_strided_slice %37 {offsets = [0, 0, 24], sizes = [2, 8, 8], strides = [1, 1, 1]} : vector<2x8x32xf32> to vector<2x8x8xf32>
    %97 = vector.extract_strided_slice %39 {offsets = [0, 0, 24], sizes = [2, 8, 8], strides = [1, 1, 1]} : vector<2x8x32xf32> to vector<2x8x8xf32>
    %98 = vector.extract_strided_slice %41 {offsets = [0, 0, 24], sizes = [2, 8, 8], strides = [1, 1, 1]} : vector<2x8x32xf32> to vector<2x8x8xf32>
    "tpu.trace_start"() <{level = 10 : i32, message = "bqd,bkd->bqk"}> : () -> ()
    %cst_48 = arith.constant dense<0.000000e+00> : vector<2x8x8xf32>
    %99 = tpu.matmul %96, %97, %cst_48 {dimension_numbers = #tpu.dot_dimension_numbers<[2], [2], [1], [1], [0, 0, 0, 1, 1, 1], [0], [0]>} : vector<2x8x8xf32>, vector<2x8x8xf32>, vector<2x8x8xf32> -> vector<2x8x8xf32>
    "tpu.trace_stop"() : () -> ()
    %cst_49 = arith.constant 0.353553385 : f32
    %100 = vector.broadcast %cst_49 : f32 to vector<2x8x8xf32>
    %101 = arith.mulf %99, %100 : vector<2x8x8xf32>
    %cst_50 = arith.constant -1.000000e+04 : f32
    %102 = vector.broadcast %cst_50 : f32 to vector<2x8x8xf32>
    %103 = arith.select %2, %101, %102 : vector<2x8x8xi1>, vector<2x8x8xf32>
    %cst_51 = arith.constant dense<0xFF800000> : vector<2x8xf32>
    %104 = vector.multi_reduction <maximumf>, %103, %cst_51 [2] : vector<2x8x8xf32> to vector<2x8xf32>
    %105 = vector.shape_cast %104 : vector<2x8xf32> to vector<2x8x1xf32>
    %106 = vector.broadcast %105 : vector<2x8x1xf32> to vector<2x8x8xf32>
    %107 = arith.subf %103, %106 : vector<2x8x8xf32>
    %108 = math.exp %107 : vector<2x8x8xf32>
    %cst_52 = arith.constant dense<0.000000e+00> : vector<2x8xf32>
    %109 = vector.multi_reduction <add>, %108, %cst_52 [2] : vector<2x8x8xf32> to vector<2x8xf32>
    %110 = vector.shape_cast %109 : vector<2x8xf32> to vector<2x8x1xf32>
    %111 = vector.broadcast %110 : vector<2x8x1xf32> to vector<2x8x8xf32>
    %112 = arith.divf %108, %111 : vector<2x8x8xf32>
    "tpu.trace_start"() <{level = 10 : i32, message = "bqk,bkd->bqd"}> : () -> ()
    %cst_53 = arith.constant dense<0.000000e+00> : vector<2x8x8xf32>
    %113 = tpu.matmul %112, %98, %cst_53 {dimension_numbers = #tpu.dot_dimension_numbers<[2], [1], [1], [2], [0, 0, 0, 1, 1, 2], [0], [0]>} : vector<2x8x8xf32>, vector<2x8x8xf32>, vector<2x8x8xf32> -> vector<2x8x8xf32>
    "tpu.trace_stop"() : () -> ()
    %114 = tpu.concatenate %59, %77, %95, %113 in 2 : vector<2x8x8xf32>, vector<2x8x8xf32>, vector<2x8x8xf32>, vector<2x8x8xf32> -> vector<2x8x32xf32>
    %115 = vector.shape_cast %114 : vector<2x8x32xf32> to vector<16x32xf32>
    %cst_54 = arith.constant dense<0.000000e+00> : vector<16x32xf32>
    %116 = tpu.matmul %115, %15, %cst_54 {dimension_numbers = #tpu.dot_dimension_numbers<[1], [0], [0], [1], [0, 0, 1, 1], [], []>} : vector<16x32xf32>, vector<32x32xf32>, vector<16x32xf32> -> vector<16x32xf32>
    %117 = vector.broadcast %25 : vector<1x32xf32> to vector<16x32xf32>
    %118 = arith.addf %116, %117 : vector<16x32xf32>
    %119 = vector.shape_cast %118 : vector<16x32xf32> to vector<2x8x32xf32>
    %120 = arith.addf %119, %9 : vector<2x8x32xf32>
    %121 = vector.shape_cast %120 : vector<2x8x32xf32> to vector<16x32xf32>
    %cst_55 = arith.constant dense<0.000000e+00> : vector<16xf32>
    %122 = vector.multi_reduction <add>, %121, %cst_55 [1] : vector<16x32xf32> to vector<16xf32>
    %123 = vector.shape_cast %122 : vector<16xf32> to vector<16x1xf32>
    %cst_56 = arith.constant 3.200000e+01 : f32
    %124 = vector.broadcast %cst_56 : f32 to vector<16x1xf32>
    %125 = arith.divf %123, %124 : vector<16x1xf32>
    %126 = vector.broadcast %125 : vector<16x1xf32> to vector<16x32xf32>
    %127 = arith.subf %121, %126 : vector<16x32xf32>
    %128 = arith.mulf %127, %127 : vector<16x32xf32>
    %cst_57 = arith.constant dense<0.000000e+00> : vector<16xf32>
    %129 = vector.multi_reduction <add>, %128, %cst_57 [1] : vector<16x32xf32> to vector<16xf32>
    %130 = vector.shape_cast %129 : vector<16xf32> to vector<16x1xf32>
    %cst_58 = arith.constant 3.200000e+01 : f32
    %131 = vector.broadcast %cst_58 : f32 to vector<16x1xf32>
    %132 = arith.divf %130, %131 : vector<16x1xf32>
    %133 = vector.broadcast %125 : vector<16x1xf32> to vector<16x32xf32>
    %134 = arith.subf %121, %133 : vector<16x32xf32>
    %cst_59 = arith.constant 9.99999996E-13 : f32
    %135 = vector.broadcast %cst_59 : f32 to vector<16x1xf32>
    %136 = arith.addf %132, %135 : vector<16x1xf32>
    %137 = math.rsqrt %136 : vector<16x1xf32>
    %138 = vector.broadcast %137 : vector<16x1xf32> to vector<16x32xf32>
    %139 = arith.mulf %134, %138 : vector<16x32xf32>
    %140 = vector.broadcast %26 : vector<1x32xf32> to vector<16x32xf32>
    %141 = arith.mulf %139, %140 : vector<16x32xf32>
    %142 = vector.broadcast %27 : vector<1x32xf32> to vector<16x32xf32>
    %143 = arith.addf %141, %142 : vector<16x32xf32>
    %144 = vector.shape_cast %143 : vector<16x32xf32> to vector<2x8x32xf32>
    %145 = vector.shape_cast %144 : vector<2x8x32xf32> to vector<16x32xf32>
    %cst_60 = arith.constant dense<0.000000e+00> : vector<16x64xf32>
    %146 = tpu.matmul %145, %18, %cst_60 {dimension_numbers = #tpu.dot_dimension_numbers<[1], [0], [0], [1], [0, 0, 1, 1], [], []>} : vector<16x32xf32>, vector<32x64xf32>, vector<16x64xf32> -> vector<16x64xf32>
    %147 = vector.broadcast %28 : vector<1x64xf32> to vector<16x64xf32>
    %148 = arith.addf %146, %147 : vector<16x64xf32>
    %cst_61 = arith.constant 0.000000e+00 : f32
    %149 = vector.broadcast %cst_61 : f32 to vector<16x64xf32>
    %150 = arith.maximumf %148, %149 : vector<16x64xf32>
    %cst_62 = arith.constant dense<0.000000e+00> : vector<16x32xf32>
    %151 = tpu.matmul %150, %21, %cst_62 {dimension_numbers = #tpu.dot_dimension_numbers<[1], [0], [0], [1], [0, 0, 1, 1], [], []>} : vector<16x64xf32>, vector<64x32xf32>, vector<16x32xf32> -> vector<16x32xf32>
    %152 = vector.broadcast %29 : vector<1x32xf32> to vector<16x32xf32>
    %153 = arith.addf %151, %152 : vector<16x32xf32>
    %154 = vector.shape_cast %153 : vector<16x32xf32> to vector<2x8x32xf32>
    %155 = arith.addf %154, %144 : vector<2x8x32xf32>
    %156 = vector.shape_cast %155 : vector<2x8x32xf32> to vector<16x32xf32>
    %cst_63 = arith.constant dense<0.000000e+00> : vector<16xf32>
    %157 = vector.multi_reduction <add>, %156, %cst_63 [1] : vector<16x32xf32> to vector<16xf32>
    %158 = vector.shape_cast %157 : vector<16xf32> to vector<16x1xf32>
    %cst_64 = arith.constant 3.200000e+01 : f32
    %159 = vector.broadcast %cst_64 : f32 to vector<16x1xf32>
    %160 = arith.divf %158, %159 : vector<16x1xf32>
    %161 = vector.broadcast %160 : vector<16x1xf32> to vector<16x32xf32>
    %162 = arith.subf %156, %161 : vector<16x32xf32>
    %163 = arith.mulf %162, %162 : vector<16x32xf32>
    %cst_65 = arith.constant dense<0.000000e+00> : vector<16xf32>
    %164 = vector.multi_reduction <add>, %163, %cst_65 [1] : vector<16x32xf32> to vector<16xf32>
    %165 = vector.shape_cast %164 : vector<16xf32> to vector<16x1xf32>
    %cst_66 = arith.constant 3.200000e+01 : f32
    %166 = vector.broadcast %cst_66 : f32 to vector<16x1xf32>
    %167 = arith.divf %165, %166 : vector<16x1xf32>
    %168 = vector.broadcast %160 : vector<16x1xf32> to vector<16x32xf32>
    %169 = arith.subf %156, %168 : vector<16x32xf32>
    %cst_67 = arith.constant 9.99999996E-13 : f32
    %170 = vector.broadcast %cst_67 : f32 to vector<16x1xf32>
    %171 = arith.addf %167, %170 : vector<16x1xf32>
    %172 = math.rsqrt %171 : vector<16x1xf32>
    %173 = vector.broadcast %172 : vector<16x1xf32> to vector<16x32xf32>
    %174 = arith.mulf %169, %173 : vector<16x32xf32>
    %175 = vector.broadcast %30 : vector<1x32xf32> to vector<16x32xf32>
    %176 = arith.mulf %174, %175 : vector<16x32xf32>
    %177 = vector.broadcast %31 : vector<1x32xf32> to vector<16x32xf32>
    %178 = arith.addf %176, %177 : vector<16x32xf32>
    %179 = vector.shape_cast %178 : vector<16x32xf32> to vector<2x8x32xf32>
    %c1_68 = arith.constant 1 : index
    %c0_69 = arith.constant 0 : index
    %c0_70 = arith.constant 0 : index
    %c0_71 = arith.constant 0 : index
    %180 = vector.load %arg6[%c1_68, %c0_69, %c0_70, %c0_71] : memref<2x4x64x96xf32, #tpu.memory_space<vmem>>, vector<1x1x64x96xf32>
    %181 = vector.shape_cast %180 : vector<1x1x64x96xf32> to vector<64x96xf32>
    %182 = vector.extract_strided_slice %181 {offsets = [0, 0], sizes = [32, 96], strides = [1, 1]} : vector<64x96xf32> to vector<32x96xf32>
    %c1_72 = arith.constant 1 : index
    %c1_73 = arith.constant 1 : index
    %c0_74 = arith.constant 0 : index
    %c0_75 = arith.constant 0 : index
    %183 = vector.load %arg6[%c1_72, %c1_73, %c0_74, %c0_75] : memref<2x4x64x96xf32, #tpu.memory_space<vmem>>, vector<1x1x64x96xf32>
    %184 = vector.shape_cast %183 : vector<1x1x64x96xf32> to vector<64x96xf32>
    %185 = vector.extract_strided_slice %184 {offsets = [0, 0], sizes = [32, 32], strides = [1, 1]} : vector<64x96xf32> to vector<32x32xf32>
    %c1_76 = arith.constant 1 : index
    %c2_77 = arith.constant 2 : index
    %c0_78 = arith.constant 0 : index
    %c0_79 = arith.constant 0 : index
    %186 = vector.load %arg6[%c1_76, %c2_77, %c0_78, %c0_79] : memref<2x4x64x96xf32, #tpu.memory_space<vmem>>, vector<1x1x64x96xf32>
    %187 = vector.shape_cast %186 : vector<1x1x64x96xf32> to vector<64x96xf32>
    %188 = vector.extract_strided_slice %187 {offsets = [0, 0], sizes = [32, 64], strides = [1, 1]} : vector<64x96xf32> to vector<32x64xf32>
    %c1_80 = arith.constant 1 : index
    %c3_81 = arith.constant 3 : index
    %c0_82 = arith.constant 0 : index
    %c0_83 = arith.constant 0 : index
    %189 = vector.load %arg6[%c1_80, %c3_81, %c0_82, %c0_83] : memref<2x4x64x96xf32, #tpu.memory_space<vmem>>, vector<1x1x64x96xf32>
    %190 = vector.shape_cast %189 : vector<1x1x64x96xf32> to vector<64x96xf32>
    %191 = vector.extract_strided_slice %190 {offsets = [0, 0], sizes = [64, 32], strides = [1, 1]} : vector<64x96xf32> to vector<64x32xf32>
    %c1_84 = arith.constant 1 : index
    %c0_85 = arith.constant 0 : index
    %c0_86 = arith.constant 0 : index
    %192 = vector.load %arg7[%c1_84, %c0_85, %c0_86] : memref<2x8x96xf32, #tpu.memory_space<vmem>>, vector<1x8x96xf32>
    %193 = vector.shape_cast %192 : vector<1x8x96xf32> to vector<8x96xf32>
    %194 = vector.extract_strided_slice %193 {offsets = [0, 0], sizes = [1, 96], strides = [1, 1]} : vector<8x96xf32> to vector<1x96xf32>
    %195 = vector.extract_strided_slice %193 {offsets = [1, 0], sizes = [1, 32], strides = [1, 1]} : vector<8x96xf32> to vector<1x32xf32>
    %196 = vector.extract_strided_slice %193 {offsets = [2, 0], sizes = [1, 32], strides = [1, 1]} : vector<8x96xf32> to vector<1x32xf32>
    %197 = vector.extract_strided_slice %193 {offsets = [3, 0], sizes = [1, 32], strides = [1, 1]} : vector<8x96xf32> to vector<1x32xf32>
    %198 = vector.extract_strided_slice %193 {offsets = [4, 0], sizes = [1, 64], strides = [1, 1]} : vector<8x96xf32> to vector<1x64xf32>
    %199 = vector.extract_strided_slice %193 {offsets = [5, 0], sizes = [1, 32], strides = [1, 1]} : vector<8x96xf32> to vector<1x32xf32>
    %200 = vector.extract_strided_slice %193 {offsets = [6, 0], sizes = [1, 32], strides = [1, 1]} : vector<8x96xf32> to vector<1x32xf32>
    %201 = vector.extract_strided_slice %193 {offsets = [7, 0], sizes = [1, 32], strides = [1, 1]} : vector<8x96xf32> to vector<1x32xf32>
    %202 = vector.shape_cast %179 : vector<2x8x32xf32> to vector<16x32xf32>
    %cst_87 = arith.constant dense<0.000000e+00> : vector<16x96xf32>
    %203 = tpu.matmul %202, %182, %cst_87 {dimension_numbers = #tpu.dot_dimension_numbers<[1], [0], [0], [1], [0, 0, 1, 1], [], []>} : vector<16x32xf32>, vector<32x96xf32>, vector<16x96xf32> -> vector<16x96xf32>
    %204 = vector.broadcast %194 : vector<1x96xf32> to vector<16x96xf32>
    %205 = arith.addf %203, %204 : vector<16x96xf32>
    %206 = vector.extract_strided_slice %205 {offsets = [0, 0], sizes = [16, 32], strides = [1, 1]} : vector<16x96xf32> to vector<16x32xf32>
    %207 = vector.shape_cast %206 : vector<16x32xf32> to vector<2x8x32xf32>
    %208 = vector.extract_strided_slice %205 {offsets = [0, 32], sizes = [16, 32], strides = [1, 1]} : vector<16x96xf32> to vector<16x32xf32>
    %209 = vector.shape_cast %208 : vector<16x32xf32> to vector<2x8x32xf32>
    %210 = vector.extract_strided_slice %205 {offsets = [0, 64], sizes = [16, 32], strides = [1, 1]} : vector<16x96xf32> to vector<16x32xf32>
    %211 = vector.shape_cast %210 : vector<16x32xf32> to vector<2x8x32xf32>
    %212 = vector.extract_strided_slice %207 {offsets = [0, 0, 0], sizes = [2, 8, 8], strides = [1, 1, 1]} : vector<2x8x32xf32> to vector<2x8x8xf32>
    %213 = vector.extract_strided_slice %209 {offsets = [0, 0, 0], sizes = [2, 8, 8], strides = [1, 1, 1]} : vector<2x8x32xf32> to vector<2x8x8xf32>
    %214 = vector.extract_strided_slice %211 {offsets = [0, 0, 0], sizes = [2, 8, 8], strides = [1, 1, 1]} : vector<2x8x32xf32> to vector<2x8x8xf32>
    "tpu.trace_start"() <{level = 10 : i32, message = "bqd,bkd->bqk"}> : () -> ()
    %cst_88 = arith.constant dense<0.000000e+00> : vector<2x8x8xf32>
    %215 = tpu.matmul %212, %213, %cst_88 {dimension_numbers = #tpu.dot_dimension_numbers<[2], [2], [1], [1], [0, 0, 0, 1, 1, 1], [0], [0]>} : vector<2x8x8xf32>, vector<2x8x8xf32>, vector<2x8x8xf32> -> vector<2x8x8xf32>
    "tpu.trace_stop"() : () -> ()
    %cst_89 = arith.constant 0.353553385 : f32
    %216 = vector.broadcast %cst_89 : f32 to vector<2x8x8xf32>
    %217 = arith.mulf %215, %216 : vector<2x8x8xf32>
    %cst_90 = arith.constant -1.000000e+04 : f32
    %218 = vector.broadcast %cst_90 : f32 to vector<2x8x8xf32>
    %219 = arith.select %2, %217, %218 : vector<2x8x8xi1>, vector<2x8x8xf32>
    %cst_91 = arith.constant dense<0xFF800000> : vector<2x8xf32>
    %220 = vector.multi_reduction <maximumf>, %219, %cst_91 [2] : vector<2x8x8xf32> to vector<2x8xf32>
    %221 = vector.shape_cast %220 : vector<2x8xf32> to vector<2x8x1xf32>
    %222 = vector.broadcast %221 : vector<2x8x1xf32> to vector<2x8x8xf32>
    %223 = arith.subf %219, %222 : vector<2x8x8xf32>
    %224 = math.exp %223 : vector<2x8x8xf32>
    %cst_92 = arith.constant dense<0.000000e+00> : vector<2x8xf32>
    %225 = vector.multi_reduction <add>, %224, %cst_92 [2] : vector<2x8x8xf32> to vector<2x8xf32>
    %226 = vector.shape_cast %225 : vector<2x8xf32> to vector<2x8x1xf32>
    %227 = vector.broadcast %226 : vector<2x8x1xf32> to vector<2x8x8xf32>
    %228 = arith.divf %224, %227 : vector<2x8x8xf32>
    "tpu.trace_start"() <{level = 10 : i32, message = "bqk,bkd->bqd"}> : () -> ()
    %cst_93 = arith.constant dense<0.000000e+00> : vector<2x8x8xf32>
    %229 = tpu.matmul %228, %214, %cst_93 {dimension_numbers = #tpu.dot_dimension_numbers<[2], [1], [1], [2], [0, 0, 0, 1, 1, 2], [0], [0]>} : vector<2x8x8xf32>, vector<2x8x8xf32>, vector<2x8x8xf32> -> vector<2x8x8xf32>
    "tpu.trace_stop"() : () -> ()
    %230 = vector.extract_strided_slice %207 {offsets = [0, 0, 8], sizes = [2, 8, 8], strides = [1, 1, 1]} : vector<2x8x32xf32> to vector<2x8x8xf32>
    %231 = vector.extract_strided_slice %209 {offsets = [0, 0, 8], sizes = [2, 8, 8], strides = [1, 1, 1]} : vector<2x8x32xf32> to vector<2x8x8xf32>
    %232 = vector.extract_strided_slice %211 {offsets = [0, 0, 8], sizes = [2, 8, 8], strides = [1, 1, 1]} : vector<2x8x32xf32> to vector<2x8x8xf32>
    "tpu.trace_start"() <{level = 10 : i32, message = "bqd,bkd->bqk"}> : () -> ()
    %cst_94 = arith.constant dense<0.000000e+00> : vector<2x8x8xf32>
    %233 = tpu.matmul %230, %231, %cst_94 {dimension_numbers = #tpu.dot_dimension_numbers<[2], [2], [1], [1], [0, 0, 0, 1, 1, 1], [0], [0]>} : vector<2x8x8xf32>, vector<2x8x8xf32>, vector<2x8x8xf32> -> vector<2x8x8xf32>
    "tpu.trace_stop"() : () -> ()
    %cst_95 = arith.constant 0.353553385 : f32
    %234 = vector.broadcast %cst_95 : f32 to vector<2x8x8xf32>
    %235 = arith.mulf %233, %234 : vector<2x8x8xf32>
    %cst_96 = arith.constant -1.000000e+04 : f32
    %236 = vector.broadcast %cst_96 : f32 to vector<2x8x8xf32>
    %237 = arith.select %2, %235, %236 : vector<2x8x8xi1>, vector<2x8x8xf32>
    %cst_97 = arith.constant dense<0xFF800000> : vector<2x8xf32>
    %238 = vector.multi_reduction <maximumf>, %237, %cst_97 [2] : vector<2x8x8xf32> to vector<2x8xf32>
    %239 = vector.shape_cast %238 : vector<2x8xf32> to vector<2x8x1xf32>
    %240 = vector.broadcast %239 : vector<2x8x1xf32> to vector<2x8x8xf32>
    %241 = arith.subf %237, %240 : vector<2x8x8xf32>
    %242 = math.exp %241 : vector<2x8x8xf32>
    %cst_98 = arith.constant dense<0.000000e+00> : vector<2x8xf32>
    %243 = vector.multi_reduction <add>, %242, %cst_98 [2] : vector<2x8x8xf32> to vector<2x8xf32>
    %244 = vector.shape_cast %243 : vector<2x8xf32> to vector<2x8x1xf32>
    %245 = vector.broadcast %244 : vector<2x8x1xf32> to vector<2x8x8xf32>
    %246 = arith.divf %242, %245 : vector<2x8x8xf32>
    "tpu.trace_start"() <{level = 10 : i32, message = "bqk,bkd->bqd"}> : () -> ()
    %cst_99 = arith.constant dense<0.000000e+00> : vector<2x8x8xf32>
    %247 = tpu.matmul %246, %232, %cst_99 {dimension_numbers = #tpu.dot_dimension_numbers<[2], [1], [1], [2], [0, 0, 0, 1, 1, 2], [0], [0]>} : vector<2x8x8xf32>, vector<2x8x8xf32>, vector<2x8x8xf32> -> vector<2x8x8xf32>
    "tpu.trace_stop"() : () -> ()
    %248 = vector.extract_strided_slice %207 {offsets = [0, 0, 16], sizes = [2, 8, 8], strides = [1, 1, 1]} : vector<2x8x32xf32> to vector<2x8x8xf32>
    %249 = vector.extract_strided_slice %209 {offsets = [0, 0, 16], sizes = [2, 8, 8], strides = [1, 1, 1]} : vector<2x8x32xf32> to vector<2x8x8xf32>
    %250 = vector.extract_strided_slice %211 {offsets = [0, 0, 16], sizes = [2, 8, 8], strides = [1, 1, 1]} : vector<2x8x32xf32> to vector<2x8x8xf32>
    "tpu.trace_start"() <{level = 10 : i32, message = "bqd,bkd->bqk"}> : () -> ()
    %cst_100 = arith.constant dense<0.000000e+00> : vector<2x8x8xf32>
    %251 = tpu.matmul %248, %249, %cst_100 {dimension_numbers = #tpu.dot_dimension_numbers<[2], [2], [1], [1], [0, 0, 0, 1, 1, 1], [0], [0]>} : vector<2x8x8xf32>, vector<2x8x8xf32>, vector<2x8x8xf32> -> vector<2x8x8xf32>
    "tpu.trace_stop"() : () -> ()
    %cst_101 = arith.constant 0.353553385 : f32
    %252 = vector.broadcast %cst_101 : f32 to vector<2x8x8xf32>
    %253 = arith.mulf %251, %252 : vector<2x8x8xf32>
    %cst_102 = arith.constant -1.000000e+04 : f32
    %254 = vector.broadcast %cst_102 : f32 to vector<2x8x8xf32>
    %255 = arith.select %2, %253, %254 : vector<2x8x8xi1>, vector<2x8x8xf32>
    %cst_103 = arith.constant dense<0xFF800000> : vector<2x8xf32>
    %256 = vector.multi_reduction <maximumf>, %255, %cst_103 [2] : vector<2x8x8xf32> to vector<2x8xf32>
    %257 = vector.shape_cast %256 : vector<2x8xf32> to vector<2x8x1xf32>
    %258 = vector.broadcast %257 : vector<2x8x1xf32> to vector<2x8x8xf32>
    %259 = arith.subf %255, %258 : vector<2x8x8xf32>
    %260 = math.exp %259 : vector<2x8x8xf32>
    %cst_104 = arith.constant dense<0.000000e+00> : vector<2x8xf32>
    %261 = vector.multi_reduction <add>, %260, %cst_104 [2] : vector<2x8x8xf32> to vector<2x8xf32>
    %262 = vector.shape_cast %261 : vector<2x8xf32> to vector<2x8x1xf32>
    %263 = vector.broadcast %262 : vector<2x8x1xf32> to vector<2x8x8xf32>
    %264 = arith.divf %260, %263 : vector<2x8x8xf32>
    "tpu.trace_start"() <{level = 10 : i32, message = "bqk,bkd->bqd"}> : () -> ()
    %cst_105 = arith.constant dense<0.000000e+00> : vector<2x8x8xf32>
    %265 = tpu.matmul %264, %250, %cst_105 {dimension_numbers = #tpu.dot_dimension_numbers<[2], [1], [1], [2], [0, 0, 0, 1, 1, 2], [0], [0]>} : vector<2x8x8xf32>, vector<2x8x8xf32>, vector<2x8x8xf32> -> vector<2x8x8xf32>
    "tpu.trace_stop"() : () -> ()
    %266 = vector.extract_strided_slice %207 {offsets = [0, 0, 24], sizes = [2, 8, 8], strides = [1, 1, 1]} : vector<2x8x32xf32> to vector<2x8x8xf32>
    %267 = vector.extract_strided_slice %209 {offsets = [0, 0, 24], sizes = [2, 8, 8], strides = [1, 1, 1]} : vector<2x8x32xf32> to vector<2x8x8xf32>
    %268 = vector.extract_strided_slice %211 {offsets = [0, 0, 24], sizes = [2, 8, 8], strides = [1, 1, 1]} : vector<2x8x32xf32> to vector<2x8x8xf32>
    "tpu.trace_start"() <{level = 10 : i32, message = "bqd,bkd->bqk"}> : () -> ()
    %cst_106 = arith.constant dense<0.000000e+00> : vector<2x8x8xf32>
    %269 = tpu.matmul %266, %267, %cst_106 {dimension_numbers = #tpu.dot_dimension_numbers<[2], [2], [1], [1], [0, 0, 0, 1, 1, 1], [0], [0]>} : vector<2x8x8xf32>, vector<2x8x8xf32>, vector<2x8x8xf32> -> vector<2x8x8xf32>
    "tpu.trace_stop"() : () -> ()
    %cst_107 = arith.constant 0.353553385 : f32
    %270 = vector.broadcast %cst_107 : f32 to vector<2x8x8xf32>
    %271 = arith.mulf %269, %270 : vector<2x8x8xf32>
    %cst_108 = arith.constant -1.000000e+04 : f32
    %272 = vector.broadcast %cst_108 : f32 to vector<2x8x8xf32>
    %273 = arith.select %2, %271, %272 : vector<2x8x8xi1>, vector<2x8x8xf32>
    %cst_109 = arith.constant dense<0xFF800000> : vector<2x8xf32>
    %274 = vector.multi_reduction <maximumf>, %273, %cst_109 [2] : vector<2x8x8xf32> to vector<2x8xf32>
    %275 = vector.shape_cast %274 : vector<2x8xf32> to vector<2x8x1xf32>
    %276 = vector.broadcast %275 : vector<2x8x1xf32> to vector<2x8x8xf32>
    %277 = arith.subf %273, %276 : vector<2x8x8xf32>
    %278 = math.exp %277 : vector<2x8x8xf32>
    %cst_110 = arith.constant dense<0.000000e+00> : vector<2x8xf32>
    %279 = vector.multi_reduction <add>, %278, %cst_110 [2] : vector<2x8x8xf32> to vector<2x8xf32>
    %280 = vector.shape_cast %279 : vector<2x8xf32> to vector<2x8x1xf32>
    %281 = vector.broadcast %280 : vector<2x8x1xf32> to vector<2x8x8xf32>
    %282 = arith.divf %278, %281 : vector<2x8x8xf32>
    "tpu.trace_start"() <{level = 10 : i32, message = "bqk,bkd->bqd"}> : () -> ()
    %cst_111 = arith.constant dense<0.000000e+00> : vector<2x8x8xf32>
    %283 = tpu.matmul %282, %268, %cst_111 {dimension_numbers = #tpu.dot_dimension_numbers<[2], [1], [1], [2], [0, 0, 0, 1, 1, 2], [0], [0]>} : vector<2x8x8xf32>, vector<2x8x8xf32>, vector<2x8x8xf32> -> vector<2x8x8xf32>
    "tpu.trace_stop"() : () -> ()
    %284 = tpu.concatenate %229, %247, %265, %283 in 2 : vector<2x8x8xf32>, vector<2x8x8xf32>, vector<2x8x8xf32>, vector<2x8x8xf32> -> vector<2x8x32xf32>
    %285 = vector.shape_cast %284 : vector<2x8x32xf32> to vector<16x32xf32>
    %cst_112 = arith.constant dense<0.000000e+00> : vector<16x32xf32>
    %286 = tpu.matmul %285, %185, %cst_112 {dimension_numbers = #tpu.dot_dimension_numbers<[1], [0], [0], [1], [0, 0, 1, 1], [], []>} : vector<16x32xf32>, vector<32x32xf32>, vector<16x32xf32> -> vector<16x32xf32>
    %287 = vector.broadcast %195 : vector<1x32xf32> to vector<16x32xf32>
    %288 = arith.addf %286, %287 : vector<16x32xf32>
    %289 = vector.shape_cast %288 : vector<16x32xf32> to vector<2x8x32xf32>
    %290 = arith.addf %289, %179 : vector<2x8x32xf32>
    %291 = vector.shape_cast %290 : vector<2x8x32xf32> to vector<16x32xf32>
    %cst_113 = arith.constant dense<0.000000e+00> : vector<16xf32>
    %292 = vector.multi_reduction <add>, %291, %cst_113 [1] : vector<16x32xf32> to vector<16xf32>
    %293 = vector.shape_cast %292 : vector<16xf32> to vector<16x1xf32>
    %cst_114 = arith.constant 3.200000e+01 : f32
    %294 = vector.broadcast %cst_114 : f32 to vector<16x1xf32>
    %295 = arith.divf %293, %294 : vector<16x1xf32>
    %296 = vector.broadcast %295 : vector<16x1xf32> to vector<16x32xf32>
    %297 = arith.subf %291, %296 : vector<16x32xf32>
    %298 = arith.mulf %297, %297 : vector<16x32xf32>
    %cst_115 = arith.constant dense<0.000000e+00> : vector<16xf32>
    %299 = vector.multi_reduction <add>, %298, %cst_115 [1] : vector<16x32xf32> to vector<16xf32>
    %300 = vector.shape_cast %299 : vector<16xf32> to vector<16x1xf32>
    %cst_116 = arith.constant 3.200000e+01 : f32
    %301 = vector.broadcast %cst_116 : f32 to vector<16x1xf32>
    %302 = arith.divf %300, %301 : vector<16x1xf32>
    %303 = vector.broadcast %295 : vector<16x1xf32> to vector<16x32xf32>
    %304 = arith.subf %291, %303 : vector<16x32xf32>
    %cst_117 = arith.constant 9.99999996E-13 : f32
    %305 = vector.broadcast %cst_117 : f32 to vector<16x1xf32>
    %306 = arith.addf %302, %305 : vector<16x1xf32>
    %307 = math.rsqrt %306 : vector<16x1xf32>
    %308 = vector.broadcast %307 : vector<16x1xf32> to vector<16x32xf32>
    %309 = arith.mulf %304, %308 : vector<16x32xf32>
    %310 = vector.broadcast %196 : vector<1x32xf32> to vector<16x32xf32>
    %311 = arith.mulf %309, %310 : vector<16x32xf32>
    %312 = vector.broadcast %197 : vector<1x32xf32> to vector<16x32xf32>
    %313 = arith.addf %311, %312 : vector<16x32xf32>
    %314 = vector.shape_cast %313 : vector<16x32xf32> to vector<2x8x32xf32>
    %315 = vector.shape_cast %314 : vector<2x8x32xf32> to vector<16x32xf32>
    %cst_118 = arith.constant dense<0.000000e+00> : vector<16x64xf32>
    %316 = tpu.matmul %315, %188, %cst_118 {dimension_numbers = #tpu.dot_dimension_numbers<[1], [0], [0], [1], [0, 0, 1, 1], [], []>} : vector<16x32xf32>, vector<32x64xf32>, vector<16x64xf32> -> vector<16x64xf32>
    %317 = vector.broadcast %198 : vector<1x64xf32> to vector<16x64xf32>
    %318 = arith.addf %316, %317 : vector<16x64xf32>
    %cst_119 = arith.constant 0.000000e+00 : f32
    %319 = vector.broadcast %cst_119 : f32 to vector<16x64xf32>
    %320 = arith.maximumf %318, %319 : vector<16x64xf32>
    %cst_120 = arith.constant dense<0.000000e+00> : vector<16x32xf32>
    %321 = tpu.matmul %320, %191, %cst_120 {dimension_numbers = #tpu.dot_dimension_numbers<[1], [0], [0], [1], [0, 0, 1, 1], [], []>} : vector<16x64xf32>, vector<64x32xf32>, vector<16x32xf32> -> vector<16x32xf32>
    %322 = vector.broadcast %199 : vector<1x32xf32> to vector<16x32xf32>
    %323 = arith.addf %321, %322 : vector<16x32xf32>
    %324 = vector.shape_cast %323 : vector<16x32xf32> to vector<2x8x32xf32>
    %325 = arith.addf %324, %314 : vector<2x8x32xf32>
    %326 = vector.shape_cast %325 : vector<2x8x32xf32> to vector<16x32xf32>
    %cst_121 = arith.constant dense<0.000000e+00> : vector<16xf32>
    %327 = vector.multi_reduction <add>, %326, %cst_121 [1] : vector<16x32xf32> to vector<16xf32>
    %328 = vector.shape_cast %327 : vector<16xf32> to vector<16x1xf32>
    %cst_122 = arith.constant 3.200000e+01 : f32
    %329 = vector.broadcast %cst_122 : f32 to vector<16x1xf32>
    %330 = arith.divf %328, %329 : vector<16x1xf32>
    %331 = vector.broadcast %330 : vector<16x1xf32> to vector<16x32xf32>
    %332 = arith.subf %326, %331 : vector<16x32xf32>
    %333 = arith.mulf %332, %332 : vector<16x32xf32>
    %cst_123 = arith.constant dense<0.000000e+00> : vector<16xf32>
    %334 = vector.multi_reduction <add>, %333, %cst_123 [1] : vector<16x32xf32> to vector<16xf32>
    %335 = vector.shape_cast %334 : vector<16xf32> to vector<16x1xf32>
    %cst_124 = arith.constant 3.200000e+01 : f32
    %336 = vector.broadcast %cst_124 : f32 to vector<16x1xf32>
    %337 = arith.divf %335, %336 : vector<16x1xf32>
    %338 = vector.broadcast %330 : vector<16x1xf32> to vector<16x32xf32>
    %339 = arith.subf %326, %338 : vector<16x32xf32>
    %cst_125 = arith.constant 9.99999996E-13 : f32
    %340 = vector.broadcast %cst_125 : f32 to vector<16x1xf32>
    %341 = arith.addf %337, %340 : vector<16x1xf32>
    %342 = math.rsqrt %341 : vector<16x1xf32>
    %343 = vector.broadcast %342 : vector<16x1xf32> to vector<16x32xf32>
    %344 = arith.mulf %339, %343 : vector<16x32xf32>
    %345 = vector.broadcast %200 : vector<1x32xf32> to vector<16x32xf32>
    %346 = arith.mulf %344, %345 : vector<16x32xf32>
    %347 = vector.broadcast %201 : vector<1x32xf32> to vector<16x32xf32>
    %348 = arith.addf %346, %347 : vector<16x32xf32>
    %349 = vector.shape_cast %348 : vector<16x32xf32> to vector<2x8x32xf32>
    %c0_126 = arith.constant 0 : index
    %c0_127 = arith.constant 0 : index
    %c0_128 = arith.constant 0 : index
    %350 = vector.load %arg2[%c0_126, %c0_127, %c0_128] : memref<2x8x32xf32, #tpu.memory_space<vmem>>, vector<2x8x32xf32>
    %c0_129 = arith.constant 0 : index
    %c0_130 = arith.constant 0 : index
    %c0_131 = arith.constant 0 : index
    %c0_132 = arith.constant 0 : index
    %351 = vector.load %arg8[%c0_129, %c0_130, %c0_131, %c0_132] : memref<2x7x64x96xf32, #tpu.memory_space<vmem>>, vector<1x1x64x96xf32>
    %352 = vector.shape_cast %351 : vector<1x1x64x96xf32> to vector<64x96xf32>
    %353 = vector.extract_strided_slice %352 {offsets = [0, 0], sizes = [32, 96], strides = [1, 1]} : vector<64x96xf32> to vector<32x96xf32>
    %c0_133 = arith.constant 0 : index
    %c1_134 = arith.constant 1 : index
    %c0_135 = arith.constant 0 : index
    %c0_136 = arith.constant 0 : index
    %354 = vector.load %arg8[%c0_133, %c1_134, %c0_135, %c0_136] : memref<2x7x64x96xf32, #tpu.memory_space<vmem>>, vector<1x1x64x96xf32>
    %355 = vector.shape_cast %354 : vector<1x1x64x96xf32> to vector<64x96xf32>
    %356 = vector.extract_strided_slice %355 {offsets = [0, 0], sizes = [32, 32], strides = [1, 1]} : vector<64x96xf32> to vector<32x32xf32>
    %c0_137 = arith.constant 0 : index
    %c2_138 = arith.constant 2 : index
    %c0_139 = arith.constant 0 : index
    %c0_140 = arith.constant 0 : index
    %357 = vector.load %arg8[%c0_137, %c2_138, %c0_139, %c0_140] : memref<2x7x64x96xf32, #tpu.memory_space<vmem>>, vector<1x1x64x96xf32>
    %358 = vector.shape_cast %357 : vector<1x1x64x96xf32> to vector<64x96xf32>
    %359 = vector.extract_strided_slice %358 {offsets = [0, 0], sizes = [32, 32], strides = [1, 1]} : vector<64x96xf32> to vector<32x32xf32>
    %c0_141 = arith.constant 0 : index
    %c3_142 = arith.constant 3 : index
    %c0_143 = arith.constant 0 : index
    %c0_144 = arith.constant 0 : index
    %360 = vector.load %arg8[%c0_141, %c3_142, %c0_143, %c0_144] : memref<2x7x64x96xf32, #tpu.memory_space<vmem>>, vector<1x1x64x96xf32>
    %361 = vector.shape_cast %360 : vector<1x1x64x96xf32> to vector<64x96xf32>
    %362 = vector.extract_strided_slice %361 {offsets = [0, 0], sizes = [32, 64], strides = [1, 1]} : vector<64x96xf32> to vector<32x64xf32>
    %c0_145 = arith.constant 0 : index
    %c4 = arith.constant 4 : index
    %c0_146 = arith.constant 0 : index
    %c0_147 = arith.constant 0 : index
    %363 = vector.load %arg8[%c0_145, %c4, %c0_146, %c0_147] : memref<2x7x64x96xf32, #tpu.memory_space<vmem>>, vector<1x1x64x96xf32>
    %364 = vector.shape_cast %363 : vector<1x1x64x96xf32> to vector<64x96xf32>
    %365 = vector.extract_strided_slice %364 {offsets = [0, 0], sizes = [32, 32], strides = [1, 1]} : vector<64x96xf32> to vector<32x32xf32>
    %c0_148 = arith.constant 0 : index
    %c5 = arith.constant 5 : index
    %c0_149 = arith.constant 0 : index
    %c0_150 = arith.constant 0 : index
    %366 = vector.load %arg8[%c0_148, %c5, %c0_149, %c0_150] : memref<2x7x64x96xf32, #tpu.memory_space<vmem>>, vector<1x1x64x96xf32>
    %367 = vector.shape_cast %366 : vector<1x1x64x96xf32> to vector<64x96xf32>
    %368 = vector.extract_strided_slice %367 {offsets = [0, 0], sizes = [32, 64], strides = [1, 1]} : vector<64x96xf32> to vector<32x64xf32>
    %c0_151 = arith.constant 0 : index
    %c6 = arith.constant 6 : index
    %c0_152 = arith.constant 0 : index
    %c0_153 = arith.constant 0 : index
    %369 = vector.load %arg8[%c0_151, %c6, %c0_152, %c0_153] : memref<2x7x64x96xf32, #tpu.memory_space<vmem>>, vector<1x1x64x96xf32>
    %370 = vector.shape_cast %369 : vector<1x1x64x96xf32> to vector<64x96xf32>
    %371 = vector.extract_strided_slice %370 {offsets = [0, 0], sizes = [64, 32], strides = [1, 1]} : vector<64x96xf32> to vector<64x32xf32>
    %c0_154 = arith.constant 0 : index
    %c0_155 = arith.constant 0 : index
    %c0_156 = arith.constant 0 : index
    %372 = vector.load %arg9[%c0_154, %c0_155, %c0_156] : memref<2x16x96xf32, #tpu.memory_space<vmem>>, vector<1x16x96xf32>
    %373 = vector.shape_cast %372 : vector<1x16x96xf32> to vector<16x96xf32>
    %374 = vector.extract_strided_slice %373 {offsets = [0, 0], sizes = [1, 96], strides = [1, 1]} : vector<16x96xf32> to vector<1x96xf32>
    %375 = vector.extract_strided_slice %373 {offsets = [1, 0], sizes = [1, 32], strides = [1, 1]} : vector<16x96xf32> to vector<1x32xf32>
    %376 = vector.extract_strided_slice %373 {offsets = [2, 0], sizes = [1, 32], strides = [1, 1]} : vector<16x96xf32> to vector<1x32xf32>
    %377 = vector.extract_strided_slice %373 {offsets = [3, 0], sizes = [1, 32], strides = [1, 1]} : vector<16x96xf32> to vector<1x32xf32>
    %378 = vector.extract_strided_slice %373 {offsets = [4, 0], sizes = [1, 32], strides = [1, 1]} : vector<16x96xf32> to vector<1x32xf32>
    %379 = vector.extract_strided_slice %373 {offsets = [5, 0], sizes = [1, 64], strides = [1, 1]} : vector<16x96xf32> to vector<1x64xf32>
    %380 = vector.extract_strided_slice %373 {offsets = [6, 0], sizes = [1, 32], strides = [1, 1]} : vector<16x96xf32> to vector<1x32xf32>
    %381 = vector.extract_strided_slice %373 {offsets = [7, 0], sizes = [1, 32], strides = [1, 1]} : vector<16x96xf32> to vector<1x32xf32>
    %382 = vector.extract_strided_slice %373 {offsets = [8, 0], sizes = [1, 32], strides = [1, 1]} : vector<16x96xf32> to vector<1x32xf32>
    %383 = vector.extract_strided_slice %373 {offsets = [9, 0], sizes = [1, 64], strides = [1, 1]} : vector<16x96xf32> to vector<1x64xf32>
    %384 = vector.extract_strided_slice %373 {offsets = [10, 0], sizes = [1, 32], strides = [1, 1]} : vector<16x96xf32> to vector<1x32xf32>
    %385 = vector.extract_strided_slice %373 {offsets = [11, 0], sizes = [1, 32], strides = [1, 1]} : vector<16x96xf32> to vector<1x32xf32>
    %386 = vector.extract_strided_slice %373 {offsets = [12, 0], sizes = [1, 32], strides = [1, 1]} : vector<16x96xf32> to vector<1x32xf32>
    %387 = vector.shape_cast %350 : vector<2x8x32xf32> to vector<16x32xf32>
    %cst_157 = arith.constant dense<0.000000e+00> : vector<16x96xf32>
    %388 = tpu.matmul %387, %353, %cst_157 {dimension_numbers = #tpu.dot_dimension_numbers<[1], [0], [0], [1], [0, 0, 1, 1], [], []>} : vector<16x32xf32>, vector<32x96xf32>, vector<16x96xf32> -> vector<16x96xf32>
    %389 = vector.broadcast %374 : vector<1x96xf32> to vector<16x96xf32>
    %390 = arith.addf %388, %389 : vector<16x96xf32>
    %391 = vector.extract_strided_slice %390 {offsets = [0, 0], sizes = [16, 32], strides = [1, 1]} : vector<16x96xf32> to vector<16x32xf32>
    %392 = vector.shape_cast %391 : vector<16x32xf32> to vector<2x8x32xf32>
    %393 = vector.extract_strided_slice %390 {offsets = [0, 32], sizes = [16, 32], strides = [1, 1]} : vector<16x96xf32> to vector<16x32xf32>
    %394 = vector.shape_cast %393 : vector<16x32xf32> to vector<2x8x32xf32>
    %395 = vector.extract_strided_slice %390 {offsets = [0, 64], sizes = [16, 32], strides = [1, 1]} : vector<16x96xf32> to vector<16x32xf32>
    %396 = vector.shape_cast %395 : vector<16x32xf32> to vector<2x8x32xf32>
    %397 = vector.extract_strided_slice %392 {offsets = [0, 0, 0], sizes = [2, 8, 8], strides = [1, 1, 1]} : vector<2x8x32xf32> to vector<2x8x8xf32>
    %398 = vector.extract_strided_slice %394 {offsets = [0, 0, 0], sizes = [2, 8, 8], strides = [1, 1, 1]} : vector<2x8x32xf32> to vector<2x8x8xf32>
    %399 = vector.extract_strided_slice %396 {offsets = [0, 0, 0], sizes = [2, 8, 8], strides = [1, 1, 1]} : vector<2x8x32xf32> to vector<2x8x8xf32>
    "tpu.trace_start"() <{level = 10 : i32, message = "bqd,bkd->bqk"}> : () -> ()
    %cst_158 = arith.constant dense<0.000000e+00> : vector<2x8x8xf32>
    %400 = tpu.matmul %397, %398, %cst_158 {dimension_numbers = #tpu.dot_dimension_numbers<[2], [2], [1], [1], [0, 0, 0, 1, 1, 1], [0], [0]>} : vector<2x8x8xf32>, vector<2x8x8xf32>, vector<2x8x8xf32> -> vector<2x8x8xf32>
    "tpu.trace_stop"() : () -> ()
    %cst_159 = arith.constant 0.353553385 : f32
    %401 = vector.broadcast %cst_159 : f32 to vector<2x8x8xf32>
    %402 = arith.mulf %400, %401 : vector<2x8x8xf32>
    %cst_160 = arith.constant -1.000000e+04 : f32
    %403 = vector.broadcast %cst_160 : f32 to vector<2x8x8xf32>
    %404 = arith.select %5, %402, %403 : vector<2x8x8xi1>, vector<2x8x8xf32>
    %cst_161 = arith.constant dense<0xFF800000> : vector<2x8xf32>
    %405 = vector.multi_reduction <maximumf>, %404, %cst_161 [2] : vector<2x8x8xf32> to vector<2x8xf32>
    %406 = vector.shape_cast %405 : vector<2x8xf32> to vector<2x8x1xf32>
    %407 = vector.broadcast %406 : vector<2x8x1xf32> to vector<2x8x8xf32>
    %408 = arith.subf %404, %407 : vector<2x8x8xf32>
    %409 = math.exp %408 : vector<2x8x8xf32>
    %cst_162 = arith.constant dense<0.000000e+00> : vector<2x8xf32>
    %410 = vector.multi_reduction <add>, %409, %cst_162 [2] : vector<2x8x8xf32> to vector<2x8xf32>
    %411 = vector.shape_cast %410 : vector<2x8xf32> to vector<2x8x1xf32>
    %412 = vector.broadcast %411 : vector<2x8x1xf32> to vector<2x8x8xf32>
    %413 = arith.divf %409, %412 : vector<2x8x8xf32>
    "tpu.trace_start"() <{level = 10 : i32, message = "bqk,bkd->bqd"}> : () -> ()
    %cst_163 = arith.constant dense<0.000000e+00> : vector<2x8x8xf32>
    %414 = tpu.matmul %413, %399, %cst_163 {dimension_numbers = #tpu.dot_dimension_numbers<[2], [1], [1], [2], [0, 0, 0, 1, 1, 2], [0], [0]>} : vector<2x8x8xf32>, vector<2x8x8xf32>, vector<2x8x8xf32> -> vector<2x8x8xf32>
    "tpu.trace_stop"() : () -> ()
    %415 = vector.extract_strided_slice %392 {offsets = [0, 0, 8], sizes = [2, 8, 8], strides = [1, 1, 1]} : vector<2x8x32xf32> to vector<2x8x8xf32>
    %416 = vector.extract_strided_slice %394 {offsets = [0, 0, 8], sizes = [2, 8, 8], strides = [1, 1, 1]} : vector<2x8x32xf32> to vector<2x8x8xf32>
    %417 = vector.extract_strided_slice %396 {offsets = [0, 0, 8], sizes = [2, 8, 8], strides = [1, 1, 1]} : vector<2x8x32xf32> to vector<2x8x8xf32>
    "tpu.trace_start"() <{level = 10 : i32, message = "bqd,bkd->bqk"}> : () -> ()
    %cst_164 = arith.constant dense<0.000000e+00> : vector<2x8x8xf32>
    %418 = tpu.matmul %415, %416, %cst_164 {dimension_numbers = #tpu.dot_dimension_numbers<[2], [2], [1], [1], [0, 0, 0, 1, 1, 1], [0], [0]>} : vector<2x8x8xf32>, vector<2x8x8xf32>, vector<2x8x8xf32> -> vector<2x8x8xf32>
    "tpu.trace_stop"() : () -> ()
    %cst_165 = arith.constant 0.353553385 : f32
    %419 = vector.broadcast %cst_165 : f32 to vector<2x8x8xf32>
    %420 = arith.mulf %418, %419 : vector<2x8x8xf32>
    %cst_166 = arith.constant -1.000000e+04 : f32
    %421 = vector.broadcast %cst_166 : f32 to vector<2x8x8xf32>
    %422 = arith.select %5, %420, %421 : vector<2x8x8xi1>, vector<2x8x8xf32>
    %cst_167 = arith.constant dense<0xFF800000> : vector<2x8xf32>
    %423 = vector.multi_reduction <maximumf>, %422, %cst_167 [2] : vector<2x8x8xf32> to vector<2x8xf32>
    %424 = vector.shape_cast %423 : vector<2x8xf32> to vector<2x8x1xf32>
    %425 = vector.broadcast %424 : vector<2x8x1xf32> to vector<2x8x8xf32>
    %426 = arith.subf %422, %425 : vector<2x8x8xf32>
    %427 = math.exp %426 : vector<2x8x8xf32>
    %cst_168 = arith.constant dense<0.000000e+00> : vector<2x8xf32>
    %428 = vector.multi_reduction <add>, %427, %cst_168 [2] : vector<2x8x8xf32> to vector<2x8xf32>
    %429 = vector.shape_cast %428 : vector<2x8xf32> to vector<2x8x1xf32>
    %430 = vector.broadcast %429 : vector<2x8x1xf32> to vector<2x8x8xf32>
    %431 = arith.divf %427, %430 : vector<2x8x8xf32>
    "tpu.trace_start"() <{level = 10 : i32, message = "bqk,bkd->bqd"}> : () -> ()
    %cst_169 = arith.constant dense<0.000000e+00> : vector<2x8x8xf32>
    %432 = tpu.matmul %431, %417, %cst_169 {dimension_numbers = #tpu.dot_dimension_numbers<[2], [1], [1], [2], [0, 0, 0, 1, 1, 2], [0], [0]>} : vector<2x8x8xf32>, vector<2x8x8xf32>, vector<2x8x8xf32> -> vector<2x8x8xf32>
    "tpu.trace_stop"() : () -> ()
    %433 = vector.extract_strided_slice %392 {offsets = [0, 0, 16], sizes = [2, 8, 8], strides = [1, 1, 1]} : vector<2x8x32xf32> to vector<2x8x8xf32>
    %434 = vector.extract_strided_slice %394 {offsets = [0, 0, 16], sizes = [2, 8, 8], strides = [1, 1, 1]} : vector<2x8x32xf32> to vector<2x8x8xf32>
    %435 = vector.extract_strided_slice %396 {offsets = [0, 0, 16], sizes = [2, 8, 8], strides = [1, 1, 1]} : vector<2x8x32xf32> to vector<2x8x8xf32>
    "tpu.trace_start"() <{level = 10 : i32, message = "bqd,bkd->bqk"}> : () -> ()
    %cst_170 = arith.constant dense<0.000000e+00> : vector<2x8x8xf32>
    %436 = tpu.matmul %433, %434, %cst_170 {dimension_numbers = #tpu.dot_dimension_numbers<[2], [2], [1], [1], [0, 0, 0, 1, 1, 1], [0], [0]>} : vector<2x8x8xf32>, vector<2x8x8xf32>, vector<2x8x8xf32> -> vector<2x8x8xf32>
    "tpu.trace_stop"() : () -> ()
    %cst_171 = arith.constant 0.353553385 : f32
    %437 = vector.broadcast %cst_171 : f32 to vector<2x8x8xf32>
    %438 = arith.mulf %436, %437 : vector<2x8x8xf32>
    %cst_172 = arith.constant -1.000000e+04 : f32
    %439 = vector.broadcast %cst_172 : f32 to vector<2x8x8xf32>
    %440 = arith.select %5, %438, %439 : vector<2x8x8xi1>, vector<2x8x8xf32>
    %cst_173 = arith.constant dense<0xFF800000> : vector<2x8xf32>
    %441 = vector.multi_reduction <maximumf>, %440, %cst_173 [2] : vector<2x8x8xf32> to vector<2x8xf32>
    %442 = vector.shape_cast %441 : vector<2x8xf32> to vector<2x8x1xf32>
    %443 = vector.broadcast %442 : vector<2x8x1xf32> to vector<2x8x8xf32>
    %444 = arith.subf %440, %443 : vector<2x8x8xf32>
    %445 = math.exp %444 : vector<2x8x8xf32>
    %cst_174 = arith.constant dense<0.000000e+00> : vector<2x8xf32>
    %446 = vector.multi_reduction <add>, %445, %cst_174 [2] : vector<2x8x8xf32> to vector<2x8xf32>
    %447 = vector.shape_cast %446 : vector<2x8xf32> to vector<2x8x1xf32>
    %448 = vector.broadcast %447 : vector<2x8x1xf32> to vector<2x8x8xf32>
    %449 = arith.divf %445, %448 : vector<2x8x8xf32>
    "tpu.trace_start"() <{level = 10 : i32, message = "bqk,bkd->bqd"}> : () -> ()
    %cst_175 = arith.constant dense<0.000000e+00> : vector<2x8x8xf32>
    %450 = tpu.matmul %449, %435, %cst_175 {dimension_numbers = #tpu.dot_dimension_numbers<[2], [1], [1], [2], [0, 0, 0, 1, 1, 2], [0], [0]>} : vector<2x8x8xf32>, vector<2x8x8xf32>, vector<2x8x8xf32> -> vector<2x8x8xf32>
    "tpu.trace_stop"() : () -> ()
    %451 = vector.extract_strided_slice %392 {offsets = [0, 0, 24], sizes = [2, 8, 8], strides = [1, 1, 1]} : vector<2x8x32xf32> to vector<2x8x8xf32>
    %452 = vector.extract_strided_slice %394 {offsets = [0, 0, 24], sizes = [2, 8, 8], strides = [1, 1, 1]} : vector<2x8x32xf32> to vector<2x8x8xf32>
    %453 = vector.extract_strided_slice %396 {offsets = [0, 0, 24], sizes = [2, 8, 8], strides = [1, 1, 1]} : vector<2x8x32xf32> to vector<2x8x8xf32>
    "tpu.trace_start"() <{level = 10 : i32, message = "bqd,bkd->bqk"}> : () -> ()
    %cst_176 = arith.constant dense<0.000000e+00> : vector<2x8x8xf32>
    %454 = tpu.matmul %451, %452, %cst_176 {dimension_numbers = #tpu.dot_dimension_numbers<[2], [2], [1], [1], [0, 0, 0, 1, 1, 1], [0], [0]>} : vector<2x8x8xf32>, vector<2x8x8xf32>, vector<2x8x8xf32> -> vector<2x8x8xf32>
    "tpu.trace_stop"() : () -> ()
    %cst_177 = arith.constant 0.353553385 : f32
    %455 = vector.broadcast %cst_177 : f32 to vector<2x8x8xf32>
    %456 = arith.mulf %454, %455 : vector<2x8x8xf32>
    %cst_178 = arith.constant -1.000000e+04 : f32
    %457 = vector.broadcast %cst_178 : f32 to vector<2x8x8xf32>
    %458 = arith.select %5, %456, %457 : vector<2x8x8xi1>, vector<2x8x8xf32>
    %cst_179 = arith.constant dense<0xFF800000> : vector<2x8xf32>
    %459 = vector.multi_reduction <maximumf>, %458, %cst_179 [2] : vector<2x8x8xf32> to vector<2x8xf32>
    %460 = vector.shape_cast %459 : vector<2x8xf32> to vector<2x8x1xf32>
    %461 = vector.broadcast %460 : vector<2x8x1xf32> to vector<2x8x8xf32>
    %462 = arith.subf %458, %461 : vector<2x8x8xf32>
    %463 = math.exp %462 : vector<2x8x8xf32>
    %cst_180 = arith.constant dense<0.000000e+00> : vector<2x8xf32>
    %464 = vector.multi_reduction <add>, %463, %cst_180 [2] : vector<2x8x8xf32> to vector<2x8xf32>
    %465 = vector.shape_cast %464 : vector<2x8xf32> to vector<2x8x1xf32>
    %466 = vector.broadcast %465 : vector<2x8x1xf32> to vector<2x8x8xf32>
    %467 = arith.divf %463, %466 : vector<2x8x8xf32>
    "tpu.trace_start"() <{level = 10 : i32, message = "bqk,bkd->bqd"}> : () -> ()
    %cst_181 = arith.constant dense<0.000000e+00> : vector<2x8x8xf32>
    %468 = tpu.matmul %467, %453, %cst_181 {dimension_numbers = #tpu.dot_dimension_numbers<[2], [1], [1], [2], [0, 0, 0, 1, 1, 2], [0], [0]>} : vector<2x8x8xf32>, vector<2x8x8xf32>, vector<2x8x8xf32> -> vector<2x8x8xf32>
    "tpu.trace_stop"() : () -> ()
    %469 = tpu.concatenate %414, %432, %450, %468 in 2 : vector<2x8x8xf32>, vector<2x8x8xf32>, vector<2x8x8xf32>, vector<2x8x8xf32> -> vector<2x8x32xf32>
    %470 = vector.shape_cast %469 : vector<2x8x32xf32> to vector<16x32xf32>
    %cst_182 = arith.constant dense<0.000000e+00> : vector<16x32xf32>
    %471 = tpu.matmul %470, %356, %cst_182 {dimension_numbers = #tpu.dot_dimension_numbers<[1], [0], [0], [1], [0, 0, 1, 1], [], []>} : vector<16x32xf32>, vector<32x32xf32>, vector<16x32xf32> -> vector<16x32xf32>
    %472 = vector.broadcast %375 : vector<1x32xf32> to vector<16x32xf32>
    %473 = arith.addf %471, %472 : vector<16x32xf32>
    %474 = vector.shape_cast %473 : vector<16x32xf32> to vector<2x8x32xf32>
    %475 = arith.addf %474, %350 : vector<2x8x32xf32>
    %476 = vector.shape_cast %475 : vector<2x8x32xf32> to vector<16x32xf32>
    %cst_183 = arith.constant dense<0.000000e+00> : vector<16xf32>
    %477 = vector.multi_reduction <add>, %476, %cst_183 [1] : vector<16x32xf32> to vector<16xf32>
    %478 = vector.shape_cast %477 : vector<16xf32> to vector<16x1xf32>
    %cst_184 = arith.constant 3.200000e+01 : f32
    %479 = vector.broadcast %cst_184 : f32 to vector<16x1xf32>
    %480 = arith.divf %478, %479 : vector<16x1xf32>
    %481 = vector.broadcast %480 : vector<16x1xf32> to vector<16x32xf32>
    %482 = arith.subf %476, %481 : vector<16x32xf32>
    %483 = arith.mulf %482, %482 : vector<16x32xf32>
    %cst_185 = arith.constant dense<0.000000e+00> : vector<16xf32>
    %484 = vector.multi_reduction <add>, %483, %cst_185 [1] : vector<16x32xf32> to vector<16xf32>
    %485 = vector.shape_cast %484 : vector<16xf32> to vector<16x1xf32>
    %cst_186 = arith.constant 3.200000e+01 : f32
    %486 = vector.broadcast %cst_186 : f32 to vector<16x1xf32>
    %487 = arith.divf %485, %486 : vector<16x1xf32>
    %488 = vector.broadcast %480 : vector<16x1xf32> to vector<16x32xf32>
    %489 = arith.subf %476, %488 : vector<16x32xf32>
    %cst_187 = arith.constant 9.99999996E-13 : f32
    %490 = vector.broadcast %cst_187 : f32 to vector<16x1xf32>
    %491 = arith.addf %487, %490 : vector<16x1xf32>
    %492 = math.rsqrt %491 : vector<16x1xf32>
    %493 = vector.broadcast %492 : vector<16x1xf32> to vector<16x32xf32>
    %494 = arith.mulf %489, %493 : vector<16x32xf32>
    %495 = vector.broadcast %376 : vector<1x32xf32> to vector<16x32xf32>
    %496 = arith.mulf %494, %495 : vector<16x32xf32>
    %497 = vector.broadcast %377 : vector<1x32xf32> to vector<16x32xf32>
    %498 = arith.addf %496, %497 : vector<16x32xf32>
    %499 = vector.shape_cast %498 : vector<16x32xf32> to vector<2x8x32xf32>
    %500 = vector.shape_cast %499 : vector<2x8x32xf32> to vector<16x32xf32>
    %cst_188 = arith.constant dense<0.000000e+00> : vector<16x32xf32>
    %501 = tpu.matmul %500, %359, %cst_188 {dimension_numbers = #tpu.dot_dimension_numbers<[1], [0], [0], [1], [0, 0, 1, 1], [], []>} : vector<16x32xf32>, vector<32x32xf32>, vector<16x32xf32> -> vector<16x32xf32>
    %502 = vector.broadcast %378 : vector<1x32xf32> to vector<16x32xf32>
    %503 = arith.addf %501, %502 : vector<16x32xf32>
    %504 = vector.shape_cast %503 : vector<16x32xf32> to vector<2x8x32xf32>
    %505 = vector.shape_cast %349 : vector<2x8x32xf32> to vector<16x32xf32>
    %cst_189 = arith.constant dense<0.000000e+00> : vector<16x64xf32>
    %506 = tpu.matmul %505, %362, %cst_189 {dimension_numbers = #tpu.dot_dimension_numbers<[1], [0], [0], [1], [0, 0, 1, 1], [], []>} : vector<16x32xf32>, vector<32x64xf32>, vector<16x64xf32> -> vector<16x64xf32>
    %507 = vector.broadcast %379 : vector<1x64xf32> to vector<16x64xf32>
    %508 = arith.addf %506, %507 : vector<16x64xf32>
    %509 = vector.extract_strided_slice %508 {offsets = [0, 0], sizes = [16, 32], strides = [1, 1]} : vector<16x64xf32> to vector<16x32xf32>
    %510 = vector.shape_cast %509 : vector<16x32xf32> to vector<2x8x32xf32>
    %511 = vector.extract_strided_slice %508 {offsets = [0, 32], sizes = [16, 32], strides = [1, 1]} : vector<16x64xf32> to vector<16x32xf32>
    %512 = vector.shape_cast %511 : vector<16x32xf32> to vector<2x8x32xf32>
    %513 = vector.extract_strided_slice %504 {offsets = [0, 0, 0], sizes = [2, 8, 8], strides = [1, 1, 1]} : vector<2x8x32xf32> to vector<2x8x8xf32>
    %514 = vector.extract_strided_slice %510 {offsets = [0, 0, 0], sizes = [2, 8, 8], strides = [1, 1, 1]} : vector<2x8x32xf32> to vector<2x8x8xf32>
    %515 = vector.extract_strided_slice %512 {offsets = [0, 0, 0], sizes = [2, 8, 8], strides = [1, 1, 1]} : vector<2x8x32xf32> to vector<2x8x8xf32>
    "tpu.trace_start"() <{level = 10 : i32, message = "bqd,bkd->bqk"}> : () -> ()
    %cst_190 = arith.constant dense<0.000000e+00> : vector<2x8x8xf32>
    %516 = tpu.matmul %513, %514, %cst_190 {dimension_numbers = #tpu.dot_dimension_numbers<[2], [2], [1], [1], [0, 0, 0, 1, 1, 1], [0], [0]>} : vector<2x8x8xf32>, vector<2x8x8xf32>, vector<2x8x8xf32> -> vector<2x8x8xf32>
    "tpu.trace_stop"() : () -> ()
    %cst_191 = arith.constant 0.353553385 : f32
    %517 = vector.broadcast %cst_191 : f32 to vector<2x8x8xf32>
    %518 = arith.mulf %516, %517 : vector<2x8x8xf32>
    %cst_192 = arith.constant -1.000000e+04 : f32
    %519 = vector.broadcast %cst_192 : f32 to vector<2x8x8xf32>
    %520 = arith.select %8, %518, %519 : vector<2x8x8xi1>, vector<2x8x8xf32>
    %cst_193 = arith.constant dense<0xFF800000> : vector<2x8xf32>
    %521 = vector.multi_reduction <maximumf>, %520, %cst_193 [2] : vector<2x8x8xf32> to vector<2x8xf32>
    %522 = vector.shape_cast %521 : vector<2x8xf32> to vector<2x8x1xf32>
    %523 = vector.broadcast %522 : vector<2x8x1xf32> to vector<2x8x8xf32>
    %524 = arith.subf %520, %523 : vector<2x8x8xf32>
    %525 = math.exp %524 : vector<2x8x8xf32>
    %cst_194 = arith.constant dense<0.000000e+00> : vector<2x8xf32>
    %526 = vector.multi_reduction <add>, %525, %cst_194 [2] : vector<2x8x8xf32> to vector<2x8xf32>
    %527 = vector.shape_cast %526 : vector<2x8xf32> to vector<2x8x1xf32>
    %528 = vector.broadcast %527 : vector<2x8x1xf32> to vector<2x8x8xf32>
    %529 = arith.divf %525, %528 : vector<2x8x8xf32>
    "tpu.trace_start"() <{level = 10 : i32, message = "bqk,bkd->bqd"}> : () -> ()
    %cst_195 = arith.constant dense<0.000000e+00> : vector<2x8x8xf32>
    %530 = tpu.matmul %529, %515, %cst_195 {dimension_numbers = #tpu.dot_dimension_numbers<[2], [1], [1], [2], [0, 0, 0, 1, 1, 2], [0], [0]>} : vector<2x8x8xf32>, vector<2x8x8xf32>, vector<2x8x8xf32> -> vector<2x8x8xf32>
    "tpu.trace_stop"() : () -> ()
    %531 = vector.extract_strided_slice %504 {offsets = [0, 0, 8], sizes = [2, 8, 8], strides = [1, 1, 1]} : vector<2x8x32xf32> to vector<2x8x8xf32>
    %532 = vector.extract_strided_slice %510 {offsets = [0, 0, 8], sizes = [2, 8, 8], strides = [1, 1, 1]} : vector<2x8x32xf32> to vector<2x8x8xf32>
    %533 = vector.extract_strided_slice %512 {offsets = [0, 0, 8], sizes = [2, 8, 8], strides = [1, 1, 1]} : vector<2x8x32xf32> to vector<2x8x8xf32>
    "tpu.trace_start"() <{level = 10 : i32, message = "bqd,bkd->bqk"}> : () -> ()
    %cst_196 = arith.constant dense<0.000000e+00> : vector<2x8x8xf32>
    %534 = tpu.matmul %531, %532, %cst_196 {dimension_numbers = #tpu.dot_dimension_numbers<[2], [2], [1], [1], [0, 0, 0, 1, 1, 1], [0], [0]>} : vector<2x8x8xf32>, vector<2x8x8xf32>, vector<2x8x8xf32> -> vector<2x8x8xf32>
    "tpu.trace_stop"() : () -> ()
    %cst_197 = arith.constant 0.353553385 : f32
    %535 = vector.broadcast %cst_197 : f32 to vector<2x8x8xf32>
    %536 = arith.mulf %534, %535 : vector<2x8x8xf32>
    %cst_198 = arith.constant -1.000000e+04 : f32
    %537 = vector.broadcast %cst_198 : f32 to vector<2x8x8xf32>
    %538 = arith.select %8, %536, %537 : vector<2x8x8xi1>, vector<2x8x8xf32>
    %cst_199 = arith.constant dense<0xFF800000> : vector<2x8xf32>
    %539 = vector.multi_reduction <maximumf>, %538, %cst_199 [2] : vector<2x8x8xf32> to vector<2x8xf32>
    %540 = vector.shape_cast %539 : vector<2x8xf32> to vector<2x8x1xf32>
    %541 = vector.broadcast %540 : vector<2x8x1xf32> to vector<2x8x8xf32>
    %542 = arith.subf %538, %541 : vector<2x8x8xf32>
    %543 = math.exp %542 : vector<2x8x8xf32>
    %cst_200 = arith.constant dense<0.000000e+00> : vector<2x8xf32>
    %544 = vector.multi_reduction <add>, %543, %cst_200 [2] : vector<2x8x8xf32> to vector<2x8xf32>
    %545 = vector.shape_cast %544 : vector<2x8xf32> to vector<2x8x1xf32>
    %546 = vector.broadcast %545 : vector<2x8x1xf32> to vector<2x8x8xf32>
    %547 = arith.divf %543, %546 : vector<2x8x8xf32>
    "tpu.trace_start"() <{level = 10 : i32, message = "bqk,bkd->bqd"}> : () -> ()
    %cst_201 = arith.constant dense<0.000000e+00> : vector<2x8x8xf32>
    %548 = tpu.matmul %547, %533, %cst_201 {dimension_numbers = #tpu.dot_dimension_numbers<[2], [1], [1], [2], [0, 0, 0, 1, 1, 2], [0], [0]>} : vector<2x8x8xf32>, vector<2x8x8xf32>, vector<2x8x8xf32> -> vector<2x8x8xf32>
    "tpu.trace_stop"() : () -> ()
    %549 = vector.extract_strided_slice %504 {offsets = [0, 0, 16], sizes = [2, 8, 8], strides = [1, 1, 1]} : vector<2x8x32xf32> to vector<2x8x8xf32>
    %550 = vector.extract_strided_slice %510 {offsets = [0, 0, 16], sizes = [2, 8, 8], strides = [1, 1, 1]} : vector<2x8x32xf32> to vector<2x8x8xf32>
    %551 = vector.extract_strided_slice %512 {offsets = [0, 0, 16], sizes = [2, 8, 8], strides = [1, 1, 1]} : vector<2x8x32xf32> to vector<2x8x8xf32>
    "tpu.trace_start"() <{level = 10 : i32, message = "bqd,bkd->bqk"}> : () -> ()
    %cst_202 = arith.constant dense<0.000000e+00> : vector<2x8x8xf32>
    %552 = tpu.matmul %549, %550, %cst_202 {dimension_numbers = #tpu.dot_dimension_numbers<[2], [2], [1], [1], [0, 0, 0, 1, 1, 1], [0], [0]>} : vector<2x8x8xf32>, vector<2x8x8xf32>, vector<2x8x8xf32> -> vector<2x8x8xf32>
    "tpu.trace_stop"() : () -> ()
    %cst_203 = arith.constant 0.353553385 : f32
    %553 = vector.broadcast %cst_203 : f32 to vector<2x8x8xf32>
    %554 = arith.mulf %552, %553 : vector<2x8x8xf32>
    %cst_204 = arith.constant -1.000000e+04 : f32
    %555 = vector.broadcast %cst_204 : f32 to vector<2x8x8xf32>
    %556 = arith.select %8, %554, %555 : vector<2x8x8xi1>, vector<2x8x8xf32>
    %cst_205 = arith.constant dense<0xFF800000> : vector<2x8xf32>
    %557 = vector.multi_reduction <maximumf>, %556, %cst_205 [2] : vector<2x8x8xf32> to vector<2x8xf32>
    %558 = vector.shape_cast %557 : vector<2x8xf32> to vector<2x8x1xf32>
    %559 = vector.broadcast %558 : vector<2x8x1xf32> to vector<2x8x8xf32>
    %560 = arith.subf %556, %559 : vector<2x8x8xf32>
    %561 = math.exp %560 : vector<2x8x8xf32>
    %cst_206 = arith.constant dense<0.000000e+00> : vector<2x8xf32>
    %562 = vector.multi_reduction <add>, %561, %cst_206 [2] : vector<2x8x8xf32> to vector<2x8xf32>
    %563 = vector.shape_cast %562 : vector<2x8xf32> to vector<2x8x1xf32>
    %564 = vector.broadcast %563 : vector<2x8x1xf32> to vector<2x8x8xf32>
    %565 = arith.divf %561, %564 : vector<2x8x8xf32>
    "tpu.trace_start"() <{level = 10 : i32, message = "bqk,bkd->bqd"}> : () -> ()
    %cst_207 = arith.constant dense<0.000000e+00> : vector<2x8x8xf32>
    %566 = tpu.matmul %565, %551, %cst_207 {dimension_numbers = #tpu.dot_dimension_numbers<[2], [1], [1], [2], [0, 0, 0, 1, 1, 2], [0], [0]>} : vector<2x8x8xf32>, vector<2x8x8xf32>, vector<2x8x8xf32> -> vector<2x8x8xf32>
    "tpu.trace_stop"() : () -> ()
    %567 = vector.extract_strided_slice %504 {offsets = [0, 0, 24], sizes = [2, 8, 8], strides = [1, 1, 1]} : vector<2x8x32xf32> to vector<2x8x8xf32>
    %568 = vector.extract_strided_slice %510 {offsets = [0, 0, 24], sizes = [2, 8, 8], strides = [1, 1, 1]} : vector<2x8x32xf32> to vector<2x8x8xf32>
    %569 = vector.extract_strided_slice %512 {offsets = [0, 0, 24], sizes = [2, 8, 8], strides = [1, 1, 1]} : vector<2x8x32xf32> to vector<2x8x8xf32>
    "tpu.trace_start"() <{level = 10 : i32, message = "bqd,bkd->bqk"}> : () -> ()
    %cst_208 = arith.constant dense<0.000000e+00> : vector<2x8x8xf32>
    %570 = tpu.matmul %567, %568, %cst_208 {dimension_numbers = #tpu.dot_dimension_numbers<[2], [2], [1], [1], [0, 0, 0, 1, 1, 1], [0], [0]>} : vector<2x8x8xf32>, vector<2x8x8xf32>, vector<2x8x8xf32> -> vector<2x8x8xf32>
    "tpu.trace_stop"() : () -> ()
    %cst_209 = arith.constant 0.353553385 : f32
    %571 = vector.broadcast %cst_209 : f32 to vector<2x8x8xf32>
    %572 = arith.mulf %570, %571 : vector<2x8x8xf32>
    %cst_210 = arith.constant -1.000000e+04 : f32
    %573 = vector.broadcast %cst_210 : f32 to vector<2x8x8xf32>
    %574 = arith.select %8, %572, %573 : vector<2x8x8xi1>, vector<2x8x8xf32>
    %cst_211 = arith.constant dense<0xFF800000> : vector<2x8xf32>
    %575 = vector.multi_reduction <maximumf>, %574, %cst_211 [2] : vector<2x8x8xf32> to vector<2x8xf32>
    %576 = vector.shape_cast %575 : vector<2x8xf32> to vector<2x8x1xf32>
    %577 = vector.broadcast %576 : vector<2x8x1xf32> to vector<2x8x8xf32>
    %578 = arith.subf %574, %577 : vector<2x8x8xf32>
    %579 = math.exp %578 : vector<2x8x8xf32>
    %cst_212 = arith.constant dense<0.000000e+00> : vector<2x8xf32>
    %580 = vector.multi_reduction <add>, %579, %cst_212 [2] : vector<2x8x8xf32> to vector<2x8xf32>
    %581 = vector.shape_cast %580 : vector<2x8xf32> to vector<2x8x1xf32>
    %582 = vector.broadcast %581 : vector<2x8x1xf32> to vector<2x8x8xf32>
    %583 = arith.divf %579, %582 : vector<2x8x8xf32>
    "tpu.trace_start"() <{level = 10 : i32, message = "bqk,bkd->bqd"}> : () -> ()
    %cst_213 = arith.constant dense<0.000000e+00> : vector<2x8x8xf32>
    %584 = tpu.matmul %583, %569, %cst_213 {dimension_numbers = #tpu.dot_dimension_numbers<[2], [1], [1], [2], [0, 0, 0, 1, 1, 2], [0], [0]>} : vector<2x8x8xf32>, vector<2x8x8xf32>, vector<2x8x8xf32> -> vector<2x8x8xf32>
    "tpu.trace_stop"() : () -> ()
    %585 = tpu.concatenate %530, %548, %566, %584 in 2 : vector<2x8x8xf32>, vector<2x8x8xf32>, vector<2x8x8xf32>, vector<2x8x8xf32> -> vector<2x8x32xf32>
    %586 = vector.shape_cast %585 : vector<2x8x32xf32> to vector<16x32xf32>
    %cst_214 = arith.constant dense<0.000000e+00> : vector<16x32xf32>
    %587 = tpu.matmul %586, %365, %cst_214 {dimension_numbers = #tpu.dot_dimension_numbers<[1], [0], [0], [1], [0, 0, 1, 1], [], []>} : vector<16x32xf32>, vector<32x32xf32>, vector<16x32xf32> -> vector<16x32xf32>
    %588 = vector.broadcast %380 : vector<1x32xf32> to vector<16x32xf32>
    %589 = arith.addf %587, %588 : vector<16x32xf32>
    %590 = vector.shape_cast %589 : vector<16x32xf32> to vector<2x8x32xf32>
    %591 = arith.addf %590, %499 : vector<2x8x32xf32>
    %592 = vector.shape_cast %591 : vector<2x8x32xf32> to vector<16x32xf32>
    %cst_215 = arith.constant dense<0.000000e+00> : vector<16xf32>
    %593 = vector.multi_reduction <add>, %592, %cst_215 [1] : vector<16x32xf32> to vector<16xf32>
    %594 = vector.shape_cast %593 : vector<16xf32> to vector<16x1xf32>
    %cst_216 = arith.constant 3.200000e+01 : f32
    %595 = vector.broadcast %cst_216 : f32 to vector<16x1xf32>
    %596 = arith.divf %594, %595 : vector<16x1xf32>
    %597 = vector.broadcast %596 : vector<16x1xf32> to vector<16x32xf32>
    %598 = arith.subf %592, %597 : vector<16x32xf32>
    %599 = arith.mulf %598, %598 : vector<16x32xf32>
    %cst_217 = arith.constant dense<0.000000e+00> : vector<16xf32>
    %600 = vector.multi_reduction <add>, %599, %cst_217 [1] : vector<16x32xf32> to vector<16xf32>
    %601 = vector.shape_cast %600 : vector<16xf32> to vector<16x1xf32>
    %cst_218 = arith.constant 3.200000e+01 : f32
    %602 = vector.broadcast %cst_218 : f32 to vector<16x1xf32>
    %603 = arith.divf %601, %602 : vector<16x1xf32>
    %604 = vector.broadcast %596 : vector<16x1xf32> to vector<16x32xf32>
    %605 = arith.subf %592, %604 : vector<16x32xf32>
    %cst_219 = arith.constant 9.99999996E-13 : f32
    %606 = vector.broadcast %cst_219 : f32 to vector<16x1xf32>
    %607 = arith.addf %603, %606 : vector<16x1xf32>
    %608 = math.rsqrt %607 : vector<16x1xf32>
    %609 = vector.broadcast %608 : vector<16x1xf32> to vector<16x32xf32>
    %610 = arith.mulf %605, %609 : vector<16x32xf32>
    %611 = vector.broadcast %381 : vector<1x32xf32> to vector<16x32xf32>
    %612 = arith.mulf %610, %611 : vector<16x32xf32>
    %613 = vector.broadcast %382 : vector<1x32xf32> to vector<16x32xf32>
    %614 = arith.addf %612, %613 : vector<16x32xf32>
    %615 = vector.shape_cast %614 : vector<16x32xf32> to vector<2x8x32xf32>
    %616 = vector.shape_cast %615 : vector<2x8x32xf32> to vector<16x32xf32>
    %cst_220 = arith.constant dense<0.000000e+00> : vector<16x64xf32>
    %617 = tpu.matmul %616, %368, %cst_220 {dimension_numbers = #tpu.dot_dimension_numbers<[1], [0], [0], [1], [0, 0, 1, 1], [], []>} : vector<16x32xf32>, vector<32x64xf32>, vector<16x64xf32> -> vector<16x64xf32>
    %618 = vector.broadcast %383 : vector<1x64xf32> to vector<16x64xf32>
    %619 = arith.addf %617, %618 : vector<16x64xf32>
    %cst_221 = arith.constant 0.000000e+00 : f32
    %620 = vector.broadcast %cst_221 : f32 to vector<16x64xf32>
    %621 = arith.maximumf %619, %620 : vector<16x64xf32>
    %cst_222 = arith.constant dense<0.000000e+00> : vector<16x32xf32>
    %622 = tpu.matmul %621, %371, %cst_222 {dimension_numbers = #tpu.dot_dimension_numbers<[1], [0], [0], [1], [0, 0, 1, 1], [], []>} : vector<16x64xf32>, vector<64x32xf32>, vector<16x32xf32> -> vector<16x32xf32>
    %623 = vector.broadcast %384 : vector<1x32xf32> to vector<16x32xf32>
    %624 = arith.addf %622, %623 : vector<16x32xf32>
    %625 = vector.shape_cast %624 : vector<16x32xf32> to vector<2x8x32xf32>
    %626 = arith.addf %625, %615 : vector<2x8x32xf32>
    %627 = vector.shape_cast %626 : vector<2x8x32xf32> to vector<16x32xf32>
    %cst_223 = arith.constant dense<0.000000e+00> : vector<16xf32>
    %628 = vector.multi_reduction <add>, %627, %cst_223 [1] : vector<16x32xf32> to vector<16xf32>
    %629 = vector.shape_cast %628 : vector<16xf32> to vector<16x1xf32>
    %cst_224 = arith.constant 3.200000e+01 : f32
    %630 = vector.broadcast %cst_224 : f32 to vector<16x1xf32>
    %631 = arith.divf %629, %630 : vector<16x1xf32>
    %632 = vector.broadcast %631 : vector<16x1xf32> to vector<16x32xf32>
    %633 = arith.subf %627, %632 : vector<16x32xf32>
    %634 = arith.mulf %633, %633 : vector<16x32xf32>
    %cst_225 = arith.constant dense<0.000000e+00> : vector<16xf32>
    %635 = vector.multi_reduction <add>, %634, %cst_225 [1] : vector<16x32xf32> to vector<16xf32>
    %636 = vector.shape_cast %635 : vector<16xf32> to vector<16x1xf32>
    %cst_226 = arith.constant 3.200000e+01 : f32
    %637 = vector.broadcast %cst_226 : f32 to vector<16x1xf32>
    %638 = arith.divf %636, %637 : vector<16x1xf32>
    %639 = vector.broadcast %631 : vector<16x1xf32> to vector<16x32xf32>
    %640 = arith.subf %627, %639 : vector<16x32xf32>
    %cst_227 = arith.constant 9.99999996E-13 : f32
    %641 = vector.broadcast %cst_227 : f32 to vector<16x1xf32>
    %642 = arith.addf %638, %641 : vector<16x1xf32>
    %643 = math.rsqrt %642 : vector<16x1xf32>
    %644 = vector.broadcast %643 : vector<16x1xf32> to vector<16x32xf32>
    %645 = arith.mulf %640, %644 : vector<16x32xf32>
    %646 = vector.broadcast %385 : vector<1x32xf32> to vector<16x32xf32>
    %647 = arith.mulf %645, %646 : vector<16x32xf32>
    %648 = vector.broadcast %386 : vector<1x32xf32> to vector<16x32xf32>
    %649 = arith.addf %647, %648 : vector<16x32xf32>
    %650 = vector.shape_cast %649 : vector<16x32xf32> to vector<2x8x32xf32>
    %c1_228 = arith.constant 1 : index
    %c0_229 = arith.constant 0 : index
    %c0_230 = arith.constant 0 : index
    %c0_231 = arith.constant 0 : index
    %651 = vector.load %arg8[%c1_228, %c0_229, %c0_230, %c0_231] : memref<2x7x64x96xf32, #tpu.memory_space<vmem>>, vector<1x1x64x96xf32>
    %652 = vector.shape_cast %651 : vector<1x1x64x96xf32> to vector<64x96xf32>
    %653 = vector.extract_strided_slice %652 {offsets = [0, 0], sizes = [32, 96], strides = [1, 1]} : vector<64x96xf32> to vector<32x96xf32>
    %c1_232 = arith.constant 1 : index
    %c1_233 = arith.constant 1 : index
    %c0_234 = arith.constant 0 : index
    %c0_235 = arith.constant 0 : index
    %654 = vector.load %arg8[%c1_232, %c1_233, %c0_234, %c0_235] : memref<2x7x64x96xf32, #tpu.memory_space<vmem>>, vector<1x1x64x96xf32>
    %655 = vector.shape_cast %654 : vector<1x1x64x96xf32> to vector<64x96xf32>
    %656 = vector.extract_strided_slice %655 {offsets = [0, 0], sizes = [32, 32], strides = [1, 1]} : vector<64x96xf32> to vector<32x32xf32>
    %c1_236 = arith.constant 1 : index
    %c2_237 = arith.constant 2 : index
    %c0_238 = arith.constant 0 : index
    %c0_239 = arith.constant 0 : index
    %657 = vector.load %arg8[%c1_236, %c2_237, %c0_238, %c0_239] : memref<2x7x64x96xf32, #tpu.memory_space<vmem>>, vector<1x1x64x96xf32>
    %658 = vector.shape_cast %657 : vector<1x1x64x96xf32> to vector<64x96xf32>
    %659 = vector.extract_strided_slice %658 {offsets = [0, 0], sizes = [32, 32], strides = [1, 1]} : vector<64x96xf32> to vector<32x32xf32>
    %c1_240 = arith.constant 1 : index
    %c3_241 = arith.constant 3 : index
    %c0_242 = arith.constant 0 : index
    %c0_243 = arith.constant 0 : index
    %660 = vector.load %arg8[%c1_240, %c3_241, %c0_242, %c0_243] : memref<2x7x64x96xf32, #tpu.memory_space<vmem>>, vector<1x1x64x96xf32>
    %661 = vector.shape_cast %660 : vector<1x1x64x96xf32> to vector<64x96xf32>
    %662 = vector.extract_strided_slice %661 {offsets = [0, 0], sizes = [32, 64], strides = [1, 1]} : vector<64x96xf32> to vector<32x64xf32>
    %c1_244 = arith.constant 1 : index
    %c4_245 = arith.constant 4 : index
    %c0_246 = arith.constant 0 : index
    %c0_247 = arith.constant 0 : index
    %663 = vector.load %arg8[%c1_244, %c4_245, %c0_246, %c0_247] : memref<2x7x64x96xf32, #tpu.memory_space<vmem>>, vector<1x1x64x96xf32>
    %664 = vector.shape_cast %663 : vector<1x1x64x96xf32> to vector<64x96xf32>
    %665 = vector.extract_strided_slice %664 {offsets = [0, 0], sizes = [32, 32], strides = [1, 1]} : vector<64x96xf32> to vector<32x32xf32>
    %c1_248 = arith.constant 1 : index
    %c5_249 = arith.constant 5 : index
    %c0_250 = arith.constant 0 : index
    %c0_251 = arith.constant 0 : index
    %666 = vector.load %arg8[%c1_248, %c5_249, %c0_250, %c0_251] : memref<2x7x64x96xf32, #tpu.memory_space<vmem>>, vector<1x1x64x96xf32>
    %667 = vector.shape_cast %666 : vector<1x1x64x96xf32> to vector<64x96xf32>
    %668 = vector.extract_strided_slice %667 {offsets = [0, 0], sizes = [32, 64], strides = [1, 1]} : vector<64x96xf32> to vector<32x64xf32>
    %c1_252 = arith.constant 1 : index
    %c6_253 = arith.constant 6 : index
    %c0_254 = arith.constant 0 : index
    %c0_255 = arith.constant 0 : index
    %669 = vector.load %arg8[%c1_252, %c6_253, %c0_254, %c0_255] : memref<2x7x64x96xf32, #tpu.memory_space<vmem>>, vector<1x1x64x96xf32>
    %670 = vector.shape_cast %669 : vector<1x1x64x96xf32> to vector<64x96xf32>
    %671 = vector.extract_strided_slice %670 {offsets = [0, 0], sizes = [64, 32], strides = [1, 1]} : vector<64x96xf32> to vector<64x32xf32>
    %c1_256 = arith.constant 1 : index
    %c0_257 = arith.constant 0 : index
    %c0_258 = arith.constant 0 : index
    %672 = vector.load %arg9[%c1_256, %c0_257, %c0_258] : memref<2x16x96xf32, #tpu.memory_space<vmem>>, vector<1x16x96xf32>
    %673 = vector.shape_cast %672 : vector<1x16x96xf32> to vector<16x96xf32>
    %674 = vector.extract_strided_slice %673 {offsets = [0, 0], sizes = [1, 96], strides = [1, 1]} : vector<16x96xf32> to vector<1x96xf32>
    %675 = vector.extract_strided_slice %673 {offsets = [1, 0], sizes = [1, 32], strides = [1, 1]} : vector<16x96xf32> to vector<1x32xf32>
    %676 = vector.extract_strided_slice %673 {offsets = [2, 0], sizes = [1, 32], strides = [1, 1]} : vector<16x96xf32> to vector<1x32xf32>
    %677 = vector.extract_strided_slice %673 {offsets = [3, 0], sizes = [1, 32], strides = [1, 1]} : vector<16x96xf32> to vector<1x32xf32>
    %678 = vector.extract_strided_slice %673 {offsets = [4, 0], sizes = [1, 32], strides = [1, 1]} : vector<16x96xf32> to vector<1x32xf32>
    %679 = vector.extract_strided_slice %673 {offsets = [5, 0], sizes = [1, 64], strides = [1, 1]} : vector<16x96xf32> to vector<1x64xf32>
    %680 = vector.extract_strided_slice %673 {offsets = [6, 0], sizes = [1, 32], strides = [1, 1]} : vector<16x96xf32> to vector<1x32xf32>
    %681 = vector.extract_strided_slice %673 {offsets = [7, 0], sizes = [1, 32], strides = [1, 1]} : vector<16x96xf32> to vector<1x32xf32>
    %682 = vector.extract_strided_slice %673 {offsets = [8, 0], sizes = [1, 32], strides = [1, 1]} : vector<16x96xf32> to vector<1x32xf32>
    %683 = vector.extract_strided_slice %673 {offsets = [9, 0], sizes = [1, 64], strides = [1, 1]} : vector<16x96xf32> to vector<1x64xf32>
    %684 = vector.extract_strided_slice %673 {offsets = [10, 0], sizes = [1, 32], strides = [1, 1]} : vector<16x96xf32> to vector<1x32xf32>
    %685 = vector.extract_strided_slice %673 {offsets = [11, 0], sizes = [1, 32], strides = [1, 1]} : vector<16x96xf32> to vector<1x32xf32>
    %686 = vector.extract_strided_slice %673 {offsets = [12, 0], sizes = [1, 32], strides = [1, 1]} : vector<16x96xf32> to vector<1x32xf32>
    %687 = vector.shape_cast %650 : vector<2x8x32xf32> to vector<16x32xf32>
    %cst_259 = arith.constant dense<0.000000e+00> : vector<16x96xf32>
    %688 = tpu.matmul %687, %653, %cst_259 {dimension_numbers = #tpu.dot_dimension_numbers<[1], [0], [0], [1], [0, 0, 1, 1], [], []>} : vector<16x32xf32>, vector<32x96xf32>, vector<16x96xf32> -> vector<16x96xf32>
    %689 = vector.broadcast %674 : vector<1x96xf32> to vector<16x96xf32>
    %690 = arith.addf %688, %689 : vector<16x96xf32>
    %691 = vector.extract_strided_slice %690 {offsets = [0, 0], sizes = [16, 32], strides = [1, 1]} : vector<16x96xf32> to vector<16x32xf32>
    %692 = vector.shape_cast %691 : vector<16x32xf32> to vector<2x8x32xf32>
    %693 = vector.extract_strided_slice %690 {offsets = [0, 32], sizes = [16, 32], strides = [1, 1]} : vector<16x96xf32> to vector<16x32xf32>
    %694 = vector.shape_cast %693 : vector<16x32xf32> to vector<2x8x32xf32>
    %695 = vector.extract_strided_slice %690 {offsets = [0, 64], sizes = [16, 32], strides = [1, 1]} : vector<16x96xf32> to vector<16x32xf32>
    %696 = vector.shape_cast %695 : vector<16x32xf32> to vector<2x8x32xf32>
    %697 = vector.extract_strided_slice %692 {offsets = [0, 0, 0], sizes = [2, 8, 8], strides = [1, 1, 1]} : vector<2x8x32xf32> to vector<2x8x8xf32>
    %698 = vector.extract_strided_slice %694 {offsets = [0, 0, 0], sizes = [2, 8, 8], strides = [1, 1, 1]} : vector<2x8x32xf32> to vector<2x8x8xf32>
    %699 = vector.extract_strided_slice %696 {offsets = [0, 0, 0], sizes = [2, 8, 8], strides = [1, 1, 1]} : vector<2x8x32xf32> to vector<2x8x8xf32>
    "tpu.trace_start"() <{level = 10 : i32, message = "bqd,bkd->bqk"}> : () -> ()
    %cst_260 = arith.constant dense<0.000000e+00> : vector<2x8x8xf32>
    %700 = tpu.matmul %697, %698, %cst_260 {dimension_numbers = #tpu.dot_dimension_numbers<[2], [2], [1], [1], [0, 0, 0, 1, 1, 1], [0], [0]>} : vector<2x8x8xf32>, vector<2x8x8xf32>, vector<2x8x8xf32> -> vector<2x8x8xf32>
    "tpu.trace_stop"() : () -> ()
    %cst_261 = arith.constant 0.353553385 : f32
    %701 = vector.broadcast %cst_261 : f32 to vector<2x8x8xf32>
    %702 = arith.mulf %700, %701 : vector<2x8x8xf32>
    %cst_262 = arith.constant -1.000000e+04 : f32
    %703 = vector.broadcast %cst_262 : f32 to vector<2x8x8xf32>
    %704 = arith.select %5, %702, %703 : vector<2x8x8xi1>, vector<2x8x8xf32>
    %cst_263 = arith.constant dense<0xFF800000> : vector<2x8xf32>
    %705 = vector.multi_reduction <maximumf>, %704, %cst_263 [2] : vector<2x8x8xf32> to vector<2x8xf32>
    %706 = vector.shape_cast %705 : vector<2x8xf32> to vector<2x8x1xf32>
    %707 = vector.broadcast %706 : vector<2x8x1xf32> to vector<2x8x8xf32>
    %708 = arith.subf %704, %707 : vector<2x8x8xf32>
    %709 = math.exp %708 : vector<2x8x8xf32>
    %cst_264 = arith.constant dense<0.000000e+00> : vector<2x8xf32>
    %710 = vector.multi_reduction <add>, %709, %cst_264 [2] : vector<2x8x8xf32> to vector<2x8xf32>
    %711 = vector.shape_cast %710 : vector<2x8xf32> to vector<2x8x1xf32>
    %712 = vector.broadcast %711 : vector<2x8x1xf32> to vector<2x8x8xf32>
    %713 = arith.divf %709, %712 : vector<2x8x8xf32>
    "tpu.trace_start"() <{level = 10 : i32, message = "bqk,bkd->bqd"}> : () -> ()
    %cst_265 = arith.constant dense<0.000000e+00> : vector<2x8x8xf32>
    %714 = tpu.matmul %713, %699, %cst_265 {dimension_numbers = #tpu.dot_dimension_numbers<[2], [1], [1], [2], [0, 0, 0, 1, 1, 2], [0], [0]>} : vector<2x8x8xf32>, vector<2x8x8xf32>, vector<2x8x8xf32> -> vector<2x8x8xf32>
    "tpu.trace_stop"() : () -> ()
    %715 = vector.extract_strided_slice %692 {offsets = [0, 0, 8], sizes = [2, 8, 8], strides = [1, 1, 1]} : vector<2x8x32xf32> to vector<2x8x8xf32>
    %716 = vector.extract_strided_slice %694 {offsets = [0, 0, 8], sizes = [2, 8, 8], strides = [1, 1, 1]} : vector<2x8x32xf32> to vector<2x8x8xf32>
    %717 = vector.extract_strided_slice %696 {offsets = [0, 0, 8], sizes = [2, 8, 8], strides = [1, 1, 1]} : vector<2x8x32xf32> to vector<2x8x8xf32>
    "tpu.trace_start"() <{level = 10 : i32, message = "bqd,bkd->bqk"}> : () -> ()
    %cst_266 = arith.constant dense<0.000000e+00> : vector<2x8x8xf32>
    %718 = tpu.matmul %715, %716, %cst_266 {dimension_numbers = #tpu.dot_dimension_numbers<[2], [2], [1], [1], [0, 0, 0, 1, 1, 1], [0], [0]>} : vector<2x8x8xf32>, vector<2x8x8xf32>, vector<2x8x8xf32> -> vector<2x8x8xf32>
    "tpu.trace_stop"() : () -> ()
    %cst_267 = arith.constant 0.353553385 : f32
    %719 = vector.broadcast %cst_267 : f32 to vector<2x8x8xf32>
    %720 = arith.mulf %718, %719 : vector<2x8x8xf32>
    %cst_268 = arith.constant -1.000000e+04 : f32
    %721 = vector.broadcast %cst_268 : f32 to vector<2x8x8xf32>
    %722 = arith.select %5, %720, %721 : vector<2x8x8xi1>, vector<2x8x8xf32>
    %cst_269 = arith.constant dense<0xFF800000> : vector<2x8xf32>
    %723 = vector.multi_reduction <maximumf>, %722, %cst_269 [2] : vector<2x8x8xf32> to vector<2x8xf32>
    %724 = vector.shape_cast %723 : vector<2x8xf32> to vector<2x8x1xf32>
    %725 = vector.broadcast %724 : vector<2x8x1xf32> to vector<2x8x8xf32>
    %726 = arith.subf %722, %725 : vector<2x8x8xf32>
    %727 = math.exp %726 : vector<2x8x8xf32>
    %cst_270 = arith.constant dense<0.000000e+00> : vector<2x8xf32>
    %728 = vector.multi_reduction <add>, %727, %cst_270 [2] : vector<2x8x8xf32> to vector<2x8xf32>
    %729 = vector.shape_cast %728 : vector<2x8xf32> to vector<2x8x1xf32>
    %730 = vector.broadcast %729 : vector<2x8x1xf32> to vector<2x8x8xf32>
    %731 = arith.divf %727, %730 : vector<2x8x8xf32>
    "tpu.trace_start"() <{level = 10 : i32, message = "bqk,bkd->bqd"}> : () -> ()
    %cst_271 = arith.constant dense<0.000000e+00> : vector<2x8x8xf32>
    %732 = tpu.matmul %731, %717, %cst_271 {dimension_numbers = #tpu.dot_dimension_numbers<[2], [1], [1], [2], [0, 0, 0, 1, 1, 2], [0], [0]>} : vector<2x8x8xf32>, vector<2x8x8xf32>, vector<2x8x8xf32> -> vector<2x8x8xf32>
    "tpu.trace_stop"() : () -> ()
    %733 = vector.extract_strided_slice %692 {offsets = [0, 0, 16], sizes = [2, 8, 8], strides = [1, 1, 1]} : vector<2x8x32xf32> to vector<2x8x8xf32>
    %734 = vector.extract_strided_slice %694 {offsets = [0, 0, 16], sizes = [2, 8, 8], strides = [1, 1, 1]} : vector<2x8x32xf32> to vector<2x8x8xf32>
    %735 = vector.extract_strided_slice %696 {offsets = [0, 0, 16], sizes = [2, 8, 8], strides = [1, 1, 1]} : vector<2x8x32xf32> to vector<2x8x8xf32>
    "tpu.trace_start"() <{level = 10 : i32, message = "bqd,bkd->bqk"}> : () -> ()
    %cst_272 = arith.constant dense<0.000000e+00> : vector<2x8x8xf32>
    %736 = tpu.matmul %733, %734, %cst_272 {dimension_numbers = #tpu.dot_dimension_numbers<[2], [2], [1], [1], [0, 0, 0, 1, 1, 1], [0], [0]>} : vector<2x8x8xf32>, vector<2x8x8xf32>, vector<2x8x8xf32> -> vector<2x8x8xf32>
    "tpu.trace_stop"() : () -> ()
    %cst_273 = arith.constant 0.353553385 : f32
    %737 = vector.broadcast %cst_273 : f32 to vector<2x8x8xf32>
    %738 = arith.mulf %736, %737 : vector<2x8x8xf32>
    %cst_274 = arith.constant -1.000000e+04 : f32
    %739 = vector.broadcast %cst_274 : f32 to vector<2x8x8xf32>
    %740 = arith.select %5, %738, %739 : vector<2x8x8xi1>, vector<2x8x8xf32>
    %cst_275 = arith.constant dense<0xFF800000> : vector<2x8xf32>
    %741 = vector.multi_reduction <maximumf>, %740, %cst_275 [2] : vector<2x8x8xf32> to vector<2x8xf32>
    %742 = vector.shape_cast %741 : vector<2x8xf32> to vector<2x8x1xf32>
    %743 = vector.broadcast %742 : vector<2x8x1xf32> to vector<2x8x8xf32>
    %744 = arith.subf %740, %743 : vector<2x8x8xf32>
    %745 = math.exp %744 : vector<2x8x8xf32>
    %cst_276 = arith.constant dense<0.000000e+00> : vector<2x8xf32>
    %746 = vector.multi_reduction <add>, %745, %cst_276 [2] : vector<2x8x8xf32> to vector<2x8xf32>
    %747 = vector.shape_cast %746 : vector<2x8xf32> to vector<2x8x1xf32>
    %748 = vector.broadcast %747 : vector<2x8x1xf32> to vector<2x8x8xf32>
    %749 = arith.divf %745, %748 : vector<2x8x8xf32>
    "tpu.trace_start"() <{level = 10 : i32, message = "bqk,bkd->bqd"}> : () -> ()
    %cst_277 = arith.constant dense<0.000000e+00> : vector<2x8x8xf32>
    %750 = tpu.matmul %749, %735, %cst_277 {dimension_numbers = #tpu.dot_dimension_numbers<[2], [1], [1], [2], [0, 0, 0, 1, 1, 2], [0], [0]>} : vector<2x8x8xf32>, vector<2x8x8xf32>, vector<2x8x8xf32> -> vector<2x8x8xf32>
    "tpu.trace_stop"() : () -> ()
    %751 = vector.extract_strided_slice %692 {offsets = [0, 0, 24], sizes = [2, 8, 8], strides = [1, 1, 1]} : vector<2x8x32xf32> to vector<2x8x8xf32>
    %752 = vector.extract_strided_slice %694 {offsets = [0, 0, 24], sizes = [2, 8, 8], strides = [1, 1, 1]} : vector<2x8x32xf32> to vector<2x8x8xf32>
    %753 = vector.extract_strided_slice %696 {offsets = [0, 0, 24], sizes = [2, 8, 8], strides = [1, 1, 1]} : vector<2x8x32xf32> to vector<2x8x8xf32>
    "tpu.trace_start"() <{level = 10 : i32, message = "bqd,bkd->bqk"}> : () -> ()
    %cst_278 = arith.constant dense<0.000000e+00> : vector<2x8x8xf32>
    %754 = tpu.matmul %751, %752, %cst_278 {dimension_numbers = #tpu.dot_dimension_numbers<[2], [2], [1], [1], [0, 0, 0, 1, 1, 1], [0], [0]>} : vector<2x8x8xf32>, vector<2x8x8xf32>, vector<2x8x8xf32> -> vector<2x8x8xf32>
    "tpu.trace_stop"() : () -> ()
    %cst_279 = arith.constant 0.353553385 : f32
    %755 = vector.broadcast %cst_279 : f32 to vector<2x8x8xf32>
    %756 = arith.mulf %754, %755 : vector<2x8x8xf32>
    %cst_280 = arith.constant -1.000000e+04 : f32
    %757 = vector.broadcast %cst_280 : f32 to vector<2x8x8xf32>
    %758 = arith.select %5, %756, %757 : vector<2x8x8xi1>, vector<2x8x8xf32>
    %cst_281 = arith.constant dense<0xFF800000> : vector<2x8xf32>
    %759 = vector.multi_reduction <maximumf>, %758, %cst_281 [2] : vector<2x8x8xf32> to vector<2x8xf32>
    %760 = vector.shape_cast %759 : vector<2x8xf32> to vector<2x8x1xf32>
    %761 = vector.broadcast %760 : vector<2x8x1xf32> to vector<2x8x8xf32>
    %762 = arith.subf %758, %761 : vector<2x8x8xf32>
    %763 = math.exp %762 : vector<2x8x8xf32>
    %cst_282 = arith.constant dense<0.000000e+00> : vector<2x8xf32>
    %764 = vector.multi_reduction <add>, %763, %cst_282 [2] : vector<2x8x8xf32> to vector<2x8xf32>
    %765 = vector.shape_cast %764 : vector<2x8xf32> to vector<2x8x1xf32>
    %766 = vector.broadcast %765 : vector<2x8x1xf32> to vector<2x8x8xf32>
    %767 = arith.divf %763, %766 : vector<2x8x8xf32>
    "tpu.trace_start"() <{level = 10 : i32, message = "bqk,bkd->bqd"}> : () -> ()
    %cst_283 = arith.constant dense<0.000000e+00> : vector<2x8x8xf32>
    %768 = tpu.matmul %767, %753, %cst_283 {dimension_numbers = #tpu.dot_dimension_numbers<[2], [1], [1], [2], [0, 0, 0, 1, 1, 2], [0], [0]>} : vector<2x8x8xf32>, vector<2x8x8xf32>, vector<2x8x8xf32> -> vector<2x8x8xf32>
    "tpu.trace_stop"() : () -> ()
    %769 = tpu.concatenate %714, %732, %750, %768 in 2 : vector<2x8x8xf32>, vector<2x8x8xf32>, vector<2x8x8xf32>, vector<2x8x8xf32> -> vector<2x8x32xf32>
    %770 = vector.shape_cast %769 : vector<2x8x32xf32> to vector<16x32xf32>
    %cst_284 = arith.constant dense<0.000000e+00> : vector<16x32xf32>
    %771 = tpu.matmul %770, %656, %cst_284 {dimension_numbers = #tpu.dot_dimension_numbers<[1], [0], [0], [1], [0, 0, 1, 1], [], []>} : vector<16x32xf32>, vector<32x32xf32>, vector<16x32xf32> -> vector<16x32xf32>
    %772 = vector.broadcast %675 : vector<1x32xf32> to vector<16x32xf32>
    %773 = arith.addf %771, %772 : vector<16x32xf32>
    %774 = vector.shape_cast %773 : vector<16x32xf32> to vector<2x8x32xf32>
    %775 = arith.addf %774, %650 : vector<2x8x32xf32>
    %776 = vector.shape_cast %775 : vector<2x8x32xf32> to vector<16x32xf32>
    %cst_285 = arith.constant dense<0.000000e+00> : vector<16xf32>
    %777 = vector.multi_reduction <add>, %776, %cst_285 [1] : vector<16x32xf32> to vector<16xf32>
    %778 = vector.shape_cast %777 : vector<16xf32> to vector<16x1xf32>
    %cst_286 = arith.constant 3.200000e+01 : f32
    %779 = vector.broadcast %cst_286 : f32 to vector<16x1xf32>
    %780 = arith.divf %778, %779 : vector<16x1xf32>
    %781 = vector.broadcast %780 : vector<16x1xf32> to vector<16x32xf32>
    %782 = arith.subf %776, %781 : vector<16x32xf32>
    %783 = arith.mulf %782, %782 : vector<16x32xf32>
    %cst_287 = arith.constant dense<0.000000e+00> : vector<16xf32>
    %784 = vector.multi_reduction <add>, %783, %cst_287 [1] : vector<16x32xf32> to vector<16xf32>
    %785 = vector.shape_cast %784 : vector<16xf32> to vector<16x1xf32>
    %cst_288 = arith.constant 3.200000e+01 : f32
    %786 = vector.broadcast %cst_288 : f32 to vector<16x1xf32>
    %787 = arith.divf %785, %786 : vector<16x1xf32>
    %788 = vector.broadcast %780 : vector<16x1xf32> to vector<16x32xf32>
    %789 = arith.subf %776, %788 : vector<16x32xf32>
    %cst_289 = arith.constant 9.99999996E-13 : f32
    %790 = vector.broadcast %cst_289 : f32 to vector<16x1xf32>
    %791 = arith.addf %787, %790 : vector<16x1xf32>
    %792 = math.rsqrt %791 : vector<16x1xf32>
    %793 = vector.broadcast %792 : vector<16x1xf32> to vector<16x32xf32>
    %794 = arith.mulf %789, %793 : vector<16x32xf32>
    %795 = vector.broadcast %676 : vector<1x32xf32> to vector<16x32xf32>
    %796 = arith.mulf %794, %795 : vector<16x32xf32>
    %797 = vector.broadcast %677 : vector<1x32xf32> to vector<16x32xf32>
    %798 = arith.addf %796, %797 : vector<16x32xf32>
    %799 = vector.shape_cast %798 : vector<16x32xf32> to vector<2x8x32xf32>
    %800 = vector.shape_cast %799 : vector<2x8x32xf32> to vector<16x32xf32>
    %cst_290 = arith.constant dense<0.000000e+00> : vector<16x32xf32>
    %801 = tpu.matmul %800, %659, %cst_290 {dimension_numbers = #tpu.dot_dimension_numbers<[1], [0], [0], [1], [0, 0, 1, 1], [], []>} : vector<16x32xf32>, vector<32x32xf32>, vector<16x32xf32> -> vector<16x32xf32>
    %802 = vector.broadcast %678 : vector<1x32xf32> to vector<16x32xf32>
    %803 = arith.addf %801, %802 : vector<16x32xf32>
    %804 = vector.shape_cast %803 : vector<16x32xf32> to vector<2x8x32xf32>
    %805 = vector.shape_cast %349 : vector<2x8x32xf32> to vector<16x32xf32>
    %cst_291 = arith.constant dense<0.000000e+00> : vector<16x64xf32>
    %806 = tpu.matmul %805, %662, %cst_291 {dimension_numbers = #tpu.dot_dimension_numbers<[1], [0], [0], [1], [0, 0, 1, 1], [], []>} : vector<16x32xf32>, vector<32x64xf32>, vector<16x64xf32> -> vector<16x64xf32>
    %807 = vector.broadcast %679 : vector<1x64xf32> to vector<16x64xf32>
    %808 = arith.addf %806, %807 : vector<16x64xf32>
    %809 = vector.extract_strided_slice %808 {offsets = [0, 0], sizes = [16, 32], strides = [1, 1]} : vector<16x64xf32> to vector<16x32xf32>
    %810 = vector.shape_cast %809 : vector<16x32xf32> to vector<2x8x32xf32>
    %811 = vector.extract_strided_slice %808 {offsets = [0, 32], sizes = [16, 32], strides = [1, 1]} : vector<16x64xf32> to vector<16x32xf32>
    %812 = vector.shape_cast %811 : vector<16x32xf32> to vector<2x8x32xf32>
    %813 = vector.extract_strided_slice %804 {offsets = [0, 0, 0], sizes = [2, 8, 8], strides = [1, 1, 1]} : vector<2x8x32xf32> to vector<2x8x8xf32>
    %814 = vector.extract_strided_slice %810 {offsets = [0, 0, 0], sizes = [2, 8, 8], strides = [1, 1, 1]} : vector<2x8x32xf32> to vector<2x8x8xf32>
    %815 = vector.extract_strided_slice %812 {offsets = [0, 0, 0], sizes = [2, 8, 8], strides = [1, 1, 1]} : vector<2x8x32xf32> to vector<2x8x8xf32>
    "tpu.trace_start"() <{level = 10 : i32, message = "bqd,bkd->bqk"}> : () -> ()
    %cst_292 = arith.constant dense<0.000000e+00> : vector<2x8x8xf32>
    %816 = tpu.matmul %813, %814, %cst_292 {dimension_numbers = #tpu.dot_dimension_numbers<[2], [2], [1], [1], [0, 0, 0, 1, 1, 1], [0], [0]>} : vector<2x8x8xf32>, vector<2x8x8xf32>, vector<2x8x8xf32> -> vector<2x8x8xf32>
    "tpu.trace_stop"() : () -> ()
    %cst_293 = arith.constant 0.353553385 : f32
    %817 = vector.broadcast %cst_293 : f32 to vector<2x8x8xf32>
    %818 = arith.mulf %816, %817 : vector<2x8x8xf32>
    %cst_294 = arith.constant -1.000000e+04 : f32
    %819 = vector.broadcast %cst_294 : f32 to vector<2x8x8xf32>
    %820 = arith.select %8, %818, %819 : vector<2x8x8xi1>, vector<2x8x8xf32>
    %cst_295 = arith.constant dense<0xFF800000> : vector<2x8xf32>
    %821 = vector.multi_reduction <maximumf>, %820, %cst_295 [2] : vector<2x8x8xf32> to vector<2x8xf32>
    %822 = vector.shape_cast %821 : vector<2x8xf32> to vector<2x8x1xf32>
    %823 = vector.broadcast %822 : vector<2x8x1xf32> to vector<2x8x8xf32>
    %824 = arith.subf %820, %823 : vector<2x8x8xf32>
    %825 = math.exp %824 : vector<2x8x8xf32>
    %cst_296 = arith.constant dense<0.000000e+00> : vector<2x8xf32>
    %826 = vector.multi_reduction <add>, %825, %cst_296 [2] : vector<2x8x8xf32> to vector<2x8xf32>
    %827 = vector.shape_cast %826 : vector<2x8xf32> to vector<2x8x1xf32>
    %828 = vector.broadcast %827 : vector<2x8x1xf32> to vector<2x8x8xf32>
    %829 = arith.divf %825, %828 : vector<2x8x8xf32>
    "tpu.trace_start"() <{level = 10 : i32, message = "bqk,bkd->bqd"}> : () -> ()
    %cst_297 = arith.constant dense<0.000000e+00> : vector<2x8x8xf32>
    %830 = tpu.matmul %829, %815, %cst_297 {dimension_numbers = #tpu.dot_dimension_numbers<[2], [1], [1], [2], [0, 0, 0, 1, 1, 2], [0], [0]>} : vector<2x8x8xf32>, vector<2x8x8xf32>, vector<2x8x8xf32> -> vector<2x8x8xf32>
    "tpu.trace_stop"() : () -> ()
    %831 = vector.extract_strided_slice %804 {offsets = [0, 0, 8], sizes = [2, 8, 8], strides = [1, 1, 1]} : vector<2x8x32xf32> to vector<2x8x8xf32>
    %832 = vector.extract_strided_slice %810 {offsets = [0, 0, 8], sizes = [2, 8, 8], strides = [1, 1, 1]} : vector<2x8x32xf32> to vector<2x8x8xf32>
    %833 = vector.extract_strided_slice %812 {offsets = [0, 0, 8], sizes = [2, 8, 8], strides = [1, 1, 1]} : vector<2x8x32xf32> to vector<2x8x8xf32>
    "tpu.trace_start"() <{level = 10 : i32, message = "bqd,bkd->bqk"}> : () -> ()
    %cst_298 = arith.constant dense<0.000000e+00> : vector<2x8x8xf32>
    %834 = tpu.matmul %831, %832, %cst_298 {dimension_numbers = #tpu.dot_dimension_numbers<[2], [2], [1], [1], [0, 0, 0, 1, 1, 1], [0], [0]>} : vector<2x8x8xf32>, vector<2x8x8xf32>, vector<2x8x8xf32> -> vector<2x8x8xf32>
    "tpu.trace_stop"() : () -> ()
    %cst_299 = arith.constant 0.353553385 : f32
    %835 = vector.broadcast %cst_299 : f32 to vector<2x8x8xf32>
    %836 = arith.mulf %834, %835 : vector<2x8x8xf32>
    %cst_300 = arith.constant -1.000000e+04 : f32
    %837 = vector.broadcast %cst_300 : f32 to vector<2x8x8xf32>
    %838 = arith.select %8, %836, %837 : vector<2x8x8xi1>, vector<2x8x8xf32>
    %cst_301 = arith.constant dense<0xFF800000> : vector<2x8xf32>
    %839 = vector.multi_reduction <maximumf>, %838, %cst_301 [2] : vector<2x8x8xf32> to vector<2x8xf32>
    %840 = vector.shape_cast %839 : vector<2x8xf32> to vector<2x8x1xf32>
    %841 = vector.broadcast %840 : vector<2x8x1xf32> to vector<2x8x8xf32>
    %842 = arith.subf %838, %841 : vector<2x8x8xf32>
    %843 = math.exp %842 : vector<2x8x8xf32>
    %cst_302 = arith.constant dense<0.000000e+00> : vector<2x8xf32>
    %844 = vector.multi_reduction <add>, %843, %cst_302 [2] : vector<2x8x8xf32> to vector<2x8xf32>
    %845 = vector.shape_cast %844 : vector<2x8xf32> to vector<2x8x1xf32>
    %846 = vector.broadcast %845 : vector<2x8x1xf32> to vector<2x8x8xf32>
    %847 = arith.divf %843, %846 : vector<2x8x8xf32>
    "tpu.trace_start"() <{level = 10 : i32, message = "bqk,bkd->bqd"}> : () -> ()
    %cst_303 = arith.constant dense<0.000000e+00> : vector<2x8x8xf32>
    %848 = tpu.matmul %847, %833, %cst_303 {dimension_numbers = #tpu.dot_dimension_numbers<[2], [1], [1], [2], [0, 0, 0, 1, 1, 2], [0], [0]>} : vector<2x8x8xf32>, vector<2x8x8xf32>, vector<2x8x8xf32> -> vector<2x8x8xf32>
    "tpu.trace_stop"() : () -> ()
    %849 = vector.extract_strided_slice %804 {offsets = [0, 0, 16], sizes = [2, 8, 8], strides = [1, 1, 1]} : vector<2x8x32xf32> to vector<2x8x8xf32>
    %850 = vector.extract_strided_slice %810 {offsets = [0, 0, 16], sizes = [2, 8, 8], strides = [1, 1, 1]} : vector<2x8x32xf32> to vector<2x8x8xf32>
    %851 = vector.extract_strided_slice %812 {offsets = [0, 0, 16], sizes = [2, 8, 8], strides = [1, 1, 1]} : vector<2x8x32xf32> to vector<2x8x8xf32>
    "tpu.trace_start"() <{level = 10 : i32, message = "bqd,bkd->bqk"}> : () -> ()
    %cst_304 = arith.constant dense<0.000000e+00> : vector<2x8x8xf32>
    %852 = tpu.matmul %849, %850, %cst_304 {dimension_numbers = #tpu.dot_dimension_numbers<[2], [2], [1], [1], [0, 0, 0, 1, 1, 1], [0], [0]>} : vector<2x8x8xf32>, vector<2x8x8xf32>, vector<2x8x8xf32> -> vector<2x8x8xf32>
    "tpu.trace_stop"() : () -> ()
    %cst_305 = arith.constant 0.353553385 : f32
    %853 = vector.broadcast %cst_305 : f32 to vector<2x8x8xf32>
    %854 = arith.mulf %852, %853 : vector<2x8x8xf32>
    %cst_306 = arith.constant -1.000000e+04 : f32
    %855 = vector.broadcast %cst_306 : f32 to vector<2x8x8xf32>
    %856 = arith.select %8, %854, %855 : vector<2x8x8xi1>, vector<2x8x8xf32>
    %cst_307 = arith.constant dense<0xFF800000> : vector<2x8xf32>
    %857 = vector.multi_reduction <maximumf>, %856, %cst_307 [2] : vector<2x8x8xf32> to vector<2x8xf32>
    %858 = vector.shape_cast %857 : vector<2x8xf32> to vector<2x8x1xf32>
    %859 = vector.broadcast %858 : vector<2x8x1xf32> to vector<2x8x8xf32>
    %860 = arith.subf %856, %859 : vector<2x8x8xf32>
    %861 = math.exp %860 : vector<2x8x8xf32>
    %cst_308 = arith.constant dense<0.000000e+00> : vector<2x8xf32>
    %862 = vector.multi_reduction <add>, %861, %cst_308 [2] : vector<2x8x8xf32> to vector<2x8xf32>
    %863 = vector.shape_cast %862 : vector<2x8xf32> to vector<2x8x1xf32>
    %864 = vector.broadcast %863 : vector<2x8x1xf32> to vector<2x8x8xf32>
    %865 = arith.divf %861, %864 : vector<2x8x8xf32>
    "tpu.trace_start"() <{level = 10 : i32, message = "bqk,bkd->bqd"}> : () -> ()
    %cst_309 = arith.constant dense<0.000000e+00> : vector<2x8x8xf32>
    %866 = tpu.matmul %865, %851, %cst_309 {dimension_numbers = #tpu.dot_dimension_numbers<[2], [1], [1], [2], [0, 0, 0, 1, 1, 2], [0], [0]>} : vector<2x8x8xf32>, vector<2x8x8xf32>, vector<2x8x8xf32> -> vector<2x8x8xf32>
    "tpu.trace_stop"() : () -> ()
    %867 = vector.extract_strided_slice %804 {offsets = [0, 0, 24], sizes = [2, 8, 8], strides = [1, 1, 1]} : vector<2x8x32xf32> to vector<2x8x8xf32>
    %868 = vector.extract_strided_slice %810 {offsets = [0, 0, 24], sizes = [2, 8, 8], strides = [1, 1, 1]} : vector<2x8x32xf32> to vector<2x8x8xf32>
    %869 = vector.extract_strided_slice %812 {offsets = [0, 0, 24], sizes = [2, 8, 8], strides = [1, 1, 1]} : vector<2x8x32xf32> to vector<2x8x8xf32>
    "tpu.trace_start"() <{level = 10 : i32, message = "bqd,bkd->bqk"}> : () -> ()
    %cst_310 = arith.constant dense<0.000000e+00> : vector<2x8x8xf32>
    %870 = tpu.matmul %867, %868, %cst_310 {dimension_numbers = #tpu.dot_dimension_numbers<[2], [2], [1], [1], [0, 0, 0, 1, 1, 1], [0], [0]>} : vector<2x8x8xf32>, vector<2x8x8xf32>, vector<2x8x8xf32> -> vector<2x8x8xf32>
    "tpu.trace_stop"() : () -> ()
    %cst_311 = arith.constant 0.353553385 : f32
    %871 = vector.broadcast %cst_311 : f32 to vector<2x8x8xf32>
    %872 = arith.mulf %870, %871 : vector<2x8x8xf32>
    %cst_312 = arith.constant -1.000000e+04 : f32
    %873 = vector.broadcast %cst_312 : f32 to vector<2x8x8xf32>
    %874 = arith.select %8, %872, %873 : vector<2x8x8xi1>, vector<2x8x8xf32>
    %cst_313 = arith.constant dense<0xFF800000> : vector<2x8xf32>
    %875 = vector.multi_reduction <maximumf>, %874, %cst_313 [2] : vector<2x8x8xf32> to vector<2x8xf32>
    %876 = vector.shape_cast %875 : vector<2x8xf32> to vector<2x8x1xf32>
    %877 = vector.broadcast %876 : vector<2x8x1xf32> to vector<2x8x8xf32>
    %878 = arith.subf %874, %877 : vector<2x8x8xf32>
    %879 = math.exp %878 : vector<2x8x8xf32>
    %cst_314 = arith.constant dense<0.000000e+00> : vector<2x8xf32>
    %880 = vector.multi_reduction <add>, %879, %cst_314 [2] : vector<2x8x8xf32> to vector<2x8xf32>
    %881 = vector.shape_cast %880 : vector<2x8xf32> to vector<2x8x1xf32>
    %882 = vector.broadcast %881 : vector<2x8x1xf32> to vector<2x8x8xf32>
    %883 = arith.divf %879, %882 : vector<2x8x8xf32>
    "tpu.trace_start"() <{level = 10 : i32, message = "bqk,bkd->bqd"}> : () -> ()
    %cst_315 = arith.constant dense<0.000000e+00> : vector<2x8x8xf32>
    %884 = tpu.matmul %883, %869, %cst_315 {dimension_numbers = #tpu.dot_dimension_numbers<[2], [1], [1], [2], [0, 0, 0, 1, 1, 2], [0], [0]>} : vector<2x8x8xf32>, vector<2x8x8xf32>, vector<2x8x8xf32> -> vector<2x8x8xf32>
    "tpu.trace_stop"() : () -> ()
    %885 = tpu.concatenate %830, %848, %866, %884 in 2 : vector<2x8x8xf32>, vector<2x8x8xf32>, vector<2x8x8xf32>, vector<2x8x8xf32> -> vector<2x8x32xf32>
    %886 = vector.shape_cast %885 : vector<2x8x32xf32> to vector<16x32xf32>
    %cst_316 = arith.constant dense<0.000000e+00> : vector<16x32xf32>
    %887 = tpu.matmul %886, %665, %cst_316 {dimension_numbers = #tpu.dot_dimension_numbers<[1], [0], [0], [1], [0, 0, 1, 1], [], []>} : vector<16x32xf32>, vector<32x32xf32>, vector<16x32xf32> -> vector<16x32xf32>
    %888 = vector.broadcast %680 : vector<1x32xf32> to vector<16x32xf32>
    %889 = arith.addf %887, %888 : vector<16x32xf32>
    %890 = vector.shape_cast %889 : vector<16x32xf32> to vector<2x8x32xf32>
    %891 = arith.addf %890, %799 : vector<2x8x32xf32>
    %892 = vector.shape_cast %891 : vector<2x8x32xf32> to vector<16x32xf32>
    %cst_317 = arith.constant dense<0.000000e+00> : vector<16xf32>
    %893 = vector.multi_reduction <add>, %892, %cst_317 [1] : vector<16x32xf32> to vector<16xf32>
    %894 = vector.shape_cast %893 : vector<16xf32> to vector<16x1xf32>
    %cst_318 = arith.constant 3.200000e+01 : f32
    %895 = vector.broadcast %cst_318 : f32 to vector<16x1xf32>
    %896 = arith.divf %894, %895 : vector<16x1xf32>
    %897 = vector.broadcast %896 : vector<16x1xf32> to vector<16x32xf32>
    %898 = arith.subf %892, %897 : vector<16x32xf32>
    %899 = arith.mulf %898, %898 : vector<16x32xf32>
    %cst_319 = arith.constant dense<0.000000e+00> : vector<16xf32>
    %900 = vector.multi_reduction <add>, %899, %cst_319 [1] : vector<16x32xf32> to vector<16xf32>
    %901 = vector.shape_cast %900 : vector<16xf32> to vector<16x1xf32>
    %cst_320 = arith.constant 3.200000e+01 : f32
    %902 = vector.broadcast %cst_320 : f32 to vector<16x1xf32>
    %903 = arith.divf %901, %902 : vector<16x1xf32>
    %904 = vector.broadcast %896 : vector<16x1xf32> to vector<16x32xf32>
    %905 = arith.subf %892, %904 : vector<16x32xf32>
    %cst_321 = arith.constant 9.99999996E-13 : f32
    %906 = vector.broadcast %cst_321 : f32 to vector<16x1xf32>
    %907 = arith.addf %903, %906 : vector<16x1xf32>
    %908 = math.rsqrt %907 : vector<16x1xf32>
    %909 = vector.broadcast %908 : vector<16x1xf32> to vector<16x32xf32>
    %910 = arith.mulf %905, %909 : vector<16x32xf32>
    %911 = vector.broadcast %681 : vector<1x32xf32> to vector<16x32xf32>
    %912 = arith.mulf %910, %911 : vector<16x32xf32>
    %913 = vector.broadcast %682 : vector<1x32xf32> to vector<16x32xf32>
    %914 = arith.addf %912, %913 : vector<16x32xf32>
    %915 = vector.shape_cast %914 : vector<16x32xf32> to vector<2x8x32xf32>
    %916 = vector.shape_cast %915 : vector<2x8x32xf32> to vector<16x32xf32>
    %cst_322 = arith.constant dense<0.000000e+00> : vector<16x64xf32>
    %917 = tpu.matmul %916, %668, %cst_322 {dimension_numbers = #tpu.dot_dimension_numbers<[1], [0], [0], [1], [0, 0, 1, 1], [], []>} : vector<16x32xf32>, vector<32x64xf32>, vector<16x64xf32> -> vector<16x64xf32>
    %918 = vector.broadcast %683 : vector<1x64xf32> to vector<16x64xf32>
    %919 = arith.addf %917, %918 : vector<16x64xf32>
    %cst_323 = arith.constant 0.000000e+00 : f32
    %920 = vector.broadcast %cst_323 : f32 to vector<16x64xf32>
    %921 = arith.maximumf %919, %920 : vector<16x64xf32>
    %cst_324 = arith.constant dense<0.000000e+00> : vector<16x32xf32>
    %922 = tpu.matmul %921, %671, %cst_324 {dimension_numbers = #tpu.dot_dimension_numbers<[1], [0], [0], [1], [0, 0, 1, 1], [], []>} : vector<16x64xf32>, vector<64x32xf32>, vector<16x32xf32> -> vector<16x32xf32>
    %923 = vector.broadcast %684 : vector<1x32xf32> to vector<16x32xf32>
    %924 = arith.addf %922, %923 : vector<16x32xf32>
    %925 = vector.shape_cast %924 : vector<16x32xf32> to vector<2x8x32xf32>
    %926 = arith.addf %925, %915 : vector<2x8x32xf32>
    %927 = vector.shape_cast %926 : vector<2x8x32xf32> to vector<16x32xf32>
    %cst_325 = arith.constant dense<0.000000e+00> : vector<16xf32>
    %928 = vector.multi_reduction <add>, %927, %cst_325 [1] : vector<16x32xf32> to vector<16xf32>
    %929 = vector.shape_cast %928 : vector<16xf32> to vector<16x1xf32>
    %cst_326 = arith.constant 3.200000e+01 : f32
    %930 = vector.broadcast %cst_326 : f32 to vector<16x1xf32>
    %931 = arith.divf %929, %930 : vector<16x1xf32>
    %932 = vector.broadcast %931 : vector<16x1xf32> to vector<16x32xf32>
    %933 = arith.subf %927, %932 : vector<16x32xf32>
    %934 = arith.mulf %933, %933 : vector<16x32xf32>
    %cst_327 = arith.constant dense<0.000000e+00> : vector<16xf32>
    %935 = vector.multi_reduction <add>, %934, %cst_327 [1] : vector<16x32xf32> to vector<16xf32>
    %936 = vector.shape_cast %935 : vector<16xf32> to vector<16x1xf32>
    %cst_328 = arith.constant 3.200000e+01 : f32
    %937 = vector.broadcast %cst_328 : f32 to vector<16x1xf32>
    %938 = arith.divf %936, %937 : vector<16x1xf32>
    %939 = vector.broadcast %931 : vector<16x1xf32> to vector<16x32xf32>
    %940 = arith.subf %927, %939 : vector<16x32xf32>
    %cst_329 = arith.constant 9.99999996E-13 : f32
    %941 = vector.broadcast %cst_329 : f32 to vector<16x1xf32>
    %942 = arith.addf %938, %941 : vector<16x1xf32>
    %943 = math.rsqrt %942 : vector<16x1xf32>
    %944 = vector.broadcast %943 : vector<16x1xf32> to vector<16x32xf32>
    %945 = arith.mulf %940, %944 : vector<16x32xf32>
    %946 = vector.broadcast %685 : vector<1x32xf32> to vector<16x32xf32>
    %947 = arith.mulf %945, %946 : vector<16x32xf32>
    %948 = vector.broadcast %686 : vector<1x32xf32> to vector<16x32xf32>
    %949 = arith.addf %947, %948 : vector<16x32xf32>
    %950 = vector.shape_cast %949 : vector<16x32xf32> to vector<2x8x32xf32>
    %951 = vector.shape_cast %950 : vector<2x8x32xf32> to vector<16x32xf32>
    %c0_330 = arith.constant 0 : index
    %c0_331 = arith.constant 0 : index
    %952 = vector.load %arg10[%c0_330, %c0_331] : memref<32x128xf32, #tpu.memory_space<vmem>>, vector<32x128xf32>
    %cst_332 = arith.constant dense<0.000000e+00> : vector<16x128xf32>
    %953 = tpu.matmul %951, %952, %cst_332 {dimension_numbers = #tpu.dot_dimension_numbers<[1], [0], [0], [1], [0, 0, 1, 1], [], []>} : vector<16x32xf32>, vector<32x128xf32>, vector<16x128xf32> -> vector<16x128xf32>
    %c0_333 = arith.constant 0 : index
    %c0_334 = arith.constant 0 : index
    %954 = vector.load %arg11[%c0_333, %c0_334] : memref<1x128xf32, #tpu.memory_space<vmem>>, vector<1x128xf32>
    %955 = vector.broadcast %954 : vector<1x128xf32> to vector<16x128xf32>
    %956 = arith.addf %953, %955 : vector<16x128xf32>
    %957 = vector.shape_cast %956 : vector<16x128xf32> to vector<2x8x128xf32>
    %c0_335 = arith.constant 0 : index
    %c0_336 = arith.constant 0 : index
    %c0_337 = arith.constant 0 : index
    %958 = vector.load %arg12[%c0_335, %c0_336, %c0_337] : memref<2x8x128xf32, #tpu.memory_space<vmem>>, vector<2x8x128xf32>
    tpu.vector_store %arg12[%c0_335, %c0_336, %c0_337], %957 {strides = array<i32>} : memref<2x8x128xf32, #tpu.memory_space<vmem>>, vector<2x8x128xf32>,
    return
  }
  func.func @transform_0(%arg0: i32) -> (i32, i32, i32) {
    %c0_i32 = arith.constant 0 : i32
    %c0_i32_0 = arith.constant 0 : i32
    %c0_i32_1 = arith.constant 0 : i32
    %c0_i32_2 = arith.constant 0 : i32
    return %c0_i32, %c0_i32_0, %c0_i32_1 : i32, i32, i32
  }
  func.func @transform_1(%arg0: i32) -> (i32, i32, i32) {
    %c0_i32 = arith.constant 0 : i32
    %c0_i32_0 = arith.constant 0 : i32
    %c0_i32_1 = arith.constant 0 : i32
    %c0_i32_2 = arith.constant 0 : i32
    return %c0_i32, %c0_i32_0, %c0_i32_1 : i32, i32, i32
  }
  func.func @transform_2(%arg0: i32) -> (i32, i32, i32) {
    %c0_i32 = arith.constant 0 : i32
    %c0_i32_0 = arith.constant 0 : i32
    %c0_i32_1 = arith.constant 0 : i32
    %c0_i32_2 = arith.constant 0 : i32
    return %c0_i32, %c0_i32_0, %c0_i32_1 : i32, i32, i32
  }
  func.func @transform_3(%arg0: i32) -> (i32, i32, i32) {
    %c0_i32 = arith.constant 0 : i32
    %c0_i32_0 = arith.constant 0 : i32
    %c0_i32_1 = arith.constant 0 : i32
    %c0_i32_2 = arith.constant 0 : i32
    return %c0_i32, %c0_i32_0, %c0_i32_1 : i32, i32, i32
  }
  func.func @transform_4(%arg0: i32) -> (i32, i32, i32) {
    %c0_i32 = arith.constant 0 : i32
    %c0_i32_0 = arith.constant 0 : i32
    %c0_i32_1 = arith.constant 0 : i32
    %c0_i32_2 = arith.constant 0 : i32
    return %c0_i32, %c0_i32_0, %c0_i32_1 : i32, i32, i32
  }
  func.func @transform_5(%arg0: i32) -> (i32, i32, i32, i32) {
    %c0_i32 = arith.constant 0 : i32
    %c0_i32_0 = arith.constant 0 : i32
    %c0_i32_1 = arith.constant 0 : i32
    %c0_i32_2 = arith.constant 0 : i32
    %c0_i32_3 = arith.constant 0 : i32
    return %c0_i32, %c0_i32_0, %c0_i32_1, %c0_i32_2 : i32, i32, i32, i32
  }
  func.func @transform_6(%arg0: i32) -> (i32, i32, i32) {
    %c0_i32 = arith.constant 0 : i32
    %c0_i32_0 = arith.constant 0 : i32
    %c0_i32_1 = arith.constant 0 : i32
    %c0_i32_2 = arith.constant 0 : i32
    return %c0_i32, %c0_i32_0, %c0_i32_1 : i32, i32, i32
  }
  func.func @transform_7(%arg0: i32) -> (i32, i32, i32, i32) {
    %c0_i32 = arith.constant 0 : i32
    %c0_i32_0 = arith.constant 0 : i32
    %c0_i32_1 = arith.constant 0 : i32
    %c0_i32_2 = arith.constant 0 : i32
    %c0_i32_3 = arith.constant 0 : i32
    return %c0_i32, %c0_i32_0, %c0_i32_1, %c0_i32_2 : i32, i32, i32, i32
  }
  func.func @transform_8(%arg0: i32) -> (i32, i32, i32) {
    %c0_i32 = arith.constant 0 : i32
    %c0_i32_0 = arith.constant 0 : i32
    %c0_i32_1 = arith.constant 0 : i32
    %c0_i32_2 = arith.constant 0 : i32
    return %c0_i32, %c0_i32_0, %c0_i32_1 : i32, i32, i32
  }
  func.func @transform_9(%arg0: i32) -> (i32, i32) {
    %c0_i32 = arith.constant 0 : i32
    %c0_i32_0 = arith.constant 0 : i32
    %c0_i32_1 = arith.constant 0 : i32
    return %c0_i32, %c0_i32_0 : i32, i32
  }
  func.func @transform_10(%arg0: i32) -> (i32, i32) {
    %c0_i32 = arith.constant 0 : i32
    %c0_i32_0 = arith.constant 0 : i32
    %c0_i32_1 = arith.constant 0 : i32
    return %c0_i32, %c0_i32_0 : i32, i32
  }
  func.func @transform_11(%arg0: i32) -> (i32, i32, i32) {
    %c0_i32 = arith.constant 0 : i32
    %c0_i32_0 = arith.constant 0 : i32
    %c0_i32_1 = arith.constant 0 : i32
    %c0_i32_2 = arith.constant 0 : i32
    return %c0_i32, %c0_i32_0, %c0_i32_1 : i32, i32, i32
  }
}

</mosaic_0001>

<bundles_post_ra>
// kernel: transformer_forward.1
= control target key start
LH: loop header
LB: loop body
LE: loop exit
PB: predicated region body
PF: predicated region fallthrough
CT: control target
= control target key end

     0   :  { %16 = vsyncpa [#allocation3], 0  ;;  %s14291_s0 = inlined_call_operand.vmem [shape: f32[2,8,32], index: 0, kind: input, shape index: {}]   ;;  %s14292_s1 = inlined_call_operand.vmem [shape: f32[2,8,32], index: 1, kind: input, shape index: {}]   ;;  %s14293_s2 = inlined_call_operand.vmem [shape: f32[2,8,8], index: 2, kind: input, shape index: {}, may-alias: {2,4}]   ;;  %s14294_s3 = inlined_call_operand.vmem [shape: f32[2,8,8], index: 3, kind: input, shape index: {}]   ;;  %s14295_s4 = inlined_call_operand.vmem [shape: f32[2,8,8], index: 4, kind: input, shape index: {}, may-alias: {2,4}]   ;;  %s14296_s5 = inlined_call_operand.vmem [shape: f32[2,4,64,96], index: 5, kind: input, shape index: {}]   ;;  %s14297_s6 = inlined_call_operand.vmem [shape: f32[2,8,96], index: 6, kind: input, shape index: {}]   ;;  %s14298_s7 = inlined_call_operand.hbm [shape: f32[2,7,64,96], index: 7, kind: input, shape index: {}]   ;;  %s14299_s8 = inlined_call_operand.vmem [shape: f32[2,16,96], index: 8, kind: input, shape index: {}]   ;;  %s14300_s9 = inlined_call_operand.vmem [shape: f32[32,128], index: 9, kind: input, shape index: {}]   ;;  %s14301_s10 = inlined_call_operand.vmem [shape: f32[1,128], index: 10, kind: input, shape index: {}]   ;;  %s14302_s11 = inlined_call_operand.hbm [shape: f32[2,8,128], index: 11, kind: output, shape index: {}]  }
   0x1   :  { %17 = vsyncpa [#allocation4], 0  ;;  %s12629_s17 = smov [#allocation2]   ;;  %s12581_s21 = scalar_lea.hbm %s14298_s7, 14336 }
   0x2   :  { %s37_s18 = sshll.u32 %s12629_s17, 4  ;;  %p12582_p0 = scmp.ne.s32.totalorder %s14298_s7, %s12581_s21  ;;  %s38_s18 = int_to_ptr.vmem [resolvable:$true] %s37_s18 }
   0x3   :  { %p12585_p1 = scmp.lt.u32.totalorder %s12581_s21, %s14298_s7 }
   0x5   :  { %p12587_p2 = pnand %p12585_p1, %p12582_p0 }
   0x7   :  { %12590 = shalt.err (!%p12587_p2)
}
   0x8   :  { %s12591_s26 = scalar_lea.vmem %s38_s18, 14336  ;;  %p12596_p4 = scmp.lt.s32.totalorder %s38_s18, %s38_s18 }
   0x9   :  { %p12592_p3 = scmp.ne.s32.totalorder %s38_s18, %s12591_s26  ;;  %p12597_p5 = scmp.lt.s32.totalorder %s12591_s26, %s12591_s26 }
   0xb   :  { %p12598_p6 = por %p12597_p5, %p12596_p4 }
   0xd   :  { %p12599_p7 = pnand %p12598_p6, %p12592_p3 }
   0xf   :  { %12602 = shalt.err (!%p12599_p7)
}
  0x10   :  { %s14303_s27 = smov 128   ;;  %s14308_s28 = smov 8  }
  0x11   :  { %43 = dma.hbm_to_vmem [thread:$0]  %s14298_s7, 14336, %s38_s18, [#allocation3], %s14303_s27, %s14303_s27, %s14308_s28  }
  0x12   :  { %12625 = dma.done.wait [#allocation3], 14336  }
  0x13   :  { %12626 = vsyncadd [#allocation3], 4294952960  ;;  %vm95_vm0 = vcmask 261120   ;;  %v67_v0 = vld [vmem:[%s14296_s5] sm:$0xff]  ;;  %v68_v1 = vld [vmem:[%s14296_s5 + $0x8] sm:$0xff]  ;;  %v12632_v8 = vmov 0.0   ;;  %v91_v9 = vlaneseq }
  0x14   :  { %v69_v2 = vld [vmem:[%s14296_s5 + $0x10] sm:$0xff]  ;;  %v12111_v3 = vpack.c.bf16 %v68_v1, %v67_v0  ;;  %v70_v4 = vld [vmem:[%s14296_s5 + $0x18] sm:$0xff]  ;;  %v12738_v5 = vld [vmem:[%s14291_s0] sm:$0xff]  ;;  %11357 = vmatprep.subr.mxu1 %v12632_v8  ;;  %vm12633_vm1 = vmmov 0   ;;  %s12634_s24 = smov 96   ;;  %vm180_vm2 = vcmask 64512  }
  0x15   :  { %v12115_v6 = vpack.c.bf16 %v70_v4, %v69_v2  ;;  %11354 = vmatprep.mubr.msk.f32.mxu0 %vm95_vm0, %v12738_v5  ;;  %v12745_v7 = vld [vmem:[%s14291_s0 + $0x8] sm:$0xff]  ;;  %v12751_v10 = vshrl.u32 %v91_v9, 7  ;;  %11359 = vmatprep.mubr.msk.f32.mxu1 %vm12633_vm1, %v12632_v8  ;;  %v12763_v12 = vld [vmem:[%s14297_s6] sm:$0xff]  ;;  %s12635_s12 = smov 64   ;;  %s12637_s13 = smov 120   ;;  %vm1541_vm5 = vcmask 195584  }
  0x16   :  { %12112 = vmatprep.subr.bf16.mxu0 %v12111_v3  ;;  %v12790_v20 = vld [vmem:[%s14293_s2] sm:$0xff]  ;;  %v12796_v24 = vld [vmem:[%s14293_s2 + $0x8] sm:$0xff]  ;;  %s12636_s2 = smov 88   ;;  %s12638_s14 = smov 56   ;;  %vm1538_vm6 = vcmask 130048   ;;  %vm1761_vm7 = vcmask 523264  }
  0x17   :  { %12114 = vmatpush3.bf16.msra.mxu0 %v12111_v3  ;;  %v12758_v11 = vsub.s32 0, %v12751_v10  ;;  %vm55_vm3 = vcmp.gt.f32.partialorder %v12790_v20, 0.0  ;;  %vm56_vm4 = vcmp.gt.f32.partialorder %v12796_v24, 0.0  ;;  %s12639_s15 = smov 112   ;;  %s12640_s16 = smov 80  }
  0x18   :  { %12116 = vmatprep.subr.bf16.mxu0 %v12115_v6  ;;  %s12641_s17 = smov 48   ;;  %s12642_s19 = smov 72  }
  0x19   :  { %v94_v13 = vrot.slane %v12763_v12, %v12758_v11  ;;  %s12643_s20 = smov 104   ;;  %s14310_s7 = smov 40  }
  0x1a   :  { %s14306_s18 = smov 16   ;;  %s14304_s21 = smov 24  }
  0x1b   :  { %12118 = vmatpush3.bf16.msra.mxu0 %v12115_v6  ;;  %s14312_s26 = smov 16   ;;  %s14313_s25 = smov 24  }
  0x1c   :  { %11377 = vmatprep.subr.mxu0 %v12632_v8  ;;  %s14315_s30 = smov 8  }
  0x1e   :  { %11355 = vmatmul.mubr.msk.f32.vlgmr.msra.gmra.mrb[0].mxu0 %vm95_vm0, %v12745_v7 }
  0x1f   :  { %11379 = vmatprep.mubr.msk.f32.mxu0 %vm12633_vm1, %v12632_v8 }
  0xf1   :  { %v11356_v14 = vpop.f32.mrb[0].mxu0 }
  0xf2   :  { %v168_v15 = vpop.f32.mrb[1].mxu0  ;;  %v12771_v17 = vadd.f32 %v11356_v14, %v94_v13 }
  0xf3   :  { %v12767_v16 = vadd.f32 %v168_v15, %v94_v13 }
  0xf5   :  { %178 = vrot.lane.b32.xlu0 %v12767_v16, %s12634_s24 }
  0xf9   :  { %256 = vrot.lane.b32.xlu0 %v12771_v17, %s12634_s24 }
 0x167   :  { %v179_v18 = vpop.permute.xlu0 %178 }
 0x168   :  { %11358 = vmatpush3.xpose.msk.msra.mxu1 %vm180_vm2, %v179_v18 }
 0x169   :  { %11362 = vmatprep.subr.mxu1 %v12632_v8 }
 0x16b   :  { %11360 = vmatmul.mubr.msk.f32.vlgmr.msra.gmra.mrb[0].mxu1 %vm180_vm2, %v12767_v16  ;;  %v257_v19 = vpop.permute.xlu0 %256 }
 0x16c   :  { %11363 = vmatpush3.xpose.msk.msra.mxu1 %vm180_vm2, %v257_v19  ;;  %11364 = vmatprep.mubr.msk.f32.mxu1 %vm12633_vm1, %v12632_v8 }
 0x16d   :  { %11367 = vmatprep.subr.mxu1 %v12632_v8 }
 0x16f   :  { %11365 = vmatmul.mubr.msk.f32.vlgmr.msra.gmra.mrb[2].mxu1 %vm180_vm2, %v12771_v17 }
 0x170   :  { %11369 = vmatprep.mubr.msk.f32.mxu1 %vm12633_vm1, %v12632_v8 }
 0x23e   :  { %v251_v21 = vpop.f32.mrb[0].mxu1 }
 0x23f   :  { %v332_v22 = vmul.f32 0.35355338, %v251_v21  ;;  %v11361_v23 = vpop.f32.mrb[1].mxu1 }
 0x241   :  { %v334_v25 = vsel %vm55_vm3, %v332_v22, -10000.0 }
 0x242   :  { %v328_v26 = vpop.f32.mrb[2].mxu1  ;;  %v336_v27 = vsel %vm180_vm2, %v334_v25, -inf }
 0x243   :  { %v333_v28 = vmul.f32 0.35355338, %v328_v26  ;;  %v11366_v29 = vpop.f32.mrb[3].mxu1  ;;  %337 = vmax.xlane.f32.xlu1 %v336_v27 }
 0x245   :  { %v335_v30 = vsel %vm56_vm4, %v333_v28, -10000.0 }
 0x246   :  { %v339_v31 = vsel %vm180_vm2, %v335_v30, -inf }
 0x247   :  { %340 = vmax.xlane.f32.xlu1 %v339_v31 }
 0x258   :  { %358 = vrot.lane.b32.xlu1 %v12767_v16, %s12635_s12 }
 0x25c   :  { %434 = vrot.lane.b32.xlu1 %v12771_v17, %s12635_s12 }
 0x260   :  { %512 = vrot.lane.b32.xlu1 %v12767_v16, %s12636_s2 }
 0x264   :  { %590 = vrot.lane.b32.xlu1 %v12771_v17, %s12636_s2 }
 0x2d0   :  { %v338_v32 = vpop.xlane.xlu1 %337 }
 0x2d1   :  { %v342_v33 = vsub.f32 %v334_v25, %v338_v32 }
 0x2d3   :  { %v344_v34 = vmul.f32 1.442695, %v342_v33 }
 0x2d4   :  { %v341_v35 = vpop.xlane.xlu1 %340 }
 0x2d5   :  { %12346 = vpow2.f32 %v344_v34  ;;  %v343_v36 = vsub.f32 %v335_v30, %v341_v35 }
 0x2d7   :  { %v346_v37 = vmul.f32 1.442695, %v343_v36 }
 0x2d8   :  { %v359_v38 = vpop.permute.xlu1 %358 }
 0x2d9   :  { %12348 = vpow2.f32 %v346_v37  ;;  %11368 = vmatpush3.msra.mxu1 %v359_v38 }
 0x2da   :  { %11372 = vmatprep.subr.mxu1 %v12632_v8 }
 0x2dc   :  { %v435_v39 = vpop.permute.xlu1 %434 }
 0x2df   :  { %v12347_v40 = vpop.eup %12346 }
 0x2e0   :  { %v513_v41 = vpop.permute.xlu1 %512  ;;  %v348_v42 = vsel %vm180_vm2, %v12347_v40, 0.0 }
 0x2e1   :  { %349 = vadd.xlane.f32.xlu0 %v348_v42  ;;  %11378 = vmatpush3.xpose.msk.msra.mxu0 %vm180_vm2, %v513_v41 }
 0x2e2   :  { %11387 = vmatprep.subr.mxu0 %v12632_v8 }
 0x2e3   :  { %v12349_v43 = vpop.eup %12348 }
 0x2e4   :  { %v351_v44 = vsel %vm180_vm2, %v12349_v43, 0.0  ;;  %v591_v45 = vpop.permute.xlu1 %590 }
 0x2e5   :  { %352 = vadd.xlane.f32.xlu1 %v351_v44 }
 0x2f6   :  { %588 = vrot.lane.b32.xlu1 %v12771_v17, %s12637_s13 }
 0x2f7   :  { %510 = vrot.lane.b32.xlu0 %v12767_v16, %s12637_s13 }
 0x36e   :  { %v350_v46 = vpop.xlane.xlu0 %349 }
 0x36f   :  { %12350 = vrcp.f32 %v350_v46 }
 0x372   :  { %v511_v47 = vpop.permute.xlu0 %510  ;;  %v353_v48 = vpop.xlane.xlu1 %352 }
 0x373   :  { %12352 = vrcp.f32 %v353_v48  ;;  %11380 = vmatmul.mubr.msk.f32.vlgmr.msra.gmra.mrb[2].mxu0 %vm180_vm2, %v511_v47 }
 0x374   :  { %11389 = vmatprep.mubr.msk.f32.mxu0 %vm12633_vm1, %v12632_v8 }
 0x376   :  { %v589_v53 = vpop.permute.xlu1 %588 }
 0x379   :  { %v12351_v49 = vpop.eup %12350 }
 0x37a   :  { %v355_v50 = vmul.f32 %v12351_v49, %v12347_v40 }
 0x37c   :  { %11370 = vmatmul.mubr.msk.f32.vlgmr.msra.gmra.mrb[4].mxu1 %vm180_vm2, %v355_v50 }
 0x37d   :  { %v12353_v51 = vpop.eup %12352  ;;  %11373 = vmatpush3.msra.mxu1 %v435_v39  ;;  %11374 = vmatprep.mubr.msk.f32.mxu1 %vm12633_vm1, %v12632_v8 }
 0x37e   :  { %v357_v52 = vmul.f32 %v12353_v51, %v12349_v43  ;;  %11382 = vmatprep.subr.mxu1 %v12632_v8 }
 0x380   :  { %11375 = vmatmul.mubr.msk.f32.vlgmr.msra.gmra.mrb[6].mxu1 %vm180_vm2, %v357_v52 }
 0x381   :  { %11384 = vmatprep.mubr.msk.f32.mxu1 %vm12633_vm1, %v12632_v8 }
 0x384   :  { %11383 = vmatpush3.xpose.msk.msra.mxu1 %vm180_vm2, %v591_v45 }
 0x385   :  { %11392 = vmatprep.subr.mxu1 %v12632_v8 }
 0x387   :  { %11385 = vmatmul.mubr.msk.f32.vlgmr.msra.gmra.mrb[8].mxu1 %vm180_vm2, %v589_v53 }
 0x388   :  { %11394 = vmatprep.mubr.msk.f32.mxu1 %vm12633_vm1, %v12632_v8 }
 0x446   :  { %v584_v54 = vpop.f32.mrb[2].mxu0 }
 0x447   :  { %v666_v55 = vmul.f32 0.35355338, %v584_v54  ;;  %v11381_v56 = vpop.f32.mrb[3].mxu0 }
 0x449   :  { %v668_v57 = vsel %vm55_vm3, %v666_v55, -10000.0 }
 0x44a   :  { %v670_v58 = vsel %vm180_vm2, %v668_v57, -inf }
 0x44b   :  { %671 = vmax.xlane.f32.xlu1 %v670_v58 }
 0x44f   :  { %v12840_v59 = vpop.f32.mrb[4].mxu1 }
 0x450   :  { %v11371_v60 = vpop.f32.mrb[5].mxu1 }
 0x453   :  { %v12842_v61 = vpop.f32.mrb[6].mxu1 }
 0x454   :  { %v11376_v62 = vpop.f32.mrb[7].mxu1 }
 0x45a   :  { %v662_v63 = vpop.f32.mrb[8].mxu1 }
 0x45b   :  { %v667_v0 = vmul.f32 0.35355338, %v662_v63  ;;  %v11386_v1 = vpop.f32.mrb[9].mxu1 }
 0x45d   :  { %v669_v2 = vsel %vm56_vm4, %v667_v0, -10000.0 }
 0x45e   :  { %v673_v3 = vsel %vm180_vm2, %v669_v2, -inf }
 0x45f   :  { %674 = vmax.xlane.f32.xlu0 %v673_v3 }
 0x475   :  { %768 = vrot.lane.b32.xlu0 %v12771_v17, %s12638_s14 }
 0x479   :  { %844 = vrot.lane.b32.xlu0 %v12767_v16, %s12639_s15 }
 0x4d8   :  { %v672_v4 = vpop.xlane.xlu1 %671 }
 0x4d9   :  { %v676_v6 = vsub.f32 %v668_v57, %v672_v4 }
 0x4db   :  { %v678_v9 = vmul.f32 1.442695, %v676_v6 }
 0x4dd   :  { %12354 = vpow2.f32 %v678_v9 }
 0x4e7   :  { %v12355_v13 = vpop.eup %12354 }
 0x4e8   :  { %v682_v14 = vsel %vm180_vm2, %v12355_v13, 0.0 }
 0x4e9   :  { %683 = vadd.xlane.f32.xlu1 %v682_v14 }
 0x4ec   :  { %v675_v15 = vpop.xlane.xlu0 %674 }
 0x4ed   :  { %v677_v19 = vsub.f32 %v669_v2, %v675_v15 }
 0x4ef   :  { %v680_v21 = vmul.f32 1.442695, %v677_v19 }
 0x4f0   :  { %v769_v18 = vpop.permute.xlu0 %768 }
 0x4f1   :  { %11393 = vmatpush3.msra.mxu1 %v769_v18  ;;  %12356 = vpow2.f32 %v680_v21 }
 0x4f2   :  { %11402 = vmatprep.subr.mxu1 %v12632_v8 }
 0x4f4   :  { %v845_v30 = vpop.permute.xlu0 %844 }
 0x4fa   :  { %692 = vrot.lane.b32.xlu1 %v12767_v16, %s12638_s14 }
 0x4fb   :  { %v12357_v22 = vpop.eup %12356 }
 0x4fc   :  { %v685_v23 = vsel %vm180_vm2, %v12357_v22, 0.0 }
 0x4fe   :  { %846 = vrot.lane.b32.xlu1 %v12767_v16, %s12640_s16 }
 0x502   :  { %924 = vrot.lane.b32.xlu1 %v12771_v17, %s12640_s16 }
 0x526   :  { %686 = vadd.xlane.f32.xlu1 %v685_v23 }
 0x537   :  { %922 = vrot.lane.b32.xlu1 %v12771_v17, %s12639_s15 }
 0x576   :  { %v684_v25 = vpop.xlane.xlu1 %683 }
 0x577   :  { %12358 = vrcp.f32 %v684_v25 }
 0x57a   :  { %v693_v26 = vpop.permute.xlu1 %692 }
 0x57b   :  { %11388 = vmatpush3.msra.mxu0 %v693_v26 }
 0x57c   :  { %11397 = vmatprep.subr.mxu0 %v12632_v8 }
 0x57e   :  { %v847_v29 = vpop.permute.xlu1 %846 }
 0x581   :  { %v12359_v27 = vpop.eup %12358 }
 0x582   :  { %v689_v28 = vmul.f32 %v12359_v27, %v12355_v13  ;;  %v925_v31 = vpop.permute.xlu1 %924 }
 0x584   :  { %11390 = vmatmul.mubr.msk.f32.vlgmr.msra.gmra.mrb[4].mxu0 %vm180_vm2, %v689_v28 }
 0x585   :  { %11398 = vmatpush3.xpose.msk.msra.mxu0 %vm180_vm2, %v847_v29  ;;  %11399 = vmatprep.mubr.msk.f32.mxu0 %vm12633_vm1, %v12632_v8 }
 0x586   :  { %11407 = vmatprep.subr.mxu0 %v12632_v8 }
 0x588   :  { %11400 = vmatmul.mubr.msk.f32.vlgmr.msra.gmra.mrb[6].mxu0 %vm180_vm2, %v845_v30 }
 0x589   :  { %11409 = vmatprep.mubr.msk.f32.mxu0 %vm12633_vm1, %v12632_v8 }
 0x5b3   :  { %v687_v32 = vpop.xlane.xlu1 %686 }
 0x5b4   :  { %12360 = vrcp.f32 %v687_v32 }
 0x5b7   :  { %v923_v35 = vpop.permute.xlu1 %922 }
 0x5be   :  { %v12361_v33 = vpop.eup %12360 }
 0x5bf   :  { %v691_v34 = vmul.f32 %v12361_v33, %v12357_v22 }
 0x5c1   :  { %11395 = vmatmul.mubr.msk.f32.vlgmr.msra.gmra.mrb[10].mxu1 %vm180_vm2, %v691_v34 }
 0x5c2   :  { %11403 = vmatpush3.xpose.msk.msra.mxu1 %vm180_vm2, %v925_v31  ;;  %11404 = vmatprep.mubr.msk.f32.mxu1 %vm12633_vm1, %v12632_v8 }
 0x5c3   :  { %11412 = vmatprep.subr.mxu1 %v12632_v8 }
 0x5c5   :  { %11405 = vmatmul.mubr.msk.f32.vlgmr.msra.gmra.mrb[12].mxu1 %vm180_vm2, %v923_v35 }
 0x5c6   :  { %11414 = vmatprep.mubr.msk.f32.mxu1 %vm12633_vm1, %v12632_v8 }
 0x657   :  { %v12879_v36 = vpop.f32.mrb[4].mxu0 }
 0x658   :  { %v11391_v37 = vpop.f32.mrb[5].mxu0 }
 0x65b   :  { %v918_v38 = vpop.f32.mrb[6].mxu0 }
 0x65c   :  { %v1000_v39 = vmul.f32 0.35355338, %v918_v38  ;;  %v11401_v40 = vpop.f32.mrb[7].mxu0 }
 0x65e   :  { %v1002_v41 = vsel %vm55_vm3, %v1000_v39, -10000.0 }
 0x65f   :  { %v1004_v42 = vsel %vm180_vm2, %v1002_v41, -inf }
 0x660   :  { %1005 = vmax.xlane.f32.xlu0 %v1004_v42 }
 0x694   :  { %v12884_v43 = vpop.f32.mrb[10].mxu1 }
 0x695   :  { %v11396_v44 = vpop.f32.mrb[11].mxu1 }
 0x698   :  { %v996_v45 = vpop.f32.mrb[12].mxu1 }
 0x699   :  { %v1001_v46 = vmul.f32 0.35355338, %v996_v45  ;;  %v11406_v47 = vpop.f32.mrb[13].mxu1 }
 0x69b   :  { %v1003_v48 = vsel %vm56_vm4, %v1001_v46, -10000.0 }
 0x69c   :  { %v1007_v49 = vsel %vm180_vm2, %v1003_v48, -inf }
 0x69d   :  { %1008 = vmax.xlane.f32.xlu1 %v1007_v49 }
 0x6ae   :  { %1026 = vrot.lane.b32.xlu1 %v12767_v16, %s12641_s17 }
 0x6b2   :  { %1180 = vrot.lane.b32.xlu1 %v12767_v16, %s12642_s19 }
 0x6b6   :  { %1258 = vrot.lane.b32.xlu1 %v12771_v17, %s12642_s19 }
 0x6ba   :  { %1256 = vrot.lane.b32.xlu1 %v12771_v17, %s12643_s20 }
 0x6ed   :  { %v1006_v50 = vpop.xlane.xlu0 %1005 }
 0x6ee   :  { %v1010_v51 = vsub.f32 %v1002_v41, %v1006_v50 }
 0x6f0   :  { %v1012_v52 = vmul.f32 1.442695, %v1010_v51  ;;  %v10771_v51 = vld [vmem:[%s14296_s5 + $0x48] sm:$0xff] }
 0x6f2   :  { %12362 = vpow2.f32 %v1012_v52  ;;  %v10772_v52 = vld [vmem:[%s14296_s5 + $0x50] sm:$0xff] }
 0x6fc   :  { %v12363_v53 = vpop.eup %12362 }
 0x6fd   :  { %v1016_v54 = vsel %vm180_vm2, %v12363_v53, 0.0 }
 0x6fe   :  { %1017 = vadd.xlane.f32.xlu0 %v1016_v54  ;;  %v10773_v54 = vld [vmem:[%s14296_s5 + $0x58] sm:$0xff] }
 0x714   :  { %1102 = vrot.lane.b32.xlu0 %v12771_v17, %s12641_s17 }
 0x72a   :  { %v1009_v55 = vpop.xlane.xlu1 %1008 }
 0x72b   :  { %v1011_v56 = vsub.f32 %v1003_v48, %v1009_v55  ;;  %v12123_v55 = vpack.c.bf16 %v10773_v54, %v10772_v52 }
 0x72d   :  { %v1014_v57 = vmul.f32 1.442695, %v1011_v56 }
 0x72e   :  { %v1027_v58 = vpop.permute.xlu1 %1026 }
 0x72f   :  { %12364 = vpow2.f32 %v1014_v57  ;;  %11408 = vmatpush3.msra.mxu0 %v1027_v58 }
 0x730   :  { %11417 = vmatprep.subr.mxu0 %v12632_v8 }
 0x732   :  { %v1181_v3 = vpop.permute.xlu1 %1180 }
 0x736   :  { %v1259_v13 = vpop.permute.xlu1 %1258 }
 0x739   :  { %v12365_v60 = vpop.eup %12364 }
 0x73a   :  { %v1019_v62 = vsel %vm180_vm2, %v12365_v60, 0.0  ;;  %v1257_v15 = vpop.permute.xlu1 %1256 }
 0x73b   :  { %1020 = vadd.xlane.f32.xlu0 %v1019_v62 }
 0x751   :  { %1178 = vrot.lane.b32.xlu0 %v12767_v16, %s12643_s20 }
 0x78b   :  { %v1018_v63 = vpop.xlane.xlu0 %1017 }
 0x78c   :  { %12366 = vrcp.f32 %v1018_v63 }
 0x78f   :  { %v1103_v0 = vpop.permute.xlu0 %1102 }
 0x790   :  { %11413 = vmatpush3.msra.mxu1 %v1103_v0 }
 0x791   :  { %11422 = vmatprep.subr.mxu1 %v12632_v8 }
 0x796   :  { %v12367_v1 = vpop.eup %12366 }
 0x797   :  { %v1023_v2 = vmul.f32 %v12367_v1, %v12363_v53 }
 0x799   :  { %11410 = vmatmul.mubr.msk.f32.vlgmr.msra.gmra.mrb[8].mxu0 %vm180_vm2, %v1023_v2 }
 0x79a   :  { %11418 = vmatpush3.xpose.msk.msra.mxu0 %vm180_vm2, %v1181_v3  ;;  %11419 = vmatprep.mubr.msk.f32.mxu0 %vm12633_vm1, %v12632_v8 }
 0x79b   :  { %11427 = vmatprep.subr.mxu0 %v12632_v8 }
 0x7c8   :  { %v1021_v4 = vpop.xlane.xlu0 %1020 }
 0x7c9   :  { %12368 = vrcp.f32 %v1021_v4 }
 0x7cc   :  { %v1179_v6 = vpop.permute.xlu0 %1178 }
 0x7cd   :  { %11420 = vmatmul.mubr.msk.f32.vlgmr.msra.gmra.mrb[10].mxu0 %vm180_vm2, %v1179_v6 }
 0x7ce   :  { %11429 = vmatprep.mubr.msk.f32.mxu0 %vm12633_vm1, %v12632_v8 }
 0x7d3   :  { %v12369_v9 = vpop.eup %12368 }
 0x7d4   :  { %v1025_v14 = vmul.f32 %v12369_v9, %v12365_v60 }
 0x7d6   :  { %11415 = vmatmul.mubr.msk.f32.vlgmr.msra.gmra.mrb[14].mxu1 %vm180_vm2, %v1025_v14 }
 0x7d7   :  { %11423 = vmatpush3.xpose.msk.msra.mxu1 %vm180_vm2, %v1259_v13  ;;  %11424 = vmatprep.mubr.msk.f32.mxu1 %vm12633_vm1, %v12632_v8 }
 0x7d8   :  { %11432 = vmatprep.subr.mxu1 %v12632_v8 }
 0x7da   :  { %11425 = vmatmul.mubr.msk.f32.vlgmr.msra.gmra.mrb[16].mxu1 %vm180_vm2, %v1257_v15 }
 0x7db   :  { %11434 = vmatprep.mubr.msk.f32.mxu1 %vm12633_vm1, %v12632_v8 }
 0x86c   :  { %v1098_v18 = vpop.f32.mrb[8].mxu0 }
 0x86d   :  { %v11411_v19 = vpop.f32.mrb[9].mxu0 }
 0x8a0   :  { %v1252_v21 = vpop.f32.mrb[10].mxu0 }
 0x8a1   :  { %v1334_v22 = vmul.f32 0.35355338, %v1252_v21  ;;  %v11421_v23 = vpop.f32.mrb[11].mxu0 }
 0x8a3   :  { %v1336_v25 = vsel %vm55_vm3, %v1334_v22, -10000.0 }
 0x8a4   :  { %v1338_v26 = vsel %vm180_vm2, %v1336_v25, -inf }
 0x8a5   :  { %1339 = vmax.xlane.f32.xlu0 %v1338_v26 }
 0x8a9   :  { %v1174_v27 = vpop.f32.mrb[14].mxu1 }
 0x8aa   :  { %v11416_v28 = vpop.f32.mrb[15].mxu1 }
 0x8ad   :  { %v1330_v29 = vpop.f32.mrb[16].mxu1 }
 0x8ae   :  { %v1335_v30 = vmul.f32 0.35355338, %v1330_v29  ;;  %v11426_v31 = vpop.f32.mrb[17].mxu1 }
 0x8b0   :  { %v1337_v32 = vsel %vm56_vm4, %v1335_v30, -10000.0 }
 0x8b1   :  { %v1341_v33 = vsel %vm180_vm2, %v1337_v32, -inf }
 0x8b2   :  { %1342 = vmax.xlane.f32.xlu1 %v1341_v33 }
 0x8c3   :  { %1360 = vrot.lane.b32.xlu1 %v12767_v16, %s14310_s7 }
 0x8c7   :  { %1514 = vrot.lane.b32.xlu1 %v12879_v36, %s14308_s28 }
 0x8cb   :  { %1516 = vrot.lane.b32.xlu1 %v12884_v43, %s14308_s28 }
 0x8cf   :  { %1524 = vrot.lane.b32.xlu1 %v1174_v27, %s14306_s18 }
 0x932   :  { %v1340_v34 = vpop.xlane.xlu0 %1339 }
 0x933   :  { %v1344_v35 = vsub.f32 %v1336_v25, %v1340_v34 }
 0x935   :  { %v1346_v37 = vmul.f32 1.442695, %v1344_v35 }
 0x937   :  { %12370 = vpow2.f32 %v1346_v37 }
 0x93f   :  { %v1343_v38 = vpop.xlane.xlu1 %1342 }
 0x940   :  { %v1345_v39 = vsub.f32 %v1337_v32, %v1343_v38  ;;  %v10775_v38 = vld [vmem:[%s14296_s5 + $0x88] sm:$0xff] }
 0x941   :  { %v12371_v40 = vpop.eup %12370 }
 0x942   :  { %v1348_v41 = vmul.f32 1.442695, %v1345_v39  ;;  %v1350_v42 = vsel %vm180_vm2, %v12371_v40, 0.0 }
 0x943   :  { %1351 = vadd.xlane.f32.xlu0 %v1350_v42  ;;  %v1361_v16 = vpop.permute.xlu1 %1360 }
 0x944   :  { %12372 = vpow2.f32 %v1348_v41  ;;  %11428 = vmatpush3.msra.mxu0 %v1361_v16  ;;  %v10777_v41 = vld [vmem:[%s14296_s5 + $0x98] sm:$0xff]  ;;  %v10778_v16 = vld [vmem:[%s14296_s5 + $0xc0] sm:$0xff] }
 0x947   :  { %v1515_v62 = vpop.permute.xlu1 %1514 }
 0x948   :  { %v1536_v0 = vsel %vm180_vm2, %v12840_v59, %v1515_v62  ;;  %v12966_v59 = vsub.s32 1, %v12751_v10 }
 0x94b   :  { %v1517_v4 = vpop.permute.xlu1 %1516 }
 0x94c   :  { %v1537_v9 = vsel %vm180_vm2, %v12842_v61, %v1517_v4 }
 0x94e   :  { %v12373_v36 = vpop.eup %12372 }
 0x94f   :  { %v1353_v43 = vsel %vm180_vm2, %v12373_v36, 0.0  ;;  %v1525_v6 = vpop.permute.xlu1 %1524 }
 0x950   :  { %1354 = vadd.xlane.f32.xlu0 %v1353_v43  ;;  %v1540_v13 = vsel %vm1538_vm6, %v1537_v9, %v1525_v6  ;;  %v10780_v43 = vld [vmem:[%s14296_s5 + $0xd0] sm:$0xff]  ;;  %v10785_v9 = vld [vmem:[%s14296_s5 + $0xf8] sm:$0xff] }
 0x951   :  { %v10784_v6 = vld [vmem:[%s14296_s5 + $0xf0] sm:$0xff] }
 0x966   :  { %1436 = vrot.lane.b32.xlu0 %v12771_v17, %s14310_s7  ;;  %v10770_v17 = vld [vmem:[%s14296_s5 + $0x40] sm:$0xff] }
 0x967   :  { %v12119_v53 = vpack.c.bf16 %v10771_v51, %v10770_v17 }
 0x969   :  { %12120 = vmatprep.subr.bf16.mxu0 %v12119_v53 }
 0x96a   :  { %1522 = vrot.lane.b32.xlu0 %v1098_v18, %s14306_s18  ;;  %v1547_v18 = vrot.slane %v12763_v12, %v12966_v59 }
 0x9d0   :  { %v1352_v44 = vpop.xlane.xlu0 %1351 }
 0x9d1   :  { %12374 = vrcp.f32 %v1352_v44 }
 0x9db   :  { %v12375_v45 = vpop.eup %12374 }
 0x9dc   :  { %v1357_v46 = vmul.f32 %v12375_v45, %v12371_v40  ;;  %v10776_v40 = vld [vmem:[%s14296_s5 + $0x90] sm:$0xff]  ;;  %v10781_v45 = vld [vmem:[%s14296_s5 + $0xd8] sm:$0xff] }
 0x9dd   :  { %v1355_v47 = vpop.xlane.xlu0 %1354  ;;  %v12131_v42 = vpack.c.bf16 %v10777_v41, %v10776_v40 }
 0x9de   :  { %12376 = vrcp.f32 %v1355_v47  ;;  %11430 = vmatmul.mubr.msk.f32.vlgmr.msra.gmra.mrb[12].mxu0 %vm180_vm2, %v1357_v46  ;;  %v12139_v46 = vpack.c.bf16 %v10781_v45, %v10780_v43  ;;  %v10782_v47 = vld [vmem:[%s14296_s5 + $0xe0] sm:$0xff]  ;;  %v10819_v43 = vld [vmem:[%s14296_s5 + $0x108] sm:$0xff]  ;;  %v10820_v45 = vld [vmem:[%s14296_s5 + $0x110] sm:$0xff] }
 0x9df   :  { %12122 = vmatpush3.bf16.msra.mxu0 %v12119_v53 }
 0x9e0   :  { %12124 = vmatprep.subr.bf16.mxu0 %v12123_v55 }
 0x9e1   :  { %v1437_v48 = vpop.permute.xlu0 %1436 }
 0x9e2   :  { %11433 = vmatpush3.msra.mxu1 %v1437_v48  ;;  %v10783_v48 = vld [vmem:[%s14296_s5 + $0xe8] sm:$0xff] }
 0x9e3   :  { %12126 = vmatpush3.bf16.msra.mxu0 %v12123_v55  ;;  %v13007_v55 = vsub.s32 2, %v12751_v10 }
 0x9e5   :  { %v1523_v63 = vpop.permute.xlu0 %1522 }
 0x9e6   :  { %v1539_v1 = vsel %vm1538_vm6, %v1536_v0, %v1523_v63 }
 0x9e8   :  { %v12377_v49 = vpop.eup %12376 }
 0x9e9   :  { %v1359_v50 = vmul.f32 %v12377_v49, %v12373_v36  ;;  %v10779_v36 = vld [vmem:[%s14296_s5 + $0xc8] sm:$0xff]  ;;  %v12143_v49 = vpack.c.bf16 %v10783_v48, %v10782_v47 }
 0x9ea   :  { %v12135_v44 = vpack.c.bf16 %v10779_v36, %v10778_v16  ;;  %v10818_v36 = vld [vmem:[%s14296_s5 + $0x100] sm:$0xff] }
 0x9eb   :  { %11435 = vmatmul.mubr.msk.f32.vlgmr.msra.gmra.mrb[18].mxu1 %vm180_vm2, %v1359_v50 }
 0x9ec   :  { %12136 = vmatprep.subr.bf16.mxu0 %v12135_v44 }
 0xab1   :  { %v1432_v56 = vpop.f32.mrb[12].mxu0 }
 0xab2   :  { %1530 = vrot.lane.b32.xlu0 %v1432_v56, %s14304_s21  ;;  %v11431_v57 = vpop.f32.mrb[13].mxu0  ;;  %v13010_v56 = vsub.s32 3, %v12751_v10 }
 0xab3   :  { %v1661_v57 = vrot.slane %v12763_v12, %v13007_v55 }
 0xab4   :  { %v1667_v62 = vrot.slane %v12763_v12, %v13010_v56 }
 0xabe   :  { %v1508_v58 = vpop.f32.mrb[18].mxu1 }
 0xabf   :  { %1532 = vrot.lane.b32.xlu1 %v1508_v58, %s14304_s21  ;;  %v11436_v60 = vpop.f32.mrb[19].mxu1 }
 0xb24   :  { %v1531_v2 = vpop.permute.xlu0 %1530 }
 0xb25   :  { %v1542_v3 = vsel %vm1541_vm5, %v1539_v1, %v1531_v2 }
 0xb26   :  { %11445 = vmatprep.mubr.msk.f32.mxu0 %vm95_vm0, %v1542_v3 }
 0xb31   :  { %v1533_v14 = vpop.permute.xlu1 %1532 }
 0xb32   :  { %v1543_v15 = vsel %vm1541_vm5, %v1540_v13, %v1533_v14  ;;  %v12147_v13 = vpack.c.bf16 %v10785_v9, %v10784_v6  ;;  %v13026_v14 = vsub.s32 4, %v12751_v10 }
 0xb33   :  { %11446 = vmatmul.mubr.msk.f32.vlgmr.msra.gmra.mrb[14].mxu0 %vm95_vm0, %v1543_v15 }
 0xb34   :  { %12138 = vmatpush3.bf16.msra.mxu0 %v12135_v44  ;;  %v1673_v15 = vrot.slane %v12763_v12, %v13026_v14  ;;  %v12151_v44 = vpack.c.bf16 %v10819_v43, %v10818_v36 }
 0xb35   :  { %12140 = vmatprep.subr.bf16.mxu0 %v12139_v46 }
 0xb38   :  { %12142 = vmatpush3.bf16.msra.mxu0 %v12139_v46  ;;  %v10821_v46 = vld [vmem:[%s14296_s5 + $0x118] sm:$0xff] }
 0xb39   :  { %12144 = vmatprep.subr.bf16.mxu0 %v12143_v49  ;;  %v12155_v47 = vpack.c.bf16 %v10821_v46, %v10820_v45 }
 0xb3c   :  { %12146 = vmatpush3.bf16.msra.mxu0 %v12143_v49 }
 0xb3d   :  { %12148 = vmatprep.subr.bf16.mxu0 %v12147_v13 }
 0xb40   :  { %12150 = vmatpush3.bf16.msra.mxu0 %v12147_v13 }
 0xb41   :  { %11499 = vmatprep.subr.mxu0 %v12632_v8 }
 0xc06   :  { %v11447_v19 = vpop.f32.mrb[14].mxu0 }
 0xc07   :  { %v1626_v21 = vadd.f32 %v11447_v19, %v1547_v18  ;;  %v1620_v22 = vpop.f32.mrb[15].mxu0 }
 0xc08   :  { %v1621_v23 = vadd.f32 %v1620_v22, %v1547_v18 }
 0xc09   :  { %v1630_v25 = vadd.f32 %v1626_v21, %v12745_v7 }
 0xc0a   :  { %v1629_v61 = vadd.f32 %v1621_v23, %v12738_v5  ;;  %v10774_v5 = vld [vmem:[%s14296_s5 + $0x80] sm:$0xff] }
 0xc0b   :  { %v1634_v26 = vsel %vm95_vm0, %v1630_v25, 0.0  ;;  %v12127_v39 = vpack.c.bf16 %v10775_v38, %v10774_v5 }
 0xc0c   :  { %1635 = vadd.xlane.f32.xlu1 %v1634_v26  ;;  %v1631_v27 = vsel %vm95_vm0, %v1629_v61, 0.0 }
 0xc0d   :  { %1632 = vadd.xlane.f32.xlu0 %v1631_v27  ;;  %12128 = vmatprep.subr.bf16.mxu1 %v12127_v39 }
 0xc0e   :  { %12130 = vmatpush3.bf16.msra.mxu1 %v12127_v39 }
 0xc0f   :  { %12132 = vmatprep.subr.bf16.mxu1 %v12131_v42 }
 0xc12   :  { %12134 = vmatpush3.bf16.msra.mxu1 %v12131_v42 }
 0xc13   :  { %12152 = vmatprep.subr.bf16.mxu1 %v12151_v44 }
 0xc99   :  { %v1636_v28 = vpop.xlane.xlu1 %1635 }
 0xc9a   :  { %v1639_v29 = vmul.f32 0.03125, %v1636_v28  ;;  %v1633_v30 = vpop.xlane.xlu0 %1632 }
 0xc9b   :  { %v1638_v31 = vmul.f32 0.03125, %v1633_v30 }
 0xc9c   :  { %v1641_v32 = vsub.f32 %v1630_v25, %v1639_v29 }
 0xc9d   :  { %v1640_v33 = vsub.f32 %v1629_v61, %v1638_v31  ;;  %v13035_v61 = vsub.s32 5, %v12751_v10 }
 0xc9e   :  { %v1643_v37 = vmul.f32 %v1641_v32, %v1641_v32 }
 0xc9f   :  { %v1642_v34 = vmul.f32 %v1640_v33, %v1640_v33  ;;  %v1760_v26 = vrot.slane %v12763_v12, %v13035_v61 }
 0xca0   :  { %v1647_v7 = vsel %vm95_vm0, %v1643_v37, 0.0 }
 0xca1   :  { %v1644_v35 = vsel %vm95_vm0, %v1642_v34, 0.0 }
 0xca2   :  { %1645 = vadd.xlane.f32.xlu0 %v1644_v35 }
 0xca6   :  { %1648 = vadd.xlane.f32.xlu0 %v1647_v7 }
 0xd2f   :  { %v1646_v50 = vpop.xlane.xlu0 %1645 }
 0xd30   :  { %v1650_v17 = vmul.f32 0.03125, %v1646_v50 }
 0xd32   :  { %v1652_v51 = vadd.f32 1e-12, %v1650_v17 }
 0xd33   :  { %v1649_v52 = vpop.xlane.xlu0 %1648 }
 0xd34   :  { %12378 = vrsqrt.f32 %v1652_v51  ;;  %v1651_v53 = vmul.f32 0.03125, %v1649_v52 }
 0xd36   :  { %v1653_v54 = vadd.f32 1e-12, %v1651_v53  ;;  %v13057_v53 = vsub.s32 6, %v12751_v10 }
 0xd38   :  { %12380 = vrsqrt.f32 %v1653_v54  ;;  %v13060_v54 = vsub.s32 7, %v12751_v10  ;;  %v13079_v10 = vld [vmem:[%s14297_s6 + $0x8] sm:$0xff] }
 0xd3e   :  { %v12379_v58 = vpop.eup %12378 }
 0xd3f   :  { %v1656_v60 = vmul.f32 %v12379_v58, %v1640_v33 }
 0xd41   :  { %v1662_v63 = vmul.f32 %v1661_v57, %v1656_v60 }
 0xd42   :  { %v12381_v0 = vpop.eup %12380 }
 0xd43   :  { %v1657_v1 = vmul.f32 %v12381_v0, %v1641_v32  ;;  %v1668_v2 = vadd.f32 %v1667_v62, %v1662_v63  ;;  %v1880_v0 = vrot.slane %v12763_v12, %v13060_v54 }
 0xd45   :  { %v1663_v3 = vmul.f32 %v1661_v57, %v1657_v1  ;;  %11456 = vmatprep.mubr.msk.f32.mxu1 %vm95_vm0, %v1668_v2  ;;  %v1874_v57 = vrot.slane %v12763_v12, %v13057_v53  ;;  %v1912_v12 = vrot.slane %v13079_v10, %v12758_v11 }
 0xd47   :  { %v1669_v4 = vadd.f32 %v1667_v62, %v1663_v3 }
 0xd49   :  { %11457 = vmatmul.mubr.msk.f32.vlgmr.msra.gmra.mrb[20].mxu1 %vm95_vm0, %v1669_v4 }
 0xd4a   :  { %12154 = vmatpush3.bf16.msra.mxu1 %v12151_v44 }
 0xd4b   :  { %12156 = vmatprep.subr.bf16.mxu1 %v12155_v47 }
 0xd4e   :  { %12158 = vmatpush3.bf16.msra.mxu1 %v12155_v47 }
 0xd4f   :  { %11489 = vmatprep.subr.mxu1 %v12632_v8 }
 0xe1c   :  { %v11458_v18 = vpop.f32.mrb[20].mxu1 }
 0xe1d   :  { %v1752_v19 = vadd.f32 %v11458_v18, %v1673_v15  ;;  %v1746_v21 = vpop.f32.mrb[21].mxu1 }
 0xe1e   :  { %v1747_v22 = vadd.f32 %v1746_v21, %v1673_v15 }
 0xe1f   :  { %v1756_v25 = vmax.f32 %v1752_v19, 0.0 }
 0xe20   :  { %v1755_v23 = vmax.f32 %v1747_v22, 0.0 }
 0xe22   :  { %11475 = vmatprep.mubr.msk.f32.mxu0 %vm1761_vm7, %v1755_v23 }
 0xe23   :  { %11476 = vmatmul.mubr.msk.f32.vlgmr.msra.gmra.mrb[16].mxu0 %vm1761_vm7, %v1756_v25 }
 0xe24   :  { %11501 = vmatprep.mubr.msk.f32.mxu0 %vm12633_vm1, %v12632_v8 }
 0xef6   :  { %v11477_v27 = vpop.f32.mrb[16].mxu0 }
 0xef7   :  { %v1840_v28 = vadd.f32 %v11477_v27, %v1760_v26  ;;  %v1834_v29 = vpop.f32.mrb[17].mxu0 }
 0xef8   :  { %v1835_v30 = vadd.f32 %v1834_v29, %v1760_v26 }
 0xef9   :  { %v1844_v31 = vadd.f32 %v1840_v28, %v1669_v4 }
 0xefa   :  { %v1843_v32 = vadd.f32 %v1835_v30, %v1668_v2 }
 0xefb   :  { %v1848_v33 = vsel %vm95_vm0, %v1844_v31, 0.0 }
 0xefc   :  { %1849 = vadd.xlane.f32.xlu0 %v1848_v33  ;;  %v1845_v34 = vsel %vm95_vm0, %v1843_v32, 0.0 }
 0xefd   :  { %1846 = vadd.xlane.f32.xlu1 %v1845_v34 }
 0xf89   :  { %v1850_v35 = vpop.xlane.xlu0 %1849 }
 0xf8a   :  { %v1852_v37 = vmul.f32 0.03125, %v1850_v35  ;;  %v1847_v7 = vpop.xlane.xlu1 %1846 }
 0xf8b   :  { %v1851_v5 = vmul.f32 0.03125, %v1847_v7 }
 0xf8c   :  { %v1854_v38 = vsub.f32 %v1844_v31, %v1852_v37 }
 0xf8d   :  { %v1853_v39 = vsub.f32 %v1843_v32, %v1851_v5 }
 0xf8e   :  { %v1856_v40 = vmul.f32 %v1854_v38, %v1854_v38 }
 0xf8f   :  { %v1855_v41 = vmul.f32 %v1853_v39, %v1853_v39 }
 0xf90   :  { %v1860_v42 = vsel %vm95_vm0, %v1856_v40, 0.0 }
 0xf91   :  { %1861 = vadd.xlane.f32.xlu0 %v1860_v42  ;;  %v1857_v16 = vsel %vm95_vm0, %v1855_v41, 0.0 }
 0xf92   :  { %1858 = vadd.xlane.f32.xlu1 %v1857_v16 }
0x101e   :  { %v1862_v48 = vpop.xlane.xlu0 %1861 }
0x101f   :  { %v1864_v49 = vmul.f32 0.03125, %v1862_v48  ;;  %v1859_v50 = vpop.xlane.xlu1 %1858 }
0x1020   :  { %v1863_v17 = vmul.f32 0.03125, %v1859_v50 }
0x1021   :  { %v1866_v51 = vadd.f32 1e-12, %v1864_v49 }
0x1022   :  { %v1865_v52 = vadd.f32 1e-12, %v1863_v17 }
0x1023   :  { %12382 = vrsqrt.f32 %v1866_v51 }
0x1024   :  { %12384 = vrsqrt.f32 %v1865_v52 }
0x102d   :  { %v12383_v58 = vpop.eup %12382 }
0x102e   :  { %v12385_v60 = vpop.eup %12384  ;;  %v1870_v62 = vmul.f32 %v12383_v58, %v1854_v38 }
0x102f   :  { %v1869_v63 = vmul.f32 %v12385_v60, %v1853_v39 }
0x1030   :  { %v1876_v1 = vmul.f32 %v1874_v57, %v1870_v62 }
0x1031   :  { %v1875_v2 = vmul.f32 %v1874_v57, %v1869_v63 }
0x1032   :  { %v13068_v4 = vadd.f32 %v1880_v0, %v1876_v1 }
0x1033   :  { %v13066_v3 = vadd.f32 %v1880_v0, %v1875_v2 }
0x1035   :  { %11486 = vmatprep.mubr.msk.f32.mxu1 %vm95_vm0, %v13066_v3 }
0x1036   :  { %11487 = vmatmul.mubr.msk.f32.vlgmr.msra.gmra.mrb[22].mxu1 %vm95_vm0, %v13068_v4 }
0x1037   :  { %11491 = vmatprep.mubr.msk.f32.mxu1 %vm12633_vm1, %v12632_v8 }
0x1109   :  { %v11488_v6 = vpop.f32.mrb[22].mxu1 }
0x110a   :  { %v13083_v9 = vadd.f32 %v11488_v6, %v1912_v12  ;;  %v1985_v13 = vpop.f32.mrb[23].mxu1 }
0x110b   :  { %v13085_v15 = vadd.f32 %v1985_v13, %v1912_v12 }
0x110c   :  { %2072 = vrot.lane.b32.xlu0 %v13083_v9, %s12634_s24 }
0x110d   :  { %1995 = vrot.lane.b32.xlu1 %v13085_v15, %s12634_s24 }
0x117e   :  { %v2073_v19 = vpop.permute.xlu0 %2072 }
0x117f   :  { %v1996_v18 = vpop.permute.xlu1 %1995 }
0x1180   :  { %11490 = vmatpush3.xpose.msk.msra.mxu1 %vm180_vm2, %v1996_v18 }
0x1181   :  { %11494 = vmatprep.subr.mxu1 %v12632_v8 }
0x1183   :  { %11492 = vmatmul.mubr.msk.f32.vlgmr.msra.gmra.mrb[24].mxu1 %vm180_vm2, %v13085_v15 }
0x1184   :  { %11495 = vmatpush3.xpose.msk.msra.mxu1 %vm180_vm2, %v2073_v19  ;;  %11496 = vmatprep.mubr.msk.f32.mxu1 %vm12633_vm1, %v12632_v8 }
0x1185   :  { %11504 = vmatprep.subr.mxu1 %v12632_v8 }
0x1187   :  { %11497 = vmatmul.mubr.msk.f32.vlgmr.msra.gmra.mrb[26].mxu1 %vm180_vm2, %v13083_v9 }
0x1188   :  { %11506 = vmatprep.mubr.msk.f32.mxu1 %vm12633_vm1, %v12632_v8 }
0x1256   :  { %v2067_v21 = vpop.f32.mrb[24].mxu1 }
0x1257   :  { %v2148_v22 = vmul.f32 0.35355338, %v2067_v21  ;;  %v11493_v23 = vpop.f32.mrb[25].mxu1 }
0x1259   :  { %v2150_v25 = vsel %vm55_vm3, %v2148_v22, -10000.0 }
0x125a   :  { %v2144_v26 = vpop.f32.mrb[26].mxu1  ;;  %v2152_v27 = vsel %vm180_vm2, %v2150_v25, -inf }
0x125b   :  { %v2149_v28 = vmul.f32 0.35355338, %v2144_v26  ;;  %2153 = vmax.xlane.f32.xlu1 %v2152_v27  ;;  %v11498_v29 = vpop.f32.mrb[27].mxu1 }
0x125d   :  { %v2151_v30 = vsel %vm56_vm4, %v2149_v28, -10000.0 }
0x125e   :  { %v2155_v31 = vsel %vm180_vm2, %v2151_v30, -inf }
0x125f   :  { %2156 = vmax.xlane.f32.xlu0 %v2155_v31 }
0x126c   :  { %2174 = vrot.lane.b32.xlu1 %v13085_v15, %s12635_s12 }
0x1270   :  { %2328 = vrot.lane.b32.xlu1 %v13085_v15, %s12636_s2 }
0x1274   :  { %2406 = vrot.lane.b32.xlu1 %v13083_v9, %s12636_s2 }
0x1275   :  { %2250 = vrot.lane.b32.xlu0 %v13083_v9, %s12635_s12 }
0x12e8   :  { %v2154_v32 = vpop.xlane.xlu1 %2153 }
0x12e9   :  { %v2158_v33 = vsub.f32 %v2150_v25, %v2154_v32 }
0x12eb   :  { %v2160_v34 = vmul.f32 1.442695, %v2158_v33 }
0x12ec   :  { %v2175_v35 = vpop.permute.xlu1 %2174  ;;  %v2157_v37 = vpop.xlane.xlu0 %2156 }
0x12ed   :  { %12386 = vpow2.f32 %v2160_v34  ;;  %v2159_v7 = vsub.f32 %v2151_v30, %v2157_v37  ;;  %11500 = vmatpush3.msra.mxu0 %v2175_v35 }
0x12ee   :  { %11509 = vmatprep.subr.mxu0 %v12632_v8 }
0x12ef   :  { %v2162_v5 = vmul.f32 1.442695, %v2159_v7 }
0x12f0   :  { %v2251_v38 = vpop.permute.xlu0 %2250  ;;  %v2329_v16 = vpop.permute.xlu1 %2328 }
0x12f1   :  { %12388 = vpow2.f32 %v2162_v5  ;;  %11505 = vmatpush3.msra.mxu1 %v2251_v38 }
0x12f2   :  { %11514 = vmatprep.subr.mxu1 %v12632_v8 }
0x12f4   :  { %v2407_v36 = vpop.permute.xlu1 %2406 }
0x12f7   :  { %v12387_v39 = vpop.eup %12386 }
0x12f8   :  { %v2164_v40 = vsel %vm180_vm2, %v12387_v39, 0.0 }
0x12f9   :  { %2165 = vadd.xlane.f32.xlu1 %v2164_v40 }
0x12fb   :  { %v12389_v41 = vpop.eup %12388 }
0x12fc   :  { %v2167_v42 = vsel %vm180_vm2, %v12389_v41, 0.0 }
0x12fd   :  { %2168 = vadd.xlane.f32.xlu0 %v2167_v42 }
0x130a   :  { %2404 = vrot.lane.b32.xlu1 %v13083_v9, %s12637_s13 }
0x1313   :  { %2326 = vrot.lane.b32.xlu0 %v13085_v15, %s12637_s13 }
0x1386   :  { %v2166_v43 = vpop.xlane.xlu1 %2165 }
0x1387   :  { %12390 = vrcp.f32 %v2166_v43 }
0x138a   :  { %v2169_v44 = vpop.xlane.xlu0 %2168  ;;  %v2405_v50 = vpop.permute.xlu1 %2404 }
0x138b   :  { %12392 = vrcp.f32 %v2169_v44 }
0x138e   :  { %v2327_v49 = vpop.permute.xlu0 %2326 }
0x1391   :  { %v12391_v45 = vpop.eup %12390 }
0x1392   :  { %v2171_v46 = vmul.f32 %v12391_v45, %v12387_v39 }
0x1394   :  { %11502 = vmatmul.mubr.msk.f32.vlgmr.msra.gmra.mrb[18].mxu0 %vm180_vm2, %v2171_v46 }
0x1395   :  { %v12393_v47 = vpop.eup %12392  ;;  %11510 = vmatpush3.xpose.msk.msra.mxu0 %vm180_vm2, %v2329_v16  ;;  %11511 = vmatprep.mubr.msk.f32.mxu0 %vm12633_vm1, %v12632_v8 }
0x1396   :  { %v2173_v48 = vmul.f32 %v12393_v47, %v12389_v41  ;;  %11519 = vmatprep.subr.mxu0 %v12632_v8 }
0x1398   :  { %11507 = vmatmul.mubr.msk.f32.vlgmr.msra.gmra.mrb[28].mxu1 %vm180_vm2, %v2173_v48  ;;  %11512 = vmatmul.mubr.msk.f32.vlgmr.msra.gmra.mrb[20].mxu0 %vm180_vm2, %v2327_v49 }
0x1399   :  { %11515 = vmatpush3.xpose.msk.msra.mxu1 %vm180_vm2, %v2407_v36  ;;  %11516 = vmatprep.mubr.msk.f32.mxu1 %vm12633_vm1, %v12632_v8 }
0x139a   :  { %11524 = vmatprep.subr.mxu1 %v12632_v8  ;;  %11521 = vmatprep.mubr.msk.f32.mxu0 %vm12633_vm1, %v12632_v8 }
0x139c   :  { %11517 = vmatmul.mubr.msk.f32.vlgmr.msra.gmra.mrb[30].mxu1 %vm180_vm2, %v2405_v50 }
0x139d   :  { %11526 = vmatprep.mubr.msk.f32.mxu1 %vm12633_vm1, %v12632_v8 }
0x1467   :  { %v13141_v17 = vpop.f32.mrb[18].mxu0 }
0x1468   :  { %v11503_v51 = vpop.f32.mrb[19].mxu0 }
0x146b   :  { %v13143_v52 = vpop.f32.mrb[28].mxu1  ;;  %v2400_v57 = vpop.f32.mrb[20].mxu0 }
0x146c   :  { %v2482_v58 = vmul.f32 0.35355338, %v2400_v57  ;;  %v11508_v60 = vpop.f32.mrb[29].mxu1  ;;  %v11513_v62 = vpop.f32.mrb[21].mxu0 }
0x146e   :  { %v2484_v63 = vsel %vm55_vm3, %v2482_v58, -10000.0 }
0x146f   :  { %v2478_v0 = vpop.f32.mrb[30].mxu1  ;;  %v2486_v1 = vsel %vm180_vm2, %v2484_v63, -inf }
0x1470   :  { %v2483_v2 = vmul.f32 0.35355338, %v2478_v0  ;;  %2487 = vmax.xlane.f32.xlu0 %v2486_v1  ;;  %v11518_v12 = vpop.f32.mrb[31].mxu1 }
0x1472   :  { %v2485_v6 = vsel %vm56_vm4, %v2483_v2, -10000.0 }
0x1473   :  { %v2489_v13 = vsel %vm180_vm2, %v2485_v6, -inf }
0x1474   :  { %2490 = vmax.xlane.f32.xlu1 %v2489_v13 }
0x1485   :  { %2508 = vrot.lane.b32.xlu1 %v13085_v15, %s12638_s14 }
0x1486   :  { %2584 = vrot.lane.b32.xlu0 %v13083_v9, %s12638_s14 }
0x1489   :  { %2662 = vrot.lane.b32.xlu1 %v13085_v15, %s12640_s16 }
0x148d   :  { %2740 = vrot.lane.b32.xlu1 %v13083_v9, %s12640_s16 }
0x1491   :  { %2738 = vrot.lane.b32.xlu1 %v13083_v9, %s12639_s15 }
0x14fd   :  { %v2488_v18 = vpop.xlane.xlu0 %2487 }
0x14fe   :  { %v2492_v19 = vsub.f32 %v2484_v63, %v2488_v18 }
0x1500   :  { %v2494_v21 = vmul.f32 1.442695, %v2492_v19 }
0x1501   :  { %v2585_v22 = vpop.permute.xlu0 %2584  ;;  %v2491_v23 = vpop.xlane.xlu1 %2490 }
0x1502   :  { %12394 = vpow2.f32 %v2494_v21  ;;  %v2493_v25 = vsub.f32 %v2485_v6, %v2491_v23  ;;  %11525 = vmatpush3.msra.mxu1 %v2585_v22 }
0x1503   :  { %11534 = vmatprep.subr.mxu1 %v12632_v8 }
0x1504   :  { %v2496_v26 = vmul.f32 1.442695, %v2493_v25 }
0x1505   :  { %v2509_v27 = vpop.permute.xlu1 %2508 }
0x1506   :  { %12396 = vpow2.f32 %v2496_v26  ;;  %11520 = vmatpush3.msra.mxu0 %v2509_v27 }
0x1507   :  { %11529 = vmatprep.subr.mxu0 %v12632_v8 }
0x1509   :  { %v2663_v34 = vpop.permute.xlu1 %2662 }
0x150c   :  { %v12395_v28 = vpop.eup %12394 }
0x150d   :  { %v2498_v29 = vsel %vm180_vm2, %v12395_v28, 0.0  ;;  %v2741_v5 = vpop.permute.xlu1 %2740 }
0x150e   :  { %2499 = vadd.xlane.f32.xlu0 %v2498_v29 }
0x1510   :  { %v12397_v30 = vpop.eup %12396 }
0x1511   :  { %v2501_v31 = vsel %vm180_vm2, %v12397_v30, 0.0  ;;  %v2739_v40 = vpop.permute.xlu1 %2738 }
0x1512   :  { %2502 = vadd.xlane.f32.xlu0 %v2501_v31 }
0x1528   :  { %2660 = vrot.lane.b32.xlu0 %v13085_v15, %s12639_s15 }
0x159b   :  { %v2500_v32 = vpop.xlane.xlu0 %2499 }
0x159c   :  { %12398 = vrcp.f32 %v2500_v32 }
0x159f   :  { %v2503_v33 = vpop.xlane.xlu0 %2502 }
0x15a0   :  { %12400 = vrcp.f32 %v2503_v33 }
0x15a3   :  { %v2661_v39 = vpop.permute.xlu0 %2660 }
0x15a6   :  { %v12399_v35 = vpop.eup %12398 }
0x15a7   :  { %v2505_v37 = vmul.f32 %v12399_v35, %v12395_v28 }
0x15a9   :  { %11522 = vmatmul.mubr.msk.f32.vlgmr.msra.gmra.mrb[22].mxu0 %vm180_vm2, %v2505_v37 }
0x15aa   :  { %v12401_v7 = vpop.eup %12400  ;;  %11530 = vmatpush3.xpose.msk.msra.mxu0 %vm180_vm2, %v2663_v34  ;;  %11531 = vmatprep.mubr.msk.f32.mxu0 %vm12633_vm1, %v12632_v8 }
0x15ab   :  { %v2507_v38 = vmul.f32 %v12401_v7, %v12397_v30  ;;  %11539 = vmatprep.subr.mxu0 %v12632_v8 }
0x15ad   :  { %11527 = vmatmul.mubr.msk.f32.vlgmr.msra.gmra.mrb[32].mxu1 %vm180_vm2, %v2507_v38  ;;  %11532 = vmatmul.mubr.msk.f32.vlgmr.msra.gmra.mrb[24].mxu0 %vm180_vm2, %v2661_v39 }
0x15ae   :  { %11535 = vmatpush3.xpose.msk.msra.mxu1 %vm180_vm2, %v2741_v5  ;;  %11536 = vmatprep.mubr.msk.f32.mxu1 %vm12633_vm1, %v12632_v8 }
0x15af   :  { %11544 = vmatprep.subr.mxu1 %v12632_v8  ;;  %11541 = vmatprep.mubr.msk.f32.mxu0 %vm12633_vm1, %v12632_v8 }
0x15b1   :  { %11537 = vmatmul.mubr.msk.f32.vlgmr.msra.gmra.mrb[34].mxu1 %vm180_vm2, %v2739_v40 }
0x15b2   :  { %11546 = vmatprep.mubr.msk.f32.mxu1 %vm12633_vm1, %v12632_v8 }
0x167c   :  { %v13183_v41 = vpop.f32.mrb[22].mxu0 }
0x167d   :  { %v11523_v42 = vpop.f32.mrb[23].mxu0 }
0x1680   :  { %v13185_v16 = vpop.f32.mrb[32].mxu1  ;;  %v2734_v36 = vpop.f32.mrb[24].mxu0 }
0x1681   :  { %v2816_v43 = vmul.f32 0.35355338, %v2734_v36  ;;  %v11528_v44 = vpop.f32.mrb[33].mxu1  ;;  %v11533_v45 = vpop.f32.mrb[25].mxu0 }
0x1683   :  { %v2818_v46 = vsel %vm55_vm3, %v2816_v43, -10000.0 }
0x1684   :  { %v2812_v47 = vpop.f32.mrb[34].mxu1  ;;  %v2820_v48 = vsel %vm180_vm2, %v2818_v46, -inf }
0x1685   :  { %v2817_v49 = vmul.f32 0.35355338, %v2812_v47  ;;  %2821 = vmax.xlane.f32.xlu0 %v2820_v48  ;;  %v11538_v50 = vpop.f32.mrb[35].mxu1 }
0x1687   :  { %v2819_v51 = vsel %vm56_vm4, %v2817_v49, -10000.0 }
0x1688   :  { %v2823_v57 = vsel %vm180_vm2, %v2819_v51, -inf }
0x1689   :  { %2824 = vmax.xlane.f32.xlu1 %v2823_v57 }
0x169a   :  { %2842 = vrot.lane.b32.xlu1 %v13085_v15, %s12641_s17 }
0x169b   :  { %2918 = vrot.lane.b32.xlu0 %v13083_v9, %s12641_s17 }
0x169e   :  { %2996 = vrot.lane.b32.xlu1 %v13085_v15, %s12642_s19 }
0x16a2   :  { %3074 = vrot.lane.b32.xlu1 %v13083_v9, %s12642_s19 }
0x16a6   :  { %3072 = vrot.lane.b32.xlu1 %v13083_v9, %s12643_s20 }
0x1712   :  { %v2822_v58 = vpop.xlane.xlu0 %2821 }
0x1713   :  { %v2826_v60 = vsub.f32 %v2818_v46, %v2822_v58 }
0x1715   :  { %v2828_v62 = vmul.f32 1.442695, %v2826_v60 }
0x1716   :  { %v2919_v63 = vpop.permute.xlu0 %2918  ;;  %v2825_v0 = vpop.xlane.xlu1 %2824 }
0x1717   :  { %12402 = vpow2.f32 %v2828_v62  ;;  %v2827_v1 = vsub.f32 %v2819_v51, %v2825_v0  ;;  %11545 = vmatpush3.msra.mxu1 %v2919_v63 }
0x1718   :  { %11554 = vmatprep.subr.mxu1 %v12632_v8 }
0x1719   :  { %v2830_v2 = vmul.f32 1.442695, %v2827_v1  ;;  %v10823_v1 = vld [vmem:[%s14296_s5 + $0x148] sm:$0xff] }
0x171a   :  { %v2843_v12 = vpop.permute.xlu1 %2842 }
0x171b   :  { %12404 = vpow2.f32 %v2830_v2  ;;  %11540 = vmatpush3.msra.mxu0 %v2843_v12  ;;  %v10824_v12 = vld [vmem:[%s14296_s5 + $0x150] sm:$0xff] }
0x171c   :  { %11549 = vmatprep.subr.mxu0 %v12632_v8 }
0x171e   :  { %v2997_v23 = vpop.permute.xlu1 %2996 }
0x1721   :  { %v12403_v6 = vpop.eup %12402 }
0x1722   :  { %v2832_v13 = vsel %vm180_vm2, %v12403_v6, 0.0  ;;  %v3075_v28 = vpop.permute.xlu1 %3074 }
0x1723   :  { %2833 = vadd.xlane.f32.xlu0 %v2832_v13 }
0x1725   :  { %v12405_v18 = vpop.eup %12404 }
0x1726   :  { %v2835_v19 = vsel %vm180_vm2, %v12405_v18, 0.0  ;;  %v3073_v31 = vpop.permute.xlu1 %3072 }
0x1727   :  { %2836 = vadd.xlane.f32.xlu0 %v2835_v19 }
0x173d   :  { %2994 = vrot.lane.b32.xlu0 %v13085_v15, %s12643_s20 }
0x17b0   :  { %v2834_v21 = vpop.xlane.xlu0 %2833 }
0x17b1   :  { %12406 = vrcp.f32 %v2834_v21 }
0x17b4   :  { %v2837_v22 = vpop.xlane.xlu0 %2836 }
0x17b5   :  { %12408 = vrcp.f32 %v2837_v22 }
0x17b8   :  { %v2995_v30 = vpop.permute.xlu0 %2994 }
0x17bb   :  { %v12407_v25 = vpop.eup %12406 }
0x17bc   :  { %v2839_v26 = vmul.f32 %v12407_v25, %v12403_v6  ;;  %v10825_v6 = vld [vmem:[%s14296_s5 + $0x158] sm:$0xff] }
0x17bd   :  { %v12163_v13 = vpack.c.bf16 %v10825_v6, %v10824_v12  ;;  %v10835_v12 = vld [vmem:[%s14296_s5 + $0x1e8] sm:$0xff] }
0x17be   :  { %11542 = vmatmul.mubr.msk.f32.vlgmr.msra.gmra.mrb[26].mxu0 %vm180_vm2, %v2839_v26 }
0x17bf   :  { %v12409_v27 = vpop.eup %12408  ;;  %11550 = vmatpush3.xpose.msk.msra.mxu0 %vm180_vm2, %v2997_v23  ;;  %11551 = vmatprep.mubr.msk.f32.mxu0 %vm12633_vm1, %v12632_v8 }
0x17c0   :  { %v2841_v29 = vmul.f32 %v12409_v27, %v12405_v18  ;;  %11559 = vmatprep.subr.mxu0 %v12632_v8 }
0x17c2   :  { %11547 = vmatmul.mubr.msk.f32.vlgmr.msra.gmra.mrb[36].mxu1 %vm180_vm2, %v2841_v29  ;;  %11552 = vmatmul.mubr.msk.f32.vlgmr.msra.gmra.mrb[28].mxu0 %vm180_vm2, %v2995_v30 }
0x17c3   :  { %11555 = vmatpush3.xpose.msk.msra.mxu1 %vm180_vm2, %v3075_v28  ;;  %11556 = vmatprep.mubr.msk.f32.mxu1 %vm12633_vm1, %v12632_v8 }
0x17c4   :  { %11564 = vmatprep.subr.mxu1 %v12632_v8  ;;  %11561 = vmatprep.mubr.msk.f32.mxu0 %vm12633_vm1, %v12632_v8 }
0x17c6   :  { %11557 = vmatmul.mubr.msk.f32.vlgmr.msra.gmra.mrb[38].mxu1 %vm180_vm2, %v3073_v31 }
0x17c7   :  { %11566 = vmatprep.mubr.msk.f32.mxu1 %vm12633_vm1, %v12632_v8 }
0x1891   :  { %v2914_v32 = vpop.f32.mrb[26].mxu0 }
0x1892   :  { %v11543_v33 = vpop.f32.mrb[27].mxu0 }
0x1895   :  { %v2990_v34 = vpop.f32.mrb[36].mxu1  ;;  %v3068_v35 = vpop.f32.mrb[28].mxu0 }
0x1896   :  { %v3150_v37 = vmul.f32 0.35355338, %v3068_v35  ;;  %v11548_v7 = vpop.f32.mrb[37].mxu1  ;;  %v11553_v5 = vpop.f32.mrb[29].mxu0 }
0x1898   :  { %v3152_v38 = vsel %vm55_vm3, %v3150_v37, -10000.0 }
0x1899   :  { %v3146_v39 = vpop.f32.mrb[38].mxu1  ;;  %v3154_v40 = vsel %vm180_vm2, %v3152_v38, -inf }
0x189a   :  { %v3151_v42 = vmul.f32 0.35355338, %v3146_v39  ;;  %3155 = vmax.xlane.f32.xlu0 %v3154_v40  ;;  %v11558_v36 = vpop.f32.mrb[39].mxu1 }
0x189c   :  { %v3153_v43 = vsel %vm56_vm4, %v3151_v42, -10000.0 }
0x189d   :  { %v3157_v44 = vsel %vm180_vm2, %v3153_v43, -inf }
0x189e   :  { %3158 = vmax.xlane.f32.xlu1 %v3157_v44 }
0x18af   :  { %3176 = vrot.lane.b32.xlu1 %v13085_v15, %s14310_s7 }
0x18b3   :  { %3330 = vrot.lane.b32.xlu1 %v13183_v41, %s14308_s28 }
0x18b7   :  { %3332 = vrot.lane.b32.xlu1 %v13185_v16, %s14308_s28 }
0x18bb   :  { %3340 = vrot.lane.b32.xlu1 %v2990_v34, %s14312_s26 }
0x1927   :  { %v3156_v20 = vpop.xlane.xlu0 %3155 }
0x1928   :  { %v3160_v45 = vsub.f32 %v3152_v38, %v3156_v20 }
0x192a   :  { %v3162_v46 = vmul.f32 1.442695, %v3160_v45 }
0x192b   :  { %v3159_v47 = vpop.xlane.xlu1 %3158 }
0x192c   :  { %12410 = vpow2.f32 %v3162_v46  ;;  %v3161_v24 = vsub.f32 %v3153_v43, %v3159_v47 }
0x192e   :  { %v3164_v48 = vmul.f32 1.442695, %v3161_v24 }
0x192f   :  { %v3177_v49 = vpop.permute.xlu1 %3176 }
0x1930   :  { %12412 = vpow2.f32 %v3164_v48  ;;  %11560 = vmatpush3.msra.mxu0 %v3177_v49  ;;  %v10827_v49 = vld [vmem:[%s14296_s5 + $0x188] sm:$0xff] }
0x1933   :  { %v3331_v23 = vpop.permute.xlu1 %3330 }
0x1934   :  { %v3352_v27 = vsel %vm180_vm2, %v13141_v17, %v3331_v23  ;;  %v3361_v17 = vrot.slane %v13079_v10, %v12966_v59 }
0x1936   :  { %v12411_v50 = vpop.eup %12410 }
0x1937   :  { %v3166_v15 = vsel %vm180_vm2, %v12411_v50, 0.0  ;;  %v3333_v25 = vpop.permute.xlu1 %3332 }
0x1938   :  { %3167 = vadd.xlane.f32.xlu0 %v3166_v15  ;;  %v10828_v15 = vld [vmem:[%s14296_s5 + $0x190] sm:$0xff] }
0x193a   :  { %v12413_v41 = vpop.eup %12412 }
0x193b   :  { %v3169_v51 = vsel %vm180_vm2, %v12413_v41, 0.0  ;;  %v3341_v28 = vpop.permute.xlu1 %3340 }
0x193c   :  { %3170 = vadd.xlane.f32.xlu0 %v3169_v51 }
0x1952   :  { %3252 = vrot.lane.b32.xlu0 %v13083_v9, %s14310_s7  ;;  %v10822_v9 = vld [vmem:[%s14296_s5 + $0x140] sm:$0xff]  ;;  %s12647_s7 = smov [#allocation5]  }
0x1953   :  { %v12159_v2 = vpack.c.bf16 %v10823_v1, %v10822_v9  ;;  %v10833_v9 = vld [vmem:[%s14296_s5 + $0x1d8] sm:$0xff] }
0x1955   :  { %12160 = vmatprep.subr.bf16.mxu0 %v12159_v2 }
0x1956   :  { %3338 = vrot.lane.b32.xlu0 %v2914_v32, %s14312_s26  ;;  %v3353_v32 = vsel %vm180_vm2, %v13143_v52, %v3333_v25  ;;  %v3474_v25 = vrot.slane %v13079_v10, %v13007_v55 }
0x1957   :  { %v3355_v33 = vsel %vm1538_vm6, %v3353_v32, %v3341_v28  ;;  %v3480_v28 = vrot.slane %v13079_v10, %v13010_v56 }
0x19c5   :  { %v3168_v16 = vpop.xlane.xlu0 %3167 }
0x19c6   :  { %12414 = vrcp.f32 %v3168_v16  ;;  %v3697_v16 = vld [vmem:[#allocation2] sm:$0xff] }
0x19c9   :  { %v3171_v57 = vpop.xlane.xlu0 %3170 }
0x19ca   :  { %12416 = vrcp.f32 %v3171_v57  ;;  %v3698_v57 = vld [vmem:[#allocation2 + $0x8] sm:$0xff] }
0x19cd   :  { %v3253_v58 = vpop.permute.xlu0 %3252 }
0x19ce   :  { %11565 = vmatpush3.msra.mxu1 %v3253_v58  ;;  %v12191_v58 = vpack.c.bf16 %v3698_v57, %v3697_v16 }
0x19d0   :  { %v12415_v60 = vpop.eup %12414 }
0x19d1   :  { %v3173_v62 = vmul.f32 %v12415_v60, %v12411_v50  ;;  %v3339_v26 = vpop.permute.xlu0 %3338  ;;  %v10830_v60 = vld [vmem:[%s14296_s5 + $0x1c0] sm:$0xff] }
0x19d2   :  { %v3354_v29 = vsel %vm1538_vm6, %v3352_v27, %v3339_v26 }
0x19d3   :  { %11562 = vmatmul.mubr.msk.f32.vlgmr.msra.gmra.mrb[30].mxu0 %vm180_vm2, %v3173_v62  ;;  %v10831_v62 = vld [vmem:[%s14296_s5 + $0x1c8] sm:$0xff] }
0x19d4   :  { %v12417_v63 = vpop.eup %12416  ;;  %12162 = vmatpush3.bf16.msra.mxu0 %v12159_v2  ;;  %v10834_v2 = vld [vmem:[%s14296_s5 + $0x1e0] sm:$0xff] }
0x19d5   :  { %v3175_v0 = vmul.f32 %v12417_v63, %v12413_v41  ;;  %12164 = vmatprep.subr.bf16.mxu0 %v12163_v13  ;;  %v10829_v41 = vld [vmem:[%s14296_s5 + $0x198] sm:$0xff]  ;;  %v10832_v63 = vld [vmem:[%s14296_s5 + $0x1d0] sm:$0xff]  ;;  %v12183_v6 = vpack.c.bf16 %v10835_v12, %v10834_v2 }
0x19d6   :  { %v12171_v51 = vpack.c.bf16 %v10829_v41, %v10828_v15  ;;  %v12179_v1 = vpack.c.bf16 %v10833_v9, %v10832_v63  ;;  %v13383_v41 = vld [vmem:[%s14294_s3] sm:$0xff] }
0x19d7   :  { %11567 = vmatmul.mubr.msk.f32.vlgmr.msra.gmra.mrb[40].mxu1 %vm180_vm2, %v3175_v0  ;;  %v12175_v0 = vpack.c.bf16 %v10831_v62, %v10830_v60  ;;  %vm59_vm8 = vcmp.gt.f32.partialorder %v13383_v41, 0.0 }
0x19d8   :  { %12166 = vmatpush3.bf16.msra.mxu0 %v12163_v13 }
0x19d9   :  { %12176 = vmatprep.subr.bf16.mxu0 %v12175_v0 }
0x1aa6   :  { %v3248_v18 = vpop.f32.mrb[30].mxu0 }
0x1aa7   :  { %3346 = vrot.lane.b32.xlu0 %v3248_v18, %s14313_s25  ;;  %v11563_v19 = vpop.f32.mrb[31].mxu0 }
0x1aaa   :  { %v3324_v21 = vpop.f32.mrb[40].mxu1 }
0x1aab   :  { %3348 = vrot.lane.b32.xlu1 %v3324_v21, %s14313_s25  ;;  %v11568_v22 = vpop.f32.mrb[41].mxu1 }
0x1b19   :  { %v3347_v30 = vpop.permute.xlu0 %3346 }
0x1b1a   :  { %v3356_v31 = vsel %vm1541_vm5, %v3354_v29, %v3347_v30 }
0x1b1b   :  { %11577 = vmatprep.mubr.msk.f32.mxu0 %vm95_vm0, %v3356_v31 }
0x1b1d   :  { %v3349_v34 = vpop.permute.xlu1 %3348 }
0x1b1e   :  { %v3357_v35 = vsel %vm1541_vm5, %v3355_v33, %v3349_v34  ;;  %v3699_v33 = vld [vmem:[#allocation2 + $0x10] sm:$0xff]  ;;  %v3700_v34 = vld [vmem:[#allocation2 + $0x18] sm:$0xff] }
0x1b1f   :  { %11578 = vmatmul.mubr.msk.f32.vlgmr.msra.gmra.mrb[32].mxu0 %vm95_vm0, %v3357_v35 }
0x1b20   :  { %12178 = vmatpush3.bf16.msra.mxu0 %v12175_v0 }
0x1b21   :  { %12180 = vmatprep.subr.bf16.mxu0 %v12179_v1 }
0x1b24   :  { %12182 = vmatpush3.bf16.msra.mxu0 %v12179_v1 }
0x1b25   :  { %12184 = vmatprep.subr.bf16.mxu0 %v12183_v6 }
0x1b28   :  { %12186 = vmatpush3.bf16.msra.mxu0 %v12183_v6 }
0x1bf2   :  { %v11579_v37 = vpop.f32.mrb[32].mxu0 }
0x1bf3   :  { %v3440_v7 = vadd.f32 %v11579_v37, %v3361_v17  ;;  %v3434_v5 = vpop.f32.mrb[33].mxu0  ;;  %v12195_v37 = vpack.c.bf16 %v3700_v34, %v3699_v33 }
0x1bf4   :  { %v3435_v38 = vadd.f32 %v3434_v5, %v3361_v17  ;;  %v13329_v5 = vld [vmem:[%s14292_s1 + $0x8] sm:$0xff] }
0x1bf5   :  { %v3444_v39 = vadd.f32 %v3440_v7, %v13068_v4  ;;  %v13320_v7 = vld [vmem:[%s14292_s1] sm:$0xff] }
0x1bf6   :  { %v3443_v40 = vadd.f32 %v3435_v38, %v13066_v3  ;;  %v10826_v3 = vld [vmem:[%s14296_s5 + $0x180] sm:$0xff]  ;;  %v10836_v38 = vld [vmem:[%s14296_s5 + $0x1f0] sm:$0xff] }
0x1bf7   :  { %v3448_v52 = vsel %vm95_vm0, %v3444_v39, 0.0  ;;  %v12167_v50 = vpack.c.bf16 %v10827_v49, %v10826_v3 }
0x1bf8   :  { %3449 = vadd.xlane.f32.xlu1 %v3448_v52  ;;  %v3445_v42 = vsel %vm95_vm0, %v3443_v40, 0.0  ;;  %v3486_v52 = vrot.slane %v13079_v10, %v13026_v14 }
0x1bf9   :  { %3446 = vadd.xlane.f32.xlu0 %v3445_v42  ;;  %12168 = vmatprep.subr.bf16.mxu1 %v12167_v50 }
0x1bfa   :  { %12170 = vmatpush3.bf16.msra.mxu1 %v12167_v50 }
0x1bfb   :  { %12172 = vmatprep.subr.bf16.mxu1 %v12171_v51 }
0x1bfe   :  { %12174 = vmatpush3.bf16.msra.mxu1 %v12171_v51 }
0x1bff   :  { %12192 = vmatprep.subr.bf16.mxu1 %v12191_v58 }
0x1c85   :  { %v3450_v36 = vpop.xlane.xlu1 %3449 }
0x1c86   :  { %v3452_v43 = vmul.f32 0.03125, %v3450_v36  ;;  %v3447_v44 = vpop.xlane.xlu0 %3446 }
0x1c87   :  { %v3451_v20 = vmul.f32 0.03125, %v3447_v44 }
0x1c88   :  { %v3454_v45 = vsub.f32 %v3444_v39, %v3452_v43  ;;  %v10837_v39 = vld [vmem:[%s14296_s5 + $0x1f8] sm:$0xff] }
0x1c89   :  { %v3453_v46 = vsub.f32 %v3443_v40, %v3451_v20  ;;  %v12187_v40 = vpack.c.bf16 %v10837_v39, %v10836_v38  ;;  %v13348_v20 = vld [vmem:[%s14299_s8] sm:$0xff] }
0x1c8a   :  { %v3456_v48 = vmul.f32 %v3454_v45, %v3454_v45 }
0x1c8b   :  { %v3455_v47 = vmul.f32 %v3453_v46, %v3453_v46  ;;  %12188 = vmatprep.subr.bf16.mxu0 %v12187_v40 }
0x1c8c   :  { %v3460_v4 = vsel %vm95_vm0, %v3456_v48, 0.0  ;;  %12190 = vmatpush3.bf16.msra.mxu0 %v12187_v40 }
0x1c8d   :  { %v3457_v24 = vsel %vm95_vm0, %v3455_v47, 0.0  ;;  %11631 = vmatprep.subr.mxu0 %v12632_v8  ;;  %v3740_v47 = vrot.slane %v13348_v20, %v12758_v11 }
0x1c8e   :  { %3458 = vadd.xlane.f32.xlu0 %v3457_v24 }
0x1c92   :  { %3461 = vadd.xlane.f32.xlu0 %v3460_v4 }
0x1d1b   :  { %v3459_v13 = vpop.xlane.xlu0 %3458 }
0x1d1c   :  { %v3463_v18 = vmul.f32 0.03125, %v3459_v13 }
0x1d1e   :  { %v3465_v19 = vadd.f32 1e-12, %v3463_v18 }
0x1d1f   :  { %v3462_v21 = vpop.xlane.xlu0 %3461 }
0x1d20   :  { %12418 = vrsqrt.f32 %v3465_v19  ;;  %v3464_v22 = vmul.f32 0.03125, %v3462_v21 }
0x1d22   :  { %v3466_v23 = vadd.f32 1e-12, %v3464_v22 }
0x1d24   :  { %12420 = vrsqrt.f32 %v3466_v23 }
0x1d2a   :  { %v12419_v26 = vpop.eup %12418 }
0x1d2b   :  { %v3469_v27 = vmul.f32 %v12419_v26, %v3453_v46 }
0x1d2d   :  { %v3475_v29 = vmul.f32 %v3474_v25, %v3469_v27 }
0x1d2e   :  { %v12421_v30 = vpop.eup %12420 }
0x1d2f   :  { %v3470_v31 = vmul.f32 %v12421_v30, %v3454_v45  ;;  %v13311_v32 = vadd.f32 %v3480_v28, %v3475_v29 }
0x1d31   :  { %v3476_v35 = vmul.f32 %v3474_v25, %v3470_v31  ;;  %11588 = vmatprep.mubr.msk.f32.mxu1 %vm95_vm0, %v13311_v32 }
0x1d33   :  { %v13315_v17 = vadd.f32 %v3480_v28, %v3476_v35 }
0x1d35   :  { %11589 = vmatmul.mubr.msk.f32.vlgmr.msra.gmra.mrb[42].mxu1 %vm95_vm0, %v13315_v17 }
0x1d36   :  { %12194 = vmatpush3.bf16.msra.mxu1 %v12191_v58  ;;  %11618 = vmatprep.mubr.msk.f32.mxu1 %vm95_vm0, %v13320_v7  ;;  %v13389_v58 = vld [vmem:[%s14294_s3 + $0x8] sm:$0xff]  ;;  %s14314_s3 = smov 40  }
0x1d37   :  { %12196 = vmatprep.subr.bf16.mxu1 %v12195_v37  ;;  %vm60_vm9 = vcmp.gt.f32.partialorder %v13389_v58, 0.0 }
0x1d3a   :  { %12198 = vmatpush3.bf16.msra.mxu1 %v12195_v37 }
0x1d3b   :  { %11621 = vmatprep.subr.mxu1 %v12632_v8 }
0x1d3d   :  { %11619 = vmatmul.mubr.msk.f32.vlgmr.msra.gmra.mrb[44].mxu1 %vm95_vm0, %v13329_v5 }
0x1d3e   :  { %11623 = vmatprep.mubr.msk.f32.mxu1 %vm12633_vm1, %v12632_v8 }
0x1e08   :  { %v11590_v42 = vpop.f32.mrb[42].mxu1 }
0x1e09   :  { %v3565_v36 = vadd.f32 %v11590_v42, %v3486_v52  ;;  %v3559_v43 = vpop.f32.mrb[43].mxu1 }
0x1e0a   :  { %v3560_v44 = vadd.f32 %v3559_v43, %v3486_v52 }
0x1e0b   :  { %v3569_v46 = vmax.f32 %v3565_v36, 0.0 }
0x1e0c   :  { %v3568_v45 = vmax.f32 %v3560_v44, 0.0 }
0x1e0e   :  { %11607 = vmatprep.mubr.msk.f32.mxu0 %vm1761_vm7, %v3568_v45 }
0x1e0f   :  { %11608 = vmatmul.mubr.msk.f32.vlgmr.msra.gmra.mrb[34].mxu0 %vm1761_vm7, %v3569_v46 }
0x1e10   :  { %v11620_v24 = vpop.f32.mrb[44].mxu1  ;;  %11633 = vmatprep.mubr.msk.f32.mxu0 %vm12633_vm1, %v12632_v8 }
0x1e11   :  { %v13356_v10 = vadd.f32 %v11620_v24, %v3740_v47  ;;  %v3813_v48 = vpop.f32.mrb[45].mxu1 }
0x1e12   :  { %v13358_v4 = vadd.f32 %v3813_v48, %v3740_v47 }
0x1e13   :  { %3900 = vrot.lane.b32.xlu0 %v13356_v10, %s12634_s24 }
0x1e14   :  { %3823 = vrot.lane.b32.xlu1 %v13358_v4, %s12634_s24 }
0x1e85   :  { %v3901_v49 = vpop.permute.xlu0 %3900 }
0x1e86   :  { %v3824_v3 = vpop.permute.xlu1 %3823 }
0x1e87   :  { %11622 = vmatpush3.xpose.msk.msra.mxu1 %vm180_vm2, %v3824_v3 }
0x1e88   :  { %11626 = vmatprep.subr.mxu1 %v12632_v8 }
0x1e8a   :  { %11624 = vmatmul.mubr.msk.f32.vlgmr.msra.gmra.mrb[46].mxu1 %vm180_vm2, %v13358_v4 }
0x1e8b   :  { %11627 = vmatpush3.xpose.msk.msra.mxu1 %vm180_vm2, %v3901_v49  ;;  %11628 = vmatprep.mubr.msk.f32.mxu1 %vm12633_vm1, %v12632_v8 }
0x1e8c   :  { %11636 = vmatprep.subr.mxu1 %v12632_v8 }
0x1e8e   :  { %11629 = vmatmul.mubr.msk.f32.vlgmr.msra.gmra.mrb[48].mxu1 %vm180_vm2, %v13356_v10 }
0x1e8f   :  { %11638 = vmatprep.mubr.msk.f32.mxu1 %vm12633_vm1, %v12632_v8 }
0x1ee2   :  { %v13376_v50 = vpop.f32.mrb[34].mxu0 }
0x1ee3   :  { %v13378_v15 = vpop.f32.mrb[35].mxu0 }
0x1f5d   :  { %v3895_v51 = vpop.f32.mrb[46].mxu1 }
0x1f5e   :  { %v3976_v16 = vmul.f32 0.35355338, %v3895_v51  ;;  %v11625_v57 = vpop.f32.mrb[47].mxu1 }
0x1f60   :  { %v3978_v60 = vsel %vm59_vm8, %v3976_v16, -10000.0 }
0x1f61   :  { %v3972_v62 = vpop.f32.mrb[48].mxu1  ;;  %v3980_v63 = vsel %vm180_vm2, %v3978_v60, -inf }
0x1f62   :  { %v3977_v0 = vmul.f32 0.35355338, %v3972_v62  ;;  %3981 = vmax.xlane.f32.xlu1 %v3980_v63  ;;  %v11630_v9 = vpop.f32.mrb[49].mxu1 }
0x1f64   :  { %v3979_v1 = vsel %vm60_vm9, %v3977_v0, -10000.0 }
0x1f65   :  { %v3983_v2 = vsel %vm180_vm2, %v3979_v1, -inf }
0x1f66   :  { %3984 = vmax.xlane.f32.xlu0 %v3983_v2 }
0x1f73   :  { %4002 = vrot.lane.b32.xlu1 %v13358_v4, %s12635_s12 }
0x1f77   :  { %4156 = vrot.lane.b32.xlu1 %v13358_v4, %s12636_s2 }
0x1f7b   :  { %4234 = vrot.lane.b32.xlu1 %v13356_v10, %s12636_s2 }
0x1f7c   :  { %4078 = vrot.lane.b32.xlu0 %v13356_v10, %s12635_s12 }
0x1fef   :  { %v3982_v12 = vpop.xlane.xlu1 %3981 }
0x1ff0   :  { %v3986_v6 = vsub.f32 %v3978_v60, %v3982_v12 }
0x1ff2   :  { %v3988_v13 = vmul.f32 1.442695, %v3986_v6 }
0x1ff3   :  { %v4003_v18 = vpop.permute.xlu1 %4002  ;;  %v3985_v19 = vpop.xlane.xlu0 %3984 }
0x1ff4   :  { %12422 = vpow2.f32 %v3988_v13  ;;  %v3987_v21 = vsub.f32 %v3979_v1, %v3985_v19  ;;  %11632 = vmatpush3.msra.mxu0 %v4003_v18 }
0x1ff5   :  { %11641 = vmatprep.subr.mxu0 %v12632_v8 }
0x1ff6   :  { %v3990_v22 = vmul.f32 1.442695, %v3987_v21 }
0x1ff7   :  { %v4079_v23 = vpop.permute.xlu0 %4078  ;;  %v4157_v29 = vpop.permute.xlu1 %4156 }
0x1ff8   :  { %12424 = vpow2.f32 %v3990_v22  ;;  %11637 = vmatpush3.msra.mxu1 %v4079_v23 }
0x1ff9   :  { %11646 = vmatprep.subr.mxu1 %v12632_v8 }
0x1ffb   :  { %v4235_v30 = vpop.permute.xlu1 %4234 }
0x1ffe   :  { %v12423_v25 = vpop.eup %12422 }
0x1fff   :  { %v3992_v26 = vsel %vm180_vm2, %v12423_v25, 0.0 }
0x2000   :  { %3993 = vadd.xlane.f32.xlu1 %v3992_v26 }
0x2002   :  { %v12425_v27 = vpop.eup %12424 }
0x2003   :  { %v3995_v28 = vsel %vm180_vm2, %v12425_v27, 0.0 }
0x2004   :  { %3996 = vadd.xlane.f32.xlu0 %v3995_v28 }
0x2011   :  { %4232 = vrot.lane.b32.xlu1 %v13356_v10, %s12637_s13 }
0x201a   :  { %4154 = vrot.lane.b32.xlu0 %v13358_v4, %s12637_s13 }
0x208d   :  { %v3994_v31 = vpop.xlane.xlu1 %3993 }
0x208e   :  { %12426 = vrcp.f32 %v3994_v31 }
0x2091   :  { %v3997_v33 = vpop.xlane.xlu0 %3996  ;;  %v4233_v40 = vpop.permute.xlu1 %4232 }
0x2092   :  { %12428 = vrcp.f32 %v3997_v33 }
0x2095   :  { %v4155_v39 = vpop.permute.xlu0 %4154 }
0x2098   :  { %v12427_v34 = vpop.eup %12426 }
0x2099   :  { %v3999_v35 = vmul.f32 %v12427_v34, %v12423_v25 }
0x209b   :  { %11634 = vmatmul.mubr.msk.f32.vlgmr.msra.gmra.mrb[36].mxu0 %vm180_vm2, %v3999_v35 }
0x209c   :  { %v12429_v37 = vpop.eup %12428  ;;  %11642 = vmatpush3.xpose.msk.msra.mxu0 %vm180_vm2, %v4157_v29  ;;  %11643 = vmatprep.mubr.msk.f32.mxu0 %vm12633_vm1, %v12632_v8 }
0x209d   :  { %v4001_v38 = vmul.f32 %v12429_v37, %v12425_v27  ;;  %11651 = vmatprep.subr.mxu0 %v12632_v8 }
0x209f   :  { %11639 = vmatmul.mubr.msk.f32.vlgmr.msra.gmra.mrb[50].mxu1 %vm180_vm2, %v4001_v38  ;;  %11644 = vmatmul.mubr.msk.f32.vlgmr.msra.gmra.mrb[38].mxu0 %vm180_vm2, %v4155_v39 }
0x20a0   :  { %11647 = vmatpush3.xpose.msk.msra.mxu1 %vm180_vm2, %v4235_v30  ;;  %11648 = vmatprep.mubr.msk.f32.mxu1 %vm12633_vm1, %v12632_v8 }
0x20a1   :  { %11656 = vmatprep.subr.mxu1 %v12632_v8  ;;  %11653 = vmatprep.mubr.msk.f32.mxu0 %vm12633_vm1, %v12632_v8 }
0x20a3   :  { %11649 = vmatmul.mubr.msk.f32.vlgmr.msra.gmra.mrb[52].mxu1 %vm180_vm2, %v4233_v40 }
0x20a4   :  { %11658 = vmatprep.mubr.msk.f32.mxu1 %vm12633_vm1, %v12632_v8 }
0x216e   :  { %v13430_v52 = vpop.f32.mrb[36].mxu0 }
0x216f   :  { %v11635_v42 = vpop.f32.mrb[37].mxu0 }
0x2172   :  { %v13432_v36 = vpop.f32.mrb[50].mxu1  ;;  %v4228_v43 = vpop.f32.mrb[38].mxu0 }
0x2173   :  { %v4310_v44 = vmul.f32 0.35355338, %v4228_v43  ;;  %v11640_v45 = vpop.f32.mrb[51].mxu1  ;;  %v11645_v46 = vpop.f32.mrb[39].mxu0 }
0x2175   :  { %v4312_v47 = vsel %vm59_vm8, %v4310_v44, -10000.0 }
0x2176   :  { %v4306_v24 = vpop.f32.mrb[52].mxu1  ;;  %v4314_v48 = vsel %vm180_vm2, %v4312_v47, -inf }
0x2177   :  { %v4311_v3 = vmul.f32 0.35355338, %v4306_v24  ;;  %v11650_v49 = vpop.f32.mrb[53].mxu1  ;;  %4315 = vmax.xlane.f32.xlu0 %v4314_v48 }
0x2179   :  { %v4313_v51 = vsel %vm60_vm9, %v4311_v3, -10000.0 }
0x217a   :  { %v4317_v16 = vsel %vm180_vm2, %v4313_v51, -inf }
0x217b   :  { %4318 = vmax.xlane.f32.xlu1 %v4317_v16 }
0x218c   :  { %4336 = vrot.lane.b32.xlu1 %v13358_v4, %s12638_s14 }
0x218d   :  { %4412 = vrot.lane.b32.xlu0 %v13356_v10, %s12638_s14 }
0x2190   :  { %4490 = vrot.lane.b32.xlu1 %v13358_v4, %s12640_s16 }
0x2194   :  { %4568 = vrot.lane.b32.xlu1 %v13356_v10, %s12640_s16 }
0x2198   :  { %4566 = vrot.lane.b32.xlu1 %v13356_v10, %s12639_s15 }
0x2204   :  { %v4316_v57 = vpop.xlane.xlu0 %4315 }
0x2205   :  { %v4320_v60 = vsub.f32 %v4312_v47, %v4316_v57 }
0x2207   :  { %v4322_v62 = vmul.f32 1.442695, %v4320_v60 }
0x2208   :  { %v4319_v63 = vpop.xlane.xlu1 %4318  ;;  %v4413_v0 = vpop.permute.xlu0 %4412 }
0x2209   :  { %12430 = vpow2.f32 %v4322_v62  ;;  %v4321_v9 = vsub.f32 %v4313_v51, %v4319_v63  ;;  %11657 = vmatpush3.msra.mxu1 %v4413_v0 }
0x220a   :  { %11666 = vmatprep.subr.mxu1 %v12632_v8 }
0x220b   :  { %v4324_v1 = vmul.f32 1.442695, %v4321_v9 }
0x220c   :  { %v4337_v2 = vpop.permute.xlu1 %4336 }
0x220d   :  { %12432 = vpow2.f32 %v4324_v1  ;;  %11652 = vmatpush3.msra.mxu0 %v4337_v2 }
0x220e   :  { %11661 = vmatprep.subr.mxu0 %v12632_v8 }
0x2210   :  { %v4491_v22 = vpop.permute.xlu1 %4490 }
0x2213   :  { %v12431_v12 = vpop.eup %12430 }
0x2214   :  { %v4326_v6 = vsel %vm180_vm2, %v12431_v12, 0.0  ;;  %v4569_v27 = vpop.permute.xlu1 %4568 }
0x2215   :  { %4327 = vadd.xlane.f32.xlu0 %v4326_v6 }
0x2217   :  { %v12433_v13 = vpop.eup %12432 }
0x2218   :  { %v4329_v18 = vsel %vm180_vm2, %v12433_v13, 0.0  ;;  %v4567_v30 = vpop.permute.xlu1 %4566 }
0x2219   :  { %4330 = vadd.xlane.f32.xlu0 %v4329_v18 }
0x222f   :  { %4488 = vrot.lane.b32.xlu0 %v13358_v4, %s12639_s15 }
0x22a2   :  { %v4328_v19 = vpop.xlane.xlu0 %4327 }
0x22a3   :  { %12434 = vrcp.f32 %v4328_v19 }
0x22a6   :  { %v4331_v21 = vpop.xlane.xlu0 %4330 }
0x22a7   :  { %12436 = vrcp.f32 %v4331_v21 }
0x22aa   :  { %v4489_v29 = vpop.permute.xlu0 %4488 }
0x22ad   :  { %v12435_v23 = vpop.eup %12434 }
0x22ae   :  { %v4333_v25 = vmul.f32 %v12435_v23, %v12431_v12 }
0x22b0   :  { %11654 = vmatmul.mubr.msk.f32.vlgmr.msra.gmra.mrb[40].mxu0 %vm180_vm2, %v4333_v25 }
0x22b1   :  { %v12437_v26 = vpop.eup %12436  ;;  %11662 = vmatpush3.xpose.msk.msra.mxu0 %vm180_vm2, %v4491_v22  ;;  %11663 = vmatprep.mubr.msk.f32.mxu0 %vm12633_vm1, %v12632_v8 }
0x22b2   :  { %v4335_v28 = vmul.f32 %v12437_v26, %v12433_v13  ;;  %11671 = vmatprep.subr.mxu0 %v12632_v8 }
0x22b4   :  { %11659 = vmatmul.mubr.msk.f32.vlgmr.msra.gmra.mrb[54].mxu1 %vm180_vm2, %v4335_v28  ;;  %11664 = vmatmul.mubr.msk.f32.vlgmr.msra.gmra.mrb[42].mxu0 %vm180_vm2, %v4489_v29 }
0x22b5   :  { %11667 = vmatpush3.xpose.msk.msra.mxu1 %vm180_vm2, %v4569_v27  ;;  %11668 = vmatprep.mubr.msk.f32.mxu1 %vm12633_vm1, %v12632_v8 }
0x22b6   :  { %11676 = vmatprep.subr.mxu1 %v12632_v8  ;;  %11673 = vmatprep.mubr.msk.f32.mxu0 %vm12633_vm1, %v12632_v8 }
0x22b8   :  { %11669 = vmatmul.mubr.msk.f32.vlgmr.msra.gmra.mrb[56].mxu1 %vm180_vm2, %v4567_v30 }
0x22b9   :  { %11678 = vmatprep.mubr.msk.f32.mxu1 %vm12633_vm1, %v12632_v8 }
0x2383   :  { %v13472_v31 = vpop.f32.mrb[40].mxu0 }
0x2384   :  { %v11655_v33 = vpop.f32.mrb[41].mxu0 }
0x2387   :  { %v13474_v34 = vpop.f32.mrb[54].mxu1  ;;  %v4562_v35 = vpop.f32.mrb[42].mxu0 }
0x2388   :  { %v4644_v37 = vmul.f32 0.35355338, %v4562_v35  ;;  %v11660_v38 = vpop.f32.mrb[55].mxu1  ;;  %v11665_v39 = vpop.f32.mrb[43].mxu0 }
0x238a   :  { %v4646_v40 = vsel %vm59_vm8, %v4644_v37, -10000.0 }
0x238b   :  { %v4640_v42 = vpop.f32.mrb[56].mxu1  ;;  %v4648_v43 = vsel %vm180_vm2, %v4646_v40, -inf }
0x238c   :  { %v4645_v44 = vmul.f32 0.35355338, %v4640_v42  ;;  %v11670_v45 = vpop.f32.mrb[57].mxu1  ;;  %4649 = vmax.xlane.f32.xlu0 %v4648_v43 }
0x238e   :  { %v4647_v46 = vsel %vm60_vm9, %v4645_v44, -10000.0 }
0x238f   :  { %v4651_v47 = vsel %vm180_vm2, %v4647_v46, -inf }
0x2390   :  { %4652 = vmax.xlane.f32.xlu1 %v4651_v47 }
0x23a1   :  { %4670 = vrot.lane.b32.xlu1 %v13358_v4, %s12641_s17 }
0x23a2   :  { %4746 = vrot.lane.b32.xlu0 %v13356_v10, %s12641_s17 }
0x23a5   :  { %4824 = vrot.lane.b32.xlu1 %v13358_v4, %s12642_s19 }
0x23a9   :  { %4902 = vrot.lane.b32.xlu1 %v13356_v10, %s12642_s19 }
0x23ad   :  { %4900 = vrot.lane.b32.xlu1 %v13356_v10, %s12643_s20 }
0x2419   :  { %v4650_v24 = vpop.xlane.xlu0 %4649 }
0x241a   :  { %v4654_v48 = vsub.f32 %v4646_v40, %v4650_v24 }
0x241c   :  { %v4656_v3 = vmul.f32 1.442695, %v4654_v48 }
0x241d   :  { %v4653_v49 = vpop.xlane.xlu1 %4652  ;;  %v4747_v51 = vpop.permute.xlu0 %4746 }
0x241e   :  { %12438 = vpow2.f32 %v4656_v3  ;;  %v4655_v16 = vsub.f32 %v4647_v46, %v4653_v49  ;;  %11677 = vmatpush3.msra.mxu1 %v4747_v51 }
0x241f   :  { %11686 = vmatprep.subr.mxu1 %v12632_v8 }
0x2420   :  { %v4658_v57 = vmul.f32 1.442695, %v4655_v16 }
0x2421   :  { %v4671_v60 = vpop.permute.xlu1 %4670 }
0x2422   :  { %12440 = vpow2.f32 %v4658_v57  ;;  %11672 = vmatpush3.msra.mxu0 %v4671_v60 }
0x2423   :  { %11681 = vmatprep.subr.mxu0 %v12632_v8 }
0x2425   :  { %v4825_v12 = vpop.permute.xlu1 %4824 }
0x2428   :  { %v12439_v62 = vpop.eup %12438 }
0x2429   :  { %v4660_v63 = vsel %vm180_vm2, %v12439_v62, 0.0  ;;  %v4903_v19 = vpop.permute.xlu1 %4902 }
0x242a   :  { %4661 = vadd.xlane.f32.xlu0 %v4660_v63 }
0x242c   :  { %v12441_v0 = vpop.eup %12440 }
0x242d   :  { %v4663_v9 = vsel %vm180_vm2, %v12441_v0, 0.0  ;;  %v4901_v23 = vpop.permute.xlu1 %4900 }
0x242e   :  { %4664 = vadd.xlane.f32.xlu0 %v4663_v9  ;;  %v3702_v9 = vld [vmem:[#allocation2 + $0x40] sm:$0xff] }
0x2444   :  { %4822 = vrot.lane.b32.xlu0 %v13358_v4, %s12643_s20 }
0x24b7   :  { %v4662_v1 = vpop.xlane.xlu0 %4661 }
0x24b8   :  { %12442 = vrcp.f32 %v4662_v1  ;;  %v3703_v1 = vld [vmem:[#allocation2 + $0x48] sm:$0xff] }
0x24bb   :  { %v4665_v2 = vpop.xlane.xlu0 %4664 }
0x24bc   :  { %12444 = vrcp.f32 %v4665_v2  ;;  %v12199_v2 = vpack.c.bf16 %v3703_v1, %v3702_v9 }
0x24bf   :  { %v4823_v22 = vpop.permute.xlu0 %4822 }
0x24c2   :  { %v12443_v6 = vpop.eup %12442 }
0x24c3   :  { %v4667_v13 = vmul.f32 %v12443_v6, %v12439_v62 }
0x24c5   :  { %11674 = vmatmul.mubr.msk.f32.vlgmr.msra.gmra.mrb[44].mxu0 %vm180_vm2, %v4667_v13 }
0x24c6   :  { %v12445_v18 = vpop.eup %12444  ;;  %11682 = vmatpush3.xpose.msk.msra.mxu0 %vm180_vm2, %v4825_v12  ;;  %11683 = vmatprep.mubr.msk.f32.mxu0 %vm12633_vm1, %v12632_v8  ;;  %v3705_v12 = vld [vmem:[#allocation2 + $0x58] sm:$0xff] }
0x24c7   :  { %v4669_v21 = vmul.f32 %v12445_v18, %v12441_v0  ;;  %11691 = vmatprep.subr.mxu0 %v12632_v8 }
0x24c9   :  { %11679 = vmatmul.mubr.msk.f32.vlgmr.msra.gmra.mrb[58].mxu1 %vm180_vm2, %v4669_v21  ;;  %11684 = vmatmul.mubr.msk.f32.vlgmr.msra.gmra.mrb[46].mxu0 %vm180_vm2, %v4823_v22  ;;  %v12578_v22 = vld [vmem:[%s14297_s6 + $0x8] sm:$0xff] }
0x24ca   :  { %11687 = vmatpush3.xpose.msk.msra.mxu1 %vm180_vm2, %v4903_v19  ;;  %11688 = vmatprep.mubr.msk.f32.mxu1 %vm12633_vm1, %v12632_v8 }
0x24cb   :  { %11696 = vmatprep.subr.mxu1 %v12632_v8  ;;  %11693 = vmatprep.mubr.msk.f32.mxu0 %vm12633_vm1, %v12632_v8 }
0x24cd   :  { %11689 = vmatmul.mubr.msk.f32.vlgmr.msra.gmra.mrb[60].mxu1 %vm180_vm2, %v4901_v23  ;;  %v3573_v23 = vrot.slane %v12578_v22, %v13035_v61 }
0x24ce   :  { %11698 = vmatprep.mubr.msk.f32.mxu1 %vm12633_vm1, %v12632_v8 }
0x2598   :  { %v4742_v25 = vpop.f32.mrb[44].mxu0 }
0x2599   :  { %v11675_v26 = vpop.f32.mrb[45].mxu0 }
0x259c   :  { %v4818_v27 = vpop.f32.mrb[58].mxu1  ;;  %v4896_v28 = vpop.f32.mrb[46].mxu0 }
0x259d   :  { %v4978_v29 = vmul.f32 0.35355338, %v4896_v28  ;;  %v11680_v30 = vpop.f32.mrb[59].mxu1  ;;  %v11685_v33 = vpop.f32.mrb[47].mxu0  ;;  %v3652_v28 = vadd.f32 %v13376_v50, %v3573_v23 }
0x259f   :  { %v4980_v35 = vsel %vm59_vm8, %v4978_v29, -10000.0  ;;  %v3656_v29 = vadd.f32 %v3652_v28, %v13315_v17 }
0x25a0   :  { %v4974_v37 = vpop.f32.mrb[60].mxu1  ;;  %v4982_v38 = vsel %vm180_vm2, %v4980_v35, -inf }
0x25a1   :  { %v4979_v39 = vmul.f32 0.35355338, %v4974_v37  ;;  %v11690_v40 = vpop.f32.mrb[61].mxu1  ;;  %4983 = vmax.xlane.f32.xlu0 %v4982_v38  ;;  %v3660_v30 = vsel %vm95_vm0, %v3656_v29, 0.0 }
0x25a3   :  { %v4981_v42 = vsel %vm60_vm9, %v4979_v39, -10000.0 }
0x25a4   :  { %v4985_v43 = vsel %vm180_vm2, %v4981_v42, -inf }
0x25a5   :  { %4986 = vmax.xlane.f32.xlu1 %v4985_v43 }
0x25b6   :  { %5004 = vrot.lane.b32.xlu1 %v13358_v4, %s14314_s3 }
0x25ba   :  { %5158 = vrot.lane.b32.xlu1 %v13472_v31, %s14315_s30 }
0x25be   :  { %5160 = vrot.lane.b32.xlu1 %v13474_v34, %s14315_s30 }
0x25c2   :  { %5168 = vrot.lane.b32.xlu1 %v4818_v27, %s14312_s26 }
0x262e   :  { %v4984_v44 = vpop.xlane.xlu0 %4983 }
0x262f   :  { %v4988_v45 = vsub.f32 %v4980_v35, %v4984_v44 }
0x2631   :  { %v4990_v46 = vmul.f32 1.442695, %v4988_v45 }
0x2632   :  { %v4987_v47 = vpop.xlane.xlu1 %4986 }
0x2633   :  { %12446 = vpow2.f32 %v4990_v46  ;;  %v4989_v24 = vsub.f32 %v4981_v42, %v4987_v47 }
0x2635   :  { %v4992_v48 = vmul.f32 1.442695, %v4989_v24 }
0x2636   :  { %v5005_v3 = vpop.permute.xlu1 %5004 }
0x2637   :  { %12448 = vpow2.f32 %v4992_v48  ;;  %11692 = vmatpush3.msra.mxu0 %v5005_v3 }
0x2638   :  { %12200 = vmatprep.subr.bf16.mxu0 %v12199_v2 }
0x263a   :  { %v5159_v33 = vpop.permute.xlu1 %5158 }
0x263b   :  { %v5180_v38 = vsel %vm180_vm2, %v13430_v52, %v5159_v33 }
0x263d   :  { %v12447_v49 = vpop.eup %12446 }
0x263e   :  { %v4994_v4 = vsel %vm180_vm2, %v12447_v49, 0.0  ;;  %v5161_v35 = vpop.permute.xlu1 %5160 }
0x263f   :  { %4995 = vadd.xlane.f32.xlu0 %v4994_v4  ;;  %v5181_v17 = vsel %vm180_vm2, %v13432_v36, %v5161_v35  ;;  %v5189_v36 = vrot.slane %v13348_v20, %v12966_v59 }
0x2641   :  { %v12449_v31 = vpop.eup %12448 }
0x2642   :  { %v4997_v51 = vsel %vm180_vm2, %v12449_v31, 0.0  ;;  %v5169_v39 = vpop.permute.xlu1 %5168 }
0x2643   :  { %4998 = vadd.xlane.f32.xlu0 %v4997_v51  ;;  %v5183_v50 = vsel %vm1538_vm6, %v5181_v17, %v5169_v39 }
0x2659   :  { %5080 = vrot.lane.b32.xlu0 %v13356_v10, %s14314_s3  ;;  %v3704_v10 = vld [vmem:[#allocation2 + $0x50] sm:$0xff] }
0x265a   :  { %v12203_v6 = vpack.c.bf16 %v3705_v12, %v3704_v10 }
0x265d   :  { %5166 = vrot.lane.b32.xlu0 %v4742_v25, %s14312_s26  ;;  %v3647_v25 = vadd.f32 %v13378_v15, %v3573_v23 }
0x265f   :  { %v3655_v26 = vadd.f32 %v3647_v25, %v13311_v32 }
0x2661   :  { %v3657_v27 = vsel %vm95_vm0, %v3655_v26, 0.0 }
0x26cc   :  { %v4996_v34 = vpop.xlane.xlu0 %4995 }
0x26cd   :  { %12450 = vrcp.f32 %v4996_v34 }
0x26d0   :  { %v4999_v16 = vpop.xlane.xlu0 %4998 }
0x26d1   :  { %12452 = vrcp.f32 %v4999_v16 }
0x26d4   :  { %v5081_v57 = vpop.permute.xlu0 %5080 }
0x26d5   :  { %11697 = vmatpush3.msra.mxu1 %v5081_v57 }
0x26d7   :  { %v12451_v60 = vpop.eup %12450 }
0x26d8   :  { %v5001_v62 = vmul.f32 %v12451_v60, %v12447_v49  ;;  %v5167_v37 = vpop.permute.xlu0 %5166  ;;  %v3686_v60 = vrot.slane %v12578_v22, %v13057_v53 }
0x26d9   :  { %v5182_v15 = vsel %vm1538_vm6, %v5180_v38, %v5167_v37 }
0x26da   :  { %11694 = vmatmul.mubr.msk.f32.vlgmr.msra.gmra.mrb[48].mxu0 %vm180_vm2, %v5001_v62 }
0x26db   :  { %v12453_v63 = vpop.eup %12452  ;;  %12202 = vmatpush3.bf16.msra.mxu0 %v12199_v2  ;;  %v3692_v2 = vrot.slane %v12578_v22, %v13060_v54  ;;  %v3715_v22 = vld [vmem:[#allocation2 + $0xd8] sm:$0xff] }
0x26dc   :  { %v5003_v0 = vmul.f32 %v12453_v63, %v12449_v31  ;;  %12204 = vmatprep.subr.bf16.mxu0 %v12203_v6 }
0x26de   :  { %11699 = vmatmul.mubr.msk.f32.vlgmr.msra.gmra.mrb[62].mxu1 %vm180_vm2, %v5003_v0 }
0x26df   :  { %12206 = vmatpush3.bf16.msra.mxu0 %v12203_v6 }
0x27ad   :  { %v5076_v13 = vpop.f32.mrb[48].mxu0 }
0x27ae   :  { %5174 = vrot.lane.b32.xlu0 %v5076_v13, %s14313_s25  ;;  %v11695_v18 = vpop.f32.mrb[49].mxu0 }
0x27af   :  { %v3713_v18 = vld [vmem:[#allocation2 + $0xc8] sm:$0xff] }
0x27b1   :  { %v5152_v19 = vpop.f32.mrb[62].mxu1 }
0x27b2   :  { %5176 = vrot.lane.b32.xlu1 %v5152_v19, %s14313_s25  ;;  %v11700_v21 = vpop.f32.mrb[63].mxu1 }
0x27b3   :  { %v3714_v21 = vld [vmem:[#allocation2 + $0xd0] sm:$0xff] }
0x27b4   :  { %v12219_v23 = vpack.c.bf16 %v3715_v22, %v3714_v21 }
0x27cd   :  { %3658 = vadd.xlane.f32.xlu0 %v3657_v27 }
0x27d6   :  { %3661 = vadd.xlane.f32.xlu1 %v3660_v30 }
0x2820   :  { %v5175_v32 = vpop.permute.xlu0 %5174 }
0x2821   :  { %v5184_v40 = vsel %vm1541_vm5, %v5182_v15, %v5175_v32 }
0x2822   :  { %11709 = vmatprep.mubr.msk.f32.mxu0 %vm95_vm0, %v5184_v40 }
0x2824   :  { %v5177_v42 = vpop.permute.xlu1 %5176 }
0x2825   :  { %v5185_v43 = vsel %vm1541_vm5, %v5183_v50, %v5177_v42 }
0x2826   :  { %11710 = vmatmul.mubr.msk.f32.vlgmr.msra.gmra.mrb[50].mxu0 %vm95_vm0, %v5185_v43  ;;  %v3707_v43 = vld [vmem:[#allocation2 + $0x80] sm:$0xff] }
0x285a   :  { %v3659_v44 = vpop.xlane.xlu0 %3658 }
0x285b   :  { %v3663_v52 = vmul.f32 0.03125, %v3659_v44  ;;  %v3708_v44 = vld [vmem:[#allocation2 + $0x88] sm:$0xff] }
0x285d   :  { %v3665_v45 = vsub.f32 %v3655_v26, %v3663_v52  ;;  %v12207_v52 = vpack.c.bf16 %v3708_v44, %v3707_v43 }
0x285f   :  { %v3667_v46 = vmul.f32 %v3665_v45, %v3665_v45  ;;  %12208 = vmatprep.subr.bf16.mxu1 %v12207_v52 }
0x2860   :  { %12210 = vmatpush3.bf16.msra.mxu1 %v12207_v52 }
0x2861   :  { %v3669_v47 = vsel %vm95_vm0, %v3667_v46, 0.0  ;;  %v3710_v46 = vld [vmem:[#allocation2 + $0x98] sm:$0xff] }
0x2862   :  { %3670 = vadd.xlane.f32.xlu1 %v3669_v47 }
0x2863   :  { %v3662_v24 = vpop.xlane.xlu1 %3661 }
0x2864   :  { %v3664_v31 = vmul.f32 0.03125, %v3662_v24 }
0x2866   :  { %v3666_v63 = vsub.f32 %v3656_v29, %v3664_v31  ;;  %v5302_v31 = vrot.slane %v13348_v20, %v13007_v55 }
0x2868   :  { %v3668_v13 = vmul.f32 %v3666_v63, %v3666_v63 }
0x28ef   :  { %v3671_v48 = vpop.xlane.xlu1 %3670 }
0x28f0   :  { %v3675_v3 = vmul.f32 0.03125, %v3671_v48 }
0x28f2   :  { %v3677_v49 = vadd.f32 1e-12, %v3675_v3 }
0x28f4   :  { %12454 = vrsqrt.f32 %v3677_v49 }
0x28f9   :  { %v11711_v4 = vpop.f32.mrb[50].mxu0 }
0x28fa   :  { %v5262_v51 = vpop.f32.mrb[51].mxu0  ;;  %v5268_v34 = vadd.f32 %v11711_v4, %v5189_v36 }
0x28fb   :  { %v5263_v16 = vadd.f32 %v5262_v51, %v5189_v36 }
0x28fc   :  { %v5272_v0 = vadd.f32 %v5268_v34, %v13329_v5  ;;  %v3712_v5 = vld [vmem:[#allocation2 + $0xc0] sm:$0xff] }
0x28fd   :  { %v5271_v57 = vadd.f32 %v5263_v16, %v13320_v7  ;;  %v3672_v7 = vsel %vm95_vm0, %v3668_v13, 0.0  ;;  %v12215_v19 = vpack.c.bf16 %v3713_v18, %v3712_v5  ;;  %v5308_v16 = vrot.slane %v13348_v20, %v13010_v56 }
0x28fe   :  { %v12455_v62 = vpop.eup %12454  ;;  %v5276_v12 = vsel %vm95_vm0, %v5272_v0, 0.0 }
0x28ff   :  { %v5273_v9 = vsel %vm95_vm0, %v5271_v57, 0.0  ;;  %v3681_v1 = vmul.f32 %v12455_v62, %v3665_v45  ;;  %12216 = vmatprep.subr.bf16.mxu0 %v12215_v19  ;;  %v3709_v45 = vld [vmem:[#allocation2 + $0x90] sm:$0xff] }
0x2900   :  { %5274 = vadd.xlane.f32.xlu0 %v5273_v9  ;;  %12218 = vmatpush3.bf16.msra.mxu0 %v12215_v19  ;;  %v12211_v47 = vpack.c.bf16 %v3710_v46, %v3709_v45 }
0x2901   :  { %v3687_v10 = vmul.f32 %v3686_v60, %v3681_v1  ;;  %12220 = vmatprep.subr.bf16.mxu0 %v12219_v23  ;;  %v5399_v1 = vrot.slane %v13348_v20, %v13035_v61 }
0x2902   :  { %12212 = vmatprep.subr.bf16.mxu1 %v12211_v47 }
0x2903   :  { %v13565_v6 = vadd.f32 %v3692_v2, %v3687_v10  ;;  %12214 = vmatpush3.bf16.msra.mxu1 %v12211_v47 }
0x2904   :  { %5277 = vadd.xlane.f32.xlu0 %v5276_v12  ;;  %12222 = vmatpush3.bf16.msra.mxu0 %v12219_v23 }
0x2905   :  { %11731 = vmatprep.mubr.msk.f32.mxu0 %vm95_vm0, %v13565_v6  ;;  %11744 = vmatprep.subr.mxu0 %v12632_v8 }
0x2906   :  { %11734 = vmatprep.subr.mxu1 %v12632_v8 }
0x2908   :  { %3673 = vadd.xlane.f32.xlu0 %v3672_v7  ;;  %v5314_v7 = vrot.slane %v13348_v20, %v13026_v14  ;;  %v13623_v20 = vld [vmem:[%s14295_s4] sm:$0xff] }
0x2909   :  { %vm63_vm10 = vcmp.gt.f32.partialorder %v13623_v20, 0.0 }
0x298d   :  { %v5275_v25 = vpop.xlane.xlu0 %5274 }
0x298e   :  { %v5279_v26 = vmul.f32 0.03125, %v5275_v25 }
0x2990   :  { %v5281_v27 = vsub.f32 %v5271_v57, %v5279_v26  ;;  %v13629_v26 = vld [vmem:[%s14295_s4 + $0x8] sm:$0xff] }
0x2991   :  { %v5278_v28 = vpop.xlane.xlu0 %5277  ;;  %vm64_vm11 = vcmp.gt.f32.partialorder %v13629_v26, 0.0 }
0x2992   :  { %v5280_v29 = vmul.f32 0.03125, %v5278_v28  ;;  %v5283_v30 = vmul.f32 %v5281_v27, %v5281_v27 }
0x2994   :  { %v5282_v33 = vsub.f32 %v5272_v0, %v5280_v29  ;;  %v5285_v35 = vsel %vm95_vm0, %v5283_v30, 0.0 }
0x2995   :  { %5286 = vadd.xlane.f32.xlu1 %v5285_v35  ;;  %v3674_v37 = vpop.xlane.xlu0 %3673 }
0x2996   :  { %v3676_v38 = vmul.f32 0.03125, %v3674_v37  ;;  %v5284_v39 = vmul.f32 %v5282_v33, %v5282_v33 }
0x2998   :  { %v3678_v15 = vadd.f32 1e-12, %v3676_v38  ;;  %v5288_v32 = vsel %vm95_vm0, %v5284_v39, 0.0 }
0x2999   :  { %5289 = vadd.xlane.f32.xlu0 %v5288_v32 }
0x299a   :  { %12456 = vrsqrt.f32 %v3678_v15 }
0x29a4   :  { %v12457_v40 = vpop.eup %12456 }
0x29a5   :  { %v3682_v17 = vmul.f32 %v12457_v40, %v3666_v63 }
0x29a7   :  { %v3688_v50 = vmul.f32 %v3686_v60, %v3682_v17 }
0x29a9   :  { %v13573_v42 = vadd.f32 %v3692_v2, %v3688_v50 }
0x29ab   :  { %11732 = vmatmul.mubr.msk.f32.vlgmr.msra.gmra.mrb[52].mxu0 %vm95_vm0, %v13573_v42 }
0x29ac   :  { %11746 = vmatprep.mubr.msk.f32.mxu0 %vm12633_vm1, %v12632_v8 }
0x2a22   :  { %v5287_v24 = vpop.xlane.xlu1 %5286 }
0x2a23   :  { %v5291_v48 = vmul.f32 0.03125, %v5287_v24 }
0x2a25   :  { %v5293_v3 = vadd.f32 1e-12, %v5291_v48 }
0x2a26   :  { %v5290_v49 = vpop.xlane.xlu0 %5289 }
0x2a27   :  { %12458 = vrsqrt.f32 %v5293_v3  ;;  %v5292_v36 = vmul.f32 0.03125, %v5290_v49 }
0x2a29   :  { %v5294_v4 = vadd.f32 1e-12, %v5292_v36 }
0x2a2b   :  { %12460 = vrsqrt.f32 %v5294_v4 }
0x2a31   :  { %v12459_v51 = vpop.eup %12458 }
0x2a32   :  { %v5297_v34 = vmul.f32 %v12459_v51, %v5281_v27 }
0x2a34   :  { %v5303_v57 = vmul.f32 %v5302_v31, %v5297_v34 }
0x2a35   :  { %v12461_v60 = vpop.eup %12460 }
0x2a36   :  { %v5298_v62 = vmul.f32 %v12461_v60, %v5282_v33  ;;  %v13584_v63 = vadd.f32 %v5308_v16, %v5303_v57 }
0x2a38   :  { %v5304_v0 = vmul.f32 %v5302_v31, %v5298_v62  ;;  %11720 = vmatprep.mubr.msk.f32.mxu1 %vm95_vm0, %v13584_v63 }
0x2a3a   :  { %v13588_v9 = vadd.f32 %v5308_v16, %v5304_v0 }
0x2a3c   :  { %11721 = vmatmul.mubr.msk.f32.vlgmr.msra.gmra.mrb[64].mxu1 %vm95_vm0, %v13588_v9 }
0x2a3d   :  { %11736 = vmatprep.mubr.msk.f32.mxu1 %vm12633_vm1, %v12632_v8 }
0x2a7e   :  { %v11733_v2 = vpop.f32.mrb[52].mxu0 }
0x2a7f   :  { %v13596_v10 = vadd.f32 %v11733_v2, %v5399_v1  ;;  %v5472_v12 = vpop.f32.mrb[53].mxu0 }
0x2a80   :  { %v13598_v13 = vadd.f32 %v5472_v12, %v5399_v1 }
0x2a82   :  { %11735 = vmatpush3.xpose.msk.msra.mxu1 %vm180_vm2, %v13598_v13 }
0x2a83   :  { %11739 = vmatprep.subr.mxu1 %v12632_v8 }
0x2b0f   :  { %v11722_v5 = vpop.f32.mrb[64].mxu1 }
0x2b10   :  { %v5387_v18 = vpop.f32.mrb[65].mxu1  ;;  %v13613_v21 = vadd.f32 %v11722_v5, %v5314_v7 }
0x2b11   :  { %v13605_v19 = vadd.f32 %v5387_v18, %v5314_v7 }
0x2b13   :  { %11737 = vmatmul.mubr.msk.f32.vlgmr.msra.gmra.mrb[66].mxu1 %vm180_vm2, %v13605_v19 }
0x2b14   :  { %11740 = vmatpush3.xpose.msk.msra.mxu1 %vm180_vm2, %v13596_v10  ;;  %11741 = vmatprep.mubr.msk.f32.mxu1 %vm12633_vm1, %v12632_v8 }
0x2b15   :  { %11749 = vmatprep.subr.mxu1 %v12632_v8 }
0x2b17   :  { %11742 = vmatmul.mubr.msk.f32.vlgmr.msra.gmra.mrb[68].mxu1 %vm180_vm2, %v13613_v21 }
0x2b18   :  { %11751 = vmatprep.mubr.msk.f32.mxu1 %vm12633_vm1, %v12632_v8 }
0x2be6   :  { %v5553_v22 = vpop.f32.mrb[66].mxu1 }
0x2be7   :  { %v5633_v23 = vmul.f32 0.35355338, %v5553_v22  ;;  %v11738_v25 = vpop.f32.mrb[67].mxu1 }
0x2be9   :  { %v5635_v27 = vsel %vm63_vm10, %v5633_v23, -10000.0 }
0x2bea   :  { %v5629_v28 = vpop.f32.mrb[68].mxu1  ;;  %v5637_v29 = vsel %vm180_vm2, %v5635_v27, -inf }
0x2beb   :  { %v5634_v30 = vmul.f32 0.35355338, %v5629_v28  ;;  %5638 = vmax.xlane.f32.xlu1 %v5637_v29  ;;  %v11743_v33 = vpop.f32.mrb[69].mxu1 }
0x2bed   :  { %v5636_v35 = vsel %vm64_vm11, %v5634_v30, -10000.0 }
0x2bee   :  { %v5640_v37 = vsel %vm180_vm2, %v5636_v35, -inf }
0x2bef   :  { %5641 = vmax.xlane.f32.xlu0 %v5640_v37 }
0x2bfc   :  { %5659 = vrot.lane.b32.xlu1 %v13598_v13, %s12634_s24 }
0x2c00   :  { %5813 = vrot.lane.b32.xlu1 %v13598_v13, %s12637_s13 }
0x2c04   :  { %5891 = vrot.lane.b32.xlu1 %v13596_v10, %s12637_s13 }
0x2c05   :  { %5735 = vrot.lane.b32.xlu0 %v13596_v10, %s12634_s24 }
0x2c78   :  { %v5639_v38 = vpop.xlane.xlu1 %5638 }
0x2c79   :  { %v5643_v39 = vsub.f32 %v5635_v27, %v5639_v38 }
0x2c7b   :  { %v5645_v15 = vmul.f32 1.442695, %v5643_v39 }
0x2c7c   :  { %v5660_v32 = vpop.permute.xlu1 %5659  ;;  %v5642_v40 = vpop.xlane.xlu0 %5641 }
0x2c7d   :  { %12462 = vpow2.f32 %v5645_v15  ;;  %v5644_v17 = vsub.f32 %v5636_v35, %v5642_v40  ;;  %11745 = vmatpush3.msra.mxu0 %v5660_v32 }
0x2c7e   :  { %11754 = vmatprep.subr.mxu0 %v12632_v8 }
0x2c7f   :  { %v5647_v50 = vmul.f32 1.442695, %v5644_v17 }
0x2c80   :  { %v5736_v43 = vpop.permute.xlu0 %5735  ;;  %v5814_v47 = vpop.permute.xlu1 %5813 }
0x2c81   :  { %12464 = vpow2.f32 %v5647_v50  ;;  %11750 = vmatpush3.msra.mxu1 %v5736_v43 }
0x2c82   :  { %11759 = vmatprep.subr.mxu1 %v12632_v8 }
0x2c84   :  { %v5892_v24 = vpop.permute.xlu1 %5891 }
0x2c87   :  { %v12463_v44 = vpop.eup %12462 }
0x2c88   :  { %v5649_v52 = vsel %vm180_vm2, %v12463_v44, 0.0 }
0x2c89   :  { %5650 = vadd.xlane.f32.xlu1 %v5649_v52 }
0x2c8b   :  { %v12465_v45 = vpop.eup %12464 }
0x2c8c   :  { %v5652_v46 = vsel %vm180_vm2, %v12465_v45, 0.0 }
0x2c8d   :  { %5653 = vadd.xlane.f32.xlu0 %v5652_v46 }
0x2c9a   :  { %5889 = vrot.lane.b32.xlu1 %v13613_v21, %s12637_s13 }
0x2ca3   :  { %5811 = vrot.lane.b32.xlu0 %v13605_v19, %s12637_s13 }
0x2d16   :  { %v5651_v48 = vpop.xlane.xlu1 %5650 }
0x2d17   :  { %12466 = vrcp.f32 %v5651_v48 }
0x2d1a   :  { %v5654_v3 = vpop.xlane.xlu0 %5653  ;;  %v5890_v34 = vpop.permute.xlu1 %5889 }
0x2d1b   :  { %12468 = vrcp.f32 %v5654_v3 }
0x2d1e   :  { %v5812_v51 = vpop.permute.xlu0 %5811 }
0x2d21   :  { %v12467_v49 = vpop.eup %12466 }
0x2d22   :  { %v5656_v36 = vmul.f32 %v12467_v49, %v12463_v44 }
0x2d24   :  { %11747 = vmatmul.mubr.msk.f32.vlgmr.msra.gmra.mrb[54].mxu0 %vm180_vm2, %v5656_v36 }
0x2d25   :  { %v12469_v4 = vpop.eup %12468  ;;  %11755 = vmatpush3.xpose.msk.msra.mxu0 %vm180_vm2, %v5814_v47  ;;  %11756 = vmatprep.mubr.msk.f32.mxu0 %vm12633_vm1, %v12632_v8 }
0x2d26   :  { %v5658_v31 = vmul.f32 %v12469_v4, %v12465_v45  ;;  %11764 = vmatprep.subr.mxu0 %v12632_v8 }
0x2d28   :  { %11752 = vmatmul.mubr.msk.f32.vlgmr.msra.gmra.mrb[70].mxu1 %vm180_vm2, %v5658_v31  ;;  %11757 = vmatmul.mubr.msk.f32.vlgmr.msra.gmra.mrb[56].mxu0 %vm180_vm2, %v5812_v51 }
0x2d29   :  { %11760 = vmatpush3.xpose.msk.msra.mxu1 %vm180_vm2, %v5892_v24  ;;  %11761 = vmatprep.mubr.msk.f32.mxu1 %vm12633_vm1, %v12632_v8 }
0x2d2a   :  { %11769 = vmatprep.subr.mxu1 %v12632_v8  ;;  %11766 = vmatprep.mubr.msk.f32.mxu0 %vm12633_vm1, %v12632_v8 }
0x2d2c   :  { %11762 = vmatmul.mubr.msk.f32.vlgmr.msra.gmra.mrb[72].mxu1 %vm180_vm2, %v5890_v34 }
0x2d2d   :  { %11771 = vmatprep.mubr.msk.f32.mxu1 %vm12633_vm1, %v12632_v8 }
0x2df7   :  { %v13670_v16 = vpop.f32.mrb[54].mxu0 }
0x2df8   :  { %v11748_v57 = vpop.f32.mrb[55].mxu0 }
0x2dfb   :  { %v13672_v60 = vpop.f32.mrb[70].mxu1  ;;  %v5885_v62 = vpop.f32.mrb[56].mxu0 }
0x2dfc   :  { %v5967_v0 = vmul.f32 0.35355338, %v5885_v62  ;;  %v11753_v1 = vpop.f32.mrb[71].mxu1  ;;  %v11758_v2 = vpop.f32.mrb[57].mxu0 }
0x2dfe   :  { %v5969_v12 = vsel %vm63_vm10, %v5967_v0, -10000.0 }
0x2dff   :  { %v5963_v7 = vpop.f32.mrb[72].mxu1  ;;  %v5971_v5 = vsel %vm180_vm2, %v5969_v12, -inf }
0x2e00   :  { %v5968_v18 = vmul.f32 0.35355338, %v5963_v7  ;;  %5972 = vmax.xlane.f32.xlu0 %v5971_v5  ;;  %v11763_v22 = vpop.f32.mrb[73].mxu1 }
0x2e02   :  { %v5970_v23 = vsel %vm64_vm11, %v5968_v18, -10000.0 }
0x2e03   :  { %v5974_v25 = vsel %vm180_vm2, %v5970_v23, -inf }
0x2e04   :  { %5975 = vmax.xlane.f32.xlu1 %v5974_v25 }
0x2e15   :  { %5993 = vrot.lane.b32.xlu1 %v13598_v13, %s12636_s2 }
0x2e16   :  { %6069 = vrot.lane.b32.xlu0 %v13596_v10, %s12636_s2 }
0x2e19   :  { %6147 = vrot.lane.b32.xlu1 %v13598_v13, %s12639_s15 }
0x2e1d   :  { %6225 = vrot.lane.b32.xlu1 %v13596_v10, %s12639_s15 }
0x2e21   :  { %6223 = vrot.lane.b32.xlu1 %v13613_v21, %s12639_s15 }
0x2e8d   :  { %v5973_v27 = vpop.xlane.xlu0 %5972 }
0x2e8e   :  { %v5977_v28 = vsub.f32 %v5969_v12, %v5973_v27 }
0x2e90   :  { %v5979_v29 = vmul.f32 1.442695, %v5977_v28 }
0x2e91   :  { %v6070_v30 = vpop.permute.xlu0 %6069  ;;  %v5976_v33 = vpop.xlane.xlu1 %5975 }
0x2e92   :  { %12470 = vpow2.f32 %v5979_v29  ;;  %v5978_v35 = vsub.f32 %v5970_v23, %v5976_v33  ;;  %11770 = vmatpush3.msra.mxu1 %v6070_v30 }
0x2e93   :  { %11779 = vmatprep.subr.mxu1 %v12632_v8 }
0x2e94   :  { %v5981_v37 = vmul.f32 1.442695, %v5978_v35 }
0x2e95   :  { %v5994_v38 = vpop.permute.xlu1 %5993 }
0x2e96   :  { %12472 = vpow2.f32 %v5981_v37  ;;  %11765 = vmatpush3.msra.mxu0 %v5994_v38 }
0x2e97   :  { %11774 = vmatprep.subr.mxu0 %v12632_v8 }
0x2e99   :  { %v6148_v43 = vpop.permute.xlu1 %6147 }
0x2e9c   :  { %v12471_v39 = vpop.eup %12470 }
0x2e9d   :  { %v5983_v15 = vsel %vm180_vm2, %v12471_v39, 0.0  ;;  %v6226_v46 = vpop.permute.xlu1 %6225 }
0x2e9e   :  { %5984 = vadd.xlane.f32.xlu0 %v5983_v15 }
0x2ea0   :  { %v12473_v32 = vpop.eup %12472 }
0x2ea1   :  { %v5986_v40 = vsel %vm180_vm2, %v12473_v32, 0.0  ;;  %v6224_v48 = vpop.permute.xlu1 %6223 }
0x2ea2   :  { %5987 = vadd.xlane.f32.xlu0 %v5986_v40 }
0x2eb8   :  { %6145 = vrot.lane.b32.xlu0 %v13605_v19, %s12639_s15 }
0x2f2b   :  { %v5985_v17 = vpop.xlane.xlu0 %5984 }
0x2f2c   :  { %12474 = vrcp.f32 %v5985_v17 }
0x2f2f   :  { %v5988_v50 = vpop.xlane.xlu0 %5987 }
0x2f30   :  { %12476 = vrcp.f32 %v5988_v50 }
0x2f33   :  { %v6146_v24 = vpop.permute.xlu0 %6145 }
0x2f36   :  { %v12475_v44 = vpop.eup %12474 }
0x2f37   :  { %v5990_v52 = vmul.f32 %v12475_v44, %v12471_v39 }
0x2f39   :  { %11767 = vmatmul.mubr.msk.f32.vlgmr.msra.gmra.mrb[58].mxu0 %vm180_vm2, %v5990_v52 }
0x2f3a   :  { %v12477_v45 = vpop.eup %12476  ;;  %11775 = vmatpush3.xpose.msk.msra.mxu0 %vm180_vm2, %v6148_v43  ;;  %11776 = vmatprep.mubr.msk.f32.mxu0 %vm12633_vm1, %v12632_v8 }
0x2f3b   :  { %v5992_v47 = vmul.f32 %v12477_v45, %v12473_v32  ;;  %11784 = vmatprep.subr.mxu0 %v12632_v8 }
0x2f3d   :  { %11772 = vmatmul.mubr.msk.f32.vlgmr.msra.gmra.mrb[74].mxu1 %vm180_vm2, %v5992_v47  ;;  %11777 = vmatmul.mubr.msk.f32.vlgmr.msra.gmra.mrb[60].mxu0 %vm180_vm2, %v6146_v24 }
0x2f3e   :  { %11780 = vmatpush3.xpose.msk.msra.mxu1 %vm180_vm2, %v6226_v46  ;;  %11781 = vmatprep.mubr.msk.f32.mxu1 %vm12633_vm1, %v12632_v8 }
0x2f3f   :  { %11789 = vmatprep.subr.mxu1 %v12632_v8  ;;  %11786 = vmatprep.mubr.msk.f32.mxu0 %vm12633_vm1, %v12632_v8 }
0x2f41   :  { %11782 = vmatmul.mubr.msk.f32.vlgmr.msra.gmra.mrb[76].mxu1 %vm180_vm2, %v6224_v48 }
0x2f42   :  { %11791 = vmatprep.mubr.msk.f32.mxu1 %vm12633_vm1, %v12632_v8 }
0x300c   :  { %v13712_v3 = vpop.f32.mrb[58].mxu0 }
0x300d   :  { %v11768_v49 = vpop.f32.mrb[59].mxu0 }
0x3010   :  { %v13714_v36 = vpop.f32.mrb[74].mxu1  ;;  %v6219_v4 = vpop.f32.mrb[60].mxu0 }
0x3011   :  { %v6301_v31 = vmul.f32 0.35355338, %v6219_v4  ;;  %v11773_v51 = vpop.f32.mrb[75].mxu1  ;;  %v11778_v34 = vpop.f32.mrb[61].mxu0 }
0x3013   :  { %v6303_v57 = vsel %vm63_vm10, %v6301_v31, -10000.0 }
0x3014   :  { %v6297_v62 = vpop.f32.mrb[76].mxu1  ;;  %v6305_v0 = vsel %vm180_vm2, %v6303_v57, -inf }
0x3015   :  { %v6302_v1 = vmul.f32 0.35355338, %v6297_v62  ;;  %6306 = vmax.xlane.f32.xlu0 %v6305_v0  ;;  %v11783_v2 = vpop.f32.mrb[77].mxu1 }
0x3017   :  { %v6304_v12 = vsel %vm64_vm11, %v6302_v1, -10000.0 }
0x3018   :  { %v6308_v7 = vsel %vm180_vm2, %v6304_v12, -inf }
0x3019   :  { %6309 = vmax.xlane.f32.xlu1 %v6308_v7 }
0x302a   :  { %6327 = vrot.lane.b32.xlu1 %v13598_v13, %s12640_s16 }
0x302b   :  { %6403 = vrot.lane.b32.xlu0 %v13596_v10, %s12640_s16 }
0x302e   :  { %6481 = vrot.lane.b32.xlu1 %v13598_v13, %s12643_s20 }
0x3032   :  { %6559 = vrot.lane.b32.xlu1 %v13596_v10, %s12643_s20 }
0x3036   :  { %6557 = vrot.lane.b32.xlu1 %v13613_v21, %s12643_s20 }
0x30a2   :  { %v6307_v5 = vpop.xlane.xlu0 %6306 }
0x30a3   :  { %v6311_v18 = vsub.f32 %v6303_v57, %v6307_v5 }
0x30a5   :  { %v6313_v22 = vmul.f32 1.442695, %v6311_v18 }
0x30a6   :  { %v6404_v23 = vpop.permute.xlu0 %6403  ;;  %v6310_v25 = vpop.xlane.xlu1 %6309 }
0x30a7   :  { %12478 = vpow2.f32 %v6313_v22  ;;  %v6312_v27 = vsub.f32 %v6304_v12, %v6310_v25  ;;  %11790 = vmatpush3.msra.mxu1 %v6404_v23 }
0x30a8   :  { %11799 = vmatprep.subr.mxu1 %v12632_v8 }
0x30a9   :  { %v6315_v28 = vmul.f32 1.442695, %v6312_v27 }
0x30aa   :  { %v6328_v29 = vpop.permute.xlu1 %6327 }
0x30ab   :  { %12480 = vpow2.f32 %v6315_v28  ;;  %11785 = vmatpush3.msra.mxu0 %v6328_v29 }
0x30ac   :  { %11794 = vmatprep.subr.mxu0 %v12632_v8 }
0x30ae   :  { %v6482_v39 = vpop.permute.xlu1 %6481 }
0x30b1   :  { %v12479_v30 = vpop.eup %12478 }
0x30b2   :  { %v6317_v33 = vsel %vm180_vm2, %v12479_v30, 0.0  ;;  %v6560_v17 = vpop.permute.xlu1 %6559 }
0x30b3   :  { %6318 = vadd.xlane.f32.xlu0 %v6317_v33 }
0x30b5   :  { %v12481_v21 = vpop.eup %12480 }
0x30b6   :  { %v6320_v35 = vsel %vm180_vm2, %v12481_v21, 0.0  ;;  %v6558_v43 = vpop.permute.xlu1 %6557 }
0x30b7   :  { %6321 = vadd.xlane.f32.xlu0 %v6320_v35  ;;  %v3718_v35 = vld [vmem:[#allocation2 + $0x108] sm:$0xff] }
0x30cd   :  { %6479 = vrot.lane.b32.xlu0 %v13605_v19, %s12643_s20 }
0x3140   :  { %v6319_v37 = vpop.xlane.xlu0 %6318 }
0x3141   :  { %12482 = vrcp.f32 %v6319_v37 }
0x3144   :  { %v6322_v38 = vpop.xlane.xlu0 %6321 }
0x3145   :  { %12484 = vrcp.f32 %v6322_v38  ;;  %v3720_v38 = vld [vmem:[#allocation2 + $0x118] sm:$0xff] }
0x3148   :  { %v6480_v19 = vpop.permute.xlu0 %6479 }
0x314b   :  { %v12483_v15 = vpop.eup %12482 }
0x314c   :  { %v6324_v32 = vmul.f32 %v12483_v15, %v12479_v30 }
0x314e   :  { %11787 = vmatmul.mubr.msk.f32.vlgmr.msra.gmra.mrb[62].mxu0 %vm180_vm2, %v6324_v32 }
0x314f   :  { %v12485_v40 = vpop.eup %12484  ;;  %11795 = vmatpush3.xpose.msk.msra.mxu0 %vm180_vm2, %v6482_v39  ;;  %11796 = vmatprep.mubr.msk.f32.mxu0 %vm12633_vm1, %v12632_v8 }
0x3150   :  { %v6326_v50 = vmul.f32 %v12485_v40, %v12481_v21  ;;  %11804 = vmatprep.subr.mxu0 %v12632_v8  ;;  %v3717_v21 = vld [vmem:[#allocation2 + $0x100] sm:$0xff] }
0x3151   :  { %v12223_v37 = vpack.c.bf16 %v3718_v35, %v3717_v21  ;;  %v3728_v21 = vld [vmem:[#allocation2 + $0x188] sm:$0xff]  ;;  %v3729_v35 = vld [vmem:[#allocation2 + $0x190] sm:$0xff] }
0x3152   :  { %11792 = vmatmul.mubr.msk.f32.vlgmr.msra.gmra.mrb[78].mxu1 %vm180_vm2, %v6326_v50  ;;  %11797 = vmatmul.mubr.msk.f32.vlgmr.msra.gmra.mrb[64].mxu0 %vm180_vm2, %v6480_v19 }
0x3153   :  { %11800 = vmatpush3.xpose.msk.msra.mxu1 %vm180_vm2, %v6560_v17  ;;  %11801 = vmatprep.mubr.msk.f32.mxu1 %vm12633_vm1, %v12632_v8 }
0x3154   :  { %11809 = vmatprep.subr.mxu1 %v12632_v8  ;;  %11806 = vmatprep.mubr.msk.f32.mxu0 %vm12633_vm1, %v12632_v8 }
0x3156   :  { %11802 = vmatmul.mubr.msk.f32.vlgmr.msra.gmra.mrb[80].mxu1 %vm180_vm2, %v6558_v43 }
0x3157   :  { %11811 = vmatprep.mubr.msk.f32.mxu1 %vm12633_vm1, %v12632_v8 }
0x3221   :  { %v6399_v44 = vpop.f32.mrb[62].mxu0 }
0x3222   :  { %v11788_v52 = vpop.f32.mrb[63].mxu0 }
0x3225   :  { %v6475_v45 = vpop.f32.mrb[78].mxu1  ;;  %v6553_v46 = vpop.f32.mrb[64].mxu0 }
0x3226   :  { %v6635_v47 = vmul.f32 0.35355338, %v6553_v46  ;;  %v11793_v24 = vpop.f32.mrb[79].mxu1  ;;  %v11798_v48 = vpop.f32.mrb[65].mxu0 }
0x3228   :  { %v6637_v49 = vsel %vm63_vm10, %v6635_v47, -10000.0 }
0x3229   :  { %v6631_v4 = vpop.f32.mrb[80].mxu1  ;;  %v6639_v31 = vsel %vm180_vm2, %v6637_v49, -inf }
0x322a   :  { %v6636_v51 = vmul.f32 0.35355338, %v6631_v4  ;;  %6640 = vmax.xlane.f32.xlu0 %v6639_v31  ;;  %v11803_v34 = vpop.f32.mrb[81].mxu1 }
0x322c   :  { %v6638_v57 = vsel %vm64_vm11, %v6636_v51, -10000.0 }
0x322d   :  { %v6642_v62 = vsel %vm180_vm2, %v6638_v57, -inf }
0x322e   :  { %6643 = vmax.xlane.f32.xlu1 %v6642_v62 }
0x323f   :  { %6661 = vrot.lane.b32.xlu1 %v13598_v13, %s12642_s19 }
0x3243   :  { %6815 = vrot.lane.b32.xlu1 %v13712_v3, %s14315_s30 }
0x3247   :  { %6817 = vrot.lane.b32.xlu1 %v13714_v36, %s14315_s30 }
0x324b   :  { %6825 = vrot.lane.b32.xlu1 %v6475_v45, %s14312_s26 }
0x32b7   :  { %v6641_v0 = vpop.xlane.xlu0 %6640 }
0x32b8   :  { %v6645_v1 = vsub.f32 %v6637_v49, %v6641_v0 }
0x32ba   :  { %v6647_v2 = vmul.f32 1.442695, %v6645_v1 }
0x32bb   :  { %v6644_v12 = vpop.xlane.xlu1 %6643 }
0x32bc   :  { %12486 = vpow2.f32 %v6647_v2  ;;  %v6646_v7 = vsub.f32 %v6638_v57, %v6644_v12 }
0x32be   :  { %v6649_v5 = vmul.f32 1.442695, %v6646_v7 }
0x32bf   :  { %v6662_v18 = vpop.permute.xlu1 %6661 }
0x32c0   :  { %12488 = vpow2.f32 %v6649_v5  ;;  %11805 = vmatpush3.msra.mxu0 %v6662_v18 }
0x32c1   :  { %12224 = vmatprep.subr.bf16.mxu0 %v12223_v37 }
0x32c3   :  { %v6816_v50 = vpop.permute.xlu1 %6815 }
0x32c6   :  { %v12487_v22 = vpop.eup %12486 }
0x32c7   :  { %v6651_v13 = vsel %vm180_vm2, %v12487_v22, 0.0  ;;  %v6818_v19 = vpop.permute.xlu1 %6817 }
0x32c8   :  { %6652 = vadd.xlane.f32.xlu0 %v6651_v13  ;;  %v6838_v24 = vsel %vm180_vm2, %v13672_v60, %v6818_v19 }
0x32ca   :  { %v12489_v3 = vpop.eup %12488 }
0x32cb   :  { %v6654_v23 = vsel %vm180_vm2, %v12489_v3, 0.0  ;;  %v6826_v52 = vpop.permute.xlu1 %6825 }
0x32cc   :  { %6655 = vadd.xlane.f32.xlu0 %v6654_v23  ;;  %v6840_v48 = vsel %vm1538_vm6, %v6838_v24, %v6826_v52  ;;  %v13799_v52 = vld [vmem:[%s14299_s8 + $0x8] sm:$0xff] }
0x32cd   :  { %v6965_v24 = vrot.slane %v13799_v52, %v12758_v11 }
0x32e2   :  { %6737 = vrot.lane.b32.xlu0 %v13596_v10, %s12642_s19  ;;  %v3719_v10 = vld [vmem:[#allocation2 + $0x110] sm:$0xff] }
0x32e3   :  { %v12227_v39 = vpack.c.bf16 %v3720_v38, %v3719_v10  ;;  %v3730_v10 = vld [vmem:[#allocation2 + $0x198] sm:$0xff] }
0x32e4   :  { %v12243_v38 = vpack.c.bf16 %v3730_v10, %v3729_v35 }
0x32e6   :  { %6823 = vrot.lane.b32.xlu0 %v6399_v44, %s14312_s26  ;;  %v6837_v44 = vsel %vm180_vm2, %v13670_v16, %v6816_v50  ;;  %v12579_v16 = vld [vmem:[%s14299_s8] sm:$0xff] }
0x32e7   :  { %v6846_v31 = vrot.slane %v12579_v16, %v13057_v53 }
0x3355   :  { %v6653_v36 = vpop.xlane.xlu0 %6652 }
0x3356   :  { %12490 = vrcp.f32 %v6653_v36 }
0x3359   :  { %v6656_v25 = vpop.xlane.xlu0 %6655 }
0x335a   :  { %12492 = vrcp.f32 %v6656_v25  ;;  %v3723_v25 = vld [vmem:[#allocation2 + $0x148] sm:$0xff] }
0x335d   :  { %v6738_v27 = vpop.permute.xlu0 %6737 }
0x335e   :  { %11810 = vmatpush3.msra.mxu1 %v6738_v27 }
0x3360   :  { %v12491_v28 = vpop.eup %12490 }
0x3361   :  { %v6658_v29 = vmul.f32 %v12491_v28, %v12487_v22  ;;  %v6824_v43 = vpop.permute.xlu0 %6823  ;;  %v3724_v28 = vld [vmem:[#allocation2 + $0x150] sm:$0xff] }
0x3362   :  { %v6839_v45 = vsel %vm1538_vm6, %v6837_v44, %v6824_v43 }
0x3363   :  { %11807 = vmatmul.mubr.msk.f32.vlgmr.msra.gmra.mrb[66].mxu0 %vm180_vm2, %v6658_v29  ;;  %v3725_v29 = vld [vmem:[#allocation2 + $0x158] sm:$0xff] }
0x3364   :  { %v12493_v30 = vpop.eup %12492  ;;  %12226 = vmatpush3.bf16.msra.mxu0 %v12223_v37 }
0x3365   :  { %v6660_v33 = vmul.f32 %v12493_v30, %v12489_v3  ;;  %12228 = vmatprep.subr.bf16.mxu0 %v12227_v39  ;;  %v12235_v30 = vpack.c.bf16 %v3725_v29, %v3724_v28 }
0x3367   :  { %11812 = vmatmul.mubr.msk.f32.vlgmr.msra.gmra.mrb[82].mxu1 %vm180_vm2, %v6660_v33  ;;  %v3727_v33 = vld [vmem:[#allocation2 + $0x180] sm:$0xff] }
0x3368   :  { %12230 = vmatpush3.bf16.msra.mxu0 %v12227_v39  ;;  %v12239_v37 = vpack.c.bf16 %v3728_v21, %v3727_v33  ;;  %v3731_v39 = vld [vmem:[#allocation2 + $0x1a0] sm:$0xff] }
0x336a   :  { %12240 = vmatprep.subr.bf16.mxu0 %v12239_v37 }
0x3436   :  { %v6733_v15 = vpop.f32.mrb[66].mxu0 }
0x3437   :  { %6831 = vrot.lane.b32.xlu0 %v6733_v15, %s14313_s25  ;;  %v11808_v32 = vpop.f32.mrb[67].mxu0  ;;  %v3732_v15 = vld [vmem:[#allocation2 + $0x1a8] sm:$0xff] }
0x3438   :  { %v12247_v32 = vpack.c.bf16 %v3732_v15, %v3731_v39  ;;  %v7181_v39 = vld [vmem:[#allocation2 + $0x1c0] sm:$0xff]  ;;  %v7182_v15 = vld [vmem:[#allocation2 + $0x1c8] sm:$0xff] }
0x343a   :  { %v6809_v40 = vpop.f32.mrb[82].mxu1 }
0x343b   :  { %6833 = vrot.lane.b32.xlu1 %v6809_v40, %s14313_s25  ;;  %v11813_v17 = vpop.f32.mrb[83].mxu1 }
0x34a9   :  { %v6832_v46 = vpop.permute.xlu0 %6831 }
0x34aa   :  { %v6841_v47 = vsel %vm1541_vm5, %v6839_v45, %v6832_v46  ;;  %v6959_v45 = vrot.slane %v12579_v16, %v13060_v54  ;;  %v6971_v16 = vrot.slane %v13799_v52, %v12966_v59 }
0x34ab   :  { %11822 = vmatprep.mubr.msk.f32.mxu0 %vm95_vm0, %v6841_v47 }
0x34ad   :  { %v6834_v49 = vpop.permute.xlu1 %6833 }
0x34ae   :  { %v6842_v4 = vsel %vm1541_vm5, %v6840_v48, %v6834_v49 }
0x34af   :  { %11823 = vmatmul.mubr.msk.f32.vlgmr.msra.gmra.mrb[68].mxu0 %vm95_vm0, %v6842_v4 }
0x34b0   :  { %12242 = vmatpush3.bf16.msra.mxu0 %v12239_v37 }
0x34b1   :  { %12244 = vmatprep.subr.bf16.mxu0 %v12243_v38 }
0x34b4   :  { %12246 = vmatpush3.bf16.msra.mxu0 %v12243_v38 }
0x34b5   :  { %12248 = vmatprep.subr.bf16.mxu0 %v12247_v32 }
0x34b8   :  { %12250 = vmatpush3.bf16.msra.mxu0 %v12247_v32  ;;  %v12255_v32 = vpack.c.bf16 %v7182_v15, %v7181_v39 }
0x3582   :  { %v11824_v51 = vpop.f32.mrb[68].mxu0 }
0x3583   :  { %v6925_v34 = vadd.f32 %v11824_v51, %v6846_v31  ;;  %v6919_v57 = vpop.f32.mrb[69].mxu0 }
0x3584   :  { %v6920_v62 = vadd.f32 %v6919_v57, %v6846_v31  ;;  %v3733_v57 = vld [vmem:[#allocation2 + $0x1b0] sm:$0xff] }
0x3585   :  { %v6929_v0 = vadd.f32 %v6925_v34, %v13588_v9 }
0x3586   :  { %v6928_v60 = vadd.f32 %v6920_v62, %v13584_v63  ;;  %v3722_v63 = vld [vmem:[#allocation2 + $0x140] sm:$0xff]  ;;  %v3734_v62 = vld [vmem:[#allocation2 + $0x1b8] sm:$0xff] }
0x3587   :  { %v6933_v1 = vsel %vm95_vm0, %v6929_v0, 0.0  ;;  %v12231_v27 = vpack.c.bf16 %v3723_v25, %v3722_v63 }
0x3588   :  { %6934 = vadd.xlane.f32.xlu1 %v6933_v1  ;;  %v6930_v2 = vsel %vm95_vm0, %v6928_v60, 0.0 }
0x3589   :  { %6931 = vadd.xlane.f32.xlu0 %v6930_v2  ;;  %12232 = vmatprep.subr.bf16.mxu1 %v12231_v27 }
0x358a   :  { %12234 = vmatpush3.bf16.msra.mxu1 %v12231_v27 }
0x358b   :  { %12236 = vmatprep.subr.bf16.mxu1 %v12235_v30 }
0x358e   :  { %12238 = vmatpush3.bf16.msra.mxu1 %v12235_v30 }
0x358f   :  { %12256 = vmatprep.subr.bf16.mxu1 %v12255_v32 }
0x3615   :  { %v6935_v12 = vpop.xlane.xlu1 %6934 }
0x3616   :  { %v6937_v7 = vmul.f32 0.03125, %v6935_v12  ;;  %v6932_v5 = vpop.xlane.xlu0 %6931 }
0x3617   :  { %v6936_v18 = vmul.f32 0.03125, %v6932_v5 }
0x3618   :  { %v6939_v22 = vsub.f32 %v6929_v0, %v6937_v7  ;;  %v12251_v0 = vpack.c.bf16 %v3734_v62, %v3733_v57 }
0x3619   :  { %v6938_v13 = vsub.f32 %v6928_v60, %v6936_v18  ;;  %v7058_v18 = vrot.slane %v13799_v52, %v13007_v55 }
0x361a   :  { %v6941_v36 = vmul.f32 %v6939_v22, %v6939_v22  ;;  %12252 = vmatprep.subr.bf16.mxu0 %v12251_v0 }
0x361b   :  { %v6940_v3 = vmul.f32 %v6938_v13, %v6938_v13  ;;  %12254 = vmatpush3.bf16.msra.mxu0 %v12251_v0 }
0x361c   :  { %v6945_v9 = vsel %vm95_vm0, %v6941_v36, 0.0  ;;  %11876 = vmatprep.subr.mxu0 %v12632_v8 }
0x361d   :  { %v6942_v23 = vsel %vm95_vm0, %v6940_v3, 0.0 }
0x361e   :  { %6943 = vadd.xlane.f32.xlu0 %v6942_v23 }
0x3622   :  { %6946 = vadd.xlane.f32.xlu0 %v6945_v9 }
0x36ab   :  { %v6944_v40 = vpop.xlane.xlu0 %6943 }
0x36ac   :  { %v6948_v17 = vmul.f32 0.03125, %v6944_v40  ;;  %v7183_v40 = vld [vmem:[#allocation2 + $0x1d0] sm:$0xff] }
0x36ae   :  { %v6950_v50 = vadd.f32 1e-12, %v6948_v17  ;;  %v7184_v17 = vld [vmem:[#allocation2 + $0x1d8] sm:$0xff] }
0x36af   :  { %v6947_v19 = vpop.xlane.xlu0 %6946 }
0x36b0   :  { %12494 = vrsqrt.f32 %v6950_v50  ;;  %v6949_v43 = vmul.f32 0.03125, %v6947_v19  ;;  %v12259_v50 = vpack.c.bf16 %v7184_v17, %v7183_v40 }
0x36b2   :  { %v6951_v44 = vadd.f32 1e-12, %v6949_v43 }
0x36b4   :  { %12496 = vrsqrt.f32 %v6951_v44 }
0x36ba   :  { %v12495_v46 = vpop.eup %12494 }
0x36bb   :  { %v6954_v47 = vmul.f32 %v12495_v46, %v6938_v13 }
0x36bd   :  { %v6960_v48 = vmul.f32 %v6959_v45, %v6954_v47 }
0x36be   :  { %v12497_v49 = vpop.eup %12496 }
0x36bf   :  { %v6955_v4 = vmul.f32 %v12497_v49, %v6939_v22  ;;  %v6966_v31 = vadd.f32 %v6965_v24, %v6960_v48 }
0x36c1   :  { %v6961_v51 = vmul.f32 %v6959_v45, %v6955_v4  ;;  %11833 = vmatprep.mubr.msk.f32.mxu1 %vm95_vm0, %v6966_v31 }
0x36c3   :  { %v6967_v34 = vadd.f32 %v6965_v24, %v6961_v51  ;;  %v7171_v24 = vrot.slane %v13799_v52, %v13010_v56  ;;  %v7177_v51 = vrot.slane %v13799_v52, %v13026_v14 }
0x36c5   :  { %11834 = vmatmul.mubr.msk.f32.vlgmr.msra.gmra.mrb[84].mxu1 %vm95_vm0, %v6967_v34 }
0x36c6   :  { %12258 = vmatpush3.bf16.msra.mxu1 %v12255_v32 }
0x36c7   :  { %12260 = vmatprep.subr.bf16.mxu1 %v12259_v50 }
0x36ca   :  { %12262 = vmatpush3.bf16.msra.mxu1 %v12259_v50 }
0x36cb   :  { %11866 = vmatprep.subr.mxu1 %v12632_v8 }
0x3798   :  { %v11835_v60 = vpop.f32.mrb[84].mxu1 }
0x3799   :  { %v7050_v1 = vadd.f32 %v11835_v60, %v6971_v16  ;;  %v7044_v2 = vpop.f32.mrb[85].mxu1 }
0x379a   :  { %v7045_v12 = vadd.f32 %v7044_v2, %v6971_v16  ;;  %v13837_v16 = vld [vmem:[%s14299_s8 + $0x10] sm:$0xff] }
0x379b   :  { %v7054_v5 = vmax.f32 %v7050_v1, 0.0  ;;  %v7225_v52 = vrot.slane %v13837_v16, %v12758_v11 }
0x379c   :  { %v7053_v7 = vmax.f32 %v7045_v12, 0.0 }
0x379e   :  { %11852 = vmatprep.mubr.msk.f32.mxu0 %vm1761_vm7, %v7053_v7 }
0x379f   :  { %11853 = vmatmul.mubr.msk.f32.vlgmr.msra.gmra.mrb[70].mxu0 %vm1761_vm7, %v7054_v5 }
0x37a0   :  { %11878 = vmatprep.mubr.msk.f32.mxu0 %vm12633_vm1, %v12632_v8 }
0x3872   :  { %v11854_v22 = vpop.f32.mrb[70].mxu0 }
0x3873   :  { %v7137_v13 = vadd.f32 %v11854_v22, %v7058_v18  ;;  %v7131_v3 = vpop.f32.mrb[71].mxu0 }
0x3874   :  { %v7132_v23 = vadd.f32 %v7131_v3, %v7058_v18 }
0x3875   :  { %v7141_v36 = vadd.f32 %v7137_v13, %v6967_v34 }
0x3876   :  { %v7140_v9 = vadd.f32 %v7132_v23, %v6966_v31 }
0x3877   :  { %v7145_v63 = vsel %vm95_vm0, %v7141_v36, 0.0 }
0x3878   :  { %7146 = vadd.xlane.f32.xlu0 %v7145_v63  ;;  %v7142_v25 = vsel %vm95_vm0, %v7140_v9, 0.0 }
0x3879   :  { %7143 = vadd.xlane.f32.xlu1 %v7142_v25 }
0x3905   :  { %v7147_v27 = vpop.xlane.xlu0 %7146 }
0x3906   :  { %v7149_v28 = vmul.f32 0.03125, %v7147_v27  ;;  %v7144_v29 = vpop.xlane.xlu1 %7143 }
0x3907   :  { %v7148_v30 = vmul.f32 0.03125, %v7144_v29 }
0x3908   :  { %v7151_v33 = vsub.f32 %v7141_v36, %v7149_v28 }
0x3909   :  { %v7150_v21 = vsub.f32 %v7140_v9, %v7148_v30 }
0x390a   :  { %v7153_v35 = vmul.f32 %v7151_v33, %v7151_v33 }
0x390b   :  { %v7152_v37 = vmul.f32 %v7150_v21, %v7150_v21 }
0x390c   :  { %v7157_v10 = vsel %vm95_vm0, %v7153_v35, 0.0 }
0x390d   :  { %7158 = vadd.xlane.f32.xlu0 %v7157_v10  ;;  %v7154_v38 = vsel %vm95_vm0, %v7152_v37, 0.0 }
0x390e   :  { %7155 = vadd.xlane.f32.xlu1 %v7154_v38 }
0x399a   :  { %v7159_v19 = vpop.xlane.xlu0 %7158 }
0x399b   :  { %v7161_v43 = vmul.f32 0.03125, %v7159_v19  ;;  %v7156_v44 = vpop.xlane.xlu1 %7155 }
0x399c   :  { %v7160_v45 = vmul.f32 0.03125, %v7156_v44 }
0x399d   :  { %v7163_v46 = vadd.f32 1e-12, %v7161_v43 }
0x399e   :  { %v7162_v47 = vadd.f32 1e-12, %v7160_v45 }
0x399f   :  { %12498 = vrsqrt.f32 %v7163_v46 }
0x39a0   :  { %12500 = vrsqrt.f32 %v7162_v47 }
0x39a9   :  { %v12499_v48 = vpop.eup %12498 }
0x39aa   :  { %v12501_v49 = vpop.eup %12500  ;;  %v7167_v4 = vmul.f32 %v12499_v48, %v7151_v33 }
0x39ab   :  { %v7166_v31 = vmul.f32 %v12501_v49, %v7150_v21 }
0x39ac   :  { %v7173_v34 = vmul.f32 %v7171_v24, %v7167_v4 }
0x39ad   :  { %v7172_v57 = vmul.f32 %v7171_v24, %v7166_v31 }
0x39ae   :  { %v13826_v0 = vadd.f32 %v7177_v51, %v7173_v34 }
0x39af   :  { %v13824_v62 = vadd.f32 %v7177_v51, %v7172_v57 }
0x39b1   :  { %11863 = vmatprep.mubr.msk.f32.mxu1 %vm95_vm0, %v13824_v62 }
0x39b2   :  { %11864 = vmatmul.mubr.msk.f32.vlgmr.msra.gmra.mrb[86].mxu1 %vm95_vm0, %v13826_v0 }
0x39b3   :  { %11868 = vmatprep.mubr.msk.f32.mxu1 %vm12633_vm1, %v12632_v8 }
0x3a85   :  { %v11865_v60 = vpop.f32.mrb[86].mxu1 }
0x3a86   :  { %v13841_v1 = vadd.f32 %v11865_v60, %v7225_v52  ;;  %v7298_v2 = vpop.f32.mrb[87].mxu1 }
0x3a87   :  { %v13843_v12 = vadd.f32 %v7298_v2, %v7225_v52 }
0x3a88   :  { %7385 = vrot.lane.b32.xlu0 %v13841_v1, %s12634_s24 }
0x3a89   :  { %7308 = vrot.lane.b32.xlu1 %v13843_v12, %s12634_s24 }
0x3afa   :  { %v7386_v5 = vpop.permute.xlu0 %7385 }
0x3afb   :  { %v7309_v7 = vpop.permute.xlu1 %7308 }
0x3afc   :  { %11867 = vmatpush3.xpose.msk.msra.mxu1 %vm180_vm2, %v7309_v7 }
0x3afd   :  { %11871 = vmatprep.subr.mxu1 %v12632_v8 }
0x3aff   :  { %11869 = vmatmul.mubr.msk.f32.vlgmr.msra.gmra.mrb[88].mxu1 %vm180_vm2, %v13843_v12 }
0x3b00   :  { %11872 = vmatpush3.xpose.msk.msra.mxu1 %vm180_vm2, %v7386_v5  ;;  %11873 = vmatprep.mubr.msk.f32.mxu1 %vm12633_vm1, %v12632_v8 }
0x3b01   :  { %11881 = vmatprep.subr.mxu1 %v12632_v8 }
0x3b03   :  { %11874 = vmatmul.mubr.msk.f32.vlgmr.msra.gmra.mrb[90].mxu1 %vm180_vm2, %v13841_v1 }
0x3b04   :  { %11883 = vmatprep.mubr.msk.f32.mxu1 %vm12633_vm1, %v12632_v8 }
0x3bd2   :  { %v7380_v18 = vpop.f32.mrb[88].mxu1 }
0x3bd3   :  { %v7461_v22 = vmul.f32 0.35355338, %v7380_v18  ;;  %v11870_v13 = vpop.f32.mrb[89].mxu1 }
0x3bd5   :  { %v7463_v3 = vsel %vm59_vm8, %v7461_v22, -10000.0 }
0x3bd6   :  { %v7457_v23 = vpop.f32.mrb[90].mxu1  ;;  %v7465_v36 = vsel %vm180_vm2, %v7463_v3, -inf }
0x3bd7   :  { %v7462_v9 = vmul.f32 0.35355338, %v7457_v23  ;;  %7466 = vmax.xlane.f32.xlu1 %v7465_v36  ;;  %v11875_v63 = vpop.f32.mrb[91].mxu1 }
0x3bd9   :  { %v7464_v25 = vsel %vm60_vm9, %v7462_v9, -10000.0 }
0x3bda   :  { %v7468_v27 = vsel %vm180_vm2, %v7464_v25, -inf }
0x3bdb   :  { %7469 = vmax.xlane.f32.xlu0 %v7468_v27 }
0x3be8   :  { %7487 = vrot.lane.b32.xlu1 %v13843_v12, %s12635_s12 }
0x3bec   :  { %7641 = vrot.lane.b32.xlu1 %v13843_v12, %s12636_s2 }
0x3bf0   :  { %7719 = vrot.lane.b32.xlu1 %v13841_v1, %s12636_s2 }
0x3bf1   :  { %7563 = vrot.lane.b32.xlu0 %v13841_v1, %s12635_s12 }
0x3c64   :  { %v7467_v28 = vpop.xlane.xlu1 %7466 }
0x3c65   :  { %v7471_v29 = vsub.f32 %v7463_v3, %v7467_v28 }
0x3c67   :  { %v7473_v30 = vmul.f32 1.442695, %v7471_v29 }
0x3c68   :  { %v7488_v33 = vpop.permute.xlu1 %7487  ;;  %v7470_v21 = vpop.xlane.xlu0 %7469 }
0x3c69   :  { %12502 = vpow2.f32 %v7473_v30  ;;  %v7472_v35 = vsub.f32 %v7464_v25, %v7470_v21  ;;  %11877 = vmatpush3.msra.mxu0 %v7488_v33 }
0x3c6a   :  { %11886 = vmatprep.subr.mxu0 %v12632_v8 }
0x3c6b   :  { %v7475_v37 = vmul.f32 1.442695, %v7472_v35 }
0x3c6c   :  { %v7564_v10 = vpop.permute.xlu0 %7563  ;;  %v7642_v40 = vpop.permute.xlu1 %7641 }
0x3c6d   :  { %12504 = vpow2.f32 %v7475_v37  ;;  %11882 = vmatpush3.msra.mxu1 %v7564_v10 }
0x3c6e   :  { %11891 = vmatprep.subr.mxu1 %v12632_v8 }
0x3c70   :  { %v7720_v17 = vpop.permute.xlu1 %7719 }
0x3c73   :  { %v12503_v38 = vpop.eup %12502 }
0x3c74   :  { %v7477_v39 = vsel %vm180_vm2, %v12503_v38, 0.0 }
0x3c75   :  { %7478 = vadd.xlane.f32.xlu1 %v7477_v39 }
0x3c77   :  { %v12505_v15 = vpop.eup %12504 }
0x3c78   :  { %v7480_v32 = vsel %vm180_vm2, %v12505_v15, 0.0 }
0x3c79   :  { %7481 = vadd.xlane.f32.xlu0 %v7480_v32 }
0x3c86   :  { %7717 = vrot.lane.b32.xlu1 %v13841_v1, %s12637_s13 }
0x3c8f   :  { %7639 = vrot.lane.b32.xlu0 %v13843_v12, %s12637_s13 }
0x3d02   :  { %v7479_v50 = vpop.xlane.xlu1 %7478 }
0x3d03   :  { %12506 = vrcp.f32 %v7479_v50 }
0x3d06   :  { %v7482_v19 = vpop.xlane.xlu0 %7481  ;;  %v7718_v24 = vpop.permute.xlu1 %7717 }
0x3d07   :  { %12508 = vrcp.f32 %v7482_v19 }
0x3d0a   :  { %v7640_v47 = vpop.permute.xlu0 %7639 }
0x3d0d   :  { %v12507_v43 = vpop.eup %12506 }
0x3d0e   :  { %v7484_v44 = vmul.f32 %v12507_v43, %v12503_v38 }
0x3d10   :  { %11879 = vmatmul.mubr.msk.f32.vlgmr.msra.gmra.mrb[72].mxu0 %vm180_vm2, %v7484_v44 }
0x3d11   :  { %v12509_v45 = vpop.eup %12508  ;;  %11887 = vmatpush3.xpose.msk.msra.mxu0 %vm180_vm2, %v7642_v40  ;;  %11888 = vmatprep.mubr.msk.f32.mxu0 %vm12633_vm1, %v12632_v8 }
0x3d12   :  { %v7486_v46 = vmul.f32 %v12509_v45, %v12505_v15  ;;  %11896 = vmatprep.subr.mxu0 %v12632_v8 }
0x3d14   :  { %11884 = vmatmul.mubr.msk.f32.vlgmr.msra.gmra.mrb[92].mxu1 %vm180_vm2, %v7486_v46  ;;  %11889 = vmatmul.mubr.msk.f32.vlgmr.msra.gmra.mrb[74].mxu0 %vm180_vm2, %v7640_v47 }
0x3d15   :  { %11892 = vmatpush3.xpose.msk.msra.mxu1 %vm180_vm2, %v7720_v17  ;;  %11893 = vmatprep.mubr.msk.f32.mxu1 %vm12633_vm1, %v12632_v8 }
0x3d16   :  { %11901 = vmatprep.subr.mxu1 %v12632_v8  ;;  %11898 = vmatprep.mubr.msk.f32.mxu0 %vm12633_vm1, %v12632_v8 }
0x3d18   :  { %11894 = vmatmul.mubr.msk.f32.vlgmr.msra.gmra.mrb[94].mxu1 %vm180_vm2, %v7718_v24 }
0x3d19   :  { %11903 = vmatprep.mubr.msk.f32.mxu1 %vm12633_vm1, %v12632_v8 }
0x3de3   :  { %v13899_v48 = vpop.f32.mrb[72].mxu0 }
0x3de4   :  { %v11880_v49 = vpop.f32.mrb[73].mxu0 }
0x3de7   :  { %v13901_v4 = vpop.f32.mrb[92].mxu1  ;;  %v7713_v31 = vpop.f32.mrb[74].mxu0 }
0x3de8   :  { %v7795_v51 = vmul.f32 0.35355338, %v7713_v31  ;;  %v11885_v34 = vpop.f32.mrb[93].mxu1  ;;  %v11890_v57 = vpop.f32.mrb[75].mxu0 }
0x3dea   :  { %v7797_v52 = vsel %vm59_vm8, %v7795_v51, -10000.0 }
0x3deb   :  { %v7791_v60 = vpop.f32.mrb[94].mxu1  ;;  %v7799_v2 = vsel %vm180_vm2, %v7797_v52, -inf }
0x3dec   :  { %v7796_v7 = vmul.f32 0.35355338, %v7791_v60  ;;  %7800 = vmax.xlane.f32.xlu0 %v7799_v2  ;;  %v11895_v5 = vpop.f32.mrb[95].mxu1 }
0x3dee   :  { %v7798_v18 = vsel %vm60_vm9, %v7796_v7, -10000.0 }
0x3def   :  { %v7802_v22 = vsel %vm180_vm2, %v7798_v18, -inf }
0x3df0   :  { %7803 = vmax.xlane.f32.xlu1 %v7802_v22 }
0x3e01   :  { %7821 = vrot.lane.b32.xlu1 %v13843_v12, %s12638_s14 }
0x3e02   :  { %7897 = vrot.lane.b32.xlu0 %v13841_v1, %s12638_s14 }
0x3e05   :  { %7975 = vrot.lane.b32.xlu1 %v13843_v12, %s12640_s16 }
0x3e09   :  { %8053 = vrot.lane.b32.xlu1 %v13841_v1, %s12640_s16 }
0x3e0d   :  { %8051 = vrot.lane.b32.xlu1 %v13841_v1, %s12639_s15 }
0x3e79   :  { %v7801_v13 = vpop.xlane.xlu0 %7800 }
0x3e7a   :  { %v7805_v3 = vsub.f32 %v7797_v52, %v7801_v13 }
0x3e7c   :  { %v7807_v23 = vmul.f32 1.442695, %v7805_v3 }
0x3e7d   :  { %v7898_v36 = vpop.permute.xlu0 %7897  ;;  %v7804_v9 = vpop.xlane.xlu1 %7803 }
0x3e7e   :  { %12510 = vpow2.f32 %v7807_v23  ;;  %v7806_v63 = vsub.f32 %v7798_v18, %v7804_v9  ;;  %11902 = vmatpush3.msra.mxu1 %v7898_v36 }
0x3e7f   :  { %11911 = vmatprep.subr.mxu1 %v12632_v8 }
0x3e80   :  { %v7809_v25 = vmul.f32 1.442695, %v7806_v63 }
0x3e81   :  { %v7822_v27 = vpop.permute.xlu1 %7821 }
0x3e82   :  { %12512 = vpow2.f32 %v7809_v25  ;;  %11897 = vmatpush3.msra.mxu0 %v7822_v27 }
0x3e83   :  { %11906 = vmatprep.subr.mxu0 %v12632_v8 }
0x3e85   :  { %v7976_v37 = vpop.permute.xlu1 %7975 }
0x3e88   :  { %v12511_v28 = vpop.eup %12510 }
0x3e89   :  { %v7811_v29 = vsel %vm180_vm2, %v12511_v28, 0.0  ;;  %v8054_v15 = vpop.permute.xlu1 %8053 }
0x3e8a   :  { %7812 = vadd.xlane.f32.xlu0 %v7811_v29 }
0x3e8c   :  { %v12513_v30 = vpop.eup %12512 }
0x3e8d   :  { %v7814_v33 = vsel %vm180_vm2, %v12513_v30, 0.0  ;;  %v8052_v17 = vpop.permute.xlu1 %8051 }
0x3e8e   :  { %7815 = vadd.xlane.f32.xlu0 %v7814_v33 }
0x3ea4   :  { %7973 = vrot.lane.b32.xlu0 %v13843_v12, %s12639_s15 }
0x3f17   :  { %v7813_v21 = vpop.xlane.xlu0 %7812 }
0x3f18   :  { %12514 = vrcp.f32 %v7813_v21 }
0x3f1b   :  { %v7816_v35 = vpop.xlane.xlu0 %7815 }
0x3f1c   :  { %12516 = vrcp.f32 %v7816_v35 }
0x3f1f   :  { %v7974_v40 = vpop.permute.xlu0 %7973 }
0x3f22   :  { %v12515_v10 = vpop.eup %12514 }
0x3f23   :  { %v7818_v38 = vmul.f32 %v12515_v10, %v12511_v28 }
0x3f25   :  { %11899 = vmatmul.mubr.msk.f32.vlgmr.msra.gmra.mrb[76].mxu0 %vm180_vm2, %v7818_v38 }
0x3f26   :  { %v12517_v39 = vpop.eup %12516  ;;  %11907 = vmatpush3.xpose.msk.msra.mxu0 %vm180_vm2, %v7976_v37  ;;  %11908 = vmatprep.mubr.msk.f32.mxu0 %vm12633_vm1, %v12632_v8 }
0x3f27   :  { %v7820_v32 = vmul.f32 %v12517_v39, %v12513_v30  ;;  %11916 = vmatprep.subr.mxu0 %v12632_v8 }
0x3f29   :  { %11904 = vmatmul.mubr.msk.f32.vlgmr.msra.gmra.mrb[96].mxu1 %vm180_vm2, %v7820_v32  ;;  %11909 = vmatmul.mubr.msk.f32.vlgmr.msra.gmra.mrb[78].mxu0 %vm180_vm2, %v7974_v40 }
0x3f2a   :  { %11912 = vmatpush3.xpose.msk.msra.mxu1 %vm180_vm2, %v8054_v15  ;;  %11913 = vmatprep.mubr.msk.f32.mxu1 %vm12633_vm1, %v12632_v8 }
0x3f2b   :  { %11921 = vmatprep.subr.mxu1 %v12632_v8  ;;  %11918 = vmatprep.mubr.msk.f32.mxu0 %vm12633_vm1, %v12632_v8 }
0x3f2d   :  { %11914 = vmatmul.mubr.msk.f32.vlgmr.msra.gmra.mrb[98].mxu1 %vm180_vm2, %v8052_v17 }
0x3f2e   :  { %11923 = vmatprep.mubr.msk.f32.mxu1 %vm12633_vm1, %v12632_v8 }
0x3ff8   :  { %v13941_v50 = vpop.f32.mrb[76].mxu0 }
0x3ff9   :  { %v11900_v19 = vpop.f32.mrb[77].mxu0 }
0x3ffc   :  { %v13943_v43 = vpop.f32.mrb[96].mxu1  ;;  %v8047_v44 = vpop.f32.mrb[78].mxu0 }
0x3ffd   :  { %v8129_v45 = vmul.f32 0.35355338, %v8047_v44  ;;  %v11905_v46 = vpop.f32.mrb[97].mxu1  ;;  %v11910_v47 = vpop.f32.mrb[79].mxu0 }
0x3fff   :  { %v8131_v24 = vsel %vm59_vm8, %v8129_v45, -10000.0 }
0x4000   :  { %v8125_v49 = vpop.f32.mrb[98].mxu1  ;;  %v8133_v31 = vsel %vm180_vm2, %v8131_v24, -inf }
0x4001   :  { %v8130_v51 = vmul.f32 0.35355338, %v8125_v49  ;;  %8134 = vmax.xlane.f32.xlu0 %v8133_v31  ;;  %v11915_v34 = vpop.f32.mrb[99].mxu1 }
0x4003   :  { %v8132_v57 = vsel %vm60_vm9, %v8130_v51, -10000.0 }
0x4004   :  { %v8136_v52 = vsel %vm180_vm2, %v8132_v57, -inf }
0x4005   :  { %8137 = vmax.xlane.f32.xlu1 %v8136_v52 }
0x4016   :  { %8155 = vrot.lane.b32.xlu1 %v13843_v12, %s12641_s17 }
0x4017   :  { %8231 = vrot.lane.b32.xlu0 %v13841_v1, %s12641_s17 }
0x401a   :  { %8309 = vrot.lane.b32.xlu1 %v13843_v12, %s12642_s19 }
0x401e   :  { %8387 = vrot.lane.b32.xlu1 %v13841_v1, %s12642_s19 }
0x4022   :  { %8385 = vrot.lane.b32.xlu1 %v13841_v1, %s12643_s20 }
0x408e   :  { %v8135_v60 = vpop.xlane.xlu0 %8134 }
0x408f   :  { %v8139_v2 = vsub.f32 %v8131_v24, %v8135_v60 }
0x4091   :  { %v8141_v7 = vmul.f32 1.442695, %v8139_v2 }
0x4092   :  { %v8232_v5 = vpop.permute.xlu0 %8231  ;;  %v8138_v18 = vpop.xlane.xlu1 %8137 }
0x4093   :  { %12518 = vpow2.f32 %v8141_v7  ;;  %v8140_v22 = vsub.f32 %v8132_v57, %v8138_v18  ;;  %11922 = vmatpush3.msra.mxu1 %v8232_v5 }
0x4094   :  { %11931 = vmatprep.subr.mxu1 %v12632_v8 }
0x4095   :  { %v8143_v13 = vmul.f32 1.442695, %v8140_v22 }
0x4096   :  { %v8156_v3 = vpop.permute.xlu1 %8155 }
0x4097   :  { %12520 = vpow2.f32 %v8143_v13  ;;  %11917 = vmatpush3.msra.mxu0 %v8156_v3 }
0x4098   :  { %11926 = vmatprep.subr.mxu0 %v12632_v8 }
0x409a   :  { %v8310_v28 = vpop.permute.xlu1 %8309 }
0x409d   :  { %v12519_v23 = vpop.eup %12518 }
0x409e   :  { %v8145_v36 = vsel %vm180_vm2, %v12519_v23, 0.0  ;;  %v8388_v21 = vpop.permute.xlu1 %8387 }
0x409f   :  { %8146 = vadd.xlane.f32.xlu0 %v8145_v36  ;;  %v7186_v36 = vld [vmem:[#allocation2 + $0x200] sm:$0xff] }
0x40a1   :  { %v12521_v9 = vpop.eup %12520 }
0x40a2   :  { %v8148_v63 = vsel %vm180_vm2, %v12521_v9, 0.0  ;;  %v8386_v10 = vpop.permute.xlu1 %8385 }
0x40a3   :  { %8149 = vadd.xlane.f32.xlu0 %v8148_v63 }
0x40b9   :  { %8307 = vrot.lane.b32.xlu0 %v13843_v12, %s12643_s20 }
0x412c   :  { %v8147_v25 = vpop.xlane.xlu0 %8146 }
0x412d   :  { %12522 = vrcp.f32 %v8147_v25  ;;  %v7189_v25 = vld [vmem:[#allocation2 + $0x218] sm:$0xff] }
0x4130   :  { %v8150_v27 = vpop.xlane.xlu0 %8149 }
0x4131   :  { %12524 = vrcp.f32 %v8150_v27 }
0x4134   :  { %v8308_v37 = vpop.permute.xlu0 %8307 }
0x4137   :  { %v12523_v29 = vpop.eup %12522 }
0x4138   :  { %v8152_v30 = vmul.f32 %v12523_v29, %v12519_v23  ;;  %v7197_v29 = vld [vmem:[#allocation2 + $0x288] sm:$0xff] }
0x413a   :  { %11919 = vmatmul.mubr.msk.f32.vlgmr.msra.gmra.mrb[80].mxu0 %vm180_vm2, %v8152_v30 }
0x413b   :  { %v12525_v33 = vpop.eup %12524  ;;  %11927 = vmatpush3.xpose.msk.msra.mxu0 %vm180_vm2, %v8310_v28  ;;  %11928 = vmatprep.mubr.msk.f32.mxu0 %vm12633_vm1, %v12632_v8  ;;  %v7196_v28 = vld [vmem:[#allocation2 + $0x280] sm:$0xff] }
0x413c   :  { %v8154_v35 = vmul.f32 %v12525_v33, %v12521_v9  ;;  %11936 = vmatprep.subr.mxu0 %v12632_v8  ;;  %v7187_v9 = vld [vmem:[#allocation2 + $0x208] sm:$0xff]  ;;  %v12279_v30 = vpack.c.bf16 %v7197_v29, %v7196_v28 }
0x413d   :  { %v12263_v63 = vpack.c.bf16 %v7187_v9, %v7186_v36  ;;  %v7193_v9 = vld [vmem:[#allocation2 + $0x250] sm:$0xff] }
0x413e   :  { %11924 = vmatmul.mubr.msk.f32.vlgmr.msra.gmra.mrb[100].mxu1 %vm180_vm2, %v8154_v35  ;;  %11929 = vmatmul.mubr.msk.f32.vlgmr.msra.gmra.mrb[82].mxu0 %vm180_vm2, %v8308_v37 }
0x413f   :  { %11932 = vmatpush3.xpose.msk.msra.mxu1 %vm180_vm2, %v8388_v21  ;;  %11933 = vmatprep.mubr.msk.f32.mxu1 %vm12633_vm1, %v12632_v8 }
0x4140   :  { %11941 = vmatprep.subr.mxu1 %v12632_v8  ;;  %11938 = vmatprep.mubr.msk.f32.mxu0 %vm12633_vm1, %v12632_v8 }
0x4142   :  { %11934 = vmatmul.mubr.msk.f32.vlgmr.msra.gmra.mrb[102].mxu1 %vm180_vm2, %v8386_v10 }
0x4143   :  { %11943 = vmatprep.mubr.msk.f32.mxu1 %vm12633_vm1, %v12632_v8 }
0x420d   :  { %v8227_v38 = vpop.f32.mrb[80].mxu0 }
0x420e   :  { %v11920_v39 = vpop.f32.mrb[81].mxu0 }
0x4211   :  { %v8303_v15 = vpop.f32.mrb[100].mxu1  ;;  %v8381_v32 = vpop.f32.mrb[82].mxu0 }
0x4212   :  { %v8463_v40 = vmul.f32 0.35355338, %v8381_v32  ;;  %v11925_v17 = vpop.f32.mrb[101].mxu1  ;;  %v11930_v19 = vpop.f32.mrb[83].mxu0 }
0x4214   :  { %v8465_v44 = vsel %vm59_vm8, %v8463_v40, -10000.0 }
0x4215   :  { %v8459_v45 = vpop.f32.mrb[102].mxu1  ;;  %v8467_v46 = vsel %vm180_vm2, %v8465_v44, -inf }
0x4216   :  { %v8464_v47 = vmul.f32 0.35355338, %v8459_v45  ;;  %8468 = vmax.xlane.f32.xlu0 %v8467_v46  ;;  %v11935_v24 = vpop.f32.mrb[103].mxu1  ;;  %v7199_v45 = vld [vmem:[#allocation2 + $0x298] sm:$0xff] }
0x4218   :  { %v8466_v49 = vsel %vm60_vm9, %v8464_v47, -10000.0 }
0x4219   :  { %v8470_v31 = vsel %vm180_vm2, %v8466_v49, -inf }
0x421a   :  { %8471 = vmax.xlane.f32.xlu1 %v8470_v31 }
0x422b   :  { %8489 = vrot.lane.b32.xlu1 %v13843_v12, %s14314_s3 }
0x422f   :  { %8643 = vrot.lane.b32.xlu1 %v13941_v50, %s14315_s30 }
0x4233   :  { %8645 = vrot.lane.b32.xlu1 %v13943_v43, %s14315_s30 }
0x4237   :  { %8653 = vrot.lane.b32.xlu1 %v8303_v15, %s14312_s26 }
0x42a3   :  { %v8469_v41 = vpop.xlane.xlu0 %8468 }
0x42a4   :  { %v8473_v51 = vsub.f32 %v8465_v44, %v8469_v41  ;;  %v7198_v44 = vld [vmem:[#allocation2 + $0x290] sm:$0xff] }
0x42a6   :  { %v8475_v34 = vmul.f32 1.442695, %v8473_v51 }
0x42a7   :  { %v8472_v57 = vpop.xlane.xlu1 %8471 }
0x42a8   :  { %12526 = vpow2.f32 %v8475_v34  ;;  %v8474_v58 = vsub.f32 %v8466_v49, %v8472_v57  ;;  %v12283_v49 = vpack.c.bf16 %v7199_v45, %v7198_v44  ;;  %v8799_v44 = vrot.slane %v13837_v16, %v13026_v14 }
0x42aa   :  { %v8477_v52 = vmul.f32 1.442695, %v8474_v58 }
0x42ab   :  { %v8490_v60 = vpop.permute.xlu1 %8489 }
0x42ac   :  { %12528 = vpow2.f32 %v8477_v52  ;;  %11937 = vmatpush3.msra.mxu0 %v8490_v60  ;;  %v8884_v52 = vrot.slane %v13837_v16, %v13035_v61 }
0x42ad   :  { %12264 = vmatprep.subr.bf16.mxu0 %v12263_v63 }
0x42af   :  { %v8644_v10 = vpop.permute.xlu1 %8643 }
0x42b0   :  { %v8665_v15 = vsel %vm180_vm2, %v13899_v48, %v8644_v10  ;;  %v8674_v48 = vrot.slane %v13837_v16, %v12966_v59  ;;  %v8793_v10 = vrot.slane %v13837_v16, %v13010_v56 }
0x42b2   :  { %v12527_v2 = vpop.eup %12526 }
0x42b3   :  { %v8479_v12 = vsel %vm180_vm2, %v12527_v2, 0.0 }
0x42b4   :  { %8480 = vadd.xlane.f32.xlu0 %v8479_v12 }
0x42b6   :  { %v12529_v50 = vpop.eup %12528 }
0x42b7   :  { %v8482_v7 = vsel %vm180_vm2, %v12529_v50, 0.0 }
0x42b8   :  { %8483 = vadd.xlane.f32.xlu0 %v8482_v7 }
0x42ce   :  { %8565 = vrot.lane.b32.xlu0 %v13841_v1, %s14314_s3  ;;  %v7188_v1 = vld [vmem:[#allocation2 + $0x210] sm:$0xff]  ;;  %s10758_s3 = sshll.u32 %s12647_s7, 4  ;;  %s10759_s3 = int_to_ptr.vmem [resolvable:$true] %s10758_s3 }
0x42cf   :  { %v12267_v27 = vpack.c.bf16 %v7189_v25, %v7188_v1  ;;  %s12603_s22 = scalar_lea.vmem %s10759_s3, 256  ;;  %p12608_p9 = scmp.lt.s32.totalorder %s10759_s3, %s10759_s3 }
0x42d0   :  { %p12604_p8 = scmp.ne.s32.totalorder %s10759_s3, %s12603_s22  ;;  %p12609_p10 = scmp.lt.s32.totalorder %s12603_s22, %s12603_s22 }
0x42d2   :  { %8651 = vrot.lane.b32.xlu0 %v8227_v38, %s14312_s26  ;;  %v8646_v38 = vpop.permute.xlu1 %8645  ;;  %p12610_p11 = por %p12609_p10, %p12608_p9 }
0x42d3   :  { %v8666_v46 = vsel %vm180_vm2, %v13901_v4, %v8646_v38 }
0x42d4   :  { %p12611_p12 = pnand %p12610_p11, %p12604_p8 }
0x42d6   :  { %v8654_v32 = vpop.permute.xlu1 %8653 }
0x42d7   :  { %v8668_v47 = vsel %vm1538_vm6, %v8666_v46, %v8654_v32 }
0x4341   :  { %v8481_v43 = vpop.xlane.xlu0 %8480 }
0x4342   :  { %12530 = vrcp.f32 %v8481_v43 }
0x4345   :  { %v8484_v5 = vpop.xlane.xlu0 %8483 }
0x4346   :  { %12532 = vrcp.f32 %v8484_v5 }
0x4349   :  { %v8566_v18 = vpop.permute.xlu0 %8565 }
0x434a   :  { %11942 = vmatpush3.msra.mxu1 %v8566_v18 }
0x434c   :  { %v12531_v22 = vpop.eup %12530 }
0x434d   :  { %v8486_v13 = vmul.f32 %v12531_v22, %v12527_v2  ;;  %v8652_v39 = vpop.permute.xlu0 %8651 }
0x434e   :  { %v8667_v40 = vsel %vm1538_vm6, %v8665_v15, %v8652_v39 }
0x434f   :  { %11939 = vmatmul.mubr.msk.f32.vlgmr.msra.gmra.mrb[84].mxu0 %vm180_vm2, %v8486_v13 }
0x4350   :  { %v12533_v3 = vpop.eup %12532  ;;  %12266 = vmatpush3.bf16.msra.mxu0 %v12263_v63  ;;  %v7194_v63 = vld [vmem:[#allocation2 + $0x258] sm:$0xff] }
0x4351   :  { %v8488_v23 = vmul.f32 %v12533_v3, %v12529_v50  ;;  %12268 = vmatprep.subr.bf16.mxu0 %v12267_v27  ;;  %v7191_v3 = vld [vmem:[#allocation2 + $0x240] sm:$0xff]  ;;  %v12275_v1 = vpack.c.bf16 %v7194_v63, %v7193_v9 }
0x4353   :  { %11944 = vmatmul.mubr.msk.f32.vlgmr.msra.gmra.mrb[104].mxu1 %vm180_vm2, %v8488_v23  ;;  %v7192_v23 = vld [vmem:[#allocation2 + $0x248] sm:$0xff] }
0x4354   :  { %12270 = vmatpush3.bf16.msra.mxu0 %v12267_v27  ;;  %v12271_v36 = vpack.c.bf16 %v7192_v23, %v7191_v3 }
0x4355   :  { %12280 = vmatprep.subr.bf16.mxu0 %v12279_v30 }
0x4356   :  { %12272 = vmatprep.subr.bf16.mxu1 %v12271_v36 }
0x4357   :  { %12274 = vmatpush3.bf16.msra.mxu1 %v12271_v36 }
0x4358   :  { %12276 = vmatprep.subr.bf16.mxu1 %v12275_v1 }
0x435b   :  { %12278 = vmatpush3.bf16.msra.mxu1 %v12275_v1 }
0x435c   :  { %11979 = vmatprep.subr.mxu1 %v12632_v8 }
0x4422   :  { %v8561_v33 = vpop.f32.mrb[84].mxu0 }
0x4423   :  { %8659 = vrot.lane.b32.xlu0 %v8561_v33, %s14313_s25  ;;  %v11940_v21 = vpop.f32.mrb[85].mxu0 }
0x4424   :  { %v8787_v21 = vrot.slane %v13837_v16, %v13007_v55 }
0x4426   :  { %v8637_v35 = vpop.f32.mrb[104].mxu1 }
0x4427   :  { %8661 = vrot.lane.b32.xlu1 %v8637_v35, %s14313_s25  ;;  %v11945_v37 = vpop.f32.mrb[105].mxu1 }
0x4495   :  { %v8660_v17 = vpop.permute.xlu0 %8659 }
0x4496   :  { %v8669_v19 = vsel %vm1541_vm5, %v8667_v40, %v8660_v17 }
0x4497   :  { %11954 = vmatprep.mubr.msk.f32.mxu0 %vm95_vm0, %v8669_v19 }
0x4499   :  { %v8662_v24 = vpop.permute.xlu1 %8661 }
0x449a   :  { %v8670_v31 = vsel %vm1541_vm5, %v8668_v47, %v8662_v24 }
0x449b   :  { %11955 = vmatmul.mubr.msk.f32.vlgmr.msra.gmra.mrb[86].mxu0 %vm95_vm0, %v8670_v31 }
0x449c   :  { %12282 = vmatpush3.bf16.msra.mxu0 %v12279_v30  ;;  %11976 = vmatprep.mubr.msk.f32.mxu0 %vm95_vm0, %v13565_v6 }
0x449d   :  { %12284 = vmatprep.subr.bf16.mxu0 %v12283_v49 }
0x44a0   :  { %12286 = vmatpush3.bf16.msra.mxu0 %v12283_v49 }
0x44a1   :  { %11989 = vmatprep.subr.mxu0 %v12632_v8 }
0x44a3   :  { %11977 = vmatmul.mubr.msk.f32.vlgmr.msra.gmra.mrb[88].mxu0 %vm95_vm0, %v13573_v42 }
0x44a4   :  { %11991 = vmatprep.mubr.msk.f32.mxu0 %vm12633_vm1, %v12632_v8 }
0x456e   :  { %v11956_v4 = vpop.f32.mrb[86].mxu0 }
0x456f   :  { %v8753_v41 = vadd.f32 %v11956_v4, %v8674_v48  ;;  %v8747_v51 = vpop.f32.mrb[87].mxu0 }
0x4570   :  { %v8748_v34 = vadd.f32 %v8747_v51, %v8674_v48 }
0x4571   :  { %v8757_v57 = vadd.f32 %v8753_v41, %v13826_v0 }
0x4572   :  { %v8756_v6 = vadd.f32 %v8748_v34, %v13824_v62 }
0x4573   :  { %v8761_v58 = vsel %vm95_vm0, %v8757_v57, 0.0 }
0x4574   :  { %8762 = vadd.xlane.f32.xlu1 %v8761_v58  ;;  %v8758_v42 = vsel %vm95_vm0, %v8756_v6, 0.0 }
0x4575   :  { %8759 = vadd.xlane.f32.xlu0 %v8758_v42 }
0x4576   :  { %v11978_v60 = vpop.f32.mrb[88].mxu0 }
0x4577   :  { %v14030_v2 = vadd.f32 %v11978_v60, %v8884_v52  ;;  %v8951_v12 = vpop.f32.mrb[89].mxu0 }
0x4578   :  { %v14045_v19 = vadd.f32 %v8951_v12, %v8884_v52 }
0x4601   :  { %v8763_v50 = vpop.xlane.xlu1 %8762 }
0x4602   :  { %v8765_v7 = vmul.f32 0.03125, %v8763_v50  ;;  %v8760_v43 = vpop.xlane.xlu0 %8759 }
0x4603   :  { %v8764_v5 = vmul.f32 0.03125, %v8760_v43 }
0x4604   :  { %v8767_v0 = vsub.f32 %v8757_v57, %v8765_v7 }
0x4605   :  { %v8766_v18 = vsub.f32 %v8756_v6, %v8764_v5 }
0x4606   :  { %v8769_v13 = vmul.f32 %v8767_v0, %v8767_v0 }
0x4607   :  { %v8768_v62 = vmul.f32 %v8766_v18, %v8766_v18 }
0x4608   :  { %v8773_v61 = vsel %vm95_vm0, %v8769_v13, 0.0 }
0x4609   :  { %v8770_v22 = vsel %vm95_vm0, %v8768_v62, 0.0 }
0x460a   :  { %8771 = vadd.xlane.f32.xlu0 %v8770_v22 }
0x460e   :  { %8774 = vadd.xlane.f32.xlu0 %v8773_v61 }
0x4697   :  { %v8772_v25 = vpop.xlane.xlu0 %8771 }
0x4698   :  { %v8776_v27 = vmul.f32 0.03125, %v8772_v25 }
0x469a   :  { %v8778_v28 = vadd.f32 1e-12, %v8776_v27 }
0x469b   :  { %v8775_v29 = vpop.xlane.xlu0 %8774 }
0x469c   :  { %12534 = vrsqrt.f32 %v8778_v28  ;;  %v8777_v30 = vmul.f32 0.03125, %v8775_v29 }
0x469e   :  { %v8779_v33 = vadd.f32 1e-12, %v8777_v30 }
0x46a0   :  { %12536 = vrsqrt.f32 %v8779_v33 }
0x46a6   :  { %v12535_v35 = vpop.eup %12534 }
0x46a7   :  { %v8782_v37 = vmul.f32 %v12535_v35, %v8766_v18 }
0x46a9   :  { %v8788_v38 = vmul.f32 %v8787_v21, %v8782_v37 }
0x46aa   :  { %v12537_v39 = vpop.eup %12536 }
0x46ab   :  { %v8783_v15 = vmul.f32 %v12537_v39, %v8767_v0  ;;  %v14039_v32 = vadd.f32 %v8793_v10, %v8788_v38 }
0x46ad   :  { %v8789_v40 = vmul.f32 %v8787_v21, %v8783_v15  ;;  %11965 = vmatprep.mubr.msk.f32.mxu1 %vm95_vm0, %v14039_v32 }
0x46af   :  { %v14043_v17 = vadd.f32 %v8793_v10, %v8789_v40 }
0x46b1   :  { %11966 = vmatmul.mubr.msk.f32.vlgmr.msra.gmra.mrb[106].mxu1 %vm95_vm0, %v14043_v17 }
0x46b2   :  { %11980 = vmatpush3.xpose.msk.msra.mxu1 %vm180_vm2, %v14045_v19  ;;  %11981 = vmatprep.mubr.msk.f32.mxu1 %vm12633_vm1, %v12632_v8 }
0x46b3   :  { %11984 = vmatprep.subr.mxu1 %v12632_v8 }
0x4784   :  { %v11967_v45 = vpop.f32.mrb[106].mxu1 }
0x4785   :  { %v8872_v46 = vpop.f32.mrb[107].mxu1  ;;  %v14064_v24 = vadd.f32 %v11967_v45, %v8799_v44 }
0x4786   :  { %v14056_v47 = vadd.f32 %v8872_v46, %v8799_v44 }
0x4788   :  { %11982 = vmatmul.mubr.msk.f32.vlgmr.msra.gmra.mrb[108].mxu1 %vm180_vm2, %v14056_v47 }
0x4789   :  { %11985 = vmatpush3.xpose.msk.msra.mxu1 %vm180_vm2, %v14030_v2  ;;  %11986 = vmatprep.mubr.msk.f32.mxu1 %vm12633_vm1, %v12632_v8 }
0x478a   :  { %11994 = vmatprep.subr.mxu1 %v12632_v8 }
0x478c   :  { %11987 = vmatmul.mubr.msk.f32.vlgmr.msra.gmra.mrb[110].mxu1 %vm180_vm2, %v14064_v24 }
0x478d   :  { %11996 = vmatprep.mubr.msk.f32.mxu1 %vm12633_vm1, %v12632_v8 }
0x485b   :  { %v9032_v16 = vpop.f32.mrb[108].mxu1 }
0x485c   :  { %v9112_v49 = vmul.f32 0.35355338, %v9032_v16  ;;  %v11983_v31 = vpop.f32.mrb[109].mxu1 }
0x485e   :  { %v9114_v48 = vsel %vm63_vm10, %v9112_v49, -10000.0 }
0x485f   :  { %v9108_v4 = vpop.f32.mrb[110].mxu1  ;;  %v9116_v41 = vsel %vm180_vm2, %v9114_v48, -inf }
0x4860   :  { %v9113_v51 = vmul.f32 0.35355338, %v9108_v4  ;;  %9117 = vmax.xlane.f32.xlu1 %v9116_v41  ;;  %v11988_v34 = vpop.f32.mrb[111].mxu1 }
0x4862   :  { %v9115_v57 = vsel %vm64_vm11, %v9113_v51, -10000.0 }
0x4863   :  { %v9119_v6 = vsel %vm180_vm2, %v9115_v57, -inf }
0x4864   :  { %9120 = vmax.xlane.f32.xlu0 %v9119_v6 }
0x4871   :  { %9138 = vrot.lane.b32.xlu1 %v14045_v19, %s12634_s24 }
0x4875   :  { %9292 = vrot.lane.b32.xlu1 %v14045_v19, %s12637_s13 }
0x4879   :  { %9370 = vrot.lane.b32.xlu1 %v14030_v2, %s12637_s13 }
0x487a   :  { %9214 = vrot.lane.b32.xlu0 %v14030_v2, %s12634_s24 }
0x48ed   :  { %v9118_v58 = vpop.xlane.xlu1 %9117 }
0x48ee   :  { %v9122_v52 = vsub.f32 %v9114_v48, %v9118_v58 }
0x48f0   :  { %v9124_v42 = vmul.f32 1.442695, %v9122_v52 }
0x48f1   :  { %v9139_v60 = vpop.permute.xlu1 %9138  ;;  %v9121_v12 = vpop.xlane.xlu0 %9120 }
0x48f2   :  { %12538 = vpow2.f32 %v9124_v42  ;;  %v9123_v50 = vsub.f32 %v9115_v57, %v9121_v12  ;;  %11990 = vmatpush3.msra.mxu0 %v9139_v60 }
0x48f3   :  { %11999 = vmatprep.subr.mxu0 %v12632_v8 }
0x48f4   :  { %v9126_v7 = vmul.f32 1.442695, %v9123_v50 }
0x48f5   :  { %v9215_v43 = vpop.permute.xlu0 %9214  ;;  %v9293_v22 = vpop.permute.xlu1 %9292 }
0x48f6   :  { %12540 = vpow2.f32 %v9126_v7  ;;  %11995 = vmatpush3.msra.mxu1 %v9215_v43 }
0x48f7   :  { %12004 = vmatprep.subr.mxu1 %v12632_v8 }
0x48f9   :  { %v9371_v13 = vpop.permute.xlu1 %9370 }
0x48fc   :  { %v12539_v5 = vpop.eup %12538 }
0x48fd   :  { %v9128_v0 = vsel %vm180_vm2, %v12539_v5, 0.0 }
0x48fe   :  { %9129 = vadd.xlane.f32.xlu1 %v9128_v0 }
0x4900   :  { %v12541_v18 = vpop.eup %12540 }
0x4901   :  { %v9131_v62 = vsel %vm180_vm2, %v12541_v18, 0.0 }
0x4902   :  { %9132 = vadd.xlane.f32.xlu0 %v9131_v62 }
0x490f   :  { %9368 = vrot.lane.b32.xlu1 %v14064_v24, %s12637_s13 }
0x4918   :  { %9290 = vrot.lane.b32.xlu0 %v14056_v47, %s12637_s13 }
0x498b   :  { %v9130_v61 = vpop.xlane.xlu1 %9129 }
0x498c   :  { %12542 = vrcp.f32 %v9130_v61 }
0x498f   :  { %v9133_v3 = vpop.xlane.xlu0 %9132  ;;  %v9369_v25 = vpop.permute.xlu1 %9368 }
0x4990   :  { %12544 = vrcp.f32 %v9133_v3 }
0x4993   :  { %v9291_v1 = vpop.permute.xlu0 %9290 }
0x4996   :  { %v12543_v23 = vpop.eup %12542 }
0x4997   :  { %v9135_v36 = vmul.f32 %v12543_v23, %v12539_v5 }
0x4999   :  { %11992 = vmatmul.mubr.msk.f32.vlgmr.msra.gmra.mrb[90].mxu0 %vm180_vm2, %v9135_v36 }
0x499a   :  { %v12545_v9 = vpop.eup %12544  ;;  %12000 = vmatpush3.xpose.msk.msra.mxu0 %vm180_vm2, %v9293_v22  ;;  %12001 = vmatprep.mubr.msk.f32.mxu0 %vm12633_vm1, %v12632_v8 }
0x499b   :  { %v9137_v63 = vmul.f32 %v12545_v9, %v12541_v18  ;;  %12009 = vmatprep.subr.mxu0 %v12632_v8 }
0x499d   :  { %11997 = vmatmul.mubr.msk.f32.vlgmr.msra.gmra.mrb[112].mxu1 %vm180_vm2, %v9137_v63  ;;  %12002 = vmatmul.mubr.msk.f32.vlgmr.msra.gmra.mrb[92].mxu0 %vm180_vm2, %v9291_v1 }
0x499e   :  { %12005 = vmatpush3.xpose.msk.msra.mxu1 %vm180_vm2, %v9371_v13  ;;  %12006 = vmatprep.mubr.msk.f32.mxu1 %vm12633_vm1, %v12632_v8 }
0x499f   :  { %12014 = vmatprep.subr.mxu1 %v12632_v8  ;;  %12011 = vmatprep.mubr.msk.f32.mxu0 %vm12633_vm1, %v12632_v8 }
0x49a1   :  { %12007 = vmatmul.mubr.msk.f32.vlgmr.msra.gmra.mrb[114].mxu1 %vm180_vm2, %v9369_v25 }
0x49a2   :  { %12016 = vmatprep.mubr.msk.f32.mxu1 %vm12633_vm1, %v12632_v8 }
0x4a6c   :  { %v14109_v27 = vpop.f32.mrb[90].mxu0 }
0x4a6d   :  { %v11993_v28 = vpop.f32.mrb[91].mxu0 }
0x4a70   :  { %v14111_v29 = vpop.f32.mrb[112].mxu1  ;;  %v9364_v30 = vpop.f32.mrb[92].mxu0 }
0x4a71   :  { %v9446_v33 = vmul.f32 0.35355338, %v9364_v30  ;;  %v11998_v21 = vpop.f32.mrb[113].mxu1  ;;  %v12003_v35 = vpop.f32.mrb[93].mxu0 }
0x4a73   :  { %v9448_v37 = vsel %vm63_vm10, %v9446_v33, -10000.0 }
0x4a74   :  { %v9442_v10 = vpop.f32.mrb[114].mxu1  ;;  %v9450_v38 = vsel %vm180_vm2, %v9448_v37, -inf }
0x4a75   :  { %v9447_v39 = vmul.f32 0.35355338, %v9442_v10  ;;  %9451 = vmax.xlane.f32.xlu0 %v9450_v38  ;;  %v12008_v15 = vpop.f32.mrb[115].mxu1 }
0x4a77   :  { %v9449_v40 = vsel %vm64_vm11, %v9447_v39, -10000.0 }
0x4a78   :  { %v9453_v44 = vsel %vm180_vm2, %v9449_v40, -inf }
0x4a79   :  { %9454 = vmax.xlane.f32.xlu1 %v9453_v44 }
0x4a8a   :  { %9472 = vrot.lane.b32.xlu1 %v14045_v19, %s12636_s2 }
0x4a8b   :  { %9548 = vrot.lane.b32.xlu0 %v14030_v2, %s12636_s2 }
0x4a8e   :  { %9626 = vrot.lane.b32.xlu1 %v14045_v19, %s12639_s15 }
0x4a92   :  { %9704 = vrot.lane.b32.xlu1 %v14030_v2, %s12639_s15 }
0x4a96   :  { %9702 = vrot.lane.b32.xlu1 %v14064_v24, %s12639_s15 }
0x4b02   :  { %v9452_v45 = vpop.xlane.xlu0 %9451 }
0x4b03   :  { %v9456_v46 = vsub.f32 %v9448_v37, %v9452_v45 }
0x4b05   :  { %v9458_v16 = vmul.f32 1.442695, %v9456_v46 }
0x4b06   :  { %v9549_v49 = vpop.permute.xlu0 %9548  ;;  %v9455_v31 = vpop.xlane.xlu1 %9454 }
0x4b07   :  { %12546 = vpow2.f32 %v9458_v16  ;;  %v9457_v48 = vsub.f32 %v9449_v40, %v9455_v31  ;;  %12015 = vmatpush3.msra.mxu1 %v9549_v49 }
0x4b08   :  { %12024 = vmatprep.subr.mxu1 %v12632_v8 }
0x4b09   :  { %v9460_v4 = vmul.f32 1.442695, %v9457_v48 }
0x4b0a   :  { %v9473_v41 = vpop.permute.xlu1 %9472 }
0x4b0b   :  { %12548 = vpow2.f32 %v9460_v4  ;;  %12010 = vmatpush3.msra.mxu0 %v9473_v41 }
0x4b0c   :  { %12019 = vmatprep.subr.mxu0 %v12632_v8 }
0x4b0e   :  { %v9627_v42 = vpop.permute.xlu1 %9626 }
0x4b11   :  { %v12547_v51 = vpop.eup %12546 }
0x4b12   :  { %v9462_v34 = vsel %vm180_vm2, %v12547_v51, 0.0  ;;  %v9705_v7 = vpop.permute.xlu1 %9704 }
0x4b13   :  { %9463 = vadd.xlane.f32.xlu0 %v9462_v34 }
0x4b15   :  { %v12549_v57 = vpop.eup %12548 }
0x4b16   :  { %v9465_v6 = vsel %vm180_vm2, %v12549_v57, 0.0  ;;  %v9703_v0 = vpop.permute.xlu1 %9702 }
0x4b17   :  { %9466 = vadd.xlane.f32.xlu0 %v9465_v6 }
0x4b2d   :  { %9624 = vrot.lane.b32.xlu0 %v14056_v47, %s12639_s15 }
0x4ba0   :  { %v9464_v58 = vpop.xlane.xlu0 %9463 }
0x4ba1   :  { %12550 = vrcp.f32 %v9464_v58 }
0x4ba4   :  { %v9467_v52 = vpop.xlane.xlu0 %9466 }
0x4ba5   :  { %12552 = vrcp.f32 %v9467_v52 }
0x4ba8   :  { %v9625_v5 = vpop.permute.xlu0 %9624 }
0x4bab   :  { %v12551_v60 = vpop.eup %12550 }
0x4bac   :  { %v9469_v12 = vmul.f32 %v12551_v60, %v12547_v51 }
0x4bae   :  { %12012 = vmatmul.mubr.msk.f32.vlgmr.msra.gmra.mrb[94].mxu0 %vm180_vm2, %v9469_v12 }
0x4baf   :  { %v12553_v50 = vpop.eup %12552  ;;  %12020 = vmatpush3.xpose.msk.msra.mxu0 %vm180_vm2, %v9627_v42  ;;  %12021 = vmatprep.mubr.msk.f32.mxu0 %vm12633_vm1, %v12632_v8 }
0x4bb0   :  { %v9471_v43 = vmul.f32 %v12553_v50, %v12549_v57  ;;  %12029 = vmatprep.subr.mxu0 %v12632_v8 }
0x4bb2   :  { %12017 = vmatmul.mubr.msk.f32.vlgmr.msra.gmra.mrb[116].mxu1 %vm180_vm2, %v9471_v43  ;;  %12022 = vmatmul.mubr.msk.f32.vlgmr.msra.gmra.mrb[96].mxu0 %vm180_vm2, %v9625_v5 }
0x4bb3   :  { %12025 = vmatpush3.xpose.msk.msra.mxu1 %vm180_vm2, %v9705_v7  ;;  %12026 = vmatprep.mubr.msk.f32.mxu1 %vm12633_vm1, %v12632_v8 }
0x4bb4   :  { %12034 = vmatprep.subr.mxu1 %v12632_v8  ;;  %12031 = vmatprep.mubr.msk.f32.mxu0 %vm12633_vm1, %v12632_v8 }
0x4bb6   :  { %12027 = vmatmul.mubr.msk.f32.vlgmr.msra.gmra.mrb[118].mxu1 %vm180_vm2, %v9703_v0 }
0x4bb7   :  { %12036 = vmatprep.mubr.msk.f32.mxu1 %vm12633_vm1, %v12632_v8 }
0x4c81   :  { %v14151_v18 = vpop.f32.mrb[94].mxu0 }
0x4c82   :  { %v12013_v62 = vpop.f32.mrb[95].mxu0 }
0x4c85   :  { %v14153_v22 = vpop.f32.mrb[116].mxu1  ;;  %v9698_v13 = vpop.f32.mrb[96].mxu0 }
0x4c86   :  { %v9780_v61 = vmul.f32 0.35355338, %v9698_v13  ;;  %v12018_v3 = vpop.f32.mrb[117].mxu1  ;;  %v12023_v23 = vpop.f32.mrb[97].mxu0 }
0x4c88   :  { %v9782_v36 = vsel %vm63_vm10, %v9780_v61, -10000.0 }
0x4c89   :  { %v9776_v9 = vpop.f32.mrb[118].mxu1  ;;  %v9784_v63 = vsel %vm180_vm2, %v9782_v36, -inf }
0x4c8a   :  { %v9781_v1 = vmul.f32 0.35355338, %v9776_v9  ;;  %9785 = vmax.xlane.f32.xlu0 %v9784_v63  ;;  %v12028_v25 = vpop.f32.mrb[119].mxu1 }
0x4c8c   :  { %v9783_v28 = vsel %vm64_vm11, %v9781_v1, -10000.0 }
0x4c8d   :  { %v9787_v30 = vsel %vm180_vm2, %v9783_v28, -inf }
0x4c8e   :  { %9788 = vmax.xlane.f32.xlu1 %v9787_v30 }
0x4c9f   :  { %9806 = vrot.lane.b32.xlu1 %v14045_v19, %s12640_s16 }
0x4ca0   :  { %9882 = vrot.lane.b32.xlu0 %v14030_v2, %s12640_s16 }
0x4ca3   :  { %9960 = vrot.lane.b32.xlu1 %v14045_v19, %s12643_s20 }
0x4ca7   :  { %10038 = vrot.lane.b32.xlu1 %v14030_v2, %s12643_s20 }
0x4cab   :  { %10036 = vrot.lane.b32.xlu1 %v14064_v24, %s12643_s20 }
0x4d17   :  { %v9786_v33 = vpop.xlane.xlu0 %9785 }
0x4d18   :  { %v9790_v21 = vsub.f32 %v9782_v36, %v9786_v33 }
0x4d1a   :  { %v9792_v35 = vmul.f32 1.442695, %v9790_v21 }
0x4d1b   :  { %v9883_v37 = vpop.permute.xlu0 %9882  ;;  %v9789_v10 = vpop.xlane.xlu1 %9788 }
0x4d1c   :  { %12554 = vpow2.f32 %v9792_v35  ;;  %v9791_v38 = vsub.f32 %v9783_v28, %v9789_v10  ;;  %12035 = vmatpush3.msra.mxu1 %v9883_v37  ;;  %v7201_v35 = vld [vmem:[#allocation2 + $0x2c0] sm:$0xff]  ;;  %v7202_v37 = vld [vmem:[#allocation2 + $0x2c8] sm:$0xff] }
0x4d1d   :  { %12044 = vmatprep.subr.mxu1 %v12632_v8  ;;  %v12287_v10 = vpack.c.bf16 %v7202_v37, %v7201_v35 }
0x4d1e   :  { %v9794_v39 = vmul.f32 1.442695, %v9791_v38  ;;  %v7204_v38 = vld [vmem:[#allocation2 + $0x2d8] sm:$0xff] }
0x4d1f   :  { %v9807_v15 = vpop.permute.xlu1 %9806 }
0x4d20   :  { %12556 = vpow2.f32 %v9794_v39  ;;  %12030 = vmatpush3.msra.mxu0 %v9807_v15 }
0x4d21   :  { %12039 = vmatprep.subr.mxu0 %v12632_v8 }
0x4d23   :  { %v9961_v49 = vpop.permute.xlu1 %9960 }
0x4d26   :  { %v12555_v40 = vpop.eup %12554 }
0x4d27   :  { %v9796_v44 = vsel %vm180_vm2, %v12555_v40, 0.0  ;;  %v10039_v41 = vpop.permute.xlu1 %10038 }
0x4d28   :  { %9797 = vadd.xlane.f32.xlu0 %v9796_v44 }
0x4d2a   :  { %v12557_v24 = vpop.eup %12556 }
0x4d2b   :  { %v9799_v45 = vsel %vm180_vm2, %v12557_v24, 0.0  ;;  %v10037_v34 = vpop.permute.xlu1 %10036 }
0x4d2c   :  { %9800 = vadd.xlane.f32.xlu0 %v9799_v45 }
0x4d42   :  { %9958 = vrot.lane.b32.xlu0 %v14056_v47, %s12643_s20 }
0x4db5   :  { %v9798_v46 = vpop.xlane.xlu0 %9797 }
0x4db6   :  { %12558 = vrcp.f32 %v9798_v46 }
0x4db9   :  { %v9801_v16 = vpop.xlane.xlu0 %9800 }
0x4dba   :  { %12560 = vrcp.f32 %v9801_v16 }
0x4dbd   :  { %v9959_v47 = vpop.permute.xlu0 %9958 }
0x4dc0   :  { %v12559_v31 = vpop.eup %12558 }
0x4dc1   :  { %v9803_v48 = vmul.f32 %v12559_v31, %v12555_v40 }
0x4dc3   :  { %12032 = vmatmul.mubr.msk.f32.vlgmr.msra.gmra.mrb[98].mxu0 %vm180_vm2, %v9803_v48 }
0x4dc4   :  { %v12561_v4 = vpop.eup %12560  ;;  %12040 = vmatpush3.xpose.msk.msra.mxu0 %vm180_vm2, %v9961_v49  ;;  %12041 = vmatprep.mubr.msk.f32.mxu0 %vm12633_vm1, %v12632_v8 }
0x4dc5   :  { %v9805_v51 = vmul.f32 %v12561_v4, %v12557_v24  ;;  %12049 = vmatprep.subr.mxu0 %v12632_v8 }
0x4dc7   :  { %12037 = vmatmul.mubr.msk.f32.vlgmr.msra.gmra.mrb[120].mxu1 %vm180_vm2, %v9805_v51  ;;  %12042 = vmatmul.mubr.msk.f32.vlgmr.msra.gmra.mrb[100].mxu0 %vm180_vm2, %v9959_v47 }
0x4dc8   :  { %12045 = vmatpush3.xpose.msk.msra.mxu1 %vm180_vm2, %v10039_v41  ;;  %12046 = vmatprep.mubr.msk.f32.mxu1 %vm12633_vm1, %v12632_v8 }
0x4dc9   :  { %12054 = vmatprep.subr.mxu1 %v12632_v8  ;;  %12051 = vmatprep.mubr.msk.f32.mxu0 %vm12633_vm1, %v12632_v8 }
0x4dcb   :  { %12047 = vmatmul.mubr.msk.f32.vlgmr.msra.gmra.mrb[122].mxu1 %vm180_vm2, %v10037_v34 }
0x4dcc   :  { %12056 = vmatprep.mubr.msk.f32.mxu1 %vm12633_vm1, %v12632_v8 }
0x4e96   :  { %v9878_v57 = vpop.f32.mrb[98].mxu0 }
0x4e97   :  { %v12033_v6 = vpop.f32.mrb[99].mxu0 }
0x4e9a   :  { %v9954_v58 = vpop.f32.mrb[120].mxu1  ;;  %v10032_v52 = vpop.f32.mrb[100].mxu0 }
0x4e9b   :  { %v10114_v42 = vmul.f32 0.35355338, %v10032_v52  ;;  %v12038_v60 = vpop.f32.mrb[121].mxu1  ;;  %v12043_v12 = vpop.f32.mrb[101].mxu0 }
0x4e9d   :  { %v10116_v50 = vsel %vm63_vm10, %v10114_v42, -10000.0 }
0x4e9e   :  { %v10110_v7 = vpop.f32.mrb[122].mxu1  ;;  %v10118_v43 = vsel %vm180_vm2, %v10116_v50, -inf }
0x4e9f   :  { %v10115_v5 = vmul.f32 0.35355338, %v10110_v7  ;;  %10119 = vmax.xlane.f32.xlu0 %v10118_v43  ;;  %v12048_v0 = vpop.f32.mrb[123].mxu1 }
0x4ea1   :  { %v10117_v62 = vsel %vm64_vm11, %v10115_v5, -10000.0 }
0x4ea2   :  { %v10121_v8 = vsel %vm180_vm2, %v10117_v62, -inf }
0x4ea3   :  { %10122 = vmax.xlane.f32.xlu1 %v10121_v8 }
0x4eb4   :  { %10140 = vrot.lane.b32.xlu1 %v14045_v19, %s12642_s19 }
0x4eb8   :  { %10294 = vrot.lane.b32.xlu1 %v14151_v18, %s14315_s30 }
0x4ebc   :  { %10296 = vrot.lane.b32.xlu1 %v14153_v22, %s14315_s30 }
0x4ec0   :  { %10304 = vrot.lane.b32.xlu1 %v9954_v58, %s14312_s26 }
0x4f2c   :  { %v10120_v20 = vpop.xlane.xlu0 %10119 }
0x4f2d   :  { %v10124_v13 = vsub.f32 %v10116_v50, %v10120_v20 }
0x4f2f   :  { %v10126_v61 = vmul.f32 1.442695, %v10124_v13 }
0x4f30   :  { %v10123_v3 = vpop.xlane.xlu1 %10122 }
0x4f31   :  { %12562 = vpow2.f32 %v10126_v61  ;;  %v10125_v26 = vsub.f32 %v10117_v62, %v10123_v3  ;;  %v7207_v3 = vld [vmem:[#allocation2 + $0x308] sm:$0xff] }
0x4f33   :  { %v10128_v23 = vmul.f32 1.442695, %v10125_v26 }
0x4f34   :  { %v10141_v36 = vpop.permute.xlu1 %10140 }
0x4f35   :  { %12564 = vpow2.f32 %v10128_v23  ;;  %12050 = vmatpush3.msra.mxu0 %v10141_v36  ;;  %v7208_v23 = vld [vmem:[#allocation2 + $0x310] sm:$0xff]  ;;  %v7209_v36 = vld [vmem:[#allocation2 + $0x318] sm:$0xff] }
0x4f36   :  { %12288 = vmatprep.subr.bf16.mxu0 %v12287_v10 }
0x4f38   :  { %v10295_v45 = vpop.permute.xlu1 %10294 }
0x4f39   :  { %v10316_v49 = vsel %vm180_vm2, %v14109_v27, %v10295_v45  ;;  %v12580_v27 = vld [vmem:[%s14299_s8 + $0x10] sm:$0xff] }
0x4f3a   :  { %v10325_v6 = vrot.slane %v12580_v27, %v13057_v53 }
0x4f3b   :  { %v12563_v9 = vpop.eup %12562 }
0x4f3c   :  { %v10130_v19 = vsel %vm180_vm2, %v12563_v9, 0.0  ;;  %v10297_v46 = vpop.permute.xlu1 %10296 }
0x4f3d   :  { %10131 = vadd.xlane.f32.xlu0 %v10130_v19  ;;  %v10317_v51 = vsel %vm180_vm2, %v14111_v29, %v10297_v46  ;;  %v7211_v19 = vld [vmem:[#allocation2 + $0x340] sm:$0xff] }
0x4f3f   :  { %v12565_v18 = vpop.eup %12564 }
0x4f40   :  { %v10133_v63 = vsel %vm180_vm2, %v12565_v18, 0.0  ;;  %v10305_v31 = vpop.permute.xlu1 %10304 }
0x4f41   :  { %10134 = vadd.xlane.f32.xlu0 %v10133_v63  ;;  %v10319_v47 = vsel %vm1538_vm6, %v10317_v51, %v10305_v31  ;;  %v7213_v63 = vld [vmem:[#allocation2 + $0x350] sm:$0xff] }
0x4f57   :  { %10216 = vrot.lane.b32.xlu0 %v14030_v2, %s12642_s19  ;;  %v7203_v2 = vld [vmem:[#allocation2 + $0x2d0] sm:$0xff] }
0x4f58   :  { %v12291_v39 = vpack.c.bf16 %v7204_v38, %v7203_v2 }
0x4f5b   :  { %10302 = vrot.lane.b32.xlu0 %v9878_v57, %s14312_s26 }
0x4fca   :  { %v10132_v22 = vpop.xlane.xlu0 %10131 }
0x4fcb   :  { %12566 = vrcp.f32 %v10132_v22 }
0x4fce   :  { %v10135_v1 = vpop.xlane.xlu0 %10134 }
0x4fcf   :  { %12568 = vrcp.f32 %v10135_v1  ;;  %v7214_v1 = vld [vmem:[#allocation2 + $0x358] sm:$0xff] }
0x4fd2   :  { %v10217_v25 = vpop.permute.xlu0 %10216 }
0x4fd3   :  { %12055 = vmatpush3.msra.mxu1 %v10217_v25  ;;  %v12307_v25 = vpack.c.bf16 %v7214_v1, %v7213_v63 }
0x4fd5   :  { %v12567_v28 = vpop.eup %12566 }
0x4fd6   :  { %v10137_v30 = vmul.f32 %v12567_v28, %v12563_v9  ;;  %v10303_v16 = vpop.permute.xlu0 %10302  ;;  %v12299_v9 = vpack.c.bf16 %v7209_v36, %v7208_v23  ;;  %v7215_v28 = vld [vmem:[#allocation2 + $0x360] sm:$0xff]  ;;  %v10662_v23 = vld [vmem:[%s14300_s9 + $0x18] sm:$0xff] }
0x4fd7   :  { %v10318_v48 = vsel %vm1538_vm6, %v10316_v49, %v10303_v16 }
0x4fd8   :  { %12052 = vmatmul.mubr.msk.f32.vlgmr.msra.gmra.mrb[102].mxu0 %vm180_vm2, %v10137_v30  ;;  %v7216_v30 = vld [vmem:[#allocation2 + $0x368] sm:$0xff] }
0x4fd9   :  { %v12569_v33 = vpop.eup %12568  ;;  %12290 = vmatpush3.bf16.msra.mxu0 %v12287_v10 }
0x4fda   :  { %v10139_v21 = vmul.f32 %v12569_v33, %v12565_v18  ;;  %12292 = vmatprep.subr.bf16.mxu0 %v12291_v39  ;;  %v7212_v18 = vld [vmem:[#allocation2 + $0x348] sm:$0xff]  ;;  %v12311_v33 = vpack.c.bf16 %v7216_v30, %v7215_v28 }
0x4fdb   :  { %v12303_v22 = vpack.c.bf16 %v7212_v18, %v7211_v19 }
0x4fdc   :  { %12057 = vmatmul.mubr.msk.f32.vlgmr.msra.gmra.mrb[124].mxu1 %vm180_vm2, %v10139_v21 }
0x4fdd   :  { %12294 = vmatpush3.bf16.msra.mxu0 %v12291_v39  ;;  %v14238_v39 = vld [vmem:[%s14299_s8 + $0x18] sm:$0xff] }
0x4fde   :  { %12304 = vmatprep.subr.bf16.mxu0 %v12303_v22 }
0x50ab   :  { %v10212_v15 = vpop.f32.mrb[102].mxu0 }
0x50ac   :  { %10310 = vrot.lane.b32.xlu0 %v10212_v15, %s14313_s25  ;;  %v12053_v40 = vpop.f32.mrb[103].mxu0  ;;  %v10438_v15 = vrot.slane %v12580_v27, %v13060_v54  ;;  %v10450_v54 = vrot.slane %v14238_v39, %v12966_v59 }
0x50af   :  { %v10288_v44 = vpop.f32.mrb[124].mxu1 }
0x50b0   :  { %10312 = vrot.lane.b32.xlu1 %v10288_v44, %s14313_s25  ;;  %v12058_v24 = vpop.f32.mrb[125].mxu1 }
0x50b1   :  { %v10444_v24 = vrot.slane %v14238_v39, %v12758_v11 }
0x511e   :  { %v10311_v4 = vpop.permute.xlu0 %10310 }
0x511f   :  { %v10320_v41 = vsel %vm1541_vm5, %v10318_v48, %v10311_v4  ;;  %v7217_v4 = vld [vmem:[#allocation2 + $0x370] sm:$0xff] }
0x5120   :  { %12067 = vmatprep.mubr.msk.f32.mxu0 %vm95_vm0, %v10320_v41  ;;  %v7218_v41 = vld [vmem:[#allocation2 + $0x378] sm:$0xff] }
0x5121   :  { %v12315_v51 = vpack.c.bf16 %v7218_v41, %v7217_v4 }
0x5122   :  { %v10313_v34 = vpop.permute.xlu1 %10312 }
0x5123   :  { %v10321_v57 = vsel %vm1541_vm5, %v10319_v47, %v10313_v34 }
0x5124   :  { %12068 = vmatmul.mubr.msk.f32.vlgmr.msra.gmra.mrb[104].mxu0 %vm95_vm0, %v10321_v57 }
0x5125   :  { %12306 = vmatpush3.bf16.msra.mxu0 %v12303_v22 }
0x5126   :  { %12308 = vmatprep.subr.bf16.mxu0 %v12307_v25 }
0x5129   :  { %12310 = vmatpush3.bf16.msra.mxu0 %v12307_v25  ;;  %v10650_v25 = vrot.slane %v14238_v39, %v13010_v56 }
0x512a   :  { %12312 = vmatprep.subr.bf16.mxu0 %v12311_v33 }
0x512d   :  { %12314 = vmatpush3.bf16.msra.mxu0 %v12311_v33 }
0x512e   :  { %12316 = vmatprep.subr.bf16.mxu0 %v12315_v51 }
0x5131   :  { %12318 = vmatpush3.bf16.msra.mxu0 %v12315_v51 }
0x51f7   :  { %v12069_v58 = vpop.f32.mrb[104].mxu0 }
0x51f8   :  { %v10404_v52 = vadd.f32 %v12069_v58, %v10325_v6  ;;  %v10398_v42 = vpop.f32.mrb[105].mxu0  ;;  %v10537_v58 = vrot.slane %v14238_v39, %v13007_v55 }
0x51f9   :  { %v10399_v60 = vadd.f32 %v10398_v42, %v10325_v6 }
0x51fa   :  { %v10408_v12 = vadd.f32 %v10404_v52, %v14043_v17 }
0x51fb   :  { %v10407_v29 = vadd.f32 %v10399_v60, %v14039_v32  ;;  %v7206_v32 = vld [vmem:[#allocation2 + $0x300] sm:$0xff] }
0x51fc   :  { %v10412_v50 = vsel %vm95_vm0, %v10408_v12, 0.0  ;;  %v12295_v26 = vpack.c.bf16 %v7207_v3, %v7206_v32  ;;  %v10660_v32 = vld [vmem:[%s14300_s9 + $0x8] sm:$0xff] }
0x51fd   :  { %10413 = vadd.xlane.f32.xlu1 %v10412_v50  ;;  %v10409_v7 = vsel %vm95_vm0, %v10407_v29, 0.0 }
0x51fe   :  { %10410 = vadd.xlane.f32.xlu0 %v10409_v7  ;;  %12296 = vmatprep.subr.bf16.mxu1 %v12295_v26 }
0x51ff   :  { %12298 = vmatpush3.bf16.msra.mxu1 %v12295_v26  ;;  %v10661_v26 = vld [vmem:[%s14300_s9 + $0x10] sm:$0xff] }
0x5200   :  { %12300 = vmatprep.subr.bf16.mxu1 %v12299_v9  ;;  %v12323_v36 = vpack.c.bf16 %v10662_v23, %v10661_v26 }
0x5203   :  { %12302 = vmatpush3.bf16.msra.mxu1 %v12299_v9 }
0x528a   :  { %v10414_v43 = vpop.xlane.xlu1 %10413 }
0x528b   :  { %v10416_v5 = vmul.f32 0.03125, %v10414_v43  ;;  %v10411_v0 = vpop.xlane.xlu0 %10410 }
0x528c   :  { %v10415_v62 = vmul.f32 0.03125, %v10411_v0 }
0x528d   :  { %v10418_v8 = vsub.f32 %v10408_v12, %v10416_v5 }
0x528e   :  { %v10417_v53 = vsub.f32 %v10407_v29, %v10415_v62 }
0x528f   :  { %v10420_v61 = vmul.f32 %v10418_v8, %v10418_v8 }
0x5290   :  { %v10419_v20 = vmul.f32 %v10417_v53, %v10417_v53 }
0x5291   :  { %v10424_v17 = vsel %vm95_vm0, %v10420_v61, 0.0 }
0x5292   :  { %v10421_v13 = vsel %vm95_vm0, %v10419_v20, 0.0 }
0x5293   :  { %10422 = vadd.xlane.f32.xlu0 %v10421_v13 }
0x5297   :  { %10425 = vadd.xlane.f32.xlu0 %v10424_v17  ;;  %v10659_v17 = vld [vmem:[%s14300_s9] sm:$0xff] }
0x5298   :  { %v12319_v3 = vpack.c.bf16 %v10660_v32, %v10659_v17 }
0x529a   :  { %12320 = vmatprep.subr.bf16.mxu1 %v12319_v3 }
0x5320   :  { %v10423_v21 = vpop.xlane.xlu0 %10422 }
0x5321   :  { %v10427_v35 = vmul.f32 0.03125, %v10423_v21 }
0x5323   :  { %v10429_v37 = vadd.f32 1e-12, %v10427_v35  ;;  %v10656_v35 = vrot.slane %v14238_v39, %v13026_v14 }
0x5324   :  { %v10426_v10 = vpop.xlane.xlu0 %10425 }
0x5325   :  { %12570 = vrsqrt.f32 %v10429_v37  ;;  %v10428_v2 = vmul.f32 0.03125, %v10426_v10 }
0x5327   :  { %v10430_v38 = vadd.f32 1e-12, %v10428_v2 }
0x5329   :  { %12572 = vrsqrt.f32 %v10430_v38 }
0x532f   :  { %v12571_v40 = vpop.eup %12570 }
0x5330   :  { %v10433_v44 = vmul.f32 %v12571_v40, %v10417_v53 }
0x5332   :  { %v10439_v45 = vmul.f32 %v10438_v15, %v10433_v44 }
0x5333   :  { %v12573_v46 = vpop.eup %12572 }
0x5334   :  { %v10434_v16 = vmul.f32 %v12573_v46, %v10418_v8  ;;  %v10445_v49 = vadd.f32 %v10444_v24, %v10439_v45 }
0x5336   :  { %v10440_v31 = vmul.f32 %v10438_v15, %v10434_v16  ;;  %12078 = vmatprep.mubr.msk.f32.mxu1 %vm95_vm0, %v10445_v49  ;;  %v10997_v15 = vld [vmem:[%s14301_s10] ss:$0 sm:$0xff] }
0x5338   :  { %v10446_v48 = vadd.f32 %v10444_v24, %v10440_v31 }
0x533a   :  { %12079 = vmatmul.mubr.msk.f32.vlgmr.msra.gmra.mrb[126].mxu1 %vm95_vm0, %v10446_v48 }
0x533b   :  { %12322 = vmatpush3.bf16.msra.mxu1 %v12319_v3 }
0x533c   :  { %12324 = vmatprep.subr.bf16.mxu1 %v12323_v36 }
0x533f   :  { %12326 = vmatpush3.bf16.msra.mxu1 %v12323_v36 }
0x540d   :  { %v12080_v47 = vpop.f32.mrb[126].mxu1 }
0x540e   :  { %v10529_v11 = vadd.f32 %v12080_v47, %v10450_v54  ;;  %v10523_v34 = vpop.f32.mrb[127].mxu1 }
0x540f   :  { %v10524_v57 = vadd.f32 %v10523_v34, %v10450_v54 }
0x5410   :  { %v10533_v6 = vmax.f32 %v10529_v11, 0.0 }
0x5411   :  { %v10532_v27 = vmax.f32 %v10524_v57, 0.0 }
0x5413   :  { %12097 = vmatprep.mubr.msk.f32.mxu0 %vm1761_vm7, %v10532_v27 }
0x5414   :  { %12098 = vmatmul.mubr.msk.f32.vlgmr.msra.gmra.mrb[106].mxu0 %vm1761_vm7, %v10533_v6 }
0x54e7   :  { %v12099_v52 = vpop.f32.mrb[106].mxu0 }
0x54e8   :  { %v10616_v42 = vadd.f32 %v12099_v52, %v10537_v58  ;;  %v10610_v60 = vpop.f32.mrb[107].mxu0 }
0x54e9   :  { %v10611_v12 = vadd.f32 %v10610_v60, %v10537_v58 }
0x54ea   :  { %v10620_v29 = vadd.f32 %v10616_v42, %v10446_v48 }
0x54eb   :  { %v10619_v50 = vadd.f32 %v10611_v12, %v10445_v49 }
0x54ec   :  { %v10624_v59 = vsel %vm95_vm0, %v10620_v29, 0.0 }
0x54ed   :  { %10625 = vadd.xlane.f32.xlu0 %v10624_v59  ;;  %v10621_v7 = vsel %vm95_vm0, %v10619_v50, 0.0 }
0x54ee   :  { %10622 = vadd.xlane.f32.xlu1 %v10621_v7 }
0x557a   :  { %v10626_v43 = vpop.xlane.xlu0 %10625 }
0x557b   :  { %v10628_v5 = vmul.f32 0.03125, %v10626_v43  ;;  %v10623_v0 = vpop.xlane.xlu1 %10622 }
0x557c   :  { %v10627_v62 = vmul.f32 0.03125, %v10623_v0 }
0x557d   :  { %v10630_v8 = vsub.f32 %v10620_v29, %v10628_v5 }
0x557e   :  { %v10629_v53 = vsub.f32 %v10619_v50, %v10627_v62 }
0x557f   :  { %v10632_v20 = vmul.f32 %v10630_v8, %v10630_v8 }
0x5580   :  { %v10631_v55 = vmul.f32 %v10629_v53, %v10629_v53 }
0x5581   :  { %v10636_v13 = vsel %vm95_vm0, %v10632_v20, 0.0 }
0x5582   :  { %10637 = vadd.xlane.f32.xlu0 %v10636_v13  ;;  %v10633_v61 = vsel %vm95_vm0, %v10631_v55, 0.0 }
0x5583   :  { %10634 = vadd.xlane.f32.xlu1 %v10633_v61 }
0x560f   :  { %v10638_v9 = vpop.xlane.xlu0 %10637 }
0x5610   :  { %v10640_v19 = vmul.f32 0.03125, %v10638_v9  ;;  %v10635_v18 = vpop.xlane.xlu1 %10634 }
0x5611   :  { %v10639_v63 = vmul.f32 0.03125, %v10635_v18 }
0x5612   :  { %v10642_v22 = vadd.f32 1e-12, %v10640_v19 }
0x5613   :  { %v10641_v1 = vadd.f32 1e-12, %v10639_v63 }
0x5614   :  { %12574 = vrsqrt.f32 %v10642_v22 }
0x5615   :  { %12576 = vrsqrt.f32 %v10641_v1 }
0x561e   :  { %v12575_v28 = vpop.eup %12574 }
0x561f   :  { %v12577_v30 = vpop.eup %12576  ;;  %v10646_v33 = vmul.f32 %v12575_v28, %v10630_v8 }
0x5620   :  { %v10645_v21 = vmul.f32 %v12577_v30, %v10629_v53 }
0x5621   :  { %v10652_v37 = vmul.f32 %v10650_v25, %v10646_v33 }
0x5622   :  { %v10651_v10 = vmul.f32 %v10650_v25, %v10645_v21 }
0x5623   :  { %v10658_v38 = vadd.f32 %v10656_v35, %v10652_v37 }
0x5624   :  { %v10657_v2 = vadd.f32 %v10656_v35, %v10651_v10 }
0x5626   :  { %12108 = vmatprep.mubr.msk.f32.mxu1 %vm95_vm0, %v10657_v2 }
0x5627   :  { %12109 = vmatmul.mubr.msk.f32.vlgmr.msra.gmra.mrb[128].mxu1 %vm95_vm0, %v10658_v38 }
0x56fa   :  { %v12110_v56 = vpop.f32.mrb[128].mxu1 }
0x56fb   :  { %v10748_v40 = vadd.f32 %v12110_v56, %v10997_v15  ;;  %v10742_v44 = vpop.f32.mrb[129].mxu1 }
0x56fc   :  { %v10743_v24 = vadd.f32 %v10997_v15, %v10742_v44 }
0x56fd   :  { %10752 = vst [vmem:[#allocation5 + $0x8] sm:$0xff] %v10748_v40 }
0x56fe   :  { %10751 = vst [vmem:[#allocation5] sm:$0xff] %v10743_v24 }
0x56ff   :  { %12614 = shalt.err (!%p12611_p12)
}
0x5700   :  { %s12615_s10 = scalar_lea.hbm %s14302_s11, 256 }
0x5701   :  { %p12616_p13 = scmp.ne.s32.totalorder %s14302_s11, %s12615_s10  ;;  %p12619_p0 = scmp.lt.u32.totalorder %s12615_s10, %s14302_s11 }
0x5703   :  { %p12621_p1 = pnand %p12619_p0, %p12616_p13 }
0x5705   :  { %12624 = shalt.err (!%p12621_p1)
}
0x5706   :  { %s14316_s1 = smov 128  }
0x5707   :  { %10764 = dma.vmem_to_hbm [thread:$0]  %s10759_s3, 256, %s14302_s11, [#allocation4], %s14316_s1, %s14316_s1, %s14315_s30  }
0x5708   :  { %12627 = dma.done.wait [#allocation4], 256  }
0x5709   :  { %12628 = vsyncadd [#allocation4], 4294967040 }
0x570a   :  { %10768 = vsyncpa [#allocation3], 1 }
0x570b   :  { %10769 = vsyncpa [#allocation4], 1 }

</bundles_post_ra>
